<compile_context>
chip_gen: v5e
topology: v5e:2x2
jax: 0.10.0
libtpu: 0.0.40
codegen_flags: <defaults>
</compile_context>

<pallas_src>
import functools

import jax
import jax.numpy as jnp
import numpy as np
from jax.experimental import pallas as pl
from jax.experimental.pallas import tpu as pltpu

SOFTPLUS_BETA = 100.0        # nn.Softplus(beta=100)
SOFTPLUS_INV_BETA = 1.0 / SOFTPLUS_BETA
SOFTPLUS_THRESHOLD = 20.0    # PyTorch default: linear branch when beta*x > 20


def _softplus100(y):
    z = SOFTPLUS_BETA * y
    safe = jnp.minimum(z, SOFTPLUS_THRESHOLD)
    sp = jnp.log1p(jnp.exp(safe)) * SOFTPLUS_INV_BETA      # multiply, not divide
    return jnp.where(z > SOFTPLUS_THRESHOLD, y, sp)


def _geodesy_kernel(d_in, d_h, d_out, n_hidden, matmul_dtype,
                    x_ref, wf_ref, wh_ref, wl_ref, out_ref, xs_ref):
    """Whole MLP for one lane-dense batch tile, entirely in VMEM.

    xs_ref: persistent (K_alloc, T) bf16 scratch holding the fused LHS [h ; h*h ; 1].
    """
    T = x_ref.shape[1]
    ones_row = jnp.ones((1, T), matmul_dtype)               # hoisted, reused by all layers

    def quad(h, w, di, do):
        # Stage [h ; h*h ; 1] straight into the bf16 scratch — no f32 concat buffer.
        xs_ref[pl.ds(0, di), :] = h.astype(matmul_dtype)
        xs_ref[pl.ds(di, di), :] = (h * h).astype(matmul_dtype)   # square in f32 (VPU)
        xs_ref[pl.ds(2 * di, 1), :] = ones_row                    # bias row
        x_op = xs_ref[pl.ds(0, 2 * di + 1), :]                    # (2*di+1, T) bf16
        # One MXU push; bias folded in via the ones row; f32 accumulation.
        y = jnp.dot(w, x_op, preferred_element_type=jnp.float32)  # (3*do, T)
        return y[0:do] * y[do:2 * do] + y[2 * do:]                # lin1*lin2 + lin3

    h = x_ref[...].astype(jnp.float32)                            # (d_in, T) f32
    h = _softplus100(quad(h, wf_ref[...], d_in, d_h))             # first QuadraticLayer
    for l in range(n_hidden):                                     # static unroll
        h = _softplus100(quad(h, wh_ref[l], d_h, d_h))
    y = quad(h, wl_ref[...], d_h, d_out)                          # last QuadraticLayer
    out_ref[...] = jnp.abs(y).astype(out_ref.dtype)               # AbsLayer


def _pack_layer(w1, b1, w2, b2, w3, b3, matmul_dtype):
    """Pack one QuadraticLayer into Wcat = [[W1,0,b1],[W2,0,b2],[0,W3,b3]] (3*do, 2*di+1)."""
    do, di = w1.shape
    z = jnp.zeros((do, di), jnp.float32)

    def block(wa, wb, b):
        return jnp.concatenate([wa, wb, b.reshape(do, 1)], axis=1)

    wcat = jnp.concatenate([block(w1, z, b1), block(w2, z, b2), block(z, w3, b3)], axis=0)
    return wcat.astype(matmul_dtype)


def geodesy_forward(x, params, *, tile_n=4096, matmul_dtype=jnp.bfloat16,
                    vmem_limit_bytes=None):
    """x: (N, d_in).  params: list of (w1, b1, w2, b2, w3, b3) per QuadraticLayer,
    weights in PyTorch layout (d_out, d_in), biases (d_out,).

    tile_n: sweep 2048-8192 (cap around 8K-16K on v7x, which has only 64 MiB VMEM).
    Ensure N // tile_n >= 2 so ("parallel",) actually shards across v7x's 2 TensorCores.
    """
    N, d_in = x.shape
    n_q = len(params)
    assert n_q >= 2, "need at least first + last QuadraticLayer"
    d_h = params[0][0].shape[0]
    d_out = params[-1][0].shape[0]
    n_hidden = n_q - 2
    # Keep hidden width sublane-aligned (multiple of 8, ideally 16 for bf16 packing)
    # so the y[0:d], y[d:2d], y[2d:] slices and scratch writes stay vreg-aligned.
    assert d_h % 8 == 0, "d_hidden must be a multiple of 8 (ideally 16)"
    for (w1, *_rest) in params[1:]:
        assert w1.shape[1] == d_h, "hidden layers must all take d_hidden inputs"

    # One-time weight packing (wrapper-side, amortized). Bias is folded into the matmul.
    packed = [_pack_layer(*p, matmul_dtype=matmul_dtype) for p in params]
    wf = packed[0]                      # (3*d_h,  2*d_in + 1)
    wl = packed[-1]                     # (3*d_out, 2*d_h + 1)
    if n_hidden > 0:
        wh = jnp.stack(packed[1:-1], axis=0)          # (n_hidden, 3*d_h, 2*d_h+1)
    else:  # dummy; never read (static loop has zero iterations)
        wh = jnp.zeros((1, 3 * d_h, 2 * d_h + 1), matmul_dtype)

    # Feature-major, lane-dense layout: batch on the 128-wide lane axis.
    # TODO(synk): for repeated evaluation of the same point cloud, cache x_t to skip
    # this O(N) transpose/pad pass.
    n_pad = pl.cdiv(N, tile_n) * tile_n
    x_t = jnp.zeros((d_in, n_pad), matmul_dtype).at[:, :N].set(x.T.astype(matmul_dtype))
    grid = (n_pad // tile_n,)

    # Shared bf16 LHS scratch: big enough for the widest layer, rounded to 16 rows.
    k_max = 2 * max(d_in, d_h) + 1
    k_alloc = ((k_max + 15) // 16) * 16

    kernel = functools.partial(_geodesy_kernel, d_in, d_h, d_out, n_hidden, matmul_dtype)
    out_t = pl.pallas_call(
        kernel,
        out_shape=jax.ShapeDtypeStruct((d_out, n_pad), jnp.float32),
        grid_spec=pltpu.PrefetchScalarGridSpec(
            num_scalar_prefetch=0,
            grid=grid,
            in_specs=[
                pl.BlockSpec((d_in, tile_n), lambda i: (0, i)),   # points tile
                pl.BlockSpec(wf.shape, lambda i: (0, 0)),         # first-layer Wcat
                pl.BlockSpec(wh.shape, lambda i: (0, 0, 0)),      # stacked hidden Wcat
                pl.BlockSpec(wl.shape, lambda i: (0, 0)),         # last-layer Wcat
            ],
            out_specs=pl.BlockSpec((d_out, tile_n), lambda i: (0, i)),
            scratch_shapes=[pltpu.VMEM((k_alloc, tile_n), matmul_dtype)],
        ),
        compiler_params=pltpu.CompilerParams(
            dimension_semantics=("parallel",),
            vmem_limit_bytes=vmem_limit_bytes,
        ),
    )(x_t, wf, wh, wl)

    return out_t[:, :N].T.astype(x.dtype)                         # back to (N, d_out)


def init_params(key, d_in=3, d_out=1, d_hidden=32, n_layers=3):
    """Deterministic synthetic init matching sine_init / first_layer_sine_init.
    Weights in PyTorch layout (d_out, d_in)."""
    dims = [d_in] + [d_hidden] * n_layers + [d_out]
    params = []
    for l in range(len(dims) - 1):
        di, do = dims[l], dims[l + 1]
        key, k1, kb1, k2, k3 = jax.random.split(key, 5)
        bound1 = (1.0 / di) if l == 0 else (np.sqrt(6.0 / di) / 30.0)
        w1 = jax.random.uniform(k1, (do, di), jnp.float32, -bound1, bound1)
        # lin1.bias keeps default nn.Linear init U(-1/sqrt(fan_in), 1/sqrt(fan_in))
        b1 = jax.random.uniform(kb1, (do,), jnp.float32,
                                -1.0 / np.sqrt(di), 1.0 / np.sqrt(di))
        w2 = jax.random.normal(k2, (do, di), jnp.float32) * 1e-16   # N(0, 1e-16)
        b2 = jnp.ones((do,), jnp.float32)                            # ones
        w3 = jax.random.normal(k3, (do, di), jnp.float32) * 1e-16   # N(0, 1e-16)
        b3 = jnp.zeros((do,), jnp.float32)                           # zeros
        params.append((w1, b1, w2, b2, w3, b3))
    return params


def reference_forward(x, params, matmul_dtype=jnp.float32):
    """Pure-JAX reference reproducing the PyTorch forward.  With matmul_dtype=bf16 it
    applies the same operand/bias rounding as the kernel (pure f32 when f32)."""
    n_q = len(params)
    h = x.astype(matmul_dtype).astype(jnp.float32)
    for l, (w1, b1, w2, b2, w3, b3) in enumerate(params):
        hm = h.astype(matmul_dtype)
        h2m = (h * h).astype(matmul_dtype)

        def lin(w, b, v):
            return (jnp.dot(v, w.T.astype(matmul_dtype), preferred_element_type=jnp.float32)
                    + b.astype(matmul_dtype).astype(jnp.float32))

        y = lin(w1, b1, hm) * lin(w2, b2, hm) + lin(w3, b3, h2m)
        h = jnp.abs(y) if l == n_q - 1 else _softplus100(y)
    return h


if __name__ == "__main__":
    key = jax.random.PRNGKey(0)
    kx, kp = jax.random.split(key)

    # Small shapes consistent with the module (points in R^3 -> scalar density).
    N, d_in, d_out, d_hidden, n_layers = 4096, 3, 1, 32, 3
    x = jax.random.uniform(kx, (N, d_in), jnp.float32, minval=-1.0, maxval=1.0)
    params = init_params(kp, d_in=d_in, d_out=d_out, d_hidden=d_hidden, n_layers=n_layers)

    # tile_n=2048 => grid of 2 steps (keeps both v7x TensorCores fed even at demo size).
    out = geodesy_forward(x, params, tile_n=2048, matmul_dtype=jnp.bfloat16)
    out = jax.block_until_ready(out)
    assert out.shape == (N, d_out)

    # Correctness vs a reference that applies the same bf16 operand/bias rounding.
    ref_bf16 = reference_forward(x, params, matmul_dtype=jnp.bfloat16)
    np.testing.assert_allclose(np.asarray(out), np.asarray(ref_bf16), rtol=3e-3, atol=5e-4)

    # Informational only: deviation of the bf16-matmul kernel from the pure-f32 model.
    ref_f32 = reference_forward(x, params, matmul_dtype=jnp.float32)
    _max_f32_dev = float(jnp.max(jnp.abs(out - ref_f32)))

    print("KERNEL_OK")
</pallas_src>

<mosaic_0001>
module attributes {stable_mosaic.version = 11 : i64} {
  func.func @_geodesy_kernel(%arg0: i32, %arg1: memref<3x2048xbf16, #tpu.memory_space<vmem>>, %arg2: memref<96x7xbf16, #tpu.memory_space<vmem>>, %arg3: memref<2x96x65xbf16, #tpu.memory_space<vmem>>, %arg4: memref<3x65xbf16, #tpu.memory_space<vmem>>, %arg5: memref<1x2048xf32, #tpu.memory_space<vmem>>, %arg6: memref<80x2048xbf16, #tpu.memory_space<vmem>>) attributes {dimension_semantics = [#tpu.dimension_semantics<parallel>], iteration_bounds = array<i64: 2>, scalar_prefetch = 0 : i64, scratch_operands = 1 : i64, tpu.core_type = #tpu.core_type<tc>, window_params = [{transform_indices = @transform_0, window_bounds = array<i64: 3, 2048>}, {pipeline_mode = #tpu.pipeline_mode<synchronous>, transform_indices = @transform_1, window_bounds = array<i64: 96, 7>}, {pipeline_mode = #tpu.pipeline_mode<synchronous>, transform_indices = @transform_2, window_bounds = array<i64: 2, 96, 65>}, {pipeline_mode = #tpu.pipeline_mode<synchronous>, transform_indices = @transform_3, window_bounds = array<i64: 3, 65>}, {transform_indices = @transform_4, window_bounds = array<i64: 1, 2048>}]} {
    %cst = arith.constant 1.000000e+00 : bf16
    %0 = vector.broadcast %cst : bf16 to vector<1x2048xbf16>
    %c0 = arith.constant 0 : index
    %c0_0 = arith.constant 0 : index
    %1 = vector.load %arg1[%c0, %c0_0] : memref<3x2048xbf16, #tpu.memory_space<vmem>>, vector<3x2048xbf16>
    %2 = arith.extf %1 : vector<3x2048xbf16> to vector<3x2048xf32>
    %c0_1 = arith.constant 0 : index
    %c0_2 = arith.constant 0 : index
    %3 = vector.load %arg2[%c0_1, %c0_2] : memref<96x7xbf16, #tpu.memory_space<vmem>>, vector<96x7xbf16>
    %4 = arith.truncf %2 : vector<3x2048xf32> to vector<3x2048xbf16>
    %c0_3 = arith.constant 0 : index
    %c0_4 = arith.constant 0 : index
    %5 = vector.load %arg6[%c0_3, %c0_4] : memref<80x2048xbf16, #tpu.memory_space<vmem>>, vector<3x2048xbf16>
    tpu.vector_store %arg6[%c0_3, %c0_4], %4 {strides = array<i32>} : memref<80x2048xbf16, #tpu.memory_space<vmem>>, vector<3x2048xbf16>,
    %6 = arith.mulf %2, %2 : vector<3x2048xf32>
    %7 = arith.truncf %6 : vector<3x2048xf32> to vector<3x2048xbf16>
    %c3 = arith.constant 3 : index
    %c0_5 = arith.constant 0 : index
    %8 = vector.load %arg6[%c3, %c0_5] : memref<80x2048xbf16, #tpu.memory_space<vmem>>, vector<3x2048xbf16>
    tpu.vector_store %arg6[%c3, %c0_5], %7 {strides = array<i32>} : memref<80x2048xbf16, #tpu.memory_space<vmem>>, vector<3x2048xbf16>,
    %c6 = arith.constant 6 : index
    %c0_6 = arith.constant 0 : index
    %9 = vector.load %arg6[%c6, %c0_6] : memref<80x2048xbf16, #tpu.memory_space<vmem>>, vector<1x2048xbf16>
    tpu.vector_store %arg6[%c6, %c0_6], %0 {strides = array<i32>} : memref<80x2048xbf16, #tpu.memory_space<vmem>>, vector<1x2048xbf16>,
    %c0_7 = arith.constant 0 : index
    %c0_8 = arith.constant 0 : index
    %10 = vector.load %arg6[%c0_7, %c0_8] : memref<80x2048xbf16, #tpu.memory_space<vmem>>, vector<7x2048xbf16>
    %cst_9 = arith.constant dense<0.000000e+00> : vector<96x2048xf32>
    %11 = tpu.matmul %3, %10, %cst_9 {dimension_numbers = #tpu.dot_dimension_numbers<[1], [0], [0], [1], [0, 0, 1, 1], [], []>} : vector<96x7xbf16>, vector<7x2048xbf16>, vector<96x2048xf32> -> vector<96x2048xf32>
    %12 = vector.extract_strided_slice %11 {offsets = [0, 0], sizes = [32, 2048], strides = [1, 1]} : vector<96x2048xf32> to vector<32x2048xf32>
    %13 = vector.extract_strided_slice %11 {offsets = [32, 0], sizes = [32, 2048], strides = [1, 1]} : vector<96x2048xf32> to vector<32x2048xf32>
    %14 = arith.mulf %12, %13 : vector<32x2048xf32>
    %15 = vector.extract_strided_slice %11 {offsets = [64, 0], sizes = [32, 2048], strides = [1, 1]} : vector<96x2048xf32> to vector<32x2048xf32>
    %16 = arith.addf %14, %15 : vector<32x2048xf32>
    %cst_10 = arith.constant 1.000000e+02 : f32
    %17 = vector.broadcast %cst_10 : f32 to vector<32x2048xf32>
    %18 = arith.mulf %17, %16 : vector<32x2048xf32>
    %cst_11 = arith.constant 2.000000e+01 : f32
    %19 = vector.broadcast %cst_11 : f32 to vector<32x2048xf32>
    %20 = arith.minimumf %18, %19 : vector<32x2048xf32>
    %21 = math.exp %20 : vector<32x2048xf32>
    %22 = math.log1p %21 : vector<32x2048xf32>
    %cst_12 = arith.constant 0.00999999977 : f32
    %23 = vector.broadcast %cst_12 : f32 to vector<32x2048xf32>
    %24 = arith.mulf %22, %23 : vector<32x2048xf32>
    %cst_13 = arith.constant 2.000000e+01 : f32
    %25 = vector.broadcast %cst_13 : f32 to vector<32x2048xf32>
    %26 = arith.cmpf ogt, %18, %25 : vector<32x2048xf32>
    %27 = arith.select %26, %16, %24 : vector<32x2048xi1>, vector<32x2048xf32>
    %c0_14 = arith.constant 0 : index
    %c0_15 = arith.constant 0 : index
    %c0_16 = arith.constant 0 : index
    %28 = vector.load %arg3[%c0_14, %c0_15, %c0_16] : memref<2x96x65xbf16, #tpu.memory_space<vmem>>, vector<1x96x65xbf16>
    %29 = vector.shape_cast %28 : vector<1x96x65xbf16> to vector<96x65xbf16>
    %30 = arith.truncf %27 : vector<32x2048xf32> to vector<32x2048xbf16>
    %c0_17 = arith.constant 0 : index
    %c0_18 = arith.constant 0 : index
    %31 = vector.load %arg6[%c0_17, %c0_18] : memref<80x2048xbf16, #tpu.memory_space<vmem>>, vector<32x2048xbf16>
    tpu.vector_store %arg6[%c0_17, %c0_18], %30 {strides = array<i32>} : memref<80x2048xbf16, #tpu.memory_space<vmem>>, vector<32x2048xbf16>,
    %32 = arith.mulf %27, %27 : vector<32x2048xf32>
    %33 = arith.truncf %32 : vector<32x2048xf32> to vector<32x2048xbf16>
    %c32 = arith.constant 32 : index
    %c0_19 = arith.constant 0 : index
    %34 = vector.load %arg6[%c32, %c0_19] : memref<80x2048xbf16, #tpu.memory_space<vmem>>, vector<32x2048xbf16>
    tpu.vector_store %arg6[%c32, %c0_19], %33 {strides = array<i32>} : memref<80x2048xbf16, #tpu.memory_space<vmem>>, vector<32x2048xbf16>,
    %c64 = arith.constant 64 : index
    %c0_20 = arith.constant 0 : index
    %35 = vector.load %arg6[%c64, %c0_20] : memref<80x2048xbf16, #tpu.memory_space<vmem>>, vector<1x2048xbf16>
    tpu.vector_store %arg6[%c64, %c0_20], %0 {strides = array<i32>} : memref<80x2048xbf16, #tpu.memory_space<vmem>>, vector<1x2048xbf16>,
    %c0_21 = arith.constant 0 : index
    %c0_22 = arith.constant 0 : index
    %36 = vector.load %arg6[%c0_21, %c0_22] : memref<80x2048xbf16, #tpu.memory_space<vmem>>, vector<65x2048xbf16>
    %cst_23 = arith.constant dense<0.000000e+00> : vector<96x2048xf32>
    %37 = tpu.matmul %29, %36, %cst_23 {dimension_numbers = #tpu.dot_dimension_numbers<[1], [0], [0], [1], [0, 0, 1, 1], [], []>} : vector<96x65xbf16>, vector<65x2048xbf16>, vector<96x2048xf32> -> vector<96x2048xf32>
    %38 = vector.extract_strided_slice %37 {offsets = [0, 0], sizes = [32, 2048], strides = [1, 1]} : vector<96x2048xf32> to vector<32x2048xf32>
    %39 = vector.extract_strided_slice %37 {offsets = [32, 0], sizes = [32, 2048], strides = [1, 1]} : vector<96x2048xf32> to vector<32x2048xf32>
    %40 = arith.mulf %38, %39 : vector<32x2048xf32>
    %41 = vector.extract_strided_slice %37 {offsets = [64, 0], sizes = [32, 2048], strides = [1, 1]} : vector<96x2048xf32> to vector<32x2048xf32>
    %42 = arith.addf %40, %41 : vector<32x2048xf32>
    %cst_24 = arith.constant 1.000000e+02 : f32
    %43 = vector.broadcast %cst_24 : f32 to vector<32x2048xf32>
    %44 = arith.mulf %43, %42 : vector<32x2048xf32>
    %cst_25 = arith.constant 2.000000e+01 : f32
    %45 = vector.broadcast %cst_25 : f32 to vector<32x2048xf32>
    %46 = arith.minimumf %44, %45 : vector<32x2048xf32>
    %47 = math.exp %46 : vector<32x2048xf32>
    %48 = math.log1p %47 : vector<32x2048xf32>
    %cst_26 = arith.constant 0.00999999977 : f32
    %49 = vector.broadcast %cst_26 : f32 to vector<32x2048xf32>
    %50 = arith.mulf %48, %49 : vector<32x2048xf32>
    %cst_27 = arith.constant 2.000000e+01 : f32
    %51 = vector.broadcast %cst_27 : f32 to vector<32x2048xf32>
    %52 = arith.cmpf ogt, %44, %51 : vector<32x2048xf32>
    %53 = arith.select %52, %42, %50 : vector<32x2048xi1>, vector<32x2048xf32>
    %c1 = arith.constant 1 : index
    %c0_28 = arith.constant 0 : index
    %c0_29 = arith.constant 0 : index
    %54 = vector.load %arg3[%c1, %c0_28, %c0_29] : memref<2x96x65xbf16, #tpu.memory_space<vmem>>, vector<1x96x65xbf16>
    %55 = vector.shape_cast %54 : vector<1x96x65xbf16> to vector<96x65xbf16>
    %56 = arith.truncf %53 : vector<32x2048xf32> to vector<32x2048xbf16>
    %c0_30 = arith.constant 0 : index
    %c0_31 = arith.constant 0 : index
    %57 = vector.load %arg6[%c0_30, %c0_31] : memref<80x2048xbf16, #tpu.memory_space<vmem>>, vector<32x2048xbf16>
    tpu.vector_store %arg6[%c0_30, %c0_31], %56 {strides = array<i32>} : memref<80x2048xbf16, #tpu.memory_space<vmem>>, vector<32x2048xbf16>,
    %58 = arith.mulf %53, %53 : vector<32x2048xf32>
    %59 = arith.truncf %58 : vector<32x2048xf32> to vector<32x2048xbf16>
    %c32_32 = arith.constant 32 : index
    %c0_33 = arith.constant 0 : index
    %60 = vector.load %arg6[%c32_32, %c0_33] : memref<80x2048xbf16, #tpu.memory_space<vmem>>, vector<32x2048xbf16>
    tpu.vector_store %arg6[%c32_32, %c0_33], %59 {strides = array<i32>} : memref<80x2048xbf16, #tpu.memory_space<vmem>>, vector<32x2048xbf16>,
    %c64_34 = arith.constant 64 : index
    %c0_35 = arith.constant 0 : index
    %61 = vector.load %arg6[%c64_34, %c0_35] : memref<80x2048xbf16, #tpu.memory_space<vmem>>, vector<1x2048xbf16>
    tpu.vector_store %arg6[%c64_34, %c0_35], %0 {strides = array<i32>} : memref<80x2048xbf16, #tpu.memory_space<vmem>>, vector<1x2048xbf16>,
    %c0_36 = arith.constant 0 : index
    %c0_37 = arith.constant 0 : index
    %62 = vector.load %arg6[%c0_36, %c0_37] : memref<80x2048xbf16, #tpu.memory_space<vmem>>, vector<65x2048xbf16>
    %cst_38 = arith.constant dense<0.000000e+00> : vector<96x2048xf32>
    %63 = tpu.matmul %55, %62, %cst_38 {dimension_numbers = #tpu.dot_dimension_numbers<[1], [0], [0], [1], [0, 0, 1, 1], [], []>} : vector<96x65xbf16>, vector<65x2048xbf16>, vector<96x2048xf32> -> vector<96x2048xf32>
    %64 = vector.extract_strided_slice %63 {offsets = [0, 0], sizes = [32, 2048], strides = [1, 1]} : vector<96x2048xf32> to vector<32x2048xf32>
    %65 = vector.extract_strided_slice %63 {offsets = [32, 0], sizes = [32, 2048], strides = [1, 1]} : vector<96x2048xf32> to vector<32x2048xf32>
    %66 = arith.mulf %64, %65 : vector<32x2048xf32>
    %67 = vector.extract_strided_slice %63 {offsets = [64, 0], sizes = [32, 2048], strides = [1, 1]} : vector<96x2048xf32> to vector<32x2048xf32>
    %68 = arith.addf %66, %67 : vector<32x2048xf32>
    %cst_39 = arith.constant 1.000000e+02 : f32
    %69 = vector.broadcast %cst_39 : f32 to vector<32x2048xf32>
    %70 = arith.mulf %69, %68 : vector<32x2048xf32>
    %cst_40 = arith.constant 2.000000e+01 : f32
    %71 = vector.broadcast %cst_40 : f32 to vector<32x2048xf32>
    %72 = arith.minimumf %70, %71 : vector<32x2048xf32>
    %73 = math.exp %72 : vector<32x2048xf32>
    %74 = math.log1p %73 : vector<32x2048xf32>
    %cst_41 = arith.constant 0.00999999977 : f32
    %75 = vector.broadcast %cst_41 : f32 to vector<32x2048xf32>
    %76 = arith.mulf %74, %75 : vector<32x2048xf32>
    %cst_42 = arith.constant 2.000000e+01 : f32
    %77 = vector.broadcast %cst_42 : f32 to vector<32x2048xf32>
    %78 = arith.cmpf ogt, %70, %77 : vector<32x2048xf32>
    %79 = arith.select %78, %68, %76 : vector<32x2048xi1>, vector<32x2048xf32>
    %c0_43 = arith.constant 0 : index
    %c0_44 = arith.constant 0 : index
    %80 = vector.load %arg4[%c0_43, %c0_44] : memref<3x65xbf16, #tpu.memory_space<vmem>>, vector<3x65xbf16>
    %81 = arith.truncf %79 : vector<32x2048xf32> to vector<32x2048xbf16>
    %c0_45 = arith.constant 0 : index
    %c0_46 = arith.constant 0 : index
    %82 = vector.load %arg6[%c0_45, %c0_46] : memref<80x2048xbf16, #tpu.memory_space<vmem>>, vector<32x2048xbf16>
    tpu.vector_store %arg6[%c0_45, %c0_46], %81 {strides = array<i32>} : memref<80x2048xbf16, #tpu.memory_space<vmem>>, vector<32x2048xbf16>,
    %83 = arith.mulf %79, %79 : vector<32x2048xf32>
    %84 = arith.truncf %83 : vector<32x2048xf32> to vector<32x2048xbf16>
    %c32_47 = arith.constant 32 : index
    %c0_48 = arith.constant 0 : index
    %85 = vector.load %arg6[%c32_47, %c0_48] : memref<80x2048xbf16, #tpu.memory_space<vmem>>, vector<32x2048xbf16>
    tpu.vector_store %arg6[%c32_47, %c0_48], %84 {strides = array<i32>} : memref<80x2048xbf16, #tpu.memory_space<vmem>>, vector<32x2048xbf16>,
    %c64_49 = arith.constant 64 : index
    %c0_50 = arith.constant 0 : index
    %86 = vector.load %arg6[%c64_49, %c0_50] : memref<80x2048xbf16, #tpu.memory_space<vmem>>, vector<1x2048xbf16>
    tpu.vector_store %arg6[%c64_49, %c0_50], %0 {strides = array<i32>} : memref<80x2048xbf16, #tpu.memory_space<vmem>>, vector<1x2048xbf16>,
    %c0_51 = arith.constant 0 : index
    %c0_52 = arith.constant 0 : index
    %87 = vector.load %arg6[%c0_51, %c0_52] : memref<80x2048xbf16, #tpu.memory_space<vmem>>, vector<65x2048xbf16>
    %cst_53 = arith.constant dense<0.000000e+00> : vector<3x2048xf32>
    %88 = tpu.matmul %80, %87, %cst_53 {dimension_numbers = #tpu.dot_dimension_numbers<[1], [0], [0], [1], [0, 0, 1, 1], [], []>} : vector<3x65xbf16>, vector<65x2048xbf16>, vector<3x2048xf32> -> vector<3x2048xf32>
    %89 = vector.extract_strided_slice %88 {offsets = [0, 0], sizes = [1, 2048], strides = [1, 1]} : vector<3x2048xf32> to vector<1x2048xf32>
    %90 = vector.extract_strided_slice %88 {offsets = [1, 0], sizes = [1, 2048], strides = [1, 1]} : vector<3x2048xf32> to vector<1x2048xf32>
    %91 = arith.mulf %89, %90 : vector<1x2048xf32>
    %92 = vector.extract_strided_slice %88 {offsets = [2, 0], sizes = [1, 2048], strides = [1, 1]} : vector<3x2048xf32> to vector<1x2048xf32>
    %93 = arith.addf %91, %92 : vector<1x2048xf32>
    %94 = math.absf %93 : vector<1x2048xf32>
    %c0_54 = arith.constant 0 : index
    %c0_55 = arith.constant 0 : index
    %95 = vector.load %arg5[%c0_54, %c0_55] : memref<1x2048xf32, #tpu.memory_space<vmem>>, vector<1x2048xf32>
    tpu.vector_store %arg5[%c0_54, %c0_55], %94 {strides = array<i32>} : memref<1x2048xf32, #tpu.memory_space<vmem>>, vector<1x2048xf32>,
    return
  }
  func.func @transform_0(%arg0: i32) -> (i32, i32) {
    %c0_i32 = arith.constant 0 : i32
    %c0_i32_0 = arith.constant 0 : i32
    return %c0_i32, %arg0 : i32, i32
  }
  func.func @transform_1(%arg0: i32) -> (i32, i32) {
    %c0_i32 = arith.constant 0 : i32
    %c0_i32_0 = arith.constant 0 : i32
    %c0_i32_1 = arith.constant 0 : i32
    return %c0_i32, %c0_i32_0 : i32, i32
  }
  func.func @transform_2(%arg0: i32) -> (i32, i32, i32) {
    %c0_i32 = arith.constant 0 : i32
    %c0_i32_0 = arith.constant 0 : i32
    %c0_i32_1 = arith.constant 0 : i32
    %c0_i32_2 = arith.constant 0 : i32
    return %c0_i32, %c0_i32_0, %c0_i32_1 : i32, i32, i32
  }
  func.func @transform_3(%arg0: i32) -> (i32, i32) {
    %c0_i32 = arith.constant 0 : i32
    %c0_i32_0 = arith.constant 0 : i32
    %c0_i32_1 = arith.constant 0 : i32
    return %c0_i32, %c0_i32_0 : i32, i32
  }
  func.func @transform_4(%arg0: i32) -> (i32, i32) {
    %c0_i32 = arith.constant 0 : i32
    %c0_i32_0 = arith.constant 0 : i32
    return %c0_i32, %arg0 : i32, i32
  }
}

</mosaic_0001>

<bundles_post_ra>
// kernel: tpu_custom_call.1
= control target key start
LH: loop header
LB: loop body
LE: loop exit
PB: predicated region body
PF: predicated region fallthrough
CT: control target
= control target key end

     0   :  { %9 = vsyncpa [#allocation4], 0  ;;  %s16312_s0 = inlined_call_operand.vmem [shape: bf16[3,4096], index: 0, kind: input, shape index: {}]   ;;  %s16313_s1 = inlined_call_operand.vmem [shape: bf16[96,7], index: 1, kind: input, shape index: {}]   ;;  %s16314_s2 = inlined_call_operand.vmem [shape: bf16[2,96,65], index: 2, kind: input, shape index: {}]   ;;  %s16315_s3 = inlined_call_operand.vmem [shape: bf16[3,65], index: 3, kind: input, shape index: {}]   ;;  %s16316_s4 = inlined_call_operand.hbm [shape: f32[1,4096], index: 4, kind: output, shape index: {}]  }
   0x1   :  { %11 = vsyncpa [#allocation4 + $0x1], 0  ;;  %s10956_s15 = smov 0   ;;  %s10958_s16 = smov 0  }
   0x2   :  { %s10960_s17 = smov 0   ;;  %s10962_s18 = smov 0  }
   0x3 LB: > { %s8648_s19 = sadd.s32 4294967295, %s10927_s18   ;;  %s8649_s20 = sadd.s32 4294967294, %s10927_s18   ;;  %s10927_s18 = sphi %s10962_s18, %s16612_s18   ;;  %s10923_s17 = sphi %s10960_s17, %s16611_s17   ;;  %s10919_s16 = sphi %s10958_s16, %s16610_s16   ;;  %s10915_s15 = sphi %s10956_s15, %s16609_s15  }
   0x4   : > { %s10979_s21 = sadd.s32 1, %s10927_s18   ;;  %s113_s22 = sadd.s32 1, %s10923_s17 }
   0x5   : > { %s110_s23 = ssub.s32 %s10927_s18, %s10979_s21  ;;  %p123_p0 = scmp.ne.s32.totalorder %s10923_s17, %s10919_s16 }
   0x6   : > { %p111_p1 = scmp.eq.s32.totalorder %s110_s23, 0  ;;  %p124_p2 = scmp.eq.s32.totalorder %s8648_s19, 1 }
   0x7   : > { %p129_p3 = scmp.ne.s32.totalorder %s10919_s16, %s10915_s15  ;;  %p130_p4 = scmp.eq.s32.totalorder %s8649_s20, 1 }
   0x8   : > { %s10989_s24 = scalar_select %p111_p1, %s10923_s17, %s113_s22  }
   0x9   : > { %p10991_p5 = por %p124_p2, %p123_p0  ;;  %p10995_p6 = por %p130_p4, %p129_p3 }
   0xa   : > { %p8652_p7 = scmp.ge.s32.totalorder %s10927_s18, 1  ;;  %p166_p8 = scmp.lt.s32.totalorder %s10927_s18, 3 }
   0xc   : > { %p167_p9 = pnand %p8652_p7, %p166_p8 }
   0xd   : > { %s11001_s27 = sshll.u32 (!%p167_p9), %s8648_s19, 4  ;;  %s10885_s19 = scalar_lea.hbm (!%p167_p9), %s16316_s4, 32 }
   0xe   : > { %170 = sbr.rel (%p167_p9) target bundleno = 1660 (0x67c), region = 36  ;;  %p193_p10 = scmp.lt.s32.totalorder (!%p167_p9), %s11001_s27, 31 }
   0xf   : > { %s8585_s8 = scalar_lea.hbm (!%p167_p9), %s16316_s4, %s11001_s27 }
  0x10   : > { %s8589_s10 = sshll.u32 (!%p167_p9), %s8585_s8, 4  ;;  %s8590_s10 = int_to_ptr.hbm [resolvable:$true] %s8589_s10 }
  0x11   : > { %s10879_s11 = sshra.s32 (!%p167_p9), %s8590_s10, 4  ;;  %s10880_s11 = int_to_ptr.hbm [resolvable:$true] %s10879_s11 }
  0x12   : > { %s10881_s12 = scalar_lea.hbm (!%p167_p9), %s10880_s11, 16  ;;  %p10886_p0 = scmp.lt.s32.totalorder (!%p167_p9), %s10880_s11, %s16316_s4 }
  0x13   : > { %vm252_vm0 = vcmask 1041408   ;;  %vm253_vm1 = vsmask.f32 1280  ;;  %s194_s28 = scalar_select %p193_p10, %s11001_s27, 31  ;;  %vm255_vm2 = vcmask 1045508   ;;  %vm453_vm5 = vcmask 1043459  }
  0x14   : > { %vm256_vm3 = vsmask.f32 5376  ;;  %vm11006_vm4 = vmand %vm252_vm0, %vm253_vm1  ;;  %vm454_vm6 = vsmask.f32 3328  ;;  %vm456_vm8 = vcmask 1047559   ;;  %vm422_vm14 = vcmask 1042433   ;;  %p10882_p11 = scmp.ne.s32.totalorder %s10880_s11, %s10881_s12  ;;  %p10887_p1 = scmp.lt.s32.totalorder %s10885_s19, %s10881_s12 }
  0x15   : > { %s8655_s29 = sshll.u32 %s194_s28, 1  ;;  %vm11014_vm7 = vmand %vm255_vm2, %vm256_vm3  ;;  %vm457_vm9 = vsmask.f32 7424  ;;  %v460_v6 = vld [vmem:[#allocation2] sm:$0x88]  ;;  %vm425_vm1 = vcmask 1046533  }
  0x16   : > { %s196_s6 = scalar_lea.vmem %s16312_s0, %s8655_s29  ;;  %vm455_vm10 = vmand %vm453_vm5, %vm454_vm6  ;;  %v463_v7 = vld [vmem:[#allocation2 + $0x8] sm:$0x88]  ;;  %v259_v14 = vld [vmem:[#allocation2] sm:$0x33]  ;;  %vm423_vm15 = vsmask.f32 7942  ;;  %p10883_p12 = pnand %p10882_p11, %p10991_p5 }
  0x17   : > { %v201_v2 = vld [vmem:[%s196_s6] sm:$0xff]  ;;  %v202_v3 = vld [vmem:[%s196_s6 + $0x8] sm:$0xff]  ;;  %v203_v4 = vld [vmem:[%s196_s6 + $0x10] sm:$0xff]  ;;  %vm426_vm3 = vsmask.f32 7958  ;;  %s189_s29 = sand.u32 1, %s10919_s16   ;;  %p10888_p2 = por %p10887_p1, %p10886_p0 }
  0x18   : > { %v11018_v5 = vld [vmem:[%s196_s6 + $0x18] sm:$0xff]  ;;  %226 = vst [vmem:[#allocation1] ss:$2 sm:$0xff] %v201_v2  ;;  %vm458_vm11 = vmand %vm456_vm8, %vm457_vm9  ;;  %v205_v9 = vunpack.c.l.bf16 %v201_v2  ;;  %v206_v12 = vunpack.c.h.bf16 %v201_v2  ;;  %v207_v15 = vunpack.c.l.bf16 %v202_v3  ;;  %v208_v16 = vunpack.c.h.bf16 %v202_v3  ;;  %v262_v21 = vld [vmem:[#allocation2 + $0x8] sm:$0x33]  ;;  %s8653_s30 = sshll.u32 %s189_s29, 4  ;;  %p10884_p13 = pneg %p10883_p12 }
  0x19   : > { %229 = vst [vmem:[#allocation1 + $0x10] ss:$2 sm:$0xff] %v202_v3  ;;  %vm11020_vm12 = vmor %vm458_vm11, %vm455_vm10  ;;  %v209_v30 = vunpack.c.l.bf16 %v203_v4  ;;  %v210_v33 = vunpack.c.h.bf16 %v203_v4  ;;  %v268_v35 = vld [vmem:[#allocation2 + $0x18] sm:$0x33]  ;;  %v469_v36 = vld [vmem:[#allocation2 + $0x18] sm:$0x88]  ;;  %v212_v38 = vunpack.c.h.bf16 %v11018_v5  ;;  %v211_v42 = vunpack.c.l.bf16 %v11018_v5 }
  0x1a   : > { %232 = vst [vmem:[#allocation1 + $0x20] ss:$2 sm:$0xff] %v203_v4  ;;  %v461_v10 = vsel %vm11020_vm12, 1065369472, %v460_v6  ;;  %v464_v11 = vsel %vm11020_vm12, 1065369472, %v463_v7  ;;  %vm11033_vm13 = vmor %vm11014_vm7, %vm11006_vm4  ;;  %v283_v20 = vmul.f32 %v205_v9, %v205_v9  ;;  %v284_v24 = vmul.f32 %v206_v12, %v206_v12  ;;  %p10889_p3 = pnand %p10888_p2, %p10884_p13 }
  0x1b   : > { %235 = vst [vmem:[#allocation1 + $0x30] ss:$2 sm:$0xff] %v11018_v5  ;;  %v285_v27 = vmul.f32 %v207_v15, %v207_v15  ;;  %v286_v29 = vmul.f32 %v208_v16, %v208_v16  ;;  %v287_v34 = vmul.f32 %v209_v30, %v209_v30  ;;  %v288_v39 = vmul.f32 %v210_v33, %v210_v33  ;;  %v265_v41 = vld [vmem:[#allocation2 + $0x10] sm:$0x33]  ;;  %vm11057_vm4 = vmand %vm422_vm14, %vm423_vm15  ;;  %v466_v54 = vld [vmem:[#allocation2 + $0x10] sm:$0x88] }
  0x1c   : > { %462 = vst [vmem:[#allocation2] sm:$0x88] %v461_v10  ;;  %v470_v40 = vsel %vm11020_vm12, 1065369472, %v469_v36  ;;  %v290_v50 = vmul.f32 %v212_v38, %v212_v38  ;;  %vm427_vm5 = vmand %vm425_vm1, %vm426_vm3  ;;  %v289_v55 = vmul.f32 %v211_v42, %v211_v42  ;;  %v467_v0 = vsel %vm11020_vm12, 1065369472, %v466_v54 }
  0x1d   : > { %465 = vst [vmem:[#allocation2 + $0x8] sm:$0x88] %v464_v11  ;;  %vm11067_vm6 = vmor %vm427_vm5, %vm11057_vm4  ;;  %vm581_vm7 = vcmask 1042432   ;;  %vm582_vm8 = vcmask 1043456   ;;  %v11089_v47 = vld [vmem:[%s16313_s1] sm:$0xff]  ;;  %vm562_vm9 = vcmask 56320  }
  0x1e   : > { %471 = vst [vmem:[#allocation2 + $0x18] sm:$0x88] %v470_v40  ;;  %s16269_s5 = scalar_lea.vmem [#allocation3], %s8653_s30  ;;  %s8575_s27 = scalar_lea.sflag [#allocation4], %s189_s29 }
  0x1f   : > { %v236_v17 = vld.sshfl [vmem:[#allocation1] sm:$0xff pattern:$0x75643120]  ;;  %v237_v18 = vld.sshfl [vmem:[#allocation1 + $0x8] sm:$0xff pattern:$0x75643120] }
  0x20   : > { %v260_v19 = vsel %vm11033_vm13, %v236_v17, %v259_v14  ;;  %v238_v22 = vld.sshfl [vmem:[#allocation1 + $0x10] sm:$0xff pattern:$0x75643120]  ;;  %v239_v23 = vld.sshfl [vmem:[#allocation1 + $0x18] sm:$0xff pattern:$0x75643120]  ;;  %v263_v32 = vsel %vm11033_vm13, %v237_v18, %v262_v21 }
  0x21   : > { %v11039_v25 = vld.sshfl [vmem:[#allocation1 + $0x20] sm:$0xff pattern:$0x75643120]  ;;  %v11041_v26 = vld.sshfl [vmem:[#allocation1 + $0x28] sm:$0xff pattern:$0x75643120]  ;;  %v269_v37 = vsel %vm11033_vm13, %v239_v23, %v268_v35  ;;  %v266_v49 = vsel %vm11033_vm13, %v238_v22, %v265_v41 }
  0x22   : > { %v11043_v28 = vld.sshfl [vmem:[#allocation1 + $0x30] sm:$0xff pattern:$0x75643120]  ;;  %261 = vst [vmem:[#allocation2] sm:$0x33] %v260_v19  ;;  %s8587_s9 = sshll.u32 %s16269_s5, 4  ;;  %s8588_s9 = int_to_ptr.vmem [resolvable:$true] %s8587_s9 }
  0x23   : > { %v11045_v31 = vld.sshfl [vmem:[#allocation1 + $0x38] sm:$0xff pattern:$0x75643120]  ;;  %299 = vst [vmem:[#allocation1] ss:$2 sm:$0xff] %v283_v20 }
  0x24   : > { %301 = vst [vmem:[#allocation1 + $0x10] ss:$2 sm:$0xff] %v284_v24 }
  0x25   : > { %303 = vst [vmem:[#allocation1 + $0x20] ss:$2 sm:$0xff] %v285_v27 }
  0x26   : > { %305 = vst [vmem:[#allocation1 + $0x30] ss:$2 sm:$0xff] %v286_v29  ;;  %v10929_v29 = vmov 65535  }
  0x27   : > { %264 = vst [vmem:[#allocation2 + $0x8] sm:$0x33] %v263_v32  ;;  %v583_v30 = vsel %vm581_vm7, 4294967295, %v10929_v29 }
  0x28   : > { %270 = vst [vmem:[#allocation2 + $0x18] sm:$0x33] %v269_v37  ;;  %v11082_v37 = vsel %vm582_vm8, %v583_v30, 0 }
  0x29   : > { %v429_v56 = vld [vmem:[#allocation2] sm:$0x66]  ;;  %267 = vst [vmem:[#allocation2 + $0x10] sm:$0x33] %v266_v49 }
  0x2a   : > { %v306_v43 = vld.sshfl [vmem:[#allocation1] sm:$0xff pattern:$0x75316420]  ;;  %v307_v44 = vld.sshfl [vmem:[#allocation1 + $0x8] sm:$0xff pattern:$0x75316420] }
  0x2b   : > { %314 = vst [vmem:[#allocation1] ss:$2 sm:$0xff] %v287_v34  ;;  %v342_v45 = vpack.c.bf16 %v307_v44, %v306_v43  ;;  %v308_v46 = vld.sshfl [vmem:[#allocation1 + $0x10] sm:$0xff pattern:$0x75316420] }
  0x2c   : > { %v309_v48 = vld.sshfl [vmem:[#allocation1 + $0x18] sm:$0xff pattern:$0x75316420]  ;;  %v310_v6 = vld.sshfl [vmem:[#allocation1 + $0x20] sm:$0xff pattern:$0x75316420] }
  0x2d   : > { %v351_v51 = vshrl.u32 %v342_v45, 16  ;;  %v354_v52 = vshll.u32 %v342_v45, 16  ;;  %315 = vst [vmem:[#allocation1 + $0x10] ss:$2 sm:$0xff] %v288_v39  ;;  %v343_v53 = vpack.c.bf16 %v309_v48, %v308_v46 }
  0x2e   : > { %v312_v57 = vld.sshfl [vmem:[#allocation1 + $0x30] sm:$0xff pattern:$0x75316420]  ;;  %v313_v63 = vld.sshfl [vmem:[#allocation1 + $0x38] sm:$0xff pattern:$0x75316420] }
  0x2f   : > { %v353_v58 = vrot.slane %v351_v51, 6  ;;  %v356_v59 = vrot.slane %v354_v52, 7  ;;  %v359_v60 = vshrl.u32 %v343_v53, 16  ;;  %v362_v61 = vshll.u32 %v343_v53, 16  ;;  %v432_v4 = vld [vmem:[#allocation2 + $0x8] sm:$0x66] }
  0x30   : > { %317 = vst [vmem:[#allocation1 + $0x30] ss:$2 sm:$0xff] %v290_v50  ;;  %v345_v5 = vpack.c.bf16 %v313_v63, %v312_v57  ;;  %v311_v7 = vld.sshfl [vmem:[#allocation1 + $0x28] sm:$0xff pattern:$0x75316420] }
  0x31   : > { %v357_v1 = vor.u32 %v356_v59, %v353_v58  ;;  %v361_v2 = vrot.slane %v359_v60, 6  ;;  %v364_v3 = vrot.slane %v362_v61, 7  ;;  %316 = vst [vmem:[#allocation1 + $0x20] ss:$2 sm:$0xff] %v289_v55  ;;  %v344_v14 = vpack.c.bf16 %v311_v7, %v310_v6  ;;  %v438_v18 = vld [vmem:[#allocation2 + $0x18] sm:$0x66] }
  0x32   : > { %v375_v11 = vshrl.u32 %v345_v5, 16  ;;  %v378_v12 = vshll.u32 %v345_v5, 16  ;;  %468 = vst [vmem:[#allocation2 + $0x10] sm:$0x88] %v467_v0  ;;  %v435_v27 = vld [vmem:[#allocation2 + $0x10] sm:$0x66] }
  0x33   : > { %v430_v9 = vsel %vm11067_vm6, %v357_v1, %v429_v56  ;;  %v365_v10 = vor.u32 %v364_v3, %v361_v2  ;;  %v367_v19 = vshrl.u32 %v344_v14, 16  ;;  %v370_v20 = vshll.u32 %v344_v14, 16  ;;  %v11108_v1 = vld [vmem:[%s16313_s1 + $0x8] sm:$0xff]  ;;  %v11121_v2 = vld [vmem:[%s16313_s1 + $0x10] sm:$0xff]  ;;  %v11134_v3 = vld [vmem:[%s16313_s1 + $0x18] sm:$0xff] }
  0x34   : > { %431 = vst [vmem:[#allocation2] sm:$0x66] %v430_v9  ;;  %v377_v16 = vrot.slane %v375_v11, 6  ;;  %v380_v17 = vrot.slane %v378_v12, 7  ;;  %v274_v5 = vld [vmem:[#allocation2 + $0x28] sm:$0x33] }
  0x35   : > { %v433_v15 = vsel %vm11067_vm6, %v365_v10, %v432_v4  ;;  %v369_v22 = vrot.slane %v367_v19, 6  ;;  %v372_v23 = vrot.slane %v370_v20, 7  ;;  %v11147_v4 = vld [vmem:[%s16313_s1 + $0x20] sm:$0xff]  ;;  %v320_v6 = vld.sshfl [vmem:[#allocation1 + $0x10] sm:$0xff pattern:$0x75316420]  ;;  %v275_v7 = vsel %vm11033_vm13, %v11041_v26, %v274_v5 }
  0x36   : > { %434 = vst [vmem:[#allocation2 + $0x8] sm:$0x66] %v433_v15  ;;  %v381_v21 = vor.u32 %v380_v17, %v377_v16  ;;  %v321_v9 = vld.sshfl [vmem:[#allocation1 + $0x18] sm:$0xff pattern:$0x75316420] }
  0x37   : > { %v373_v32 = vor.u32 %v372_v23, %v369_v22  ;;  %v475_v10 = vld [vmem:[#allocation2 + $0x28] sm:$0x88]  ;;  %276 = vst [vmem:[#allocation2 + $0x28] sm:$0x33] %v275_v7  ;;  %v347_v11 = vpack.c.bf16 %v321_v9, %v320_v6  ;;  %v271_v14 = vld [vmem:[#allocation2 + $0x20] sm:$0x33] }
  0x38   : > { %v439_v24 = vsel %vm11067_vm6, %v381_v21, %v438_v18  ;;  %v476_v12 = vsel %vm11020_vm12, 1065369472, %v475_v10  ;;  %v272_v15 = vsel %vm11033_vm13, %v11039_v25, %v271_v14  ;;  %v318_v16 = vld.sshfl [vmem:[#allocation1] sm:$0xff pattern:$0x75316420]  ;;  %v11170_v25 = vld [vmem:[%s16313_s1 + $0x28] sm:$0xff] }
  0x39   : > { %440 = vst [vmem:[#allocation2 + $0x18] sm:$0x66] %v439_v24  ;;  %v436_v36 = vsel %vm11067_vm6, %v373_v32, %v435_v27  ;;  %v391_v17 = vshrl.u32 %v347_v11, 16  ;;  %v394_v18 = vshll.u32 %v347_v11, 16  ;;  %v472_v19 = vld [vmem:[#allocation2 + $0x20] sm:$0x88] }
  0x3a   : > { %437 = vst [vmem:[#allocation2 + $0x10] sm:$0x66] %v436_v36  ;;  %v319_v20 = vld.sshfl [vmem:[#allocation1 + $0x8] sm:$0xff pattern:$0x75316420] }
  0x3b   : > { %v484_v33 = vld [vmem:[#allocation2] sm:$0xff]  ;;  %477 = vst [vmem:[#allocation2 + $0x28] sm:$0x88] %v476_v12  ;;  %v473_v26 = vsel %vm11020_vm12, 1065369472, %v472_v19  ;;  %v393_v21 = vrot.slane %v391_v17, 6  ;;  %v346_v23 = vpack.c.bf16 %v319_v20, %v318_v16 }
  0x3c   : > { %v530_v34 = vunpack.c.l.b16 %v484_v33  ;;  %v531_v35 = vunpack.c.h.b16 %v484_v33  ;;  %273 = vst [vmem:[#allocation2 + $0x20] sm:$0x33] %v272_v15  ;;  %v396_v22 = vrot.slane %v394_v18, 7 }
  0x3d   : > { %v485_v38 = vld [vmem:[#allocation2 + $0x8] sm:$0xff]  ;;  %474 = vst [vmem:[#allocation2 + $0x20] sm:$0x88] %v473_v26  ;;  %v383_v27 = vshrl.u32 %v346_v23, 16  ;;  %v386_v29 = vshll.u32 %v346_v23, 16 }
  0x3e   : > { %v546_v39 = vpack.c.b16 %v530_v34, %v530_v34  ;;  %v547_v40 = vpack.c.b16 %v531_v35, %v531_v35  ;;  %v532_v41 = vunpack.c.l.b16 %v485_v38  ;;  %v533_v42 = vunpack.c.h.b16 %v485_v38  ;;  %v444_v30 = vld [vmem:[#allocation2 + $0x28] sm:$0x66] }
  0x3f   : > { %v397_v24 = vor.u32 %v396_v22, %v393_v21  ;;  %v385_v33 = vrot.slane %v383_v27, 6  ;;  %v388_v34 = vrot.slane %v386_v29, 7 }
  0x40   : > { %v586_v43 = vand.u32 %v11082_v37, %v546_v39  ;;  %v589_v44 = vand.u32 %v11082_v37, %v547_v40  ;;  %v548_v45 = vpack.c.b16 %v532_v41, %v532_v41  ;;  %v549_v46 = vpack.c.b16 %v533_v42, %v533_v42  ;;  %v487_v48 = vld [vmem:[#allocation2 + $0x18] sm:$0xff] }
  0x41   : > { %v536_v51 = vunpack.c.l.b16 %v487_v48  ;;  %v537_v52 = vunpack.c.h.b16 %v487_v48  ;;  %v486_v55 = vld [vmem:[#allocation2 + $0x10] sm:$0xff]  ;;  %v445_v32 = vsel %vm11067_vm6, %v397_v24, %v444_v30  ;;  %v389_v36 = vor.u32 %v388_v34, %v385_v33 }
  0x42   : > { %640 = vmatpush.bf16.msra.mxu0 %v586_v43  ;;  %679 = vmatpush.bf16.msra.mxu1 %v589_v44  ;;  %v592_v49 = vand.u32 %v11082_v37, %v548_v45  ;;  %v595_v50 = vand.u32 %v11082_v37, %v549_v46  ;;  %v534_v56 = vunpack.c.l.b16 %v486_v55  ;;  %v535_v57 = vunpack.c.h.b16 %v486_v55  ;;  %446 = vst [vmem:[#allocation2 + $0x28] sm:$0x66] %v445_v32 }
  0x43   : > { %v552_v53 = vpack.c.b16 %v536_v51, %v536_v51  ;;  %v553_v54 = vpack.c.b16 %v537_v52, %v537_v52  ;;  %v441_v35 = vld [vmem:[#allocation2 + $0x20] sm:$0x66] }
  0x44   : > { %718 = vmatpush.bf16.msra.mxu2 %v592_v49  ;;  %757 = vmatpush.bf16.msra.mxu3 %v595_v50  ;;  %v550_v60 = vpack.c.b16 %v534_v56, %v534_v56  ;;  %v551_v61 = vpack.c.b16 %v535_v57, %v535_v57  ;;  %v442_v38 = vsel %vm11067_vm6, %v389_v36, %v441_v35 }
  0x45   : > { %8680 = vmatmul.msk.bf16.vlgmr.msra.gmra.mxu0 %vm562_vm9, %v11089_v47  ;;  %8686 = vmatmul.msk.bf16.vlgmr.msra.gmra.mxu1 %vm562_vm9, %v11089_v47  ;;  %v604_v58 = vand.u32 %v11082_v37, %v552_v53  ;;  %v607_v59 = vand.u32 %v11082_v37, %v553_v54  ;;  %443 = vst [vmem:[#allocation2 + $0x20] sm:$0x66] %v442_v38 }
  0x46   : > { %v598_v63 = vand.u32 %v11082_v37, %v550_v60  ;;  %v601_v0 = vand.u32 %v11082_v37, %v551_v61 }
  0x47   : > { %8692 = vmatmul.msk.bf16.vlgmr.msra.gmra.mxu2 %vm562_vm9, %v11089_v47  ;;  %8698 = vmatmul.msk.bf16.vlgmr.msra.gmra.mxu3 %vm562_vm9, %v11089_v47 }
  0x48   : > { %874 = vmatpush.bf16.msrb.mxu2 %v604_v58  ;;  %913 = vmatpush.bf16.msrb.mxu3 %v607_v59 }
  0x49   : > { %796 = vmatpush.bf16.msrb.mxu0 %v598_v63  ;;  %835 = vmatpush.bf16.msrb.mxu1 %v601_v0  ;;  %v489_v39 = vld [vmem:[#allocation2 + $0x28] sm:$0xff] }
  0x4a   : > { %v540_v40 = vunpack.c.l.b16 %v489_v39  ;;  %v541_v41 = vunpack.c.h.b16 %v489_v39 }
  0x4c   : > { %v556_v42 = vpack.c.b16 %v540_v40, %v540_v40  ;;  %v557_v43 = vpack.c.b16 %v541_v41, %v541_v41  ;;  %v488_v44 = vld [vmem:[#allocation2 + $0x20] sm:$0xff] }
  0x4d   : > { %v538_v48 = vunpack.c.l.b16 %v488_v44  ;;  %v539_v49 = vunpack.c.h.b16 %v488_v44  ;;  %v280_v44 = vld [vmem:[#allocation2 + $0x38] sm:$0x33] }
  0x4e   : > { %v616_v45 = vand.u32 %v11082_v37, %v556_v42  ;;  %v619_v46 = vand.u32 %v11082_v37, %v557_v43 }
  0x4f   : > { %v554_v50 = vpack.c.b16 %v538_v48, %v538_v48  ;;  %v555_v51 = vpack.c.b16 %v539_v49, %v539_v49  ;;  %v481_v49 = vld [vmem:[#allocation2 + $0x38] sm:$0x88] }
  0x50   : > { %1030 = vmatpush.bf16.msra.mxu2 %v616_v45  ;;  %1069 = vmatpush.bf16.msra.mxu3 %v619_v46  ;;  %v324_v45 = vld.sshfl [vmem:[#allocation1 + $0x30] sm:$0xff pattern:$0x75316420] }
  0x51   : > { %v610_v52 = vand.u32 %v11082_v37, %v554_v50  ;;  %v613_v53 = vand.u32 %v11082_v37, %v555_v51 }
  0x53   : > { %952 = vmatpush.bf16.msra.mxu0 %v610_v52  ;;  %991 = vmatpush.bf16.msra.mxu1 %v613_v53  ;;  %v281_v52 = vsel %vm11033_vm13, %v11045_v31, %v280_v44  ;;  %v325_v53 = vld.sshfl [vmem:[#allocation1 + $0x38] sm:$0xff pattern:$0x75316420] }
  0x54   : > { %282 = vst [vmem:[#allocation2 + $0x38] sm:$0x33] %v281_v52 }
  0x55   : > { %8681 = vmatmul.msk.bf16.gmra.mxu0 %vm562_vm9, %v11108_v1  ;;  %8687 = vmatmul.msk.bf16.gmra.mxu1 %vm562_vm9, %v11108_v1 }
  0x57   : > { %8693 = vmatmul.msk.bf16.gmra.mxu2 %vm562_vm9, %v11108_v1  ;;  %8699 = vmatmul.msk.bf16.gmra.mxu3 %vm562_vm9, %v11108_v1 }
  0x5b   : > { %v450_v44 = vld [vmem:[#allocation2 + $0x38] sm:$0x66] }
  0x65   : > { %8682 = vmatmul.msk.bf16.gmra.mxu0 %vm562_vm9, %v11121_v2  ;;  %8688 = vmatmul.msk.bf16.gmra.mxu1 %vm562_vm9, %v11121_v2 }
  0x67   : > { %8694 = vmatmul.msk.bf16.gmra.mxu2 %vm562_vm9, %v11121_v2  ;;  %8700 = vmatmul.msk.bf16.gmra.mxu3 %vm562_vm9, %v11121_v2 }
  0x75   : > { %8683 = vmatmul.msk.bf16.gmra.mxu0 %vm562_vm9, %v11134_v3  ;;  %8689 = vmatmul.msk.bf16.gmra.mxu1 %vm562_vm9, %v11134_v3 }
  0x77   : > { %8695 = vmatmul.msk.bf16.gmra.mxu2 %vm562_vm9, %v11134_v3  ;;  %8701 = vmatmul.msk.bf16.gmra.mxu3 %vm562_vm9, %v11134_v3 }
  0x85   : > { %8684 = vmatmul.msk.bf16.gmra.mxu0 %vm562_vm9, %v11147_v4  ;;  %8690 = vmatmul.msk.bf16.gmra.mxu1 %vm562_vm9, %v11147_v4 }
  0x87   : > { %8696 = vmatmul.msk.bf16.gmra.mxu2 %vm562_vm9, %v11147_v4  ;;  %8702 = vmatmul.msk.bf16.gmra.mxu3 %vm562_vm9, %v11147_v4 }
  0x95   : > { %8685 = vmatmul.msk.bf16.gmra.mxu0 %vm562_vm9, %v11170_v25  ;;  %8691 = vmatmul.msk.bf16.gmra.mxu1 %vm562_vm9, %v11170_v25 }
  0x97   : > { %8697 = vmatmul.msk.bf16.gmra.mxu2 %vm562_vm9, %v11170_v25  ;;  %8703 = vmatmul.msk.bf16.gmra.mxu3 %vm562_vm9, %v11170_v25 }
  0xa5   : > { %8704 = vmatmul.msk.bf16.vlgmr.msrb.gmra.mxu0 %vm562_vm9, %v11089_v47  ;;  %8710 = vmatmul.msk.bf16.vlgmr.msrb.gmra.mxu1 %vm562_vm9, %v11089_v47 }
  0xa7   : > { %8716 = vmatmul.msk.bf16.vlgmr.msrb.gmra.mxu2 %vm562_vm9, %v11089_v47  ;;  %8722 = vmatmul.msk.bf16.vlgmr.msrb.gmra.mxu3 %vm562_vm9, %v11089_v47 }
  0xb5   : > { %8705 = vmatmul.msk.bf16.gmra.mxu0 %vm562_vm9, %v11108_v1  ;;  %8711 = vmatmul.msk.bf16.gmra.mxu1 %vm562_vm9, %v11108_v1 }
  0xb7   : > { %8717 = vmatmul.msk.bf16.gmra.mxu2 %vm562_vm9, %v11108_v1  ;;  %8723 = vmatmul.msk.bf16.gmra.mxu3 %vm562_vm9, %v11108_v1 }
  0xc2   : > { %v642_v54 = vpop.f32.mrf.mxu0  ;;  %v681_v55 = vpop.f32.mrf.mxu1 }
  0xc5   : > { %8706 = vmatmul.msk.bf16.gmra.mxu0 %vm562_vm9, %v11121_v2  ;;  %8712 = vmatmul.msk.bf16.gmra.mxu1 %vm562_vm9, %v11121_v2 }
  0xc7   : > { %8718 = vmatmul.msk.bf16.gmra.mxu2 %vm562_vm9, %v11121_v2  ;;  %8724 = vmatmul.msk.bf16.gmra.mxu3 %vm562_vm9, %v11121_v2 }
  0xca   : > { %v11212_v56 = vpop.f32.mrf.mxu2  ;;  %v11214_v57 = vpop.f32.mrf.mxu3 }
  0xcb   : > { %v11216_v58 = vpop.f32.mrf.mxu0  ;;  %v11218_v59 = vpop.f32.mrf.mxu1 }
  0xd2   : > { %v11220_v60 = vpop.f32.mrf.mxu2  ;;  %v11222_v61 = vpop.f32.mrf.mxu3 }
  0xd3   : > { %v11224_v63 = vpop.f32.mrf.mxu0  ;;  %v11226_v0 = vpop.f32.mrf.mxu1 }
  0xd5   : > { %8707 = vmatmul.msk.bf16.gmra.mxu0 %vm562_vm9, %v11134_v3  ;;  %8713 = vmatmul.msk.bf16.gmra.mxu1 %vm562_vm9, %v11134_v3 }
  0xd7   : > { %8719 = vmatmul.msk.bf16.gmra.mxu2 %vm562_vm9, %v11134_v3  ;;  %8725 = vmatmul.msk.bf16.gmra.mxu3 %vm562_vm9, %v11134_v3 }
  0xda   : > { %v11236_v5 = vpop.f32.mrf.mxu2  ;;  %v11238_v6 = vpop.f32.mrf.mxu3 }
  0xdb   : > { %v649_v7 = vpop.f32.mrf.mxu0  ;;  %v688_v9 = vpop.f32.mrf.mxu1 }
  0xe2   : > { %v727_v10 = vpop.f32.mrf.mxu2  ;;  %v766_v11 = vpop.f32.mrf.mxu3 }
  0xe3   : > { %v652_v12 = vpop.f32.mrf.mxu0  ;;  %v691_v14 = vpop.f32.mrf.mxu1 }
  0xe4   : > { %v1257_v32 = vmul.f32 %v652_v12, %v642_v54  ;;  %v1258_v33 = vmul.f32 %v691_v14, %v681_v55  ;;  %v482_v54 = vsel %vm11020_vm12, 1065369472, %v481_v49 }
  0xe5   : > { %8708 = vmatmul.msk.bf16.gmra.mxu0 %vm562_vm9, %v11147_v4  ;;  %8714 = vmatmul.msk.bf16.gmra.mxu1 %vm562_vm9, %v11147_v4  ;;  %483 = vst [vmem:[#allocation2 + $0x38] sm:$0x88] %v482_v54 }
  0xe7   : > { %8720 = vmatmul.msk.bf16.gmra.mxu2 %vm562_vm9, %v11147_v4  ;;  %8726 = vmatmul.msk.bf16.gmra.mxu3 %vm562_vm9, %v11147_v4 }
  0xea   : > { %v730_v15 = vpop.f32.mrf.mxu2  ;;  %v769_v16 = vpop.f32.mrf.mxu3 }
  0xeb   : > { %v654_v17 = vpop.f32.mrf.mxu0  ;;  %v693_v18 = vpop.f32.mrf.mxu1  ;;  %v1259_v50 = vmul.f32 %v730_v15, %v11212_v56  ;;  %v1260_v51 = vmul.f32 %v769_v16, %v11214_v57 }
  0xec   : > { %v1274_v56 = vmul.f32 %v693_v18, %v11218_v59 }
  0xf2   : > { %v11248_v19 = vpop.f32.mrf.mxu2  ;;  %v11250_v20 = vpop.f32.mrf.mxu3 }
  0xf3   : > { %v11252_v26 = vpop.f32.mrf.mxu0  ;;  %v11254_v21 = vpop.f32.mrf.mxu1  ;;  %v1275_v49 = vmul.f32 %v11248_v19, %v11220_v60  ;;  %v1276_v60 = vmul.f32 %v11250_v20, %v11222_v61 }
  0xf4   : > { %v1290_v61 = vmul.f32 %v11254_v21, %v11226_v0 }
  0xf5   : > { %8709 = vmatmul.msk.bf16.gmra.mxu0 %vm562_vm9, %v11170_v25  ;;  %8715 = vmatmul.msk.bf16.gmra.mxu1 %vm562_vm9, %v11170_v25 }
  0xf7   : > { %8721 = vmatmul.msk.bf16.gmra.mxu2 %vm562_vm9, %v11170_v25  ;;  %8727 = vmatmul.msk.bf16.gmra.mxu3 %vm562_vm9, %v11170_v25 }
  0xfa   : > { %v11264_v22 = vpop.f32.mrf.mxu2  ;;  %v11266_v23 = vpop.f32.mrf.mxu3 }
  0xfb   : > { %v659_v24 = vpop.f32.mrf.mxu0  ;;  %v698_v27 = vpop.f32.mrf.mxu1 }
  0xfc   : > { %v11268_v29 = vmul.f32 %v659_v24, %v649_v7  ;;  %v11270_v30 = vmul.f32 %v698_v27, %v688_v9  ;;  %v349_v9 = vpack.c.bf16 %v325_v53, %v324_v45 }
  0xfe   : > { %v407_v15 = vshrl.u32 %v349_v9, 16  ;;  %v410_v16 = vshll.u32 %v349_v9, 16 }
 0x100   : > { %v409_v18 = vrot.slane %v407_v15, 6  ;;  %v412_v27 = vrot.slane %v410_v16, 7 }
 0x102   : > { %v737_v34 = vpop.f32.mrf.mxu2  ;;  %v776_v35 = vpop.f32.mrf.mxu3 }
 0x103   : > { %v11272_v36 = vmul.f32 %v737_v34, %v727_v10  ;;  %v11274_v38 = vmul.f32 %v776_v35, %v766_v11  ;;  %v662_v39 = vpop.f32.mrf.mxu0  ;;  %v701_v25 = vpop.f32.mrf.mxu1  ;;  %v413_v35 = vor.u32 %v412_v27, %v409_v18  ;;  %v1289_v27 = vmul.f32 %v11252_v26, %v11224_v63 }
 0x104   : > { %v11276_v40 = vadd.f32 %v1257_v32, %v662_v39  ;;  %v11278_v41 = vadd.f32 %v1258_v33, %v701_v25 }
 0x105   : > { %8728 = vmatmul.msk.bf16.vlgmr.msra.gmra.mxu0 %vm562_vm9, %v11089_v47  ;;  %8734 = vmatmul.msk.bf16.vlgmr.msra.gmra.mxu1 %vm562_vm9, %v11089_v47 }
 0x106   : > { %v11285_v42 = vmul.f32 100.0, %v11276_v40  ;;  %v11288_v43 = vmul.f32 100.0, %v11278_v41 }
 0x107   : > { %8740 = vmatmul.msk.bf16.vlgmr.msra.gmra.mxu2 %vm562_vm9, %v11089_v47  ;;  %8746 = vmatmul.msk.bf16.vlgmr.msra.gmra.mxu3 %vm562_vm9, %v11089_v47  ;;  %v1273_v47 = vmul.f32 %v654_v17, %v11216_v58 }
 0x108   : > { %v1449_v46 = vmin.f32 %v11285_v42, 20.0  ;;  %v1450_v48 = vmin.f32 %v11288_v43, 20.0  ;;  %vm2281_vm11 = vcmp.gt.f32.partialorder %v11285_v42, 20.0  ;;  %vm2282_vm15 = vcmp.gt.f32.partialorder %v11288_v43, 20.0 }
 0x109   : > { %v322_v43 = vld.sshfl [vmem:[#allocation1 + $0x20] sm:$0xff pattern:$0x75316420] }
 0x10a   : > { %v1513_v55 = vmul.f32 1.442695, %v1449_v46  ;;  %v1515_v7 = vmul.f32 1.442695, %v1450_v48  ;;  %v740_v10 = vpop.f32.mrf.mxu2  ;;  %v779_v11 = vpop.f32.mrf.mxu3 }
 0x10b   : > { %v11305_v57 = vadd.f32 %v1259_v50, %v740_v10  ;;  %v11307_v12 = vadd.f32 %v1260_v51, %v779_v11  ;;  %v664_v31 = vpop.f32.mrf.mxu0  ;;  %v703_v14 = vpop.f32.mrf.mxu1  ;;  %v451_v50 = vsel %vm11067_vm6, %v413_v35, %v450_v44 }
 0x10c   : > { %10067 = vpow2.f32 %v1513_v55  ;;  %v11309_v24 = vadd.f32 %v1273_v47, %v664_v31  ;;  %v11317_v59 = vadd.f32 %v1274_v56, %v703_v14  ;;  %452 = vst [vmem:[#allocation2 + $0x38] sm:$0x66] %v451_v50 }
 0x10d   : > { %10069 = vpow2.f32 %v1515_v7  ;;  %v11312_v58 = vmul.f32 100.0, %v11305_v57  ;;  %v11315_v17 = vmul.f32 100.0, %v11307_v12 }
 0x10e   : > { %v11320_v32 = vmul.f32 100.0, %v11309_v24  ;;  %v11326_v25 = vmul.f32 100.0, %v11317_v59 }
 0x10f   : > { %v1451_v33 = vmin.f32 %v11312_v58, 20.0  ;;  %v1452_v34 = vmin.f32 %v11315_v17, 20.0  ;;  %vm2283_vm3 = vcmp.gt.f32.partialorder %v11312_v58, 20.0  ;;  %vm2284_vm4 = vcmp.gt.f32.partialorder %v11315_v17, 20.0 }
 0x110   : > { %v1465_v39 = vmin.f32 %v11320_v32, 20.0  ;;  %v1466_v52 = vmin.f32 %v11326_v25, 20.0 }
 0x111   : > { %v1517_v45 = vmul.f32 1.442695, %v1451_v33  ;;  %v1519_v46 = vmul.f32 1.442695, %v1452_v34 }
 0x112   : > { %v10068_v48 = vpop.eup %10067  ;;  %v1545_v51 = vmul.f32 1.442695, %v1465_v39  ;;  %v742_v7 = vpop.f32.mrf.mxu2  ;;  %v1547_v31 = vmul.f32 1.442695, %v1466_v52 }
 0x113   : > { %v10070_v53 = vpop.eup %10069  ;;  %v1641_v54 = vadd.f32 1.0, %v10068_v48  ;;  %v1644_v47 = vmul.f32 -0.5, %v10068_v48  ;;  %v1647_v55 = vand.u32 2147483647, %v10068_v48  ;;  %10071 = vpow2.f32 %v1517_v45  ;;  %v781_v56 = vpop.f32.mrf.mxu3  ;;  %v491_v44 = vld [vmem:[#allocation2 + $0x38] sm:$0xff] }
 0x114   : > { %v1650_v9 = vadd.f32 1.0, %v10070_v53  ;;  %v1653_v10 = vmul.f32 -0.5, %v10070_v53  ;;  %v1656_v11 = vand.u32 2147483647, %v10070_v53  ;;  %10073 = vpow2.f32 %v1519_v46  ;;  %v667_v16 = vpop.f32.mrf.mxu0  ;;  %v706_v18 = vpop.f32.mrf.mxu1 }
 0x115   : > { %10075 = vlog2.f32 %v1641_v54  ;;  %v1645_v19 = vadd.f32 1.0, %v1644_v47  ;;  %8729 = vmatmul.msk.bf16.gmra.mxu0 %vm562_vm9, %v11108_v1  ;;  %8735 = vmatmul.msk.bf16.gmra.mxu1 %vm562_vm9, %v11108_v1  ;;  %v11339_v15 = vadd.f32 %v1275_v49, %v742_v7  ;;  %v11345_v20 = vadd.f32 %v1276_v60, %v781_v56 }
 0x116   : > { %10077 = vlog2.f32 %v1650_v9  ;;  %v1654_v14 = vadd.f32 1.0, %v1653_v10  ;;  %vm11351_vm10 = vcmp.lt.f32.partialorder %v1647_v55, 0.0004427343  ;;  %vm11356_vm14 = vcmp.lt.f32.partialorder %v1656_v11, 0.0004427343 }
 0x117   : > { %10079 = vpow2.f32 %v1545_v51  ;;  %8741 = vmatmul.msk.bf16.gmra.mxu2 %vm562_vm9, %v11108_v1  ;;  %8747 = vmatmul.msk.bf16.gmra.mxu3 %vm562_vm9, %v11108_v1  ;;  %v11361_v0 = vmul.f32 100.0, %v11339_v15  ;;  %v1646_v21 = vmul.f32 %v10068_v48, %v1645_v19  ;;  %v11364_v1 = vadd.f32 %v1289_v27, %v667_v16 }
 0x118   : > { %10081 = vpow2.f32 %v1547_v31  ;;  %v1655_v34 = vmul.f32 %v10070_v53, %v1654_v14  ;;  %v11366_v35 = vadd.f32 %v1290_v61, %v706_v18  ;;  %v11369_v50 = vmul.f32 100.0, %v11345_v20 }
 0x119   : > { %v10072_v26 = vpop.eup %10071  ;;  %v544_v52 = vunpack.c.l.b16 %v491_v44  ;;  %v545_v54 = vunpack.c.h.b16 %v491_v44  ;;  %v1467_v9 = vmin.f32 %v11361_v0, 20.0 }
 0x11a   : > { %v10074_v39 = vpop.eup %10073  ;;  %v1659_v45 = vadd.f32 1.0, %v10072_v26  ;;  %v1662_v46 = vmul.f32 -0.5, %v10072_v26  ;;  %v1665_v49 = vand.u32 2147483647, %v10072_v26  ;;  %v1468_v13 = vmin.f32 %v11369_v50, 20.0 }
 0x11b   : > { %v10076_v51 = vpop.eup %10075  ;;  %v1668_v47 = vadd.f32 1.0, %v10074_v39  ;;  %v1671_v48 = vmul.f32 -0.5, %v10074_v39  ;;  %v560_v56 = vpack.c.b16 %v544_v52, %v544_v52  ;;  %v561_v60 = vpack.c.b16 %v545_v54, %v545_v54 }
 0x11c   : > { %v10078_v53 = vpop.eup %10077  ;;  %v1643_v55 = vmul.f32 0.6931472, %v10076_v51  ;;  %10083 = vlog2.f32 %v1659_v45  ;;  %v1663_v7 = vadd.f32 1.0, %v1662_v46  ;;  %vm11376_vm1 = vcmp.lt.f32.partialorder %v1665_v49, 0.0004427343  ;;  %v11388_v49 = vpop.f32.mrf.mxu3 }
 0x11d   : > { %v10080_v10 = vpop.eup %10079  ;;  %v1652_v11 = vmul.f32 0.6931472, %v10078_v53  ;;  %10085 = vlog2.f32 %v1668_v47  ;;  %v1672_v18 = vadd.f32 1.0, %v1671_v48  ;;  %v628_v44 = vand.u32 %v11082_v37, %v560_v56 }
 0x11e   : > { %v11372_v19 = vpop.eup %10081  ;;  %v1649_v31 = vsel %vm11351_vm10, %v1646_v21, %v1643_v55  ;;  %v1664_v14 = vmul.f32 %v10072_v26, %v1663_v7  ;;  %v631_v45 = vand.u32 %v11082_v37, %v561_v60  ;;  %v1674_v33 = vand.u32 2147483647, %v10074_v39  ;;  %v11386_v21 = vpop.f32.mrf.mxu2 }
 0x11f   : > { %v2217_v27 = vmul.f32 0.01, %v1649_v31  ;;  %v1658_v61 = vsel %vm11356_vm14, %v1655_v34, %v1652_v11  ;;  %v1673_v51 = vmul.f32 %v10074_v39, %v1672_v18  ;;  %v1785_v26 = vadd.f32 1.0, %v10080_v10  ;;  %1186 = vmatpush.bf16.msrb.mxu2 %v628_v44  ;;  %v11398_v55 = vpop.f32.mrf.mxu0  ;;  %v11400_v7 = vpop.f32.mrf.mxu1  ;;  %v277_v31 = vld [vmem:[#allocation2 + $0x30] sm:$0x33] }
 0x120   : > { %v2218_v46 = vmul.f32 0.01, %v1658_v61  ;;  %1225 = vmatpush.bf16.msrb.mxu3 %v631_v45  ;;  %v1788_v34 = vmul.f32 -0.5, %v10080_v10  ;;  %v1791_v52 = vand.u32 2147483647, %v10080_v10  ;;  %v1794_v54 = vadd.f32 1.0, %v11372_v19 }
 0x121   : > { %v2345_v63 = vsel %vm2281_vm11, %v11276_v40, %v2217_v27  ;;  %10087 = vlog2.f32 %v1785_v26  ;;  %v1797_v53 = vmul.f32 -0.5, %v11372_v19  ;;  %vm11402_vm5 = vcmp.lt.f32.partialorder %v1674_v33, 0.0004427343  ;;  %v323_v61 = vld.sshfl [vmem:[#allocation1 + $0x28] sm:$0xff pattern:$0x75316420] }
 0x122   : > { %v10084_v47 = vpop.eup %10083  ;;  %v2485_v48 = vmul.f32 %v2345_v63, %v2345_v63  ;;  %v2346_v39 = vsel %vm2282_vm15, %v11278_v41, %v2218_v46  ;;  %v1789_v60 = vadd.f32 1.0, %v1788_v34  ;;  %10089 = vlog2.f32 %v1794_v54 }
 0x123   : > { %v10086_v40 = vpop.eup %10085  ;;  %v2421_v42 = vpack.c.bf16 %v2346_v39, %v2345_v63  ;;  %v2486_v11 = vmul.f32 %v2346_v39, %v2346_v39  ;;  %v1661_v56 = vmul.f32 0.6931472, %v10084_v47  ;;  %v1798_v41 = vadd.f32 1.0, %v1797_v53  ;;  %v478_v47 = vld [vmem:[#allocation2 + $0x30] sm:$0x88] }
 0x124   : > { %v1670_v18 = vmul.f32 0.6931472, %v10086_v40  ;;  %vm11408_vm7 = vcmp.lt.f32.partialorder %v1791_v52, 0.0004427343  ;;  %v1800_v26 = vand.u32 2147483647, %v11372_v19  ;;  %v1790_v34 = vmul.f32 %v10080_v10, %v1789_v60 }
 0x125   : > { %v2549_v44 = vpack.c.bf16 %v2486_v11, %v2485_v48  ;;  %2453 = vst [vmem:[#allocation2] sm:$0xff] %v2421_v42  ;;  %v1667_v45 = vsel %vm11376_vm1, %v1664_v14, %v1661_v56  ;;  %8730 = vmatmul.msk.bf16.gmra.mxu0 %vm562_vm9, %v11121_v2  ;;  %v1549_v54 = vmul.f32 1.442695, %v1467_v9  ;;  %8736 = vmatmul.msk.bf16.gmra.mxu1 %vm562_vm9, %v11121_v2  ;;  %v11424_v48 = vmul.f32 100.0, %v11364_v1  ;;  %v11445_v56 = vpop.f32.mrf.mxu3 }
 0x126   : > { %v2219_v33 = vmul.f32 0.01, %v1667_v45  ;;  %v1676_v63 = vsel %vm11402_vm5, %v1673_v51, %v1670_v18  ;;  %v1799_v16 = vmul.f32 %v11372_v19, %v1798_v41  ;;  %v278_v52 = vsel %vm11033_vm13, %v11043_v28, %v277_v31  ;;  %v11443_v11 = vpop.f32.mrf.mxu2 }
 0x127   : > { %2581 = vst [vmem:[#allocation2 + $0x100] sm:$0xff] %v2549_v44  ;;  %v2220_v14 = vmul.f32 0.01, %v1676_v63  ;;  %8742 = vmatmul.msk.bf16.gmra.mxu2 %vm562_vm9, %v11121_v2  ;;  %8748 = vmatmul.msk.bf16.gmra.mxu3 %vm562_vm9, %v11121_v2  ;;  %v10088_v9 = vpop.eup %10087  ;;  %vm11433_vm10 = vcmp.lt.f32.partialorder %v1800_v26, 0.0004427343  ;;  %10091 = vpow2.f32 %v1549_v54  ;;  %v348_v2 = vpack.c.bf16 %v323_v61, %v322_v43  ;;  %v11450_v43 = vpop.f32.mrf.mxu0 }
 0x128   : > { %v2347_v10 = vsel %vm2283_vm3, %v11305_v57, %v2219_v33  ;;  %279 = vst [vmem:[#allocation2 + $0x30] sm:$0x33] %v278_v52  ;;  %v1787_v39 = vmul.f32 0.6931472, %v10088_v9  ;;  %v10090_v53 = vpop.eup %10089  ;;  %v1551_v58 = vmul.f32 1.442695, %v1468_v13  ;;  %v11452_v8 = vpop.f32.mrf.mxu1 }
 0x129   : > { %v2487_v28 = vmul.f32 %v2347_v10, %v2347_v10  ;;  %v2348_v51 = vsel %vm2284_vm4, %v11307_v12, %v2220_v14  ;;  %v479_v57 = vsel %vm11020_vm12, 1065369472, %v478_v47  ;;  %v1796_v31 = vmul.f32 0.6931472, %v10090_v53 }
 0x12a   : > { %v2422_v40 = vpack.c.bf16 %v2348_v51, %v2347_v10  ;;  %v2488_v42 = vmul.f32 %v2348_v51, %v2348_v51  ;;  %v1793_v60 = vsel %vm11408_vm7, %v1790_v34, %v1787_v39  ;;  %v399_v18 = vshrl.u32 %v348_v2, 16  ;;  %480 = vst [vmem:[#allocation2 + $0x30] sm:$0x88] %v479_v57 }
 0x12b   : > { %v402_v17 = vshll.u32 %v348_v2, 16  ;;  %v2233_v27 = vmul.f32 0.01, %v1793_v60  ;;  %10093 = vpow2.f32 %v1551_v58  ;;  %v1481_v41 = vmin.f32 %v11424_v48, 20.0 }
 0x12c   : > { %v2550_v12 = vpack.c.bf16 %v2488_v42, %v2487_v28  ;;  %2454 = vst [vmem:[#allocation2 + $0x8] sm:$0xff] %v2422_v40  ;;  %vm2297_vm12 = vcmp.gt.f32.partialorder %v11320_v32, 20.0  ;;  %v1802_v61 = vsel %vm11433_vm10, %v1799_v16, %v1796_v31  ;;  %v401_v44 = vrot.slane %v399_v18, 6 }
 0x12d   : > { %v404_v45 = vrot.slane %v402_v17, 7  ;;  %v10092_v46 = vpop.eup %10091  ;;  %v2361_v26 = vsel %vm2297_vm12, %v11309_v24, %v2233_v27  ;;  %v2234_v33 = vmul.f32 0.01, %v1802_v61  ;;  %v1577_v63 = vmul.f32 1.442695, %v1481_v41  ;;  %v11472_v2 = vpop.f32.mrf.mxu3 }
 0x12e   : > { %2582 = vst [vmem:[#allocation2 + $0x108] sm:$0xff] %v2550_v12  ;;  %v11459_v34 = vmul.f32 100.0, %v11366_v35  ;;  %v2501_v54 = vmul.f32 %v2361_v26, %v2361_v26  ;;  %vm2298_vm13 = vcmp.gt.f32.partialorder %v11326_v25, 20.0  ;;  %v1803_v14 = vadd.f32 1.0, %v10092_v46 }
 0x12f   : > { %v1806_v52 = vmul.f32 -0.5, %v10092_v46  ;;  %v447_v32 = vld [vmem:[#allocation2 + $0x30] sm:$0x66]  ;;  %v2362_v47 = vsel %vm2298_vm13, %v11317_v59, %v2234_v33  ;;  %v405_v16 = vor.u32 %v404_v45, %v401_v44  ;;  %10095 = vpow2.f32 %v1577_v63  ;;  %v11470_v59 = vpop.f32.mrf.mxu2  ;;  %v11480_v62 = vpop.f32.mrf.mxu0 }
 0x130   : > { %v1482_v9 = vmin.f32 %v11459_v34, 20.0  ;;  %v1291_v24 = vmul.f32 %v11264_v22, %v11236_v5  ;;  %v2429_v10 = vpack.c.bf16 %v2362_v47, %v2361_v26  ;;  %v2502_v19 = vmul.f32 %v2362_v47, %v2362_v47 }
 0x131   : > { %10097 = vlog2.f32 %v1803_v14  ;;  %v10094_v13 = vpop.eup %10093  ;;  %v1292_v28 = vmul.f32 %v11266_v23, %v11238_v6  ;;  %v1809_v25 = vand.u32 2147483647, %v10092_v46  ;;  %v448_v51 = vsel %vm11067_vm6, %v405_v16, %v447_v32  ;;  %v11482_v23 = vpop.f32.mrf.mxu1 }
 0x132   : > { %v1579_v39 = vmul.f32 1.442695, %v1482_v9  ;;  %2461 = vst [vmem:[#allocation2 + $0x40] sm:$0xff] %v2429_v10  ;;  %v2557_v53 = vpack.c.bf16 %v2502_v19, %v2501_v54  ;;  %v1807_v40 = vadd.f32 1.0, %v1806_v52  ;;  %v1812_v5 = vadd.f32 1.0, %v10094_v13 }
 0x133   : > { %v1815_v22 = vmul.f32 -0.5, %v10094_v13  ;;  %449 = vst [vmem:[#allocation2 + $0x30] sm:$0x66] %v448_v51  ;;  %v11475_v42 = vadd.f32 %v1291_v24, %v11386_v21  ;;  %v11478_v6 = vadd.f32 %v1292_v28, %v11388_v49  ;;  %vm2299_vm6 = vcmp.gt.f32.partialorder %v11361_v0, 20.0 }
 0x134   : > { %10099 = vpow2.f32 %v1579_v39  ;;  %2589 = vst [vmem:[#allocation2 + $0x140] sm:$0xff] %v2557_v53  ;;  %v1818_v58 = vand.u32 2147483647, %v10094_v13  ;;  %vm11487_vm11 = vcmp.lt.f32.partialorder %v1809_v25, 0.0004427343  ;;  %v11499_v31 = vadd.f32 %v11268_v29, %v11398_v55 }
 0x135   : > { %10101 = vlog2.f32 %v1812_v5  ;;  %8731 = vmatmul.msk.bf16.gmra.mxu0 %vm562_vm9, %v11134_v3  ;;  %v10096_v57 = vpop.eup %10095  ;;  %v11492_v21 = vmul.f32 100.0, %v11475_v42  ;;  %v11495_v49 = vmul.f32 100.0, %v11478_v6  ;;  %8737 = vmatmul.msk.bf16.gmra.mxu1 %vm562_vm9, %v11134_v3  ;;  %v1808_v17 = vmul.f32 %v10092_v46, %v1807_v40 }
 0x136   : > { %v1816_v12 = vadd.f32 1.0, %v1815_v22  ;;  %v1929_v27 = vadd.f32 1.0, %v10096_v57  ;;  %v1932_v41 = vmul.f32 -0.5, %v10096_v57  ;;  %vm2300_vm14 = vcmp.gt.f32.partialorder %v11369_v50, 20.0 }
 0x137   : > { %v10098_v18 = vpop.eup %10097  ;;  %8743 = vmatmul.msk.bf16.gmra.mxu2 %vm562_vm9, %v11134_v3  ;;  %8749 = vmatmul.msk.bf16.gmra.mxu3 %vm562_vm9, %v11134_v3  ;;  %v1483_v29 = vmin.f32 %v11492_v21, 20.0  ;;  %v1484_v55 = vmin.f32 %v11495_v49, 20.0  ;;  %v11512_v44 = vadd.f32 %v11270_v30, %v11400_v7  ;;  %vm11514_vm15 = vcmp.lt.f32.partialorder %v1818_v58, 0.0004427343  ;;  %v11527_v30 = vpop.f32.mrf.mxu2 }
 0x138   : > { %v1805_v61 = vmul.f32 0.6931472, %v10098_v18  ;;  %10103 = vlog2.f32 %v1929_v27  ;;  %v1935_v46 = vand.u32 2147483647, %v10096_v57  ;;  %v11520_v3 = vadd.f32 %v11272_v36, %v11443_v11  ;;  %v11529_v7 = vpop.f32.mrf.mxu3  ;;  %v11531_v28 = vpop.f32.mrf.mxu0 }
 0x139   : > { %v1933_v63 = vadd.f32 1.0, %v1932_v41  ;;  %v1581_v54 = vmul.f32 1.442695, %v1483_v29  ;;  %v11525_v14 = vmul.f32 100.0, %v11499_v31  ;;  %v1817_v47 = vmul.f32 %v10094_v13, %v1816_v12  ;;  %v11533_v25 = vpop.f32.mrf.mxu1 }
 0x13a   : > { %v10100_v26 = vpop.eup %10099  ;;  %v1811_v33 = vsel %vm11487_vm11, %v1808_v17, %v1805_v61  ;;  %v490_v16 = vld [vmem:[#allocation2 + $0x30] sm:$0xff]  ;;  %v1583_v19 = vmul.f32 1.442695, %v1484_v55  ;;  %vm11538_vm1 = vcmp.lt.f32.partialorder %v1935_v46, 0.0004427343  ;;  %v11551_v29 = vmul.f32 100.0, %v11512_v44 }
 0x13b   : > { %v10102_v52 = vpop.eup %10101  ;;  %v2235_v32 = vmul.f32 0.01, %v1811_v33  ;;  %v1938_v9 = vadd.f32 1.0, %v10100_v26  ;;  %v1941_v36 = vmul.f32 -0.5, %v10100_v26  ;;  %v542_v24 = vunpack.c.l.b16 %v490_v16 }
 0x13c   : > { %v1814_v11 = vmul.f32 0.6931472, %v10102_v52  ;;  %v543_v10 = vunpack.c.h.b16 %v490_v16  ;;  %v1497_v13 = vmin.f32 %v11525_v14, 20.0  ;;  %v1934_v22 = vmul.f32 %v10096_v57, %v1933_v63 }
 0x13d   : > { %v2363_v51 = vsel %vm2299_vm6, %v11339_v15, %v2235_v32  ;;  %10105 = vlog2.f32 %v1938_v9  ;;  %v558_v40 = vpack.c.b16 %v542_v24, %v542_v24  ;;  %v1942_v17 = vadd.f32 1.0, %v1941_v36 }
 0x13e   : > { %v1820_v53 = vsel %vm11514_vm15, %v1817_v47, %v1814_v11  ;;  %v559_v5 = vpack.c.b16 %v543_v10, %v543_v10  ;;  %v10104_v58 = vpop.eup %10103  ;;  %v2503_v60 = vmul.f32 %v2363_v51, %v2363_v51  ;;  %10107 = vpow2.f32 %v1581_v54 }
 0x13f   : > { %v2236_v18 = vmul.f32 0.01, %v1820_v53  ;;  %v622_v15 = vand.u32 %v11082_v37, %v558_v40  ;;  %v1931_v12 = vmul.f32 0.6931472, %v10104_v58  ;;  %10109 = vpow2.f32 %v1583_v19  ;;  %v11558_v46 = vpop.f32.mrf.mxu2 }
 0x140   : > { %v625_v0 = vand.u32 %v11082_v37, %v559_v5  ;;  %v1944_v41 = vand.u32 2147483647, %v10100_v26  ;;  %v1609_v61 = vmul.f32 1.442695, %v1497_v13  ;;  %v11556_v37 = vmul.f32 100.0, %v11520_v3  ;;  %v11560_v33 = vpop.f32.mrf.mxu3  ;;  %v11564_v47 = vpop.f32.mrf.mxu0 }
 0x141   : > { %v2364_v27 = vsel %vm2300_vm14, %v11345_v20, %v2236_v18  ;;  %1108 = vmatpush.bf16.msrb.mxu0 %v622_v15  ;;  %v1937_v45 = vsel %vm11538_vm1, %v1934_v22, %v1931_v12  ;;  %vm2313_vm3 = vcmp.gt.f32.partialorder %v11424_v48, 20.0  ;;  %v1943_v52 = vmul.f32 %v10100_v26, %v1942_v17  ;;  %v11566_v16 = vpop.f32.mrf.mxu1 }
 0x142   : > { %v2430_v57 = vpack.c.bf16 %v2364_v27, %v2363_v51  ;;  %v2504_v55 = vmul.f32 %v2364_v27, %v2364_v27  ;;  %1147 = vmatpush.bf16.msrb.mxu1 %v625_v0  ;;  %v2249_v50 = vmul.f32 0.01, %v1937_v45  ;;  %10111 = vpow2.f32 %v1609_v61 }
 0x143   : > { %v10106_v20 = vpop.eup %10105  ;;  %v1498_v32 = vmin.f32 %v11551_v29, 20.0  ;;  %vm1945_vm4 = vcmp.lt.f32.partialorder %v1944_v41, 0.0004427343  ;;  %vm2314_vm5 = vcmp.gt.f32.partialorder %v11459_v34, 20.0  ;;  %v1499_v26 = vmin.f32 %v11556_v37, 20.0 }
 0x144   : > { %2462 = vst [vmem:[#allocation2 + $0x48] sm:$0xff] %v2430_v57  ;;  %v2558_v63 = vpack.c.bf16 %v2504_v55, %v2503_v60  ;;  %v1940_v54 = vmul.f32 0.6931472, %v10106_v20  ;;  %v10108_v9 = vpop.eup %10107  ;;  %v2377_v36 = vsel %vm2313_vm3, %v11364_v1, %v2249_v50  ;;  %v11581_v34 = vadd.f32 %v11274_v38, %v11445_v56  ;;  %v2620_v20 = vld [vmem:[#allocation2 + $0x200] sm:$0x11] }
 0x145   : > { %8732 = vmatmul.msk.bf16.gmra.mxu0 %vm562_vm9, %v11147_v4  ;;  %v10110_v11 = vpop.eup %10109  ;;  %v1947_v24 = vadd.f32 1.0, %v10108_v9  ;;  %8738 = vmatmul.msk.bf16.gmra.mxu1 %vm562_vm9, %v11147_v4  ;;  %v1950_v19 = vmul.f32 -0.5, %v10108_v9  ;;  %v2517_v1 = vmul.f32 %v2377_v36, %v2377_v36  ;;  %v1611_v13 = vmul.f32 1.442695, %v1498_v32 }
 0x146   : > { %2590 = vst [vmem:[#allocation2 + $0x148] sm:$0xff] %v2558_v63  ;;  %v1946_v48 = vsel %vm1945_vm4, %v1943_v52, %v1940_v54  ;;  %v1956_v51 = vadd.f32 1.0, %v10110_v11  ;;  %v1959_v39 = vmul.f32 -0.5, %v10110_v11  ;;  %vm2613_vm7 = vcmask 1040384  }
 0x147   : > { %v2250_v10 = vmul.f32 0.01, %v1946_v48  ;;  %8744 = vmatmul.msk.bf16.gmra.mxu2 %vm562_vm9, %v11147_v4  ;;  %8750 = vmatmul.msk.bf16.gmra.mxu3 %vm562_vm9, %v11147_v4  ;;  %10113 = vlog2.f32 %v1947_v24  ;;  %v1953_v58 = vand.u32 2147483647, %v10108_v9  ;;  %v1613_v60 = vmul.f32 1.442695, %v1499_v26  ;;  %v11586_v18 = vpop.f32.mrf.mxu2 }
 0x148   : > { %v11583_v53 = vpop.eup %10111  ;;  %10115 = vlog2.f32 %v1956_v51  ;;  %v11588_v4 = vpop.f32.mrf.mxu3  ;;  %v1951_v17 = vadd.f32 1.0, %v1950_v19  ;;  %v1960_v15 = vadd.f32 1.0, %v1959_v39  ;;  %vm2614_vm10 = vsmask.f32 256 }
 0x149   : > { %v2378_v40 = vsel %vm2314_vm5, %v11366_v35, %v2250_v10  ;;  %v2073_v0 = vadd.f32 1.0, %v11583_v53  ;;  %v2076_v38 = vmul.f32 -0.5, %v11583_v53  ;;  %10117 = vpow2.f32 %v1611_v13  ;;  %v11595_v12 = vpop.f32.mrf.mxu0  ;;  %v11597_v27 = vpop.f32.mrf.mxu1  ;;  %vm11605_vm13 = vmand %vm2613_vm7, %vm2614_vm10 }
 0x14a   : > { %v2437_v5 = vpack.c.bf16 %v2378_v40, %v2377_v36  ;;  %v2518_v22 = vmul.f32 %v2378_v40, %v2378_v40  ;;  %v11593_v35 = vmul.f32 100.0, %v11581_v34  ;;  %v1962_v41 = vand.u32 2147483647, %v10110_v11 }
 0x14b   : > { %10119 = vlog2.f32 %v2073_v0  ;;  %vm11599_vm12 = vcmp.lt.f32.partialorder %v1953_v58, 0.0004427343  ;;  %v1952_v54 = vmul.f32 %v10108_v9, %v1951_v17  ;;  %vm2616_vm6 = vcmask 1044484  }
 0x14c   : > { %2469 = vst [vmem:[#allocation2 + $0x80] sm:$0xff] %v2437_v5  ;;  %v2565_v56 = vpack.c.bf16 %v2518_v22, %v2517_v1  ;;  %10121 = vpow2.f32 %v1613_v60  ;;  %v1500_v55 = vmin.f32 %v11593_v35, 20.0  ;;  %vm2617_vm11 = vsmask.f32 4352 }
 0x14d   : > { %v10114_v61 = vpop.eup %10113  ;;  %v1961_v32 = vmul.f32 %v10110_v11, %v1960_v15  ;;  %v2077_v36 = vadd.f32 1.0, %v2076_v38  ;;  %vm2618_vm14 = vmand %vm2616_vm6, %vm2617_vm11  ;;  %vm1963_vm15 = vcmp.lt.f32.partialorder %v1962_v41, 0.0004427343  ;;  %v2079_v26 = vand.u32 2147483647, %v11583_v53 }
 0x14e   : > { %2597 = vst [vmem:[#allocation2 + $0x180] sm:$0xff] %v2565_v56  ;;  %v10116_v50 = vpop.eup %10115  ;;  %v1949_v63 = vmul.f32 0.6931472, %v10114_v61  ;;  %v1615_v48 = vmul.f32 1.442695, %v1500_v55  ;;  %vm11615_vm1 = vmor %vm2618_vm14, %vm11605_vm13  ;;  %vm2315_vm3 = vcmp.gt.f32.partialorder %v11492_v21, 20.0 }
 0x14f   : > { %v1958_v52 = vmul.f32 0.6931472, %v10116_v50  ;;  %v11619_v9 = vpop.eup %10117  ;;  %v2621_v51 = vsel %vm11615_vm1, 1065369472, %v2620_v20  ;;  %v11623_v39 = vpop.f32.mrf.mxu2  ;;  %vm2316_vm4 = vcmp.gt.f32.partialorder %v11495_v49, 20.0  ;;  %v2078_v15 = vmul.f32 %v11583_v53, %v2077_v36 }
 0x150   : > { %v1955_v24 = vsel %vm11599_vm12, %v1952_v54, %v1949_v63  ;;  %10123 = vpow2.f32 %v1615_v48  ;;  %v11625_v1 = vpop.f32.mrf.mxu3  ;;  %v2082_v5 = vadd.f32 1.0, %v11619_v9  ;;  %v2085_v22 = vmul.f32 -0.5, %v11619_v9  ;;  %2622 = vst [vmem:[#allocation2 + $0x200] sm:$0x11] %v2621_v51  ;;  %v2623_v41 = vld [vmem:[#allocation2 + $0x208] sm:$0x11] }
 0x151   : > { %v2251_v19 = vmul.f32 0.01, %v1955_v24  ;;  %v1964_v11 = vsel %vm1963_vm15, %v1961_v32, %v1958_v52  ;;  %v10120_v13 = vpop.eup %10119  ;;  %v11635_v0 = vpop.f32.mrf.mxu0  ;;  %vm2080_vm5 = vcmp.lt.f32.partialorder %v2079_v26, 0.0004427343  ;;  %v2624_v63 = vsel %vm11615_vm1, 1065369472, %v2623_v41 }
 0x152   : > { %v2252_v40 = vmul.f32 0.01, %v1964_v11  ;;  %v11630_v58 = vpop.eup %10121  ;;  %v2075_v17 = vmul.f32 0.6931472, %v10120_v13  ;;  %v11637_v38 = vpop.f32.mrf.mxu1  ;;  %10125 = vlog2.f32 %v2082_v5  ;;  %v2086_v55 = vadd.f32 1.0, %v2085_v22 }
 0x153   : > { %v2379_v60 = vsel %vm2315_vm3, %v11475_v42, %v2251_v19  ;;  %v10835_v42 = vld [vmem:[%s16313_s1 + $0x28] sm:$0xff]  ;;  %v2091_v45 = vadd.f32 1.0, %v11630_v58  ;;  %v2094_v50 = vmul.f32 -0.5, %v11630_v58  ;;  %v2088_v54 = vand.u32 2147483647, %v11619_v9 }
 0x154   : > { %v2519_v21 = vmul.f32 %v2379_v60, %v2379_v60  ;;  %v2380_v56 = vsel %vm2316_vm4, %v11478_v6, %v2252_v40  ;;  %v2081_v53 = vsel %vm2080_vm5, %v2078_v15, %v2075_v17  ;;  %2625 = vst [vmem:[#allocation2 + $0x208] sm:$0x11] %v2624_v63  ;;  %vm2329_vm10 = vcmp.gt.f32.partialorder %v11525_v14, 20.0 }
 0x155   : > { %8733 = vmatmul.msk.bf16.gmra.mxu0 %vm562_vm9, %v10835_v42  ;;  %v2438_v49 = vpack.c.bf16 %v2380_v56, %v2379_v60  ;;  %v2520_v61 = vmul.f32 %v2380_v56, %v2380_v56  ;;  %8739 = vmatmul.msk.bf16.gmra.mxu1 %vm562_vm9, %v10835_v42  ;;  %v2265_v57 = vmul.f32 0.01, %v2081_v53  ;;  %10127 = vlog2.f32 %v2091_v45  ;;  %v10836_v53 = vld [vmem:[%s16313_s1] sm:$0xff] }
 0x156   : > { %v10124_v6 = vpop.eup %10123  ;;  %v2087_v19 = vmul.f32 %v11619_v9, %v2086_v55  ;;  %v2097_v11 = vand.u32 2147483647, %v11630_v58  ;;  %v2095_v5 = vadd.f32 1.0, %v2094_v50  ;;  %vm2089_vm12 = vcmp.lt.f32.partialorder %v2088_v54, 0.0004427343 }
 0x157   : > { %8745 = vmatmul.msk.bf16.gmra.mxu2 %vm562_vm9, %v10835_v42  ;;  %8751 = vmatmul.msk.bf16.gmra.mxu3 %vm562_vm9, %v10835_v42  ;;  %2470 = vst [vmem:[#allocation2 + $0x88] sm:$0xff] %v2438_v49  ;;  %v2566_v20 = vpack.c.bf16 %v2520_v61, %v2519_v21  ;;  %v2100_v52 = vadd.f32 1.0, %v10124_v6  ;;  %v2103_v32 = vmul.f32 -0.5, %v10124_v6  ;;  %v11653_v36 = vpop.f32.mrf.mxu2  ;;  %v2393_v26 = vsel %vm2329_vm10, %v11499_v31, %v2265_v57  ;;  %v2708_v51 = vld [vmem:[#allocation2 + $0x200] sm:$0x11] }
 0x158   : > { %v11655_v48 = vpop.f32.mrf.mxu3  ;;  %v10126_v24 = vpop.eup %10125  ;;  %v5157_v13 = vld [vmem:[#allocation2 + $0x200] sm:$0x11]  ;;  %v2946_v60 = vunpack.c.l.b16 %v2708_v51  ;;  %v10930_v15 = vmov 0   ;;  %v2947_v9 = vunpack.c.h.b16 %v2708_v51  ;;  %v2533_v56 = vmul.f32 %v2393_v26, %v2393_v26 }
 0x159   : > { %2598 = vst [vmem:[#allocation2 + $0x188] sm:$0xff] %v2566_v20  ;;  %10129 = vlog2.f32 %v2100_v52  ;;  %v2084_v40 = vmul.f32 0.6931472, %v10126_v24  ;;  %v2104_v22 = vadd.f32 1.0, %v2103_v32  ;;  %v11660_v14 = vpop.f32.mrf.mxu0  ;;  %v11665_v21 = vsel %vm2613_vm7, 65535, %v10930_v15 }
 0x15a   : > { %v11662_v17 = vpop.f32.mrf.mxu1  ;;  %v5158_v31 = vsel %vm11615_vm1, 1065369472, %v5157_v13  ;;  %vm2330_vm13 = vcmp.gt.f32.partialorder %v11551_v29, 20.0  ;;  %v3026_v42 = vpack.c.b16 %v2946_v60, %v2946_v60  ;;  %vm11670_vm11 = vcmp.lt.f32.partialorder %v2097_v11, 0.0004427343 }
 0x15b   : > { %v2090_v41 = vsel %vm2089_vm12, %v2087_v19, %v2084_v40  ;;  %5159 = vst [vmem:[#allocation2 + $0x200] sm:$0x11] %v5158_v31  ;;  %v10128_v49 = vpop.eup %10127  ;;  %v2106_v57 = vand.u32 2147483647, %v10124_v6  ;;  %v3027_v55 = vpack.c.b16 %v2947_v9, %v2947_v9  ;;  %v2096_v20 = vmul.f32 %v11630_v58, %v2095_v5  ;;  %v2709_v54 = vld [vmem:[#allocation2 + $0x208] sm:$0x11] }
 0x15c   : > { %v2266_v61 = vmul.f32 0.01, %v2090_v41  ;;  %v2093_v45 = vmul.f32 0.6931472, %v10128_v49  ;;  %v2105_v50 = vmul.f32 %v10124_v6, %v2104_v22  ;;  %v3129_v63 = vand.u32 %v11665_v21, %v3026_v42  ;;  %v5160_v52 = vld [vmem:[#allocation2 + $0x208] sm:$0x11] }
 0x15d   : > { %v3132_v24 = vand.u32 %v11665_v21, %v3027_v55  ;;  %v2948_v19 = vunpack.c.l.b16 %v2709_v54  ;;  %v5161_v11 = vsel %vm11615_vm1, 1065369472, %v5160_v52  ;;  %vm2107_vm14 = vcmp.lt.f32.partialorder %v2106_v57, 0.0004427343  ;;  %v8994_v52 = vld [vmem:[#allocation2 + $0x180] sm:$0xf] }
 0x15e   : > { %v2394_v29 = vsel %vm2330_vm13, %v11512_v44, %v2266_v61  ;;  %v2099_v40 = vsel %vm11670_vm11, %v2096_v20, %v2093_v45  ;;  %3179 = vmatpush.bf16.msra.mxu0 %v3129_v63  ;;  %5162 = vst [vmem:[#allocation2 + $0x208] sm:$0x11] %v5161_v11  ;;  %v2949_v60 = vunpack.c.h.b16 %v2709_v54  ;;  %vm2331_vm15 = vcmp.gt.f32.partialorder %v11556_v37, 20.0 }
 0x15f   : > { %v10130_v32 = vpop.eup %10129  ;;  %v2445_v51 = vpack.c.bf16 %v2394_v29, %v2393_v26  ;;  %v2534_v13 = vmul.f32 %v2394_v29, %v2394_v29  ;;  %v11682_v6 = vpop.f32.mrf.mxu2  ;;  %v2267_v22 = vmul.f32 0.01, %v2099_v40  ;;  %3218 = vmatpush.bf16.msra.mxu1 %v3132_v24  ;;  %v3028_v44 = vpack.c.b16 %v2948_v19, %v2948_v19  ;;  %v9876_v19 = vld [vmem:[#allocation2 + $0x184] sm:$0xf]  ;;  %v8930_v40 = vld [vmem:[#allocation2 + $0x100] sm:$0xf] }
 0x160   : > { %v2102_v58 = vmul.f32 0.6931472, %v10130_v32  ;;  %v11684_v5 = vpop.f32.mrf.mxu3  ;;  %v3029_v61 = vpack.c.b16 %v2949_v60, %v2949_v60  ;;  %vm2332_vm3 = vcmp.gt.f32.partialorder %v11593_v35, 20.0  ;;  %v1261_v35 = vmul.f32 %v11595_v12, %v11450_v43  ;;  %v9002_v60 = vld [vmem:[#allocation2 + $0x188] sm:$0xf] }
 0x161   : > { %2477 = vst [vmem:[#allocation2 + $0xc0] sm:$0xff] %v2445_v51  ;;  %v2573_v15 = vpack.c.bf16 %v2534_v13, %v2533_v56  ;;  %v11687_v31 = vpop.f32.mrf.mxu0  ;;  %v2395_v41 = vsel %vm2331_vm15, %v11520_v3, %v2267_v22  ;;  %v3135_v49 = vand.u32 %v11665_v21, %v3028_v44  ;;  %v1263_v22 = vmul.f32 %v11623_v39, %v11470_v59 }
 0x162   : > { %v2108_v26 = vsel %vm2107_vm14, %v2105_v50, %v2102_v58  ;;  %v11689_v9 = vpop.f32.mrf.mxu1  ;;  %v2535_v56 = vmul.f32 %v2395_v41, %v2395_v41  ;;  %v3138_v3 = vand.u32 %v11665_v21, %v3029_v61  ;;  %v9860_v58 = vld [vmem:[#allocation2 + $0x104] sm:$0xf]  ;;  %v1264_v44 = vmul.f32 %v11625_v1, %v11472_v2  ;;  %v9869_v1 = vld [vmem:[#allocation2 + $0x144] sm:$0xf0] }
 0x163   : > { %v2268_v42 = vmul.f32 0.01, %v2108_v26  ;;  %2605 = vst [vmem:[#allocation2 + $0x1c0] sm:$0xff] %v2573_v15  ;;  %3257 = vmatpush.bf16.msra.mxu2 %v3135_v49  ;;  %v9877_v15 = vld [vmem:[#allocation2 + $0x18c] sm:$0xf] }
 0x164   : > { %3296 = vmatpush.bf16.msra.mxu3 %v3138_v3 }
 0x165   : > { %8752 = vmatmul.msk.bf16.vlgmr.msrb.gmra.mxu0 %vm562_vm9, %v10836_v53  ;;  %8758 = vmatmul.msk.bf16.vlgmr.msrb.gmra.mxu1 %vm562_vm9, %v10836_v53  ;;  %v2396_v37 = vsel %vm2332_vm3, %v11581_v34, %v2268_v42  ;;  %v1262_v34 = vmul.f32 %v11597_v27, %v11452_v8  ;;  %v9868_v8 = vld [vmem:[#allocation2 + $0x13c] sm:$0xf0]  ;;  %v8932_v27 = vld [vmem:[#allocation2 + $0x140] sm:$0xf0] }
 0x166   : > { %v2446_v57 = vpack.c.bf16 %v2396_v37, %v2395_v41  ;;  %v2536_v55 = vmul.f32 %v2396_v37, %v2396_v37  ;;  %v8931_v41 = vor.u32 %v9868_v8, %v8930_v40  ;;  %v8935_v42 = vor.u32 %v9860_v58, %v8932_v27  ;;  %v8802_v27 = vld [vmem:[#allocation2] sm:$0xf]  ;;  %v8804_v58 = vld [vmem:[#allocation2 + $0x40] sm:$0xf0] }
 0x167   : > { %8770 = vmatmul.msk.bf16.vlgmr.msrb.gmra.mxu3 %vm562_vm9, %v10836_v53  ;;  %8764 = vmatmul.msk.bf16.vlgmr.msrb.gmra.mxu2 %vm562_vm9, %v10836_v53  ;;  %v893_v20 = vpop.f32.mrf.mxu2  ;;  %v9836_v40 = vld [vmem:[#allocation2 + $0x3c] sm:$0xf0] }
 0x168   : > { %2478 = vst [vmem:[#allocation2 + $0xc8] sm:$0xff] %v2446_v57  ;;  %v2574_v45 = vpack.c.bf16 %v2536_v55, %v2535_v56  ;;  %v932_v50 = vpop.f32.mrf.mxu3  ;;  %v11708_v63 = vmul.f32 %v893_v20, %v11586_v18  ;;  %v9852_v49 = vld [vmem:[#allocation2 + $0xbc] sm:$0xf0]  ;;  %v8868_v61 = vld [vmem:[#allocation2 + $0xc0] sm:$0xf0] }
 0x169   : > { %v11711_v54 = vmul.f32 %v932_v50, %v11588_v4  ;;  %v818_v32 = vpop.f32.mrf.mxu0  ;;  %v8940_v20 = vld [vmem:[#allocation2 + $0x148] sm:$0xf0] }
 0x16a   : > { %2606 = vst [vmem:[#allocation2 + $0x1c8] sm:$0xff] %v2574_v45  ;;  %v857_v29 = vpop.f32.mrf.mxu1  ;;  %v9884_v24 = vld [vmem:[#allocation2 + $0x1bc] sm:$0xf0]  ;;  %v8996_v11 = vld [vmem:[#allocation2 + $0x1c0] sm:$0xf0]  ;;  %v11713_v51 = vadd.f32 %v1261_v35, %v818_v32  ;;  %v1277_v35 = vmul.f32 %v11635_v0, %v11480_v62 }
 0x16b   : > { %v11715_v13 = vadd.f32 %v1262_v34, %v857_v29  ;;  %v8995_v43 = vor.u32 %v9884_v24, %v8994_v52  ;;  %v8999_v12 = vor.u32 %v9876_v19, %v8996_v11  ;;  %v8866_v34 = vld [vmem:[#allocation2 + $0x80] sm:$0xf]  ;;  %v9844_v52 = vld [vmem:[#allocation2 + $0x84] sm:$0xf]  ;;  %v1278_v19 = vmul.f32 %v11637_v38, %v11482_v23  ;;  %v8938_v11 = vld [vmem:[#allocation2 + $0x108] sm:$0xf] }
 0x16c   : > { %v11718_v18 = vmul.f32 100.0, %v11713_v51  ;;  %v10837_v24 = vld [vmem:[%s16313_s1 + $0x8] sm:$0xff]  ;;  %v8867_v62 = vor.u32 %v9852_v49, %v8866_v34  ;;  %v8871_v0 = vor.u32 %v9844_v52, %v8868_v61  ;;  %v8939_v8 = vor.u32 %v9869_v1, %v8938_v11  ;;  %v9829_v11 = vld [vmem:[#allocation2 + $0xc] sm:$0xf] }
 0x16d   : > { %v11721_v4 = vmul.f32 100.0, %v11715_v13  ;;  %3180 = vmatpush.bf16.msra.mxu0 %v8995_v43  ;;  %3219 = vmatpush.bf16.msra.mxu1 %v8999_v12  ;;  %v9861_v43 = vld [vmem:[#allocation2 + $0x10c] sm:$0xf]  ;;  %v9828_v38 = vld [vmem:[#allocation2 + $0x4] sm:$0xf]  ;;  %v1279_v49 = vmul.f32 %v11653_v36, %v11527_v30  ;;  %v1280_v61 = vmul.f32 %v11655_v48, %v11529_v7  ;;  %v11769_v7 = vmul.f32 %v11662_v17, %v11533_v25 }
 0x16e   : > { %v1453_v26 = vmin.f32 %v11718_v18, 20.0  ;;  %v8943_v23 = vor.u32 %v9861_v43, %v8940_v20  ;;  %v8810_v20 = vld [vmem:[#allocation2 + $0x8] sm:$0xf]  ;;  %vm2285_vm4 = vcmp.gt.f32.partialorder %v11718_v18, 20.0 }
 0x16f   : > { %v1454_v53 = vmin.f32 %v11721_v4, 20.0  ;;  %v896_v56 = vpop.f32.mrf.mxu2  ;;  %vm2286_vm10 = vcmp.gt.f32.partialorder %v11721_v4, 20.0 }
 0x170   : > { %v935_v37 = vpop.f32.mrf.mxu3  ;;  %v1521_v55 = vmul.f32 1.442695, %v1453_v26  ;;  %v11729_v45 = vadd.f32 %v1263_v22, %v896_v56  ;;  %v8876_v26 = vld [vmem:[#allocation2 + $0xc8] sm:$0xf0] }
 0x171   : > { %v9885_v3 = vld [vmem:[#allocation2 + $0x1c4] sm:$0xf0]  ;;  %v9004_v57 = vld [vmem:[#allocation2 + $0x1c8] sm:$0xf0]  ;;  %v11731_v59 = vadd.f32 %v1264_v44, %v935_v37  ;;  %3181 = vmatpush.bf16.msra.mxu0 %v8931_v41  ;;  %3220 = vmatpush.bf16.msra.mxu1 %v8935_v42  ;;  %v1523_v50 = vmul.f32 1.442695, %v1454_v53  ;;  %v820_v12 = vpop.f32.mrf.mxu0 }
 0x172   : > { %v9003_v2 = vor.u32 %v9885_v3, %v9002_v60  ;;  %v9007_v39 = vor.u32 %v9877_v15, %v9004_v57  ;;  %10131 = vpow2.f32 %v1521_v55  ;;  %v11736_v32 = vmul.f32 100.0, %v11729_v45  ;;  %v859_v60 = vpop.f32.mrf.mxu1  ;;  %v9853_v15 = vld [vmem:[#allocation2 + $0xc4] sm:$0xf0] }
 0x173   : > { %v11739_v29 = vmul.f32 100.0, %v11731_v59  ;;  %10133 = vpow2.f32 %v1523_v50  ;;  %v11751_v41 = vadd.f32 %v1277_v35, %v820_v12  ;;  %v11753_v42 = vadd.f32 %v1278_v19, %v859_v60  ;;  %v9837_v53 = vld [vmem:[#allocation2 + $0x44] sm:$0xf0] }
 0x174   : > { %3258 = vmatpush.bf16.msra.mxu2 %v9003_v2  ;;  %3297 = vmatpush.bf16.msra.mxu3 %v9007_v39  ;;  %v1455_v22 = vmin.f32 %v11736_v32, 20.0  ;;  %v11762_v3 = vmul.f32 %v11660_v14, %v11531_v28  ;;  %v8803_v57 = vor.u32 %v9836_v40, %v8802_v27  ;;  %v8807_v55 = vor.u32 %v9828_v38, %v8804_v58  ;;  %v8874_v2 = vld [vmem:[#allocation2 + $0x88] sm:$0xf]  ;;  %v9845_v39 = vld [vmem:[#allocation2 + $0x8c] sm:$0xf] }
 0x175   : > { %8753 = vmatmul.msk.bf16.gmra.mxu0 %vm562_vm9, %v10837_v24  ;;  %v1456_v44 = vmin.f32 %v11739_v29, 20.0  ;;  %8759 = vmatmul.msk.bf16.gmra.mxu1 %vm562_vm9, %v10837_v24  ;;  %v11765_v30 = vmul.f32 100.0, %v11751_v41  ;;  %v8875_v48 = vor.u32 %v9853_v15, %v8874_v2  ;;  %v8879_v1 = vor.u32 %v9845_v39, %v8876_v26  ;;  %v8812_v28 = vld [vmem:[#allocation2 + $0x48] sm:$0xf0] }
 0x176   : > { %3182 = vmatpush.bf16.msra.mxu0 %v8867_v62  ;;  %3221 = vmatpush.bf16.msra.mxu1 %v8871_v0  ;;  %v1525_v56 = vmul.f32 1.442695, %v1455_v22  ;;  %v11774_v34 = vmul.f32 100.0, %v11753_v42  ;;  %v8811_v52 = vor.u32 %v9837_v53, %v8810_v20  ;;  %v11781_v62 = vmul.f32 %v11682_v6, %v11558_v46 }
 0x177   : > { %8771 = vmatmul.msk.bf16.gmra.mxu3 %vm562_vm9, %v10837_v24  ;;  %v1527_v37 = vmul.f32 1.442695, %v1456_v44  ;;  %8765 = vmatmul.msk.bf16.gmra.mxu2 %vm562_vm9, %v10837_v24  ;;  %v1469_v17 = vmin.f32 %v11765_v30, 20.0  ;;  %v898_v19 = vpop.f32.mrf.mxu2  ;;  %v11785_v0 = vmul.f32 %v11684_v5, %v11560_v33  ;;  %v11789_v58 = vmul.f32 %v11687_v31, %v11564_v47 }
 0x178   : > { %3259 = vmatpush.bf16.msra.mxu2 %v8939_v8  ;;  %3298 = vmatpush.bf16.msra.mxu3 %v8943_v23  ;;  %v10132_v36 = vpop.eup %10131  ;;  %10135 = vpow2.f32 %v1525_v56  ;;  %v937_v12 = vpop.f32.mrf.mxu3  ;;  %v8815_v8 = vor.u32 %v9829_v11, %v8812_v28  ;;  %v1470_v46 = vmin.f32 %v11774_v34, 20.0  ;;  %v11792_v6 = vadd.f32 %v1279_v49, %v898_v19 }
 0x179   : > { %v11771_v50 = vpop.eup %10133  ;;  %v1677_v14 = vadd.f32 1.0, %v10132_v36  ;;  %v1680_v35 = vmul.f32 -0.5, %v10132_v36  ;;  %10137 = vpow2.f32 %v1527_v37  ;;  %v1683_v43 = vand.u32 2147483647, %v10132_v36  ;;  %v823_v15 = vpop.f32.mrf.mxu0 }
 0x17a   : > { %3183 = vmatpush.bf16.msra.mxu0 %v8803_v57  ;;  %3222 = vmatpush.bf16.msra.mxu1 %v8807_v55  ;;  %v1686_v24 = vadd.f32 1.0, %v11771_v50  ;;  %v1689_v25 = vmul.f32 -0.5, %v11771_v50  ;;  %v1553_v40 = vmul.f32 1.442695, %v1469_v17  ;;  %v1692_v33 = vand.u32 2147483647, %v11771_v50  ;;  %v11803_v26 = vpop.f32.mrf.mxu1 }
 0x17b   : > { %10139 = vlog2.f32 %v1677_v14  ;;  %v1681_v27 = vadd.f32 1.0, %v1680_v35  ;;  %v11796_v5 = vadd.f32 %v1280_v61, %v937_v12  ;;  %vm11798_vm5 = vcmp.lt.f32.partialorder %v1683_v43, 0.0004427343 }
 0x17c   : > { %3260 = vmatpush.bf16.msra.mxu2 %v8875_v48  ;;  %3299 = vmatpush.bf16.msra.mxu3 %v8879_v1  ;;  %10141 = vlog2.f32 %v1686_v24  ;;  %v1690_v22 = vadd.f32 1.0, %v1689_v25  ;;  %v1555_v38 = vmul.f32 1.442695, %v1470_v46  ;;  %v11806_v61 = vmul.f32 100.0, %v11792_v6 }
 0x17d   : > { %10143 = vpow2.f32 %v1553_v40  ;;  %v1682_v49 = vmul.f32 %v10132_v36, %v1681_v27  ;;  %v11810_v2 = vmul.f32 100.0, %v11796_v5  ;;  %v10838_v36 = vld [vmem:[%s16313_s1 + $0x10] sm:$0xff]  ;;  %vm1693_vm12 = vcmp.lt.f32.partialorder %v1692_v33, 0.0004427343 }
 0x17e   : > { %v10136_v44 = vpop.eup %10135  ;;  %v1691_v57 = vmul.f32 %v11771_v50, %v1690_v22  ;;  %v1471_v50 = vmin.f32 %v11806_v61, 20.0  ;;  %vm2287_vm13 = vcmp.gt.f32.partialorder %v11736_v32, 20.0  ;;  %v11822_v25 = vadd.f32 %v11762_v3, %v823_v15 }
 0x17f   : > { %v10138_v60 = vpop.eup %10137  ;;  %v1695_v47 = vadd.f32 1.0, %v10136_v44  ;;  %v1698_v31 = vmul.f32 -0.5, %v10136_v44  ;;  %v1701_v55 = vand.u32 2147483647, %v10136_v44  ;;  %v1472_v24 = vmin.f32 %v11810_v2, 20.0  ;;  %v11826_v12 = vpop.f32.mrf.mxu2 }
 0x180   : > { %3261 = vmatpush.bf16.msra.mxu2 %v8811_v52  ;;  %3300 = vmatpush.bf16.msra.mxu3 %v8815_v8  ;;  %v1704_v53 = vadd.f32 1.0, %v10138_v60  ;;  %v1707_v56 = vmul.f32 -0.5, %v10138_v60  ;;  %v1710_v20 = vand.u32 2147483647, %v10138_v60  ;;  %v11828_v8 = vpop.f32.mrf.mxu3  ;;  %vm2288_vm15 = vcmp.gt.f32.partialorder %v11739_v29, 20.0 }
 0x181   : > { %v10140_v37 = vpop.eup %10139  ;;  %10145 = vlog2.f32 %v1695_v47  ;;  %v1699_v1 = vadd.f32 1.0, %v1698_v31  ;;  %vm11830_vm11 = vcmp.lt.f32.partialorder %v1701_v55, 0.0004427343  ;;  %v1557_v47 = vmul.f32 1.442695, %v1471_v50 }
 0x182   : > { %v10142_v39 = vpop.eup %10141  ;;  %v1679_v48 = vmul.f32 0.6931472, %v10140_v37  ;;  %10147 = vlog2.f32 %v1704_v53  ;;  %v1708_v14 = vadd.f32 1.0, %v1707_v56  ;;  %vm11834_vm14 = vcmp.lt.f32.partialorder %v1710_v20, 0.0004427343 }
 0x183   : > { %v1688_v28 = vmul.f32 0.6931472, %v10142_v39  ;;  %10149 = vpow2.f32 %v1555_v38  ;;  %v10144_v35 = vpop.eup %10143  ;;  %v1700_v40 = vmul.f32 %v10136_v44, %v1699_v1  ;;  %v1559_v55 = vmul.f32 1.442695, %v1472_v24  ;;  %v11847_v39 = vpop.f32.mrf.mxu0 }
 0x184   : > { %v1685_v52 = vsel %vm11798_vm5, %v1682_v49, %v1679_v48  ;;  %v1821_v11 = vadd.f32 1.0, %v10144_v35  ;;  %v1824_v43 = vmul.f32 -0.5, %v10144_v35  ;;  %v1709_v23 = vmul.f32 %v10138_v60, %v1708_v14 }
 0x185   : > { %8754 = vmatmul.msk.bf16.gmra.mxu0 %vm562_vm9, %v10838_v36  ;;  %8760 = vmatmul.msk.bf16.gmra.mxu1 %vm562_vm9, %v10838_v36  ;;  %v2221_v17 = vmul.f32 0.01, %v1685_v52  ;;  %v1694_v19 = vsel %vm1693_vm12, %v1691_v57, %v1688_v28  ;;  %v1827_v60 = vand.u32 2147483647, %v10144_v35  ;;  %v11860_v28 = vadd.f32 %v11769_v7, %v11803_v26 }
 0x186   : > { %v2222_v27 = vmul.f32 0.01, %v1694_v19  ;;  %10151 = vlog2.f32 %v1821_v11  ;;  %v1825_v49 = vadd.f32 1.0, %v1824_v43  ;;  %v11866_v24 = vmul.f32 100.0, %v11822_v25 }
 0x187   : > { %8772 = vmatmul.msk.bf16.gmra.mxu3 %vm562_vm9, %v10838_v36  ;;  %8766 = vmatmul.msk.bf16.gmra.mxu2 %vm562_vm9, %v10838_v36  ;;  %v10146_v46 = vpop.eup %10145  ;;  %v2349_v33 = vsel %vm2285_vm4, %v11713_v51, %v2221_v17  ;;  %v11849_v51 = vpop.f32.mrf.mxu1  ;;  %10153 = vpow2.f32 %v1557_v47  ;;  %vm1828_vm3 = vcmp.lt.f32.partialorder %v1827_v60, 0.0004427343  ;;  %vm2301_vm4 = vcmp.gt.f32.partialorder %v11765_v30, 20.0 }
 0x188   : > { %v10148_v31 = vpop.eup %10147  ;;  %v2489_v44 = vmul.f32 %v2349_v33, %v2349_v33  ;;  %v2350_v38 = vsel %vm2286_vm10, %v11715_v13, %v2222_v27  ;;  %v1697_v15 = vmul.f32 0.6931472, %v10146_v46  ;;  %v1826_v52 = vmul.f32 %v10144_v35, %v1825_v49  ;;  %v11870_v26 = vpop.f32.mrf.mxu2 }
 0x189   : > { %v11845_v53 = vpop.eup %10149  ;;  %v2423_v56 = vpack.c.bf16 %v2350_v38, %v2349_v33  ;;  %v2490_v37 = vmul.f32 %v2350_v38, %v2350_v38  ;;  %v1706_v57 = vmul.f32 0.6931472, %v10148_v31  ;;  %v1485_v7 = vmin.f32 %v11866_v24, 20.0 }
 0x18a   : > { %v1703_v18 = vsel %vm11830_vm11, %v1700_v40, %v1697_v15  ;;  %v1830_v48 = vadd.f32 1.0, %v11845_v53  ;;  %v1833_v13 = vmul.f32 -0.5, %v11845_v53  ;;  %v11872_v40 = vpop.f32.mrf.mxu3  ;;  %v1836_v35 = vand.u32 2147483647, %v11845_v53 }
 0x18b   : > { %v2551_v4 = vpack.c.bf16 %v2490_v37, %v2489_v44  ;;  %2455 = vst [vmem:[#allocation2 + $0x10] sm:$0xff] %v2423_v56  ;;  %v2223_v1 = vmul.f32 0.01, %v1703_v18  ;;  %v1712_v20 = vsel %vm11834_vm14, %v1709_v23, %v1706_v57  ;;  %v1585_v33 = vmul.f32 1.442695, %v1485_v7  ;;  %v10839_v44 = vld [vmem:[%s16313_s1 + $0x18] sm:$0xff]  ;;  %v11903_v56 = vpop.f32.mrf.mxu0 }
 0x18c   : > { %v2224_v36 = vmul.f32 0.01, %v1712_v20  ;;  %10155 = vlog2.f32 %v1830_v48  ;;  %v10152_v14 = vpop.eup %10151  ;;  %v1834_v11 = vadd.f32 1.0, %v1833_v13  ;;  %v11890_v31 = vadd.f32 %v11781_v62, %v11826_v12 }
 0x18d   : > { %2583 = vst [vmem:[#allocation2 + $0x110] sm:$0xff] %v2551_v4  ;;  %v2351_v50 = vsel %vm2287_vm13, %v11729_v45, %v2223_v1  ;;  %10157 = vpow2.f32 %v1559_v55  ;;  %v1823_v29 = vmul.f32 0.6931472, %v10152_v14  ;;  %v11876_v45 = vmul.f32 %v11689_v9, %v11566_v16  ;;  %v11882_v22 = vpop.eup %10153 }
 0x18e   : > { %v2491_v17 = vmul.f32 %v2351_v50, %v2351_v50  ;;  %v2352_v19 = vsel %vm2288_vm15, %v11731_v59, %v2224_v36  ;;  %v11880_v59 = vmul.f32 100.0, %v11860_v28  ;;  %v1835_v47 = vmul.f32 %v11845_v53, %v1834_v11 }
 0x18f   : > { %v2424_v43 = vpack.c.bf16 %v2352_v19, %v2351_v50  ;;  %v2492_v27 = vmul.f32 %v2352_v19, %v2352_v19  ;;  %v1829_v32 = vsel %vm1828_vm3, %v1826_v52, %v1823_v29  ;;  %v1839_v16 = vadd.f32 1.0, %v11882_v22  ;;  %v11905_v62 = vpop.f32.mrf.mxu1 }
 0x190   : > { %v2237_v46 = vmul.f32 0.01, %v1829_v32  ;;  %v1486_v9 = vmin.f32 %v11880_v59, 20.0  ;;  %v1842_v49 = vmul.f32 -0.5, %v11882_v22  ;;  %10159 = vpow2.f32 %v1585_v33  ;;  %v11933_v50 = vpop.f32.mrf.mxu2 }
 0x191   : > { %v2552_v3 = vpack.c.bf16 %v2492_v27, %v2491_v17  ;;  %2456 = vst [vmem:[#allocation2 + $0x18] sm:$0xff] %v2424_v43  ;;  %v11901_v53 = vadd.f32 %v11785_v0, %v11828_v8  ;;  %vm1837_vm5 = vcmp.lt.f32.partialorder %v1836_v35, 0.0004427343  ;;  %vm2302_vm10 = vcmp.gt.f32.partialorder %v11774_v34, 20.0 }
 0x192   : > { %v10156_v23 = vpop.eup %10155  ;;  %v2365_v12 = vsel %vm2301_vm4, %v11751_v41, %v2237_v46  ;;  %10161 = vlog2.f32 %v1839_v16  ;;  %v1845_v0 = vand.u32 2147483647, %v11882_v22  ;;  %v1587_v18 = vmul.f32 1.442695, %v1486_v9  ;;  %v11935_v52 = vpop.f32.mrf.mxu3 }
 0x193   : > { %v11896_v38 = vpop.eup %10157  ;;  %2584 = vst [vmem:[#allocation2 + $0x118] sm:$0xff] %v2552_v3  ;;  %v1832_v15 = vmul.f32 0.6931472, %v10156_v23  ;;  %v11917_v30 = vmul.f32 100.0, %v11890_v31  ;;  %v11921_v41 = vadd.f32 %v11789_v58, %v11847_v39  ;;  %v2505_v60 = vmul.f32 %v2365_v12, %v2365_v12  ;;  %v11939_v32 = vpop.f32.mrf.mxu0 }
 0x194   : > { %v1848_v8 = vadd.f32 1.0, %v11896_v38  ;;  %v1851_v57 = vmul.f32 -0.5, %v11896_v38  ;;  %v1843_v48 = vadd.f32 1.0, %v1842_v49  ;;  %v11925_v13 = vmul.f32 100.0, %v11901_v53 }
 0x195   : > { %8755 = vmatmul.msk.bf16.gmra.mxu0 %vm562_vm9, %v10839_v44  ;;  %8761 = vmatmul.msk.bf16.gmra.mxu1 %vm562_vm9, %v10839_v44  ;;  %v1838_v37 = vsel %vm1837_vm5, %v1835_v47, %v1832_v15  ;;  %v1487_v20 = vmin.f32 %v11917_v30, 20.0  ;;  %vm2303_vm12 = vcmp.gt.f32.partialorder %v11806_v61, 20.0  ;;  %v1854_v19 = vand.u32 2147483647, %v11896_v38 }
 0x196   : > { %v2238_v55 = vmul.f32 0.01, %v1838_v37  ;;  %10163 = vlog2.f32 %v1848_v8  ;;  %v1852_v1 = vadd.f32 1.0, %v1851_v57  ;;  %v10160_v36 = vpop.eup %10159  ;;  %v1488_v39 = vmin.f32 %v11925_v13, 20.0 }
 0x197   : > { %8773 = vmatmul.msk.bf16.gmra.mxu3 %vm562_vm9, %v10839_v44  ;;  %8767 = vmatmul.msk.bf16.gmra.mxu2 %vm562_vm9, %v10839_v44  ;;  %10165 = vpow2.f32 %v1587_v18  ;;  %v1965_v34 = vadd.f32 1.0, %v10160_v36  ;;  %v1589_v29 = vmul.f32 1.442695, %v1487_v20  ;;  %v1844_v27 = vmul.f32 %v11882_v22, %v1843_v48  ;;  %v11941_v35 = vpop.f32.mrf.mxu1 }
 0x198   : > { %v2366_v4 = vsel %vm2302_vm10, %v11753_v42, %v2238_v55  ;;  %v10162_v17 = vpop.eup %10161  ;;  %v1968_v42 = vmul.f32 -0.5, %v10160_v36  ;;  %v1591_v7 = vmul.f32 1.442695, %v1488_v39  ;;  %vm1846_vm13 = vcmp.lt.f32.partialorder %v1845_v0, 0.0004427343  ;;  %v11967_v55 = vpop.f32.mrf.mxu2 }
 0x199   : > { %v2431_v14 = vpack.c.bf16 %v2366_v4, %v2365_v12  ;;  %v2506_v58 = vmul.f32 %v2366_v4, %v2366_v4  ;;  %v1841_v43 = vmul.f32 0.6931472, %v10162_v17  ;;  %v1853_v3 = vmul.f32 %v11896_v38, %v1852_v1  ;;  %v10840_v1 = vld [vmem:[%s16313_s1 + $0x20] sm:$0xff] }
 0x19a   : > { %10167 = vlog2.f32 %v1965_v34  ;;  %v11945_v46 = vmul.f32 100.0, %v11921_v41  ;;  %v1971_v47 = vand.u32 2147483647, %v10160_v36  ;;  %v11949_v22 = vadd.f32 %v11876_v45, %v11849_v51  ;;  %v11969_v61 = vpop.f32.mrf.mxu3 }
 0x19b   : > { %2463 = vst [vmem:[#allocation2 + $0x50] sm:$0xff] %v2431_v14  ;;  %v2559_v11 = vpack.c.bf16 %v2506_v58, %v2505_v60  ;;  %v1847_v23 = vsel %vm1846_vm13, %v1844_v27, %v1841_v43  ;;  %10169 = vpow2.f32 %v1589_v29  ;;  %v1969_v15 = vadd.f32 1.0, %v1968_v42  ;;  %v11979_v39 = vpop.f32.mrf.mxu0 }
 0x19c   : > { %v10164_v33 = vpop.eup %10163  ;;  %v2239_v9 = vmul.f32 0.01, %v1847_v23  ;;  %10171 = vpow2.f32 %v1591_v7  ;;  %vm1855_vm11 = vcmp.lt.f32.partialorder %v1854_v19, 0.0004427343  ;;  %v1501_v12 = vmin.f32 %v11945_v46, 20.0 }
 0x19d   : > { %2591 = vst [vmem:[#allocation2 + $0x150] sm:$0xff] %v2559_v11  ;;  %v10166_v16 = vpop.eup %10165  ;;  %v1850_v44 = vmul.f32 0.6931472, %v10164_v33  ;;  %vm2304_vm14 = vcmp.gt.f32.partialorder %v11810_v2, 20.0  ;;  %v11957_v51 = vmul.f32 100.0, %v11949_v22  ;;  %v11965_v57 = vadd.f32 %v11708_v63, %v11870_v26 }
 0x19e   : > { %v1974_v38 = vadd.f32 1.0, %v10166_v16  ;;  %v1977_v49 = vmul.f32 -0.5, %v10166_v16  ;;  %v2367_v37 = vsel %vm2303_vm12, %v11792_v6, %v2239_v9  ;;  %vm11959_vm15 = vcmp.lt.f32.partialorder %v1971_v47, 0.0004427343 }
 0x19f   : > { %v1856_v0 = vsel %vm1855_vm11, %v1853_v3, %v1850_v44  ;;  %v2507_v18 = vmul.f32 %v2367_v37, %v2367_v37  ;;  %v1970_v60 = vmul.f32 %v10160_v36, %v1969_v15  ;;  %v1980_v4 = vand.u32 2147483647, %v10166_v16  ;;  %v11981_v36 = vpop.f32.mrf.mxu1  ;;  %v2626_v15 = vld [vmem:[#allocation2 + $0x210] sm:$0x11] }
 0x1a0   : > { %v2240_v45 = vmul.f32 0.01, %v1856_v0  ;;  %10173 = vlog2.f32 %v1974_v38  ;;  %v10168_v6 = vpop.eup %10167  ;;  %v1978_v48 = vadd.f32 1.0, %v1977_v49  ;;  %v1617_v14 = vmul.f32 1.442695, %v1501_v12  ;;  %v10841_v49 = vld [vmem:[%s16313_s1 + $0x28] sm:$0xff] }
 0x1a1   : > { %v10170_v20 = vpop.eup %10169  ;;  %v1967_v26 = vmul.f32 0.6931472, %v10168_v6  ;;  %v1502_v58 = vmin.f32 %v11957_v51, 20.0  ;;  %v11992_v3 = vmul.f32 100.0, %v11965_v57  ;;  %vm2317_vm3 = vcmp.gt.f32.partialorder %v11866_v24, 20.0  ;;  %v12005_v24 = vpop.f32.mrf.mxu2 }
 0x1a2   : > { %v2368_v63 = vsel %vm2304_vm14, %v11796_v5, %v2240_v45  ;;  %v11983_v17 = vpop.eup %10171  ;;  %v1983_v42 = vadd.f32 1.0, %v10170_v20  ;;  %v1986_v29 = vmul.f32 -0.5, %v10170_v20  ;;  %v1989_v2 = vand.u32 2147483647, %v10170_v20  ;;  %v12007_v0 = vpop.f32.mrf.mxu3  ;;  %v2629_v6 = vld [vmem:[#allocation2 + $0x218] sm:$0x11] }
 0x1a3   : > { %v2432_v19 = vpack.c.bf16 %v2368_v63, %v2367_v37  ;;  %v2508_v34 = vmul.f32 %v2368_v63, %v2368_v63  ;;  %v1973_v5 = vsel %vm11959_vm15, %v1970_v60, %v1967_v26  ;;  %v1992_v11 = vadd.f32 1.0, %v11983_v17  ;;  %v12017_v60 = vpop.f32.mrf.mxu0 }
 0x1a4   : > { %v1995_v43 = vmul.f32 -0.5, %v11983_v17  ;;  %v2253_v7 = vmul.f32 0.01, %v1973_v5  ;;  %10175 = vlog2.f32 %v1983_v42  ;;  %vm11996_vm4 = vcmp.lt.f32.partialorder %v1980_v4, 0.0004427343 }
 0x1a5   : > { %8756 = vmatmul.msk.bf16.gmra.mxu0 %vm562_vm9, %v10840_v1  ;;  %8762 = vmatmul.msk.bf16.gmra.mxu1 %vm562_vm9, %v10840_v1  ;;  %2464 = vst [vmem:[#allocation2 + $0x58] sm:$0xff] %v2432_v19  ;;  %v2560_v27 = vpack.c.bf16 %v2508_v34, %v2507_v18  ;;  %10177 = vlog2.f32 %v1992_v11  ;;  %v1979_v9 = vmul.f32 %v10166_v16, %v1978_v48  ;;  %v1987_v44 = vadd.f32 1.0, %v1986_v29 }
 0x1a6   : > { %v10174_v33 = vpop.eup %10173  ;;  %10179 = vpow2.f32 %v1617_v14  ;;  %v2381_v38 = vsel %vm2317_vm3, %v11822_v25, %v2253_v7  ;;  %vm12001_vm5 = vcmp.lt.f32.partialorder %v1989_v2, 0.0004427343  ;;  %v1996_v12 = vadd.f32 1.0, %v1995_v43 }
 0x1a7   : > { %8774 = vmatmul.msk.bf16.gmra.mxu3 %vm562_vm9, %v10840_v1  ;;  %8768 = vmatmul.msk.bf16.gmra.mxu2 %vm562_vm9, %v10840_v1  ;;  %2592 = vst [vmem:[#allocation2 + $0x158] sm:$0xff] %v2560_v27  ;;  %v1976_v47 = vmul.f32 0.6931472, %v10174_v33  ;;  %v1619_v37 = vmul.f32 1.442695, %v1502_v58  ;;  %v1503_v8 = vmin.f32 %v11992_v3, 20.0  ;;  %v12015_v25 = vadd.f32 %v11711_v54, %v11872_v40  ;;  %v12019_v48 = vpop.f32.mrf.mxu1 }
 0x1a8   : > { %v1998_v16 = vand.u32 2147483647, %v11983_v17  ;;  %v2627_v4 = vsel %vm11615_vm1, 1065369472, %v2626_v15  ;;  %v2630_v1 = vsel %vm11615_vm1, 1065369472, %v2629_v6  ;;  %v2521_v26 = vmul.f32 %v2381_v38, %v2381_v38 }
 0x1a9   : > { %v1982_v45 = vsel %vm11996_vm4, %v1979_v9, %v1976_v47  ;;  %10181 = vpow2.f32 %v1619_v37  ;;  %vm2318_vm10 = vcmp.gt.f32.partialorder %v11880_v59, 20.0  ;;  %v1621_v14 = vmul.f32 1.442695, %v1503_v8  ;;  %2628 = vst [vmem:[#allocation2 + $0x210] sm:$0x11] %v2627_v4  ;;  %v12037_v47 = vpop.f32.mrf.mxu2 }
 0x1aa   : > { %v2254_v18 = vmul.f32 0.01, %v1982_v45  ;;  %v10176_v63 = vpop.eup %10175  ;;  %v12027_v54 = vmul.f32 100.0, %v12015_v25  ;;  %v1988_v34 = vmul.f32 %v10170_v20, %v1987_v44  ;;  %v1997_v42 = vmul.f32 %v11983_v17, %v1996_v12  ;;  %2631 = vst [vmem:[#allocation2 + $0x218] sm:$0x11] %v2630_v1  ;;  %v12039_v9 = vpop.f32.mrf.mxu3 }
 0x1ab   : > { %v10178_v40 = vpop.eup %10177  ;;  %v1985_v19 = vmul.f32 0.6931472, %v10176_v63  ;;  %10183 = vpow2.f32 %v1621_v14  ;;  %vm1999_vm12 = vcmp.lt.f32.partialorder %v1998_v16, 0.0004427343  ;;  %vm2319_vm13 = vcmp.gt.f32.partialorder %v11917_v30, 20.0  ;;  %v12050_v16 = vpop.f32.mrf.mxu0 }
 0x1ac   : > { %v2382_v58 = vsel %vm2318_vm10, %v11860_v28, %v2254_v18  ;;  %v10180_v29 = vpop.eup %10179  ;;  %v1994_v11 = vmul.f32 0.6931472, %v10178_v40  ;;  %v1504_v20 = vmin.f32 %v12027_v54, 20.0  ;;  %vm2320_vm11 = vcmp.gt.f32.partialorder %v11925_v13, 20.0 }
 0x1ad   : > { %v2439_v5 = vpack.c.bf16 %v2382_v58, %v2381_v38  ;;  %v2522_v2 = vmul.f32 %v2382_v58, %v2382_v58  ;;  %v1991_v59 = vsel %vm12001_vm5, %v1988_v34, %v1985_v19  ;;  %v2109_v43 = vadd.f32 1.0, %v10180_v29 }
 0x1ae   : > { %v2112_v27 = vmul.f32 -0.5, %v10180_v29  ;;  %v2255_v33 = vmul.f32 0.01, %v1991_v59  ;;  %v2000_v28 = vsel %vm1999_vm12, %v1997_v42, %v1994_v11  ;;  %v2115_v37 = vand.u32 2147483647, %v10180_v29 }
 0x1af   : > { %2471 = vst [vmem:[#allocation2 + $0x90] sm:$0xff] %v2439_v5  ;;  %v2567_v7 = vpack.c.bf16 %v2522_v2, %v2521_v26  ;;  %v12034_v23 = vpop.eup %10181  ;;  %v2256_v17 = vmul.f32 0.01, %v2000_v28  ;;  %10185 = vlog2.f32 %v2109_v43  ;;  %v1623_v45 = vmul.f32 1.442695, %v1504_v20 }
 0x1b0   : > { %v2383_v44 = vsel %vm2319_vm13, %v11890_v31, %v2255_v33  ;;  %v2118_v15 = vadd.f32 1.0, %v12034_v23  ;;  %v2121_v38 = vmul.f32 -0.5, %v12034_v23  ;;  %v12052_v31 = vpop.f32.mrf.mxu1  ;;  %v2113_v18 = vadd.f32 1.0, %v2112_v27  ;;  %v2710_v1 = vld [vmem:[#allocation2 + $0x210] sm:$0x11] }
 0x1b1   : > { %2599 = vst [vmem:[#allocation2 + $0x190] sm:$0xff] %v2567_v7  ;;  %v2523_v30 = vmul.f32 %v2383_v44, %v2383_v44  ;;  %v2384_v12 = vsel %vm2320_vm11, %v11901_v53, %v2256_v17  ;;  %v10184_v13 = vpop.eup %10183  ;;  %vm2333_vm14 = vcmp.gt.f32.partialorder %v11945_v46, 20.0  ;;  %v5163_v53 = vld [vmem:[#allocation2 + $0x210] sm:$0x11]  ;;  %v2711_v40 = vld [vmem:[#allocation2 + $0x218] sm:$0x11]  ;;  %v2950_v2 = vunpack.c.l.b16 %v2710_v1  ;;  %v12066_v27 = vpop.f32.mrf.mxu2 }
 0x1b2   : > { %v2440_v8 = vpack.c.bf16 %v2384_v12, %v2383_v44  ;;  %v2524_v6 = vmul.f32 %v2384_v12, %v2384_v12  ;;  %10187 = vlog2.f32 %v2118_v15  ;;  %v2127_v4 = vadd.f32 1.0, %v10184_v13  ;;  %v12068_v7 = vpop.f32.mrf.mxu3  ;;  %v5166_v28 = vld [vmem:[#allocation2 + $0x218] sm:$0x11] }
 0x1b3   : > { %v2122_v26 = vadd.f32 1.0, %v2121_v38  ;;  %v2130_v14 = vmul.f32 -0.5, %v10184_v13  ;;  %10189 = vpow2.f32 %v1623_v45  ;;  %vm12058_vm15 = vcmp.lt.f32.partialorder %v2115_v37, 0.0004427343  ;;  %v12073_v45 = vpop.f32.mrf.mxu0 }
 0x1b4   : > { %2472 = vst [vmem:[#allocation2 + $0x98] sm:$0xff] %v2440_v8  ;;  %v2568_v63 = vpack.c.bf16 %v2524_v6, %v2523_v30  ;;  %v2124_v34 = vand.u32 2147483647, %v12034_v23  ;;  %vm2334_vm3 = vcmp.gt.f32.partialorder %v11957_v51, 20.0  ;;  %10191 = vlog2.f32 %v2127_v4 }
 0x1b5   : > { %8757 = vmatmul.msk.bf16.gmra.mxu0 %vm562_vm9, %v10841_v49  ;;  %8763 = vmatmul.msk.bf16.gmra.mxu1 %vm562_vm9, %v10841_v49  ;;  %v10186_v58 = vpop.eup %10185  ;;  %v2114_v5 = vmul.f32 %v10180_v29, %v2113_v18  ;;  %v5164_v11 = vsel %vm11615_vm1, 1065369472, %v5163_v53  ;;  %v2133_v59 = vand.u32 2147483647, %v10184_v13  ;;  %v2951_v43 = vunpack.c.h.b16 %v2710_v1 }
 0x1b6   : > { %2600 = vst [vmem:[#allocation2 + $0x198] sm:$0xff] %v2568_v63  ;;  %v2111_v42 = vmul.f32 0.6931472, %v10186_v58  ;;  %v2952_v33 = vunpack.c.l.b16 %v2711_v40  ;;  %v2953_v20 = vunpack.c.h.b16 %v2711_v40  ;;  %v2123_v29 = vmul.f32 %v12034_v23, %v2122_v26 }
 0x1b7   : > { %8775 = vmatmul.msk.bf16.gmra.mxu3 %vm562_vm9, %v10841_v49  ;;  %8769 = vmatmul.msk.bf16.gmra.mxu2 %vm562_vm9, %v10841_v49  ;;  %5165 = vst [vmem:[#allocation2 + $0x210] sm:$0x11] %v5164_v11  ;;  %v2131_v15 = vadd.f32 1.0, %v2130_v14  ;;  %v3030_v38 = vpack.c.b16 %v2950_v2, %v2950_v2  ;;  %v3031_v12 = vpack.c.b16 %v2951_v43, %v2951_v43  ;;  %vm2125_vm9 = vcmp.lt.f32.partialorder %v2124_v34, 0.0004427343 }
 0x1b8   : > { %v10188_v17 = vpop.eup %10187  ;;  %v2117_v44 = vsel %vm12058_vm15, %v2114_v5, %v2111_v42  ;;  %v3032_v37 = vpack.c.b16 %v2952_v33, %v2952_v33  ;;  %v12075_v8 = vpop.f32.mrf.mxu1  ;;  %v5167_v4 = vsel %vm11615_vm1, 1065369472, %v5166_v28  ;;  %v3033_v1 = vpack.c.b16 %v2953_v20, %v2953_v20  ;;  %v9878_v26 = vld [vmem:[#allocation2 + $0x194] sm:$0xf] }
 0x1b9   : > { %v2269_v49 = vmul.f32 0.01, %v2117_v44  ;;  %v2120_v30 = vmul.f32 0.6931472, %v10188_v17  ;;  %v10190_v6 = vpop.eup %10189  ;;  %v3141_v18 = vand.u32 %v11665_v21, %v3030_v38  ;;  %vm12083_vm4 = vcmp.lt.f32.partialorder %v2133_v59, 0.0004427343 }
 0x1ba   : > { %v10192_v53 = vpop.eup %10191  ;;  %v2136_v14 = vadd.f32 1.0, %v10190_v6  ;;  %5168 = vst [vmem:[#allocation2 + $0x218] sm:$0x11] %v5167_v4  ;;  %v2132_v19 = vmul.f32 %v10184_v13, %v2131_v15  ;;  %v2139_v34 = vmul.f32 -0.5, %v10190_v6  ;;  %v3144_v5 = vand.u32 %v11665_v21, %v3031_v12  ;;  %v12095_v13 = vpop.f32.mrf.mxu2 }
 0x1bb   : > { %v2397_v23 = vsel %vm2333_vm14, %v11921_v41, %v2269_v49  ;;  %v2126_v63 = vsel %vm2125_vm9, %v2123_v29, %v2120_v30  ;;  %v2129_v58 = vmul.f32 0.6931472, %v10192_v53  ;;  %3335 = vmatpush.bf16.msrb.mxu0 %v3141_v18  ;;  %v3147_v2 = vand.u32 %v11665_v21, %v3032_v37  ;;  %v12097_v33 = vpop.f32.mrf.mxu3  ;;  %v9010_v53 = vld [vmem:[#allocation2 + $0x190] sm:$0xf] }
 0x1bc   : > { %v2270_v40 = vmul.f32 0.01, %v2126_v63  ;;  %v2537_v42 = vmul.f32 %v2397_v23, %v2397_v23  ;;  %10193 = vlog2.f32 %v2136_v14  ;;  %v3150_v11 = vand.u32 %v11665_v21, %v3033_v1  ;;  %3374 = vmatpush.bf16.msrb.mxu1 %v3144_v5 }
 0x1bd   : > { %v2135_v46 = vsel %vm12083_vm4, %v2132_v19, %v2129_v58  ;;  %3413 = vmatpush.bf16.msrb.mxu2 %v3147_v2  ;;  %v2140_v28 = vadd.f32 1.0, %v2139_v34  ;;  %v2142_v51 = vand.u32 2147483647, %v10190_v6  ;;  %vm2335_vm5 = vcmp.gt.f32.partialorder %v11992_v3, 20.0  ;;  %v9870_v34 = vld [vmem:[#allocation2 + $0x14c] sm:$0xf0] }
 0x1be   : > { %v2398_v41 = vsel %vm2334_vm3, %v11949_v22, %v2270_v40  ;;  %3452 = vmatpush.bf16.msrb.mxu3 %v3150_v11  ;;  %v2271_v17 = vmul.f32 0.01, %v2135_v46  ;;  %v12099_v22 = vpop.f32.mrf.mxu0  ;;  %vm2336_vm12 = vcmp.gt.f32.partialorder %v12027_v54, 20.0  ;;  %v9862_v54 = vld [vmem:[#allocation2 + $0x114] sm:$0xf]  ;;  %v1265_v11 = vmul.f32 %v12050_v16, %v11903_v56 }
 0x1bf   : > { %v2447_v59 = vpack.c.bf16 %v2398_v41, %v2397_v23  ;;  %v2538_v43 = vmul.f32 %v2398_v41, %v2398_v41  ;;  %v2141_v38 = vmul.f32 %v10190_v6, %v2140_v28  ;;  %vm2143_vm10 = vcmp.lt.f32.partialorder %v2142_v51, 0.0004427343 }
 0x1c0   : > { %v12101_v44 = vpop.f32.mrf.mxu1  ;;  %v2399_v49 = vsel %vm2335_vm5, %v11965_v57, %v2271_v17  ;;  %vm3106_vm13 = vcmask 531456  }
 0x1c1   : > { %2479 = vst [vmem:[#allocation2 + $0xd0] sm:$0xff] %v2447_v59  ;;  %v2575_v20 = vpack.c.bf16 %v2538_v43, %v2537_v42  ;;  %v2539_v4 = vmul.f32 %v2399_v49, %v2399_v49  ;;  %v8948_v42 = vld [vmem:[#allocation2 + $0x150] sm:$0xf0]  ;;  %v1266_v59 = vmul.f32 %v12052_v31, %v11905_v62  ;;  %v9822_v62 = vld [vmem:[%s16314_s2] sm:$0xff]  ;;  %v9838_v31 = vld [vmem:[#allocation2 + $0x4c] sm:$0xf0] }
 0x1c2   : > { %v10194_v29 = vpop.eup %10193  ;;  %v12105_v37 = vpop.f32.mrf.mxu2  ;;  %v8951_v2 = vor.u32 %v9862_v54, %v8948_v42 }
 0x1c3   : > { %2607 = vst [vmem:[#allocation2 + $0x1d0] sm:$0xff] %v2575_v20  ;;  %v2138_v15 = vmul.f32 0.6931472, %v10194_v29  ;;  %v12107_v18 = vpop.f32.mrf.mxu3 }
 0x1c5   : > { %v2144_v30 = vsel %vm2143_vm10, %v2141_v38, %v2138_v15  ;;  %v8882_v15 = vld [vmem:[#allocation2 + $0x90] sm:$0xf]  ;;  %v9846_v38 = vld [vmem:[#allocation2 + $0x94] sm:$0xf]  ;;  %9056 = vmatmul.msk.bf16.vlgmr.msra.gmra.mxu0 %vm3106_vm13, %v9822_v62  ;;  %9062 = vmatmul.msk.bf16.vlgmr.msra.gmra.mxu1 %vm3106_vm13, %v9822_v62 }
 0x1c6   : > { %v2272_v12 = vmul.f32 0.01, %v2144_v30  ;;  %v12111_v23 = vpop.f32.mrf.mxu0  ;;  %v8818_v30 = vld [vmem:[#allocation2 + $0x10] sm:$0xf] }
 0x1c7   : > { %9068 = vmatmul.msk.bf16.vlgmr.msra.gmra.mxu2 %vm3106_vm13, %v9822_v62  ;;  %9074 = vmatmul.msk.bf16.vlgmr.msra.gmra.mxu3 %vm3106_vm13, %v9822_v62 }
 0x1c8   : > { %v2400_v1 = vsel %vm2336_vm12, %v12015_v25, %v2272_v12  ;;  %v12113_v3 = vpop.f32.mrf.mxu1  ;;  %v8946_v25 = vld [vmem:[#allocation2 + $0x110] sm:$0xf]  ;;  %v8884_v28 = vld [vmem:[#allocation2 + $0xd0] sm:$0xf0] }
 0x1c9   : > { %v2448_v6 = vpack.c.bf16 %v2400_v1, %v2399_v49  ;;  %v2540_v63 = vmul.f32 %v2400_v1, %v2400_v1  ;;  %v8947_v5 = vor.u32 %v9870_v34, %v8946_v25  ;;  %v9854_v43 = vld [vmem:[#allocation2 + $0xcc] sm:$0xf0]  ;;  %v9830_v12 = vld [vmem:[#allocation2 + $0x14] sm:$0xf]  ;;  %v8956_v34 = vld [vmem:[#allocation2 + $0x158] sm:$0xf0]  ;;  %v8819_v25 = vor.u32 %v9838_v31, %v8818_v30 }
 0x1ca   : > { %v9886_v57 = vld [vmem:[#allocation2 + $0x1cc] sm:$0xf0]  ;;  %v9012_v14 = vld [vmem:[#allocation2 + $0x1d0] sm:$0xf0]  ;;  %v1049_v41 = vpop.f32.mrf.mxu2  ;;  %v8883_v16 = vor.u32 %v9854_v43, %v8882_v15  ;;  %v8826_v31 = vld [vmem:[#allocation2 + $0x18] sm:$0xf] }
 0x1cb   : > { %v9011_v40 = vor.u32 %v9886_v57, %v9010_v53  ;;  %v9015_v58 = vor.u32 %v9878_v26, %v9012_v14  ;;  %2480 = vst [vmem:[#allocation2 + $0xd8] sm:$0xff] %v2448_v6  ;;  %v2576_v19 = vpack.c.bf16 %v2540_v63, %v2539_v4  ;;  %v1088_v46 = vpop.f32.mrf.mxu3  ;;  %v12120_v20 = vmul.f32 %v1049_v41, %v12037_v47  ;;  %v8820_v4 = vld [vmem:[#allocation2 + $0x50] sm:$0xf0]  ;;  %v9879_v57 = vld [vmem:[#allocation2 + $0x19c] sm:$0xf] }
 0x1cc   : > { %v12123_v17 = vmul.f32 %v1088_v46, %v12039_v9  ;;  %v8887_v47 = vor.u32 %v9846_v38, %v8884_v28  ;;  %v9018_v9 = vld [vmem:[#allocation2 + $0x198] sm:$0xf]  ;;  %v1267_v6 = vmul.f32 %v12066_v27, %v11933_v50  ;;  %v1268_v14 = vmul.f32 %v12068_v7, %v11935_v52  ;;  %v9863_v7 = vld [vmem:[#allocation2 + $0x11c] sm:$0xf] }
 0x1cd   : > { %3336 = vmatpush.bf16.msrb.mxu0 %v9011_v40  ;;  %3375 = vmatpush.bf16.msrb.mxu1 %v9015_v58  ;;  %2608 = vst [vmem:[#allocation2 + $0x1d8] sm:$0xff] %v2576_v19  ;;  %v9871_v19 = vld [vmem:[#allocation2 + $0x154] sm:$0xf0]  ;;  %v8823_v50 = vor.u32 %v9830_v12, %v8820_v4  ;;  %v8959_v28 = vor.u32 %v9863_v7, %v8956_v34 }
 0x1ce   : > { %v974_v51 = vpop.f32.mrf.mxu0  ;;  %v8954_v52 = vld [vmem:[#allocation2 + $0x118] sm:$0xf]  ;;  %v1284_v4 = vmul.f32 %v12097_v33, %v11969_v61  ;;  %v12184_v61 = vmul.f32 %v12101_v44, %v11981_v36  ;;  %v9831_v33 = vld [vmem:[#allocation2 + $0x1c] sm:$0xf] }
 0x1cf   : > { %v12125_v49 = vadd.f32 %v1265_v11, %v974_v51  ;;  %v8955_v43 = vor.u32 %v9871_v19, %v8954_v52  ;;  %v12180_v19 = vmul.f32 %v12099_v22, %v11979_v39 }
 0x1d0   : > { %v1013_v29 = vpop.f32.mrf.mxu1 }
 0x1d1   : > { %3337 = vmatpush.bf16.msrb.mxu0 %v8947_v5  ;;  %3376 = vmatpush.bf16.msrb.mxu1 %v8951_v2  ;;  %v12127_v56 = vadd.f32 %v1266_v59, %v1013_v29  ;;  %v12133_v1 = vmul.f32 100.0, %v12125_v49  ;;  %v1281_v2 = vmul.f32 %v12073_v45, %v11939_v32  ;;  %v1282_v59 = vmul.f32 %v12075_v8, %v11941_v35  ;;  %v9839_v32 = vld [vmem:[#allocation2 + $0x54] sm:$0xf0] }
 0x1d2   : > { %v1052_v54 = vpop.f32.mrf.mxu2  ;;  %v1283_v8 = vmul.f32 %v12095_v13, %v11967_v55 }
 0x1d3   : > { %v12136_v53 = vmul.f32 100.0, %v12127_v56  ;;  %v1457_v42 = vmin.f32 %v12133_v1, 20.0  ;;  %v1091_v5 = vpop.f32.mrf.mxu3  ;;  %v12150_v46 = vadd.f32 %v1267_v6, %v1052_v54  ;;  %v8890_v6 = vld [vmem:[#allocation2 + $0x98] sm:$0xf]  ;;  %vm2289_vm14 = vcmp.gt.f32.partialorder %v12133_v1, 20.0 }
 0x1d4   : > { %v9887_v63 = vld [vmem:[#allocation2 + $0x1d4] sm:$0xf0]  ;;  %v9020_v26 = vld [vmem:[#allocation2 + $0x1d8] sm:$0xf0]  ;;  %v12152_v11 = vadd.f32 %v1268_v14, %v1091_v5 }
 0x1d5   : > { %3338 = vmatpush.bf16.msrb.mxu0 %v8883_v16  ;;  %3377 = vmatpush.bf16.msrb.mxu1 %v8887_v47  ;;  %v9019_v40 = vor.u32 %v9887_v63, %v9018_v9  ;;  %v9023_v58 = vor.u32 %v9879_v57, %v9020_v26  ;;  %v1458_v27 = vmin.f32 %v12136_v53, 20.0  ;;  %v1529_v41 = vmul.f32 1.442695, %v1457_v42  ;;  %v9855_v16 = vld [vmem:[#allocation2 + $0xd4] sm:$0xf0] }
 0x1d6   : > { %v976_v29 = vpop.f32.mrf.mxu0  ;;  %v12157_v45 = vmul.f32 100.0, %v12150_v46  ;;  %v12160_v38 = vmul.f32 100.0, %v12152_v11  ;;  %v8892_v47 = vld [vmem:[#allocation2 + $0xd8] sm:$0xf0]  ;;  %v8827_v57 = vor.u32 %v9839_v32, %v8826_v31  ;;  %v8891_v55 = vor.u32 %v9855_v16, %v8890_v6 }
 0x1d7   : > { %3414 = vmatpush.bf16.msrb.mxu2 %v9019_v40  ;;  %3453 = vmatpush.bf16.msrb.mxu3 %v9023_v58  ;;  %v1531_v51 = vmul.f32 1.442695, %v1458_v27  ;;  %10195 = vpow2.f32 %v1529_v41  ;;  %v12162_v62 = vadd.f32 %v1281_v2, %v976_v29  ;;  %v8828_v9 = vld [vmem:[#allocation2 + $0x58] sm:$0xf0]  ;;  %v9823_v29 = vld [vmem:[%s16314_s2 + $0x8] sm:$0xff]  ;;  %v12205_v32 = vmul.f32 %v12111_v23, %v12017_v60 }
 0x1d8   : > { %v1015_v15 = vpop.f32.mrf.mxu1  ;;  %v1459_v30 = vmin.f32 %v12157_v45, 20.0  ;;  %v1460_v12 = vmin.f32 %v12160_v38, 20.0  ;;  %v9847_v63 = vld [vmem:[#allocation2 + $0x9c] sm:$0xf]  ;;  %v8831_v54 = vor.u32 %v9831_v33, %v8828_v9  ;;  %9057 = vmatmul.msk.bf16.gmra.mxu0 %vm3106_vm13, %v9823_v29  ;;  %9063 = vmatmul.msk.bf16.gmra.mxu1 %vm3106_vm13, %v9823_v29  ;;  %vm2290_vm3 = vcmp.gt.f32.partialorder %v12136_v53, 20.0 }
 0x1d9   : > { %3339 = vmatpush.bf16.msrb.mxu0 %v8819_v25  ;;  %3378 = vmatpush.bf16.msrb.mxu1 %v8823_v50  ;;  %10197 = vpow2.f32 %v1531_v51  ;;  %v12164_v35 = vadd.f32 %v1282_v59, %v1015_v15  ;;  %v12173_v26 = vmul.f32 100.0, %v12162_v62  ;;  %v8895_v13 = vor.u32 %v9847_v63, %v8892_v47 }
 0x1da   : > { %v1533_v40 = vmul.f32 1.442695, %v1459_v30  ;;  %v1535_v58 = vmul.f32 1.442695, %v1460_v12  ;;  %v1054_v25 = vpop.f32.mrf.mxu2  ;;  %v12201_v15 = vmul.f32 %v12107_v18, %v12007_v0  ;;  %9069 = vmatmul.msk.bf16.gmra.mxu2 %vm3106_vm13, %v9823_v29  ;;  %9075 = vmatmul.msk.bf16.gmra.mxu3 %vm3106_vm13, %v9823_v29  ;;  %vm2291_vm5 = vcmp.gt.f32.partialorder %v12157_v45, 20.0 }
 0x1db   : > { %3415 = vmatpush.bf16.msrb.mxu2 %v8955_v43  ;;  %3454 = vmatpush.bf16.msrb.mxu3 %v8959_v28  ;;  %v12176_v14 = vmul.f32 100.0, %v12164_v35  ;;  %v1473_v34 = vmin.f32 %v12173_v26, 20.0  ;;  %v1093_v50 = vpop.f32.mrf.mxu3  ;;  %v12188_v5 = vadd.f32 %v1283_v8, %v1054_v25  ;;  %v12194_v43 = vmul.f32 %v12105_v37, %v12005_v24 }
 0x1dc   : > { %10199 = vpow2.f32 %v1533_v40  ;;  %v12190_v39 = vadd.f32 %v1284_v4, %v1093_v50  ;;  %vm2292_vm10 = vcmp.gt.f32.partialorder %v12160_v38, 20.0 }
 0x1dd   : > { %v1474_v42 = vmin.f32 %v12176_v14, 20.0  ;;  %v10196_v27 = vpop.eup %10195  ;;  %10201 = vpow2.f32 %v1535_v58  ;;  %v1561_v59 = vmul.f32 1.442695, %v1473_v34  ;;  %v12208_v24 = vmul.f32 100.0, %v12188_v5 }
 0x1de   : > { %v1713_v2 = vadd.f32 1.0, %v10196_v27  ;;  %v1716_v36 = vmul.f32 -0.5, %v10196_v27  ;;  %v1719_v44 = vand.u32 2147483647, %v10196_v27  ;;  %v12215_v47 = vmul.f32 100.0, %v12190_v39  ;;  %v979_v8 = vpop.f32.mrf.mxu0 }
 0x1df   : > { %3416 = vmatpush.bf16.msrb.mxu2 %v8891_v55  ;;  %3455 = vmatpush.bf16.msrb.mxu3 %v8895_v13  ;;  %v10198_v22 = vpop.eup %10197  ;;  %v1563_v51 = vmul.f32 1.442695, %v1474_v42  ;;  %v1475_v23 = vmin.f32 %v12208_v24, 20.0  ;;  %v12232_v34 = vadd.f32 %v12180_v19, %v979_v8 }
 0x1e0   : > { %v1722_v52 = vadd.f32 1.0, %v10198_v22  ;;  %v1725_v7 = vmul.f32 -0.5, %v10198_v22  ;;  %v1728_v41 = vand.u32 2147483647, %v10198_v22  ;;  %10203 = vlog2.f32 %v1713_v2  ;;  %v12225_v31 = vpop.f32.mrf.mxu1 }
 0x1e1   : > { %v1717_v28 = vadd.f32 1.0, %v1716_v36  ;;  %vm12210_vm11 = vcmp.lt.f32.partialorder %v1719_v44, 0.0004427343  ;;  %v1476_v6 = vmin.f32 %v12215_v47, 20.0  ;;  %v1565_v13 = vmul.f32 1.442695, %v1475_v23 }
 0x1e2   : > { %10205 = vlog2.f32 %v1722_v52  ;;  %v1726_v16 = vadd.f32 1.0, %v1725_v7  ;;  %v10200_v0 = vpop.eup %10199  ;;  %vm12220_vm15 = vcmp.lt.f32.partialorder %v1728_v41, 0.0004427343  ;;  %v12278_v44 = vmul.f32 100.0, %v12232_v34 }
 0x1e3   : > { %3417 = vmatpush.bf16.msrb.mxu2 %v8827_v57  ;;  %3456 = vmatpush.bf16.msrb.mxu3 %v8831_v54  ;;  %10207 = vpow2.f32 %v1561_v59  ;;  %v1718_v60 = vmul.f32 %v10196_v27, %v1717_v28  ;;  %v10202_v9 = vpop.eup %10201  ;;  %v1731_v30 = vadd.f32 1.0, %v10200_v0  ;;  %v1734_v12 = vmul.f32 -0.5, %v10200_v0  ;;  %v12245_v59 = vpop.f32.mrf.mxu2 }
 0x1e4   : > { %10209 = vpow2.f32 %v1563_v51  ;;  %v1737_v4 = vand.u32 2147483647, %v10200_v0  ;;  %v1740_v63 = vadd.f32 1.0, %v10202_v9  ;;  %v1743_v57 = vmul.f32 -0.5, %v10202_v9  ;;  %v12247_v28 = vpop.f32.mrf.mxu3 }
 0x1e5   : > { %v1746_v55 = vand.u32 2147483647, %v10202_v9  ;;  %v1727_v58 = vmul.f32 %v10198_v22, %v1726_v16  ;;  %10211 = vlog2.f32 %v1731_v30  ;;  %v1735_v33 = vadd.f32 1.0, %v1734_v12 }
 0x1e6   : > { %v10204_v40 = vpop.eup %10203  ;;  %vm12234_vm9 = vcmp.lt.f32.partialorder %v1737_v4, 0.0004427343  ;;  %10213 = vlog2.f32 %v1740_v63  ;;  %v1567_v27 = vmul.f32 1.442695, %v1476_v6  ;;  %v1744_v36 = vadd.f32 1.0, %v1743_v57 }
 0x1e7   : > { %v1715_v25 = vmul.f32 0.6931472, %v10204_v40  ;;  %vm12238_vm4 = vcmp.lt.f32.partialorder %v1746_v55, 0.0004427343  ;;  %10215 = vpow2.f32 %v1565_v13  ;;  %v1736_v52 = vmul.f32 %v10200_v0, %v1735_v33  ;;  %v981_v13 = vpop.f32.mrf.mxu0 }
 0x1e8   : > { %v10206_v42 = vpop.eup %10205  ;;  %v1745_v12 = vmul.f32 %v10202_v9, %v1744_v36  ;;  %v12262_v40 = vpop.f32.mrf.mxu1 }
 0x1e9   : > { %v10208_v54 = vpop.eup %10207  ;;  %v1724_v2 = vmul.f32 0.6931472, %v10206_v42  ;;  %v1721_v19 = vsel %vm12210_vm11, %v1718_v60, %v1715_v25  ;;  %vm2305_vm11 = vcmp.gt.f32.partialorder %v12173_v26, 20.0 }
 0x1ea   : > { %v10210_v22 = vpop.eup %10209  ;;  %v1857_v7 = vadd.f32 1.0, %v10208_v54  ;;  %v1860_v41 = vmul.f32 -0.5, %v10208_v54  ;;  %v2225_v51 = vmul.f32 0.01, %v1721_v19  ;;  %v1863_v16 = vand.u32 2147483647, %v10208_v54 }
 0x1eb   : > { %v1730_v29 = vsel %vm12220_vm15, %v1727_v58, %v1724_v2  ;;  %v1866_v23 = vadd.f32 1.0, %v10210_v22  ;;  %v1869_v0 = vmul.f32 -0.5, %v10210_v22  ;;  %v10212_v60 = vpop.eup %10211  ;;  %v1872_v4 = vand.u32 2147483647, %v10210_v22 }
 0x1ec   : > { %v2226_v8 = vmul.f32 0.01, %v1730_v29  ;;  %10217 = vlog2.f32 %v1857_v7  ;;  %v1861_v37 = vadd.f32 1.0, %v1860_v41  ;;  %v2353_v30 = vsel %vm2289_vm14, %v12125_v49, %v2225_v51  ;;  %v10214_v6 = vpop.eup %10213 }
 0x1ed   : > { %10219 = vlog2.f32 %v1866_v23  ;;  %v2493_v63 = vmul.f32 %v2353_v30, %v2353_v30  ;;  %v1733_v57 = vmul.f32 0.6931472, %v10212_v60  ;;  %vm12258_vm12 = vcmp.lt.f32.partialorder %v1863_v16, 0.0004427343  ;;  %v10216_v58 = vpop.eup %10215  ;;  %v12283_v60 = vpop.f32.mrf.mxu2 }
 0x1ee   : > { %v2354_v18 = vsel %vm2290_vm3, %v12127_v56, %v2226_v8  ;;  %v1742_v9 = vmul.f32 0.6931472, %v10214_v6  ;;  %v1862_v33 = vmul.f32 %v10208_v54, %v1861_v37  ;;  %v1870_v53 = vadd.f32 1.0, %v1869_v0 }
 0x1ef   : > { %v2425_v1 = vpack.c.bf16 %v2354_v18, %v2353_v30  ;;  %v2494_v49 = vmul.f32 %v2354_v18, %v2354_v18  ;;  %v1739_v42 = vsel %vm12234_vm9, %v1736_v52, %v1733_v57  ;;  %vm2306_vm14 = vcmp.gt.f32.partialorder %v12176_v14, 20.0  ;;  %v12285_v30 = vpop.f32.mrf.mxu3 }
 0x1f0   : > { %v1875_v56 = vadd.f32 1.0, %v10216_v58  ;;  %v1878_v25 = vmul.f32 -0.5, %v10216_v58  ;;  %v2227_v36 = vmul.f32 0.01, %v1739_v42  ;;  %v1748_v19 = vsel %vm12238_vm4, %v1745_v12, %v1742_v9 }
 0x1f1   : > { %v2553_v2 = vpack.c.bf16 %v2494_v49, %v2493_v63  ;;  %2457 = vst [vmem:[#allocation2 + $0x20] sm:$0xff] %v2425_v1  ;;  %vm12270_vm15 = vcmp.lt.f32.partialorder %v1872_v4, 0.0004427343  ;;  %v2228_v41 = vmul.f32 0.01, %v1748_v19  ;;  %v1871_v0 = vmul.f32 %v10210_v22, %v1870_v53 }
 0x1f2   : > { %v10218_v54 = vpop.eup %10217  ;;  %10221 = vlog2.f32 %v1875_v56  ;;  %v1879_v50 = vadd.f32 1.0, %v1878_v25  ;;  %v1881_v52 = vand.u32 2147483647, %v10216_v58  ;;  %v2355_v29 = vsel %vm2291_vm5, %v12150_v46, %v2227_v36 }
 0x1f3   : > { %v10220_v51 = vpop.eup %10219  ;;  %2585 = vst [vmem:[#allocation2 + $0x120] sm:$0xff] %v2553_v2  ;;  %v1859_v16 = vmul.f32 0.6931472, %v10218_v54  ;;  %10223 = vpow2.f32 %v1567_v27  ;;  %v2495_v23 = vmul.f32 %v2355_v29, %v2355_v29  ;;  %v2356_v8 = vsel %vm2292_vm10, %v12152_v11, %v2228_v41 }
 0x1f4   : > { %v1868_v37 = vmul.f32 0.6931472, %v10220_v51  ;;  %v2426_v12 = vpack.c.bf16 %v2356_v8, %v2355_v29  ;;  %v2496_v4 = vmul.f32 %v2356_v8, %v2356_v8  ;;  %v1880_v45 = vmul.f32 %v10216_v58, %v1879_v50 }
 0x1f5   : > { %v1865_v46 = vsel %vm12258_vm12, %v1862_v33, %v1859_v16  ;;  %vm12291_vm3 = vcmp.lt.f32.partialorder %v1881_v52, 0.0004427343  ;;  %v1489_v11 = vmin.f32 %v12278_v44, 20.0  ;;  %v12298_v18 = vadd.f32 %v12184_v61, %v12225_v31  ;;  %v12314_v33 = vpop.f32.mrf.mxu0  ;;  %v12316_v61 = vpop.f32.mrf.mxu1 }
 0x1f6   : > { %v2241_v27 = vmul.f32 0.01, %v1865_v46  ;;  %v1874_v6 = vsel %vm12270_vm15, %v1871_v0, %v1868_v37  ;;  %v2554_v38 = vpack.c.bf16 %v2496_v4, %v2495_v23  ;;  %2458 = vst [vmem:[#allocation2 + $0x28] sm:$0xff] %v2426_v12  ;;  %v12302_v57 = vadd.f32 %v12194_v43, %v12245_v59  ;;  %v12349_v54 = vpop.f32.mrf.mxu2 }
 0x1f7   : > { %v2242_v22 = vmul.f32 0.01, %v1874_v6  ;;  %v1593_v1 = vmul.f32 1.442695, %v1489_v11  ;;  %v12309_v49 = vadd.f32 %v12201_v15, %v12247_v28  ;;  %v12312_v9 = vadd.f32 %v12205_v32, %v981_v13  ;;  %v12327_v15 = vld [vmem:[%s16314_s2 + $0x10] sm:$0xff]  ;;  %v12351_v41 = vpop.f32.mrf.mxu3 }
 0x1f8   : > { %v10222_v55 = vpop.eup %10221  ;;  %v2369_v58 = vsel %vm2305_vm11, %v12162_v62, %v2241_v27  ;;  %2586 = vst [vmem:[#allocation2 + $0x128] sm:$0xff] %v2554_v38  ;;  %v12322_v59 = vmul.f32 100.0, %v12298_v18  ;;  %9058 = vmatmul.msk.bf16.gmra.mxu0 %vm3106_vm13, %v12327_v15  ;;  %9064 = vmatmul.msk.bf16.gmra.mxu1 %vm3106_vm13, %v12327_v15  ;;  %v12341_v2 = vmul.f32 100.0, %v12302_v57  ;;  %v1314_v50 = vmul.f32 %v12113_v3, %v12019_v48 }
 0x1f9   : > { %v10224_v31 = vpop.eup %10223  ;;  %v2509_v43 = vmul.f32 %v2369_v58, %v2369_v58  ;;  %v2370_v26 = vsel %vm2306_vm14, %v12164_v35, %v2242_v22  ;;  %v1877_v62 = vmul.f32 0.6931472, %v10222_v55  ;;  %10225 = vpow2.f32 %v1593_v1  ;;  %9070 = vmatmul.msk.bf16.gmra.mxu2 %vm3106_vm13, %v12327_v15  ;;  %9076 = vmatmul.msk.bf16.gmra.mxu3 %vm3106_vm13, %v12327_v15 }
 0x1fa   : > { %v2433_v32 = vpack.c.bf16 %v2370_v26, %v2369_v58  ;;  %v2510_v28 = vmul.f32 %v2370_v26, %v2370_v26  ;;  %v1884_v13 = vadd.f32 1.0, %v10224_v31  ;;  %v1887_v42 = vmul.f32 -0.5, %v10224_v31 }
 0x1fb   : > { %v1883_v53 = vsel %vm12291_vm3, %v1880_v45, %v1877_v62  ;;  %v1490_v14 = vmin.f32 %v12322_v59, 20.0  ;;  %v12344_v19 = vmul.f32 100.0, %v12309_v49  ;;  %v12347_v7 = vmul.f32 100.0, %v12312_v9 }
 0x1fc   : > { %2465 = vst [vmem:[#allocation2 + $0x60] sm:$0xff] %v2433_v32  ;;  %v2561_v35 = vpack.c.bf16 %v2510_v28, %v2509_v43  ;;  %10227 = vlog2.f32 %v1884_v13  ;;  %v2243_v56 = vmul.f32 0.01, %v1883_v53  ;;  %v1888_v36 = vadd.f32 1.0, %v1887_v42 }
 0x1fd   : > { %v1595_v25 = vmul.f32 1.442695, %v1490_v14  ;;  %v1491_v52 = vmin.f32 %v12341_v2, 20.0  ;;  %vm2307_vm9 = vcmp.gt.f32.partialorder %v12208_v24, 20.0  ;;  %v1890_v51 = vand.u32 2147483647, %v10224_v31  ;;  %v12359_v23 = vpop.f32.mrf.mxu0  ;;  %v12361_v8 = vpop.f32.mrf.mxu1 }
 0x1fe   : > { %2593 = vst [vmem:[#allocation2 + $0x160] sm:$0xff] %v2561_v35  ;;  %v1492_v29 = vmin.f32 %v12344_v19, 20.0  ;;  %v1505_v16 = vmin.f32 %v12347_v7, 20.0  ;;  %v2371_v0 = vsel %vm2307_vm9, %v12188_v5, %v2243_v56  ;;  %v12365_v48 = vadd.f32 %v1314_v50, %v12262_v40 }
 0x1ff   : > { %10229 = vpow2.f32 %v1595_v25  ;;  %v10226_v37 = vpop.eup %10225  ;;  %v1597_v12 = vmul.f32 1.442695, %v1491_v52  ;;  %v12369_v3 = vadd.f32 %v12120_v20, %v12283_v60  ;;  %v1889_v4 = vmul.f32 %v10224_v31, %v1888_v36  ;;  %v12379_v31 = vpop.f32.mrf.mxu2 }
 0x200   : > { %v2001_v46 = vadd.f32 1.0, %v10226_v37  ;;  %v2004_v45 = vmul.f32 -0.5, %v10226_v37  ;;  %v1599_v27 = vmul.f32 1.442695, %v1492_v29  ;;  %v1625_v63 = vmul.f32 1.442695, %v1505_v16  ;;  %v12381_v43 = vpop.f32.mrf.mxu3 }
 0x201   : > { %10231 = vpow2.f32 %v1597_v12  ;;  %v12372_v11 = vmul.f32 100.0, %v12365_v48  ;;  %vm1891_vm4 = vcmp.lt.f32.partialorder %v1890_v51, 0.0004427343  ;;  %vm2308_vm5 = vcmp.gt.f32.partialorder %v12215_v47, 20.0 }
 0x202   : > { %v10228_v24 = vpop.eup %10227  ;;  %10233 = vlog2.f32 %v2001_v46  ;;  %v12376_v5 = vmul.f32 100.0, %v12369_v3  ;;  %v2007_v60 = vand.u32 2147483647, %v10226_v37  ;;  %v2511_v22 = vmul.f32 %v2371_v0, %v2371_v0 }
 0x203   : > { %v1886_v6 = vmul.f32 0.6931472, %v10228_v24  ;;  %10235 = vpow2.f32 %v1599_v27  ;;  %v1506_v38 = vmin.f32 %v12372_v11, 20.0  ;;  %v2005_v58 = vadd.f32 1.0, %v2004_v45 }
 0x204   : > { %10237 = vpow2.f32 %v1625_v63  ;;  %v1507_v32 = vmin.f32 %v12376_v5, 20.0  ;;  %vm2321_vm10 = vcmp.gt.f32.partialorder %v12278_v44, 20.0  ;;  %v12390_v13 = vadd.f32 %v12123_v17, %v12285_v30 }
 0x205   : > { %v10230_v20 = vpop.eup %10229  ;;  %v1892_v40 = vsel %vm1891_vm4, %v1889_v4, %v1886_v6  ;;  %v1627_v62 = vmul.f32 1.442695, %v1506_v38  ;;  %v12392_v42 = vpop.f32.mrf.mxu0  ;;  %vm12396_vm12 = vcmp.lt.f32.partialorder %v2007_v60, 0.0004427343  ;;  %v2006_v17 = vmul.f32 %v10226_v37, %v2005_v58 }
 0x206   : > { %v2244_v55 = vmul.f32 0.01, %v1892_v40  ;;  %v2010_v1 = vadd.f32 1.0, %v10230_v20  ;;  %v2013_v26 = vmul.f32 -0.5, %v10230_v20  ;;  %v12394_v53 = vpop.f32.mrf.mxu1  ;;  %v2016_v30 = vand.u32 2147483647, %v10230_v20 }
 0x207   : > { %v10232_v14 = vpop.eup %10231  ;;  %vm2322_vm11 = vcmp.gt.f32.partialorder %v12322_v59, 20.0  ;;  %v12423_v38 = vpop.f32.mrf.mxu2  ;;  %vm2323_vm15 = vcmp.gt.f32.partialorder %v12341_v2, 20.0  ;;  %vm2324_vm4 = vcmp.gt.f32.partialorder %v12344_v19, 20.0 }
 0x208   : > { %v2372_v28 = vsel %vm2308_vm5, %v12190_v39, %v2244_v55  ;;  %10239 = vlog2.f32 %v2010_v1  ;;  %v12403_v39 = vld [vmem:[%s16314_s2 + $0x18] sm:$0xff]  ;;  %v10234_v47 = vpop.eup %10233  ;;  %v2019_v36 = vadd.f32 1.0, %v10232_v14  ;;  %v2022_v50 = vmul.f32 -0.5, %v10232_v14 }
 0x209   : > { %v2434_v35 = vpack.c.bf16 %v2372_v28, %v2371_v0  ;;  %v2512_v56 = vmul.f32 %v2372_v28, %v2372_v28  ;;  %10241 = vpow2.f32 %v1627_v62  ;;  %v10236_v52 = vpop.eup %10235  ;;  %v2003_v29 = vmul.f32 0.6931472, %v10234_v47  ;;  %9059 = vmatmul.msk.bf16.gmra.mxu0 %vm3106_vm13, %v12403_v39  ;;  %9065 = vmatmul.msk.bf16.gmra.mxu1 %vm3106_vm13, %v12403_v39 }
 0x20a   : > { %v2014_v16 = vadd.f32 1.0, %v2013_v26  ;;  %v1629_v0 = vmul.f32 1.442695, %v1507_v32  ;;  %10243 = vlog2.f32 %v2019_v36  ;;  %v2023_v12 = vadd.f32 1.0, %v2022_v50  ;;  %9071 = vmatmul.msk.bf16.gmra.mxu2 %vm3106_vm13, %v12403_v39  ;;  %9077 = vmatmul.msk.bf16.gmra.mxu3 %vm3106_vm13, %v12403_v39  ;;  %v12414_v4 = vpop.eup %10237 }
 0x20b   : > { %2466 = vst [vmem:[#allocation2 + $0x68] sm:$0xff] %v2434_v35  ;;  %v2562_v51 = vpack.c.bf16 %v2512_v56, %v2511_v22  ;;  %v2025_v37 = vand.u32 2147483647, %v10232_v14  ;;  %v2028_v24 = vadd.f32 1.0, %v10236_v52  ;;  %v2009_v46 = vsel %vm12396_vm12, %v2006_v17, %v2003_v29  ;;  %v12425_v22 = vpop.f32.mrf.mxu3 }
 0x20c   : > { %v2031_v45 = vmul.f32 -0.5, %v10236_v52  ;;  %v2034_v27 = vand.u32 2147483647, %v10236_v52  ;;  %10245 = vpow2.f32 %v1629_v0  ;;  %v2257_v63 = vmul.f32 0.01, %v2009_v46 }
 0x20d   : > { %2594 = vst [vmem:[#allocation2 + $0x168] sm:$0xff] %v2562_v51  ;;  %vm12418_vm14 = vcmp.lt.f32.partialorder %v2016_v30, 0.0004427343  ;;  %10247 = vlog2.f32 %v2028_v24  ;;  %v2145_v60 = vadd.f32 1.0, %v12414_v4  ;;  %v2015_v1 = vmul.f32 %v10230_v20, %v2014_v16  ;;  %v12438_v56 = vpop.f32.mrf.mxu0 }
 0x20e   : > { %v10240_v6 = vpop.eup %10239  ;;  %v2032_v26 = vadd.f32 1.0, %v2031_v45  ;;  %v2148_v62 = vmul.f32 -0.5, %v12414_v4  ;;  %v2385_v32 = vsel %vm2321_vm10, %v12232_v34, %v2257_v63  ;;  %v12436_v35 = vmul.f32 100.0, %v12390_v13  ;;  %v12440_v25 = vpop.f32.mrf.mxu1 }
 0x20f   : > { %v12427_v55 = vpop.eup %10241  ;;  %v2012_v58 = vmul.f32 0.6931472, %v10240_v6  ;;  %10249 = vlog2.f32 %v2145_v60  ;;  %v2024_v47 = vmul.f32 %v10232_v14, %v2023_v12  ;;  %vm12444_vm3 = vcmp.lt.f32.partialorder %v2025_v37, 0.0004427343 }
 0x210   : > { %v2154_v28 = vadd.f32 1.0, %v12427_v55  ;;  %vm12448_vm9 = vcmp.lt.f32.partialorder %v2034_v27, 0.0004427343  ;;  %v10244_v44 = vpop.eup %10243  ;;  %v2149_v36 = vadd.f32 1.0, %v2148_v62  ;;  %v2157_v50 = vmul.f32 -0.5, %v12427_v55 }
 0x211   : > { %v2018_v20 = vsel %vm12418_vm14, %v2015_v1, %v2012_v58  ;;  %v2525_v29 = vmul.f32 %v2385_v32, %v2385_v32  ;;  %v2021_v14 = vmul.f32 0.6931472, %v10244_v44  ;;  %v2033_v16 = vmul.f32 %v10236_v52, %v2032_v26 }
 0x212   : > { %v2258_v30 = vmul.f32 0.01, %v2018_v20  ;;  %10251 = vlog2.f32 %v2154_v28  ;;  %v12454_v51 = vpop.eup %10245  ;;  %v2151_v0 = vand.u32 2147483647, %v12414_v4  ;;  %vm2337_vm5 = vcmp.gt.f32.partialorder %v12347_v7, 20.0  ;;  %v12478_v20 = vld [vmem:[%s16314_s2 + $0x20] sm:$0xff] }
 0x213   : > { %v10248_v12 = vpop.eup %10247  ;;  %v2158_v24 = vadd.f32 1.0, %v2157_v50  ;;  %v2163_v46 = vadd.f32 1.0, %v12454_v51  ;;  %v1508_v45 = vmin.f32 %v12436_v35, 20.0  ;;  %v2027_v63 = vsel %vm12444_vm3, %v2024_v47, %v2021_v14  ;;  %v12470_v1 = vpop.f32.mrf.mxu3 }
 0x214   : > { %v2386_v37 = vsel %vm2322_vm11, %v12298_v18, %v2258_v30  ;;  %v2030_v52 = vmul.f32 0.6931472, %v10248_v12  ;;  %vm2338_vm10 = vcmp.gt.f32.partialorder %v12372_v11, 20.0  ;;  %v2259_v60 = vmul.f32 0.01, %v2027_v63  ;;  %v12468_v18 = vpop.f32.mrf.mxu2 }
 0x215   : > { %v2441_v27 = vpack.c.bf16 %v2386_v37, %v2385_v32  ;;  %v2526_v6 = vmul.f32 %v2386_v37, %v2386_v37  ;;  %v10250_v40 = vpop.eup %10249  ;;  %v2150_v58 = vmul.f32 %v12414_v4, %v2149_v36  ;;  %v2160_v59 = vand.u32 2147483647, %v12427_v55  ;;  %v12483_v30 = vpop.f32.mrf.mxu0 }
 0x216   : > { %10253 = vlog2.f32 %v2163_v46  ;;  %v2036_v62 = vsel %vm12448_vm9, %v2033_v16, %v2030_v52  ;;  %v2147_v32 = vmul.f32 0.6931472, %v10250_v40  ;;  %v2166_v28 = vmul.f32 -0.5, %v12454_v51  ;;  %v12485_v34 = vpop.f32.mrf.mxu1 }
 0x217   : > { %2473 = vst [vmem:[#allocation2 + $0xa0] sm:$0xff] %v2441_v27  ;;  %v2569_v26 = vpack.c.bf16 %v2526_v6, %v2525_v29  ;;  %v2387_v47 = vsel %vm2323_vm15, %v12302_v57, %v2259_v60  ;;  %v2260_v17 = vmul.f32 0.01, %v2036_v62  ;;  %vm2152_vm12 = vcmp.lt.f32.partialorder %v2151_v0, 0.0004427343 }
 0x218   : > { %v10252_v4 = vpop.eup %10251  ;;  %v1631_v44 = vmul.f32 1.442695, %v1508_v45  ;;  %v2527_v36 = vmul.f32 %v2387_v47, %v2387_v47  ;;  %v2153_v50 = vsel %vm2152_vm12, %v2150_v58, %v2147_v32  ;;  %v2159_v14 = vmul.f32 %v12427_v55, %v2158_v24  ;;  %v2632_v57 = vld [vmem:[#allocation2 + $0x220] sm:$0x11]  ;;  %v2635_v24 = vld [vmem:[#allocation2 + $0x228] sm:$0x11] }
 0x219   : > { %2601 = vst [vmem:[#allocation2 + $0x1a0] sm:$0xff] %v2569_v26  ;;  %v2156_v29 = vmul.f32 0.6931472, %v10252_v4  ;;  %v2388_v16 = vsel %vm2324_vm4, %v12309_v49, %v2260_v17  ;;  %v2273_v12 = vmul.f32 0.01, %v2153_v50  ;;  %v2167_v46 = vadd.f32 1.0, %v2166_v28  ;;  %9060 = vmatmul.msk.bf16.gmra.mxu0 %vm3106_vm13, %v12478_v20  ;;  %9066 = vmatmul.msk.bf16.gmra.mxu1 %vm3106_vm13, %v12478_v20 }
 0x21a   : > { %vm2161_vm11 = vcmp.lt.f32.partialorder %v2160_v59, 0.0004427343  ;;  %10255 = vpow2.f32 %v1631_v44  ;;  %v2442_v2 = vpack.c.bf16 %v2388_v16, %v2387_v47  ;;  %v2528_v0 = vmul.f32 %v2388_v16, %v2388_v16  ;;  %9072 = vmatmul.msk.bf16.gmra.mxu2 %vm3106_vm13, %v12478_v20  ;;  %9078 = vmatmul.msk.bf16.gmra.mxu3 %vm3106_vm13, %v12478_v20 }
 0x21b   : > { %v2162_v37 = vsel %vm2161_vm11, %v2159_v14, %v2156_v29  ;;  %v2401_v19 = vsel %vm2337_vm5, %v12312_v9, %v2273_v12  ;;  %v2169_v55 = vand.u32 2147483647, %v12454_v51  ;;  %v2633_v52 = vsel %vm11615_vm1, 1065369472, %v2632_v57  ;;  %v12510_v40 = vpop.f32.mrf.mxu3 }
 0x21c   : > { %v10254_v45 = vpop.eup %10253  ;;  %v2274_v49 = vmul.f32 0.01, %v2162_v37  ;;  %2474 = vst [vmem:[#allocation2 + $0xa8] sm:$0xff] %v2442_v2  ;;  %v2570_v27 = vpack.c.bf16 %v2528_v0, %v2527_v36  ;;  %v2541_v6 = vmul.f32 %v2401_v19, %v2401_v19  ;;  %v12508_v7 = vpop.f32.mrf.mxu2  ;;  %v2168_v59 = vmul.f32 %v12454_v51, %v2167_v46  ;;  %v9827_v2 = vld [vmem:[%s16314_s2 + $0x28] sm:$0xff] }
 0x21d   : > { %v2165_v63 = vmul.f32 0.6931472, %v10254_v45  ;;  %2634 = vst [vmem:[#allocation2 + $0x220] sm:$0x11] %v2633_v52  ;;  %v2636_v26 = vsel %vm11615_vm1, 1065369472, %v2635_v24  ;;  %v12515_v32 = vpop.f32.mrf.mxu0 }
 0x21e   : > { %v2402_v9 = vsel %vm2338_vm10, %v12365_v48, %v2274_v49  ;;  %2602 = vst [vmem:[#allocation2 + $0x1a8] sm:$0xff] %v2570_v27  ;;  %vm2170_vm14 = vcmp.lt.f32.partialorder %v2169_v55, 0.0004427343  ;;  %v12517_v28 = vpop.f32.mrf.mxu1  ;;  %vm2339_vm15 = vcmp.gt.f32.partialorder %v12376_v5, 20.0  ;;  %vm2340_vm9 = vcmp.gt.f32.partialorder %v12436_v35, 20.0 }
 0x21f   : > { %v2449_v60 = vpack.c.bf16 %v2402_v9, %v2401_v19  ;;  %v2542_v58 = vmul.f32 %v2402_v9, %v2402_v9  ;;  %v2171_v11 = vsel %vm2170_vm14, %v2168_v59, %v2165_v63  ;;  %2637 = vst [vmem:[#allocation2 + $0x228] sm:$0x11] %v2636_v26  ;;  %v8962_v35 = vld [vmem:[#allocation2 + $0x120] sm:$0xf] }
 0x220   : > { %v10256_v62 = vpop.eup %10255  ;;  %v2275_v17 = vmul.f32 0.01, %v2171_v11  ;;  %v9026_v24 = vld [vmem:[#allocation2 + $0x1a0] sm:$0xf]  ;;  %v9880_v26 = vld [vmem:[#allocation2 + $0x1a4] sm:$0xf] }
 0x221   : > { %2481 = vst [vmem:[#allocation2 + $0xe0] sm:$0xff] %v2449_v60  ;;  %v2577_v48 = vpack.c.bf16 %v2542_v58, %v2541_v6  ;;  %v2172_v4 = vadd.f32 1.0, %v10256_v62  ;;  %v2175_v47 = vmul.f32 -0.5, %v10256_v62  ;;  %v2178_v57 = vand.u32 2147483647, %v10256_v62 }
 0x222   : > { %v2403_v49 = vsel %vm2339_vm15, %v12369_v3, %v2275_v17 }
 0x223   : > { %2609 = vst [vmem:[#allocation2 + $0x1e0] sm:$0xff] %v2577_v48  ;;  %10257 = vlog2.f32 %v2172_v4  ;;  %v2176_v44 = vadd.f32 1.0, %v2175_v47  ;;  %v12523_v12 = vpop.f32.mrf.mxu3  ;;  %vm2179_vm3 = vcmp.lt.f32.partialorder %v2178_v57, 0.0004427343  ;;  %v9872_v57 = vld [vmem:[#allocation2 + $0x15c] sm:$0xf0] }
 0x224   : > { %v2712_v51 = vld [vmem:[#allocation2 + $0x220] sm:$0x11]  ;;  %v12521_v16 = vpop.f32.mrf.mxu2 }
 0x225   : > { %v5169_v36 = vld [vmem:[#allocation2 + $0x220] sm:$0x11]  ;;  %v2954_v50 = vunpack.c.l.b16 %v2712_v51  ;;  %v2955_v14 = vunpack.c.h.b16 %v2712_v51  ;;  %v12529_v46 = vpop.f32.mrf.mxu0  ;;  %v2177_v55 = vmul.f32 %v10256_v62, %v2176_v44  ;;  %v2543_v44 = vmul.f32 %v2403_v49, %v2403_v49 }
 0x226   : > { %v5170_v29 = vsel %vm11615_vm1, 1065369472, %v5169_v36  ;;  %v12531_v45 = vpop.f32.mrf.mxu1  ;;  %v2713_v27 = vld [vmem:[#allocation2 + $0x228] sm:$0x11] }
 0x227   : > { %5171 = vst [vmem:[#allocation2 + $0x220] sm:$0x11] %v5170_v29  ;;  %v3034_v0 = vpack.c.b16 %v2954_v50, %v2954_v50  ;;  %v3035_v37 = vpack.c.b16 %v2955_v14, %v2955_v14  ;;  %v5172_v6 = vld [vmem:[#allocation2 + $0x228] sm:$0x11]  ;;  %v2956_v58 = vunpack.c.l.b16 %v2713_v27  ;;  %v2957_v11 = vunpack.c.h.b16 %v2713_v27 }
 0x228   : > { %v5173_v48 = vsel %vm11615_vm1, 1065369472, %v5172_v6  ;;  %v8963_v6 = vor.u32 %v9872_v57, %v8962_v35 }
 0x229   : > { %v10258_v19 = vpop.eup %10257  ;;  %v3153_v52 = vand.u32 %v11665_v21, %v3034_v0  ;;  %v3156_v9 = vand.u32 %v11665_v21, %v3035_v37  ;;  %9061 = vmatmul.msk.bf16.gmra.mxu0 %vm3106_vm13, %v9827_v2  ;;  %9067 = vmatmul.msk.bf16.gmra.mxu1 %vm3106_vm13, %v9827_v2  ;;  %v3036_v4 = vpack.c.b16 %v2956_v58, %v2956_v58  ;;  %v8964_v0 = vld [vmem:[#allocation2 + $0x160] sm:$0xf0] }
 0x22a   : > { %v2174_v63 = vmul.f32 0.6931472, %v10258_v19  ;;  %v9888_v60 = vld [vmem:[#allocation2 + $0x1dc] sm:$0xf0]  ;;  %v9028_v5 = vld [vmem:[#allocation2 + $0x1e0] sm:$0xf0]  ;;  %v3037_v17 = vpack.c.b16 %v2957_v11, %v2957_v11  ;;  %9073 = vmatmul.msk.bf16.gmra.mxu2 %vm3106_vm13, %v9827_v2  ;;  %9079 = vmatmul.msk.bf16.gmra.mxu3 %vm3106_vm13, %v9827_v2 }
 0x22b   : > { %v9027_v59 = vor.u32 %v9888_v60, %v9026_v24  ;;  %3491 = vmatpush.bf16.msra.mxu0 %v3153_v52  ;;  %3530 = vmatpush.bf16.msra.mxu1 %v3156_v9  ;;  %v9031_v62 = vor.u32 %v9880_v26, %v9028_v5  ;;  %5174 = vst [vmem:[#allocation2 + $0x228] sm:$0x11] %v5173_v48  ;;  %v12546_v50 = vpop.f32.mrf.mxu3  ;;  %v9864_v24 = vld [vmem:[#allocation2 + $0x124] sm:$0xf]  ;;  %v9840_v11 = vld [vmem:[#allocation2 + $0x5c] sm:$0xf0] }
 0x22c   : > { %v2180_v3 = vsel %vm2179_vm3, %v2177_v55, %v2174_v63  ;;  %v3159_v51 = vand.u32 %v11665_v21, %v3036_v4  ;;  %v12544_v36 = vpop.f32.mrf.mxu2  ;;  %v3162_v14 = vand.u32 %v11665_v21, %v3037_v17  ;;  %v9856_v63 = vld [vmem:[#allocation2 + $0xdc] sm:$0xf0]  ;;  %v8900_v52 = vld [vmem:[#allocation2 + $0xe0] sm:$0xf0]  ;;  %v1269_v26 = vmul.f32 %v12483_v30, %v12314_v33  ;;  %v9034_v30 = vld [vmem:[#allocation2 + $0x1a8] sm:$0xf] }
 0x22d   : > { %v2276_v47 = vmul.f32 0.01, %v2180_v3  ;;  %v12550_v2 = vpop.f32.mrf.mxu0  ;;  %v9848_v9 = vld [vmem:[#allocation2 + $0xa4] sm:$0xf]  ;;  %v1270_v48 = vmul.f32 %v12485_v34, %v12316_v61  ;;  %v9881_v61 = vld [vmem:[#allocation2 + $0x1ac] sm:$0xf] }
 0x22e   : > { %v12552_v55 = vpop.f32.mrf.mxu1  ;;  %3569 = vmatpush.bf16.msra.mxu2 %v3159_v51  ;;  %3608 = vmatpush.bf16.msra.mxu3 %v3162_v14  ;;  %v8903_v5 = vor.u32 %v9848_v9, %v8900_v52  ;;  %v8836_v3 = vld [vmem:[#allocation2 + $0x60] sm:$0xf0] }
 0x22f   : > { %v2404_v29 = vsel %vm2340_vm9, %v12390_v13, %v2276_v47  ;;  %3492 = vmatpush.bf16.msra.mxu0 %v9027_v59  ;;  %3531 = vmatpush.bf16.msra.mxu1 %v9031_v62  ;;  %v8967_v13 = vor.u32 %v9864_v24, %v8964_v0  ;;  %v9832_v51 = vld [vmem:[#allocation2 + $0x24] sm:$0xf]  ;;  %v1271_v24 = vmul.f32 %v12508_v7, %v12349_v54  ;;  %v8970_v54 = vld [vmem:[#allocation2 + $0x128] sm:$0xf] }
 0x230   : > { %v2450_v37 = vpack.c.bf16 %v2404_v29, %v2403_v49  ;;  %v2544_v19 = vmul.f32 %v2404_v29, %v2404_v29  ;;  %v8898_v49 = vld [vmem:[#allocation2 + $0xa0] sm:$0xf]  ;;  %v8839_v14 = vor.u32 %v9832_v51, %v8836_v3 }
 0x231   : > { %v8899_v60 = vor.u32 %v9856_v63, %v8898_v49  ;;  %v1285_v49 = vmul.f32 %v12515_v32, %v12359_v23 }
 0x232   : > { %2482 = vst [vmem:[#allocation2 + $0xe8] sm:$0xff] %v2450_v37  ;;  %v2578_v27 = vpack.c.bf16 %v2544_v19, %v2543_v44  ;;  %v8834_v44 = vld [vmem:[#allocation2 + $0x20] sm:$0xf]  ;;  %v12577_v37 = vld [vmem:[%s16314_s2] sm:$0xff] }
 0x233   : > { %3493 = vmatpush.bf16.msra.mxu0 %v8963_v6  ;;  %3532 = vmatpush.bf16.msra.mxu1 %v8967_v13  ;;  %v1244_v59 = vpop.f32.mrf.mxu3  ;;  %v8835_v34 = vor.u32 %v9840_v11, %v8834_v44  ;;  %v9873_v6 = vld [vmem:[#allocation2 + $0x164] sm:$0xf0]  ;;  %v8972_v13 = vld [vmem:[#allocation2 + $0x168] sm:$0xf0] }
 0x234   : > { %2610 = vst [vmem:[#allocation2 + $0x1e8] sm:$0xff] %v2578_v27  ;;  %v1205_v58 = vpop.f32.mrf.mxu2  ;;  %v12562_v4 = vmul.f32 %v1244_v59, %v12470_v1  ;;  %v1272_v27 = vmul.f32 %v12510_v40, %v12351_v41  ;;  %v9865_v40 = vld [vmem:[#allocation2 + $0x12c] sm:$0xf]  ;;  %v1286_v59 = vmul.f32 %v12517_v28, %v12361_v8  ;;  %v9841_v11 = vld [vmem:[#allocation2 + $0x64] sm:$0xf0] }
 0x235   : > { %v12559_v62 = vmul.f32 %v1205_v58, %v12468_v18  ;;  %v1130_v47 = vpop.f32.mrf.mxu0  ;;  %v8844_v8 = vld [vmem:[#allocation2 + $0x68] sm:$0xf0] }
 0x236   : > { %v1169_v17 = vpop.f32.mrf.mxu1  ;;  %v12564_v29 = vadd.f32 %v1269_v26, %v1130_v47  ;;  %v8971_v26 = vor.u32 %v9873_v6, %v8970_v54  ;;  %v1287_v6 = vmul.f32 %v12521_v16, %v12379_v31  ;;  %v12625_v54 = vmul.f32 %v12529_v46, %v12392_v42 }
 0x237   : > { %3494 = vmatpush.bf16.msra.mxu0 %v8899_v60  ;;  %3533 = vmatpush.bf16.msra.mxu1 %v8903_v5  ;;  %v12566_v33 = vadd.f32 %v1270_v48, %v1169_v17  ;;  %v8975_v48 = vor.u32 %v9865_v40, %v8972_v13  ;;  %v1288_v13 = vmul.f32 %v12523_v12, %v12381_v43 }
 0x238   : > { %v12569_v0 = vmul.f32 100.0, %v12564_v29  ;;  %v12631_v43 = vmul.f32 %v12531_v45, %v12394_v53 }
 0x239   : > { %v12572_v1 = vmul.f32 100.0, %v12566_v33  ;;  %9080 = vmatmul.msk.bf16.vlgmr.msrb.gmra.mxu0 %vm3106_vm13, %v12577_v37  ;;  %9086 = vmatmul.msk.bf16.vlgmr.msrb.gmra.mxu1 %vm3106_vm13, %v12577_v37  ;;  %v9857_v32 = vld [vmem:[#allocation2 + $0xe4] sm:$0xf0]  ;;  %v8908_v47 = vld [vmem:[#allocation2 + $0xe8] sm:$0xf0] }
 0x23a   : > { %v1461_v63 = vmin.f32 %v12569_v0, 20.0  ;;  %9092 = vmatmul.msk.bf16.vlgmr.msrb.gmra.mxu2 %vm3106_vm13, %v12577_v37  ;;  %9098 = vmatmul.msk.bf16.vlgmr.msrb.gmra.mxu3 %vm3106_vm13, %v12577_v37  ;;  %vm2293_vm5 = vcmp.gt.f32.partialorder %v12569_v0, 20.0 }
 0x23b   : > { %v9889_v57 = vld [vmem:[#allocation2 + $0x1e4] sm:$0xf0]  ;;  %v9036_v18 = vld [vmem:[#allocation2 + $0x1e8] sm:$0xf0]  ;;  %3495 = vmatpush.bf16.msra.mxu0 %v8835_v34  ;;  %3534 = vmatpush.bf16.msra.mxu1 %v8839_v14  ;;  %v1462_v52 = vmin.f32 %v12572_v1, 20.0  ;;  %v1247_v41 = vpop.f32.mrf.mxu3  ;;  %vm2294_vm12 = vcmp.gt.f32.partialorder %v12572_v1, 20.0 }
 0x23c   : > { %v9035_v19 = vor.u32 %v9889_v57, %v9034_v30  ;;  %v9039_v35 = vor.u32 %v9881_v61, %v9036_v18  ;;  %v1208_v7 = vpop.f32.mrf.mxu2  ;;  %v1537_v9 = vmul.f32 1.442695, %v1461_v63  ;;  %v12597_v58 = vadd.f32 %v1272_v27, %v1247_v41  ;;  %v8842_v30 = vld [vmem:[#allocation2 + $0x28] sm:$0xf]  ;;  %v9849_v34 = vld [vmem:[#allocation2 + $0xac] sm:$0xf] }
 0x23d   : > { %v1539_v60 = vmul.f32 1.442695, %v1462_v52  ;;  %v12595_v5 = vadd.f32 %v1271_v24, %v1208_v7  ;;  %v1132_v3 = vpop.f32.mrf.mxu0  ;;  %v8906_v61 = vld [vmem:[#allocation2 + $0xa8] sm:$0xf]  ;;  %v8843_v14 = vor.u32 %v9841_v11, %v8842_v30  ;;  %v9833_v63 = vld [vmem:[#allocation2 + $0x2c] sm:$0xf]  ;;  %v12647_v30 = vmul.f32 %v12550_v2, %v12438_v56 }
 0x23e   : > { %3570 = vmatpush.bf16.msra.mxu2 %v9035_v19  ;;  %3609 = vmatpush.bf16.msra.mxu3 %v9039_v35  ;;  %v1171_v23 = vpop.f32.mrf.mxu1  ;;  %10259 = vpow2.f32 %v1537_v9  ;;  %v12605_v44 = vmul.f32 100.0, %v12597_v58  ;;  %v12607_v51 = vadd.f32 %v1285_v49, %v1132_v3  ;;  %v8907_v19 = vor.u32 %v9857_v32, %v8906_v61 }
 0x23f   : > { %v12602_v17 = vmul.f32 100.0, %v12595_v5  ;;  %10261 = vpow2.f32 %v1539_v60  ;;  %v12609_v28 = vadd.f32 %v1286_v59, %v1171_v23  ;;  %v8911_v35 = vor.u32 %v9849_v34, %v8908_v47 }
 0x240   : > { %v1464_v18 = vmin.f32 %v12605_v44, 20.0  ;;  %v12614_v24 = vmul.f32 100.0, %v12607_v51  ;;  %v8847_v7 = vor.u32 %v9833_v63, %v8844_v8  ;;  %v12639_v32 = vmul.f32 %v12544_v36, %v12423_v38  ;;  %v12655_v38 = vld [vmem:[%s16314_s2 + $0x8] sm:$0xff] }
 0x241   : > { %v1463_v57 = vmin.f32 %v12602_v17, 20.0  ;;  %v12617_v27 = vmul.f32 100.0, %v12609_v28  ;;  %v12643_v47 = vmul.f32 %v12546_v50, %v12425_v22  ;;  %vm2295_vm15 = vcmp.gt.f32.partialorder %v12602_v17, 20.0 }
 0x242   : > { %3571 = vmatpush.bf16.msra.mxu2 %v8971_v26  ;;  %3610 = vmatpush.bf16.msra.mxu3 %v8975_v48  ;;  %v1543_v49 = vmul.f32 1.442695, %v1464_v18  ;;  %v1477_v41 = vmin.f32 %v12614_v24, 20.0  ;;  %vm2296_vm3 = vcmp.gt.f32.partialorder %v12605_v44, 20.0 }
 0x243   : > { %v1541_v52 = vmul.f32 1.442695, %v1463_v57  ;;  %v1478_v40 = vmin.f32 %v12617_v27, 20.0  ;;  %v1249_v60 = vpop.f32.mrf.mxu3 }
 0x244   : > { %v1210_v9 = vpop.f32.mrf.mxu2  ;;  %v10260_v31 = vpop.eup %10259  ;;  %v12635_v12 = vadd.f32 %v1288_v13, %v1249_v60  ;;  %v1569_v23 = vmul.f32 1.442695, %v1477_v41 }
 0x245   : > { %10263 = vpow2.f32 %v1541_v52  ;;  %v12633_v16 = vadd.f32 %v1287_v6, %v1210_v9  ;;  %v10262_v42 = vpop.eup %10261  ;;  %v1749_v46 = vadd.f32 1.0, %v10260_v31  ;;  %v1752_v59 = vmul.f32 -0.5, %v10260_v31 }
 0x246   : > { %3572 = vmatpush.bf16.msra.mxu2 %v8907_v19  ;;  %3611 = vmatpush.bf16.msra.mxu3 %v8911_v35  ;;  %v1755_v26 = vand.u32 2147483647, %v10260_v31  ;;  %10265 = vpow2.f32 %v1543_v49  ;;  %v1758_v48 = vadd.f32 1.0, %v10262_v42  ;;  %v1761_v11 = vmul.f32 -0.5, %v10262_v42  ;;  %v12674_v57 = vpop.f32.mrf.mxu1 }
 0x247   : > { %v1764_v3 = vand.u32 2147483647, %v10262_v42  ;;  %10267 = vlog2.f32 %v1749_v46  ;;  %v1753_v53 = vadd.f32 1.0, %v1752_v59  ;;  %v1571_v45 = vmul.f32 1.442695, %v1478_v40 }
 0x248   : > { %10269 = vlog2.f32 %v1758_v48  ;;  %v12650_v8 = vmul.f32 100.0, %v12633_v16  ;;  %vm12661_vm4 = vcmp.lt.f32.partialorder %v1755_v26, 0.0004427343  ;;  %v1762_v56 = vadd.f32 1.0, %v1761_v11 }
 0x249   : > { %9081 = vmatmul.msk.bf16.gmra.mxu0 %vm3106_vm13, %v12655_v38  ;;  %9087 = vmatmul.msk.bf16.gmra.mxu1 %vm3106_vm13, %v12655_v38  ;;  %10271 = vpow2.f32 %v1569_v23  ;;  %v12666_v36 = vmul.f32 100.0, %v12635_v12  ;;  %v1754_v2 = vmul.f32 %v10260_v31, %v1753_v53  ;;  %vm12669_vm10 = vcmp.lt.f32.partialorder %v1764_v3, 0.0004427343 }
 0x24a   : > { %3573 = vmatpush.bf16.msra.mxu2 %v8843_v14  ;;  %3612 = vmatpush.bf16.msra.mxu3 %v8847_v7  ;;  %10273 = vpow2.f32 %v1571_v45  ;;  %v1479_v34 = vmin.f32 %v12650_v8, 20.0  ;;  %v1135_v14 = vpop.f32.mrf.mxu0  ;;  %v1763_v40 = vmul.f32 %v10262_v42, %v1762_v56 }
 0x24b   : > { %v10264_v50 = vpop.eup %10263  ;;  %9093 = vmatmul.msk.bf16.gmra.mxu2 %vm3106_vm13, %v12655_v38  ;;  %9099 = vmatmul.msk.bf16.gmra.mxu3 %vm3106_vm13, %v12655_v38  ;;  %v1480_v13 = vmin.f32 %v12666_v36, 20.0  ;;  %v12683_v60 = vadd.f32 %v12625_v54, %v1135_v14  ;;  %v12698_v14 = vpop.f32.mrf.mxu3 }
 0x24c   : > { %v10266_v18 = vpop.eup %10265  ;;  %v1767_v19 = vadd.f32 1.0, %v10264_v50  ;;  %v1770_v35 = vmul.f32 -0.5, %v10264_v50  ;;  %v1773_v6 = vand.u32 2147483647, %v10264_v50  ;;  %v1573_v7 = vmul.f32 1.442695, %v1479_v34  ;;  %v12696_v34 = vpop.f32.mrf.mxu2 }
 0x24d   : > { %v1776_v63 = vadd.f32 1.0, %v10266_v18  ;;  %v1779_v52 = vmul.f32 -0.5, %v10266_v18  ;;  %v1782_v49 = vand.u32 2147483647, %v10266_v18  ;;  %v10268_v41 = vpop.eup %10267  ;;  %v1575_v26 = vmul.f32 1.442695, %v1480_v13 }
 0x24e   : > { %10275 = vlog2.f32 %v1767_v19  ;;  %v1771_v9 = vadd.f32 1.0, %v1770_v35  ;;  %v10270_v31 = vpop.eup %10269  ;;  %v1751_v46 = vmul.f32 0.6931472, %v10268_v41  ;;  %vm12685_vm11 = vcmp.lt.f32.partialorder %v1773_v6, 0.0004427343 }
 0x24f   : > { %10277 = vlog2.f32 %v1776_v63  ;;  %v10272_v48 = vpop.eup %10271  ;;  %v1760_v11 = vmul.f32 0.6931472, %v10270_v31  ;;  %v1780_v3 = vadd.f32 1.0, %v1779_v52  ;;  %vm12689_vm14 = vcmp.lt.f32.partialorder %v1782_v49, 0.0004427343 }
 0x250   : > { %10279 = vpow2.f32 %v1573_v7  ;;  %v10274_v42 = vpop.eup %10273  ;;  %v1757_v54 = vsel %vm12661_vm4, %v1754_v2, %v1751_v46  ;;  %v1772_v53 = vmul.f32 %v10264_v50, %v1771_v9  ;;  %v1893_v45 = vadd.f32 1.0, %v10272_v48 }
 0x251   : > { %v1896_v56 = vmul.f32 -0.5, %v10272_v48  ;;  %v2229_v19 = vmul.f32 0.01, %v1757_v54  ;;  %v1766_v35 = vsel %vm12669_vm10, %v1763_v40, %v1760_v11  ;;  %v1899_v6 = vand.u32 2147483647, %v10272_v48  ;;  %v12713_v11 = vpop.f32.mrf.mxu1 }
 0x252   : > { %v1902_v13 = vadd.f32 1.0, %v10274_v42  ;;  %v2230_v63 = vmul.f32 0.01, %v1766_v35  ;;  %10281 = vlog2.f32 %v1893_v45  ;;  %v1905_v50 = vmul.f32 -0.5, %v10274_v42  ;;  %v1137_v46 = vpop.f32.mrf.mxu0 }
 0x253   : > { %v1897_v22 = vadd.f32 1.0, %v1896_v56  ;;  %v2357_v52 = vsel %vm2293_vm5, %v12564_v29, %v2229_v19  ;;  %v1781_v49 = vmul.f32 %v10266_v18, %v1780_v3  ;;  %v1908_v7 = vand.u32 2147483647, %v10274_v42 }
 0x254   : > { %v10276_v2 = vpop.eup %10275  ;;  %10283 = vlog2.f32 %v1902_v13  ;;  %v2497_v9 = vmul.f32 %v2357_v52, %v2357_v52  ;;  %v2358_v61 = vsel %vm2294_vm12, %v12566_v33, %v2230_v63  ;;  %vm12709_vm9 = vcmp.lt.f32.partialorder %v1899_v6, 0.0004427343 }
 0x255   : > { %v10278_v41 = vpop.eup %10277  ;;  %v1769_v40 = vmul.f32 0.6931472, %v10276_v2  ;;  %v2427_v0 = vpack.c.bf16 %v2358_v61, %v2357_v52  ;;  %v2498_v29 = vmul.f32 %v2358_v61, %v2358_v61  ;;  %v1898_v3 = vmul.f32 %v10272_v48, %v1897_v22 }
 0x256   : > { %v10280_v54 = vpop.eup %10279  ;;  %v1778_v18 = vmul.f32 0.6931472, %v10278_v41  ;;  %vm2309_vm4 = vcmp.gt.f32.partialorder %v12614_v24, 20.0  ;;  %v1906_v1 = vadd.f32 1.0, %v1905_v50  ;;  %vm2310_vm5 = vcmp.gt.f32.partialorder %v12617_v27, 20.0 }
 0x257   : > { %v1775_v45 = vsel %vm12685_vm11, %v1772_v53, %v1769_v40  ;;  %v1911_v33 = vadd.f32 1.0, %v10280_v54  ;;  %v1914_v56 = vmul.f32 -0.5, %v10280_v54  ;;  %v2555_v19 = vpack.c.bf16 %v2498_v29, %v2497_v9  ;;  %2459 = vst [vmem:[#allocation2 + $0x30] sm:$0xff] %v2427_v0  ;;  %v12738_v9 = vpop.f32.mrf.mxu2 }
 0x258   : > { %v2231_v35 = vmul.f32 0.01, %v1775_v45  ;;  %v1784_v6 = vsel %vm12689_vm14, %v1781_v49, %v1778_v18  ;;  %vm12721_vm10 = vcmp.lt.f32.partialorder %v1908_v7, 0.0004427343  ;;  %v10282_v48 = vpop.eup %10281  ;;  %v1917_v53 = vand.u32 2147483647, %v10280_v54 }
 0x259   : > { %v2232_v63 = vmul.f32 0.01, %v1784_v6  ;;  %10285 = vlog2.f32 %v1911_v33  ;;  %v1915_v59 = vadd.f32 1.0, %v1914_v56  ;;  %9082 = vmatmul.msk.bf16.gmra.mxu0 %vm3106_vm13, %v12327_v15  ;;  %9088 = vmatmul.msk.bf16.gmra.mxu1 %vm3106_vm13, %v12327_v15  ;;  %2587 = vst [vmem:[#allocation2 + $0x130] sm:$0xff] %v2555_v19  ;;  %v1895_v50 = vmul.f32 0.6931472, %v10282_v48  ;;  %v12740_v15 = vpop.f32.mrf.mxu3 }
 0x25a   : > { %v10284_v22 = vpop.eup %10283  ;;  %v2359_v23 = vsel %vm2295_vm15, %v12595_v5, %v2231_v35  ;;  %10287 = vpow2.f32 %v1575_v26  ;;  %v12733_v2 = vmul.f32 100.0, %v12683_v60  ;;  %v1907_v41 = vmul.f32 %v10274_v42, %v1906_v1  ;;  %v12745_v5 = vld [vmem:[%s16314_s2 + $0x10] sm:$0xff]  ;;  %v12778_v19 = vpop.f32.mrf.mxu0 }
 0x25b   : > { %v2499_v52 = vmul.f32 %v2359_v23, %v2359_v23  ;;  %v2360_v49 = vsel %vm2296_vm3, %v12597_v58, %v2232_v63  ;;  %v1904_v7 = vmul.f32 0.6931472, %v10284_v22  ;;  %9094 = vmatmul.msk.bf16.gmra.mxu2 %vm3106_vm13, %v12745_v5  ;;  %9100 = vmatmul.msk.bf16.gmra.mxu3 %vm3106_vm13, %v12745_v5  ;;  %v1901_v58 = vsel %vm12709_vm9, %v1898_v3, %v1895_v50 }
 0x25c   : > { %v2428_v17 = vpack.c.bf16 %v2360_v49, %v2359_v23  ;;  %v2500_v44 = vmul.f32 %v2360_v49, %v2360_v49  ;;  %v1916_v26 = vmul.f32 %v10280_v54, %v1915_v59  ;;  %v2245_v42 = vmul.f32 0.01, %v1901_v58 }
 0x25d   : > { %v1910_v61 = vsel %vm12721_vm10, %v1907_v41, %v1904_v7  ;;  %vm12755_vm12 = vcmp.lt.f32.partialorder %v1917_v53, 0.0004427343  ;;  %v1493_v0 = vmin.f32 %v12733_v2, 20.0  ;;  %v12762_v45 = vadd.f32 %v12631_v43, %v12674_v57  ;;  %v12780_v43 = vpop.f32.mrf.mxu1 }
 0x25e   : > { %v2556_v29 = vpack.c.bf16 %v2500_v44, %v2499_v52  ;;  %2460 = vst [vmem:[#allocation2 + $0x38] sm:$0xff] %v2428_v17  ;;  %v2246_v18 = vmul.f32 0.01, %v1910_v61  ;;  %v12766_v31 = vadd.f32 %v12639_v32, %v12696_v34  ;;  %v2373_v3 = vsel %vm2309_vm4, %v12607_v51, %v2245_v42 }
 0x25f   : > { %v10286_v54 = vpop.eup %10285  ;;  %v1601_v1 = vmul.f32 1.442695, %v1493_v0  ;;  %v12773_v33 = vadd.f32 %v12643_v47, %v12698_v14  ;;  %v12776_v56 = vadd.f32 %v12647_v30, %v1137_v46  ;;  %v2513_v32 = vmul.f32 %v2373_v3, %v2373_v3  ;;  %v12800_v22 = vpop.f32.mrf.mxu2 }
 0x260   : > { %v10288_v57 = vpop.eup %10287  ;;  %2588 = vst [vmem:[#allocation2 + $0x138] sm:$0xff] %v2556_v29  ;;  %v2374_v24 = vsel %vm2310_vm5, %v12609_v28, %v2246_v18  ;;  %v1913_v51 = vmul.f32 0.6931472, %v10286_v54  ;;  %v12786_v34 = vmul.f32 100.0, %v12762_v45  ;;  %v12792_v28 = vmul.f32 100.0, %v12766_v31 }
 0x261   : > { %v2435_v47 = vpack.c.bf16 %v2374_v24, %v2373_v3  ;;  %v2514_v14 = vmul.f32 %v2374_v24, %v2374_v24  ;;  %v1920_v35 = vadd.f32 1.0, %v10288_v57  ;;  %v1923_v30 = vmul.f32 -0.5, %v10288_v57  ;;  %v12802_v23 = vpop.f32.mrf.mxu3 }
 0x262   : > { %v1919_v46 = vsel %vm12755_vm12, %v1916_v26, %v1913_v51  ;;  %10289 = vpow2.f32 %v1601_v1  ;;  %v1494_v6 = vmin.f32 %v12786_v34, 20.0  ;;  %v12795_v59 = vmul.f32 100.0, %v12773_v33  ;;  %v12810_v17 = vpop.f32.mrf.mxu0 }
 0x263   : > { %2467 = vst [vmem:[#allocation2 + $0x70] sm:$0xff] %v2435_v47  ;;  %v2563_v13 = vpack.c.bf16 %v2514_v14, %v2513_v32  ;;  %10291 = vlog2.f32 %v1920_v35  ;;  %v2247_v48 = vmul.f32 0.01, %v1919_v46  ;;  %v1924_v63 = vadd.f32 1.0, %v1923_v30 }
 0x264   : > { %v1603_v27 = vmul.f32 1.442695, %v1494_v6  ;;  %v12798_v53 = vmul.f32 100.0, %v12776_v56  ;;  %v1318_v50 = vmul.f32 %v12552_v55, %v12440_v25  ;;  %v1495_v52 = vmin.f32 %v12792_v28, 20.0 }
 0x265   : > { %2595 = vst [vmem:[#allocation2 + $0x170] sm:$0xff] %v2563_v13  ;;  %vm2311_vm11 = vcmp.gt.f32.partialorder %v12650_v8, 20.0  ;;  %v1926_v49 = vand.u32 2147483647, %v10288_v57  ;;  %v1496_v7 = vmin.f32 %v12795_v59, 20.0  ;;  %v12812_v44 = vpop.f32.mrf.mxu1  ;;  %v12820_v55 = vadd.f32 %v12559_v62, %v12738_v9  ;;  %v12836_v9 = vld [vmem:[%s16314_s2 + $0x18] sm:$0xff] }
 0x266   : > { %10293 = vpow2.f32 %v1603_v27  ;;  %v1509_v41 = vmin.f32 %v12798_v53, 20.0  ;;  %v2375_v26 = vsel %vm2311_vm11, %v12633_v16, %v2247_v48  ;;  %v1605_v42 = vmul.f32 1.442695, %v1495_v52 }
 0x267   : > { %v12816_v25 = vadd.f32 %v1318_v50, %v12713_v11  ;;  %v1925_v61 = vmul.f32 %v10288_v57, %v1924_v63  ;;  %v1607_v29 = vmul.f32 1.442695, %v1496_v7  ;;  %vm1927_vm14 = vcmp.lt.f32.partialorder %v1926_v49, 0.0004427343  ;;  %v12843_v47 = vpop.f32.mrf.mxu2 }
 0x268   : > { %v10290_v58 = vpop.eup %10289  ;;  %10295 = vpow2.f32 %v1605_v42  ;;  %v1633_v18 = vmul.f32 1.442695, %v1509_v41  ;;  %vm2312_vm15 = vcmp.gt.f32.partialorder %v12666_v36, 20.0  ;;  %v12831_v62 = vmul.f32 100.0, %v12820_v55 }
 0x269   : > { %v10292_v8 = vpop.eup %10291  ;;  %v2037_v40 = vadd.f32 1.0, %v10290_v58  ;;  %v2040_v0 = vmul.f32 -0.5, %v10290_v58  ;;  %9083 = vmatmul.msk.bf16.gmra.mxu0 %vm3106_vm13, %v12403_v39  ;;  %9089 = vmatmul.msk.bf16.gmra.mxu1 %vm3106_vm13, %v12403_v39  ;;  %v12827_v11 = vmul.f32 100.0, %v12816_v25  ;;  %v2043_v3 = vand.u32 2147483647, %v10290_v58  ;;  %v12845_v14 = vpop.f32.mrf.mxu3 }
 0x26a   : > { %v1922_v16 = vmul.f32 0.6931472, %v10292_v8  ;;  %v2515_v57 = vmul.f32 %v2375_v26, %v2375_v26  ;;  %v1511_v46 = vmin.f32 %v12831_v62, 20.0  ;;  %vm2325_vm3 = vcmp.gt.f32.partialorder %v12733_v2, 20.0  ;;  %v12856_v48 = vpop.f32.mrf.mxu0 }
 0x26b   : > { %10297 = vlog2.f32 %v2037_v40  ;;  %9095 = vmatmul.msk.bf16.gmra.mxu2 %vm3106_vm13, %v12836_v9  ;;  %9101 = vmatmul.msk.bf16.gmra.mxu3 %vm3106_vm13, %v12836_v9  ;;  %v1510_v1 = vmin.f32 %v12827_v11, 20.0  ;;  %v2041_v24 = vadd.f32 1.0, %v2040_v0  ;;  %v12854_v13 = vadd.f32 %v12562_v4, %v12740_v15 }
 0x26c   : > { %v10294_v39 = vpop.eup %10293  ;;  %v1928_v54 = vsel %vm1927_vm14, %v1925_v61, %v1922_v16  ;;  %10299 = vpow2.f32 %v1607_v29  ;;  %vm12860_vm9 = vcmp.lt.f32.partialorder %v2043_v3, 0.0004427343  ;;  %vm2326_vm4 = vcmp.gt.f32.partialorder %v12786_v34, 20.0 }
 0x26d   : > { %v2248_v32 = vmul.f32 0.01, %v1928_v54  ;;  %v2046_v51 = vadd.f32 1.0, %v10294_v39  ;;  %v2049_v35 = vmul.f32 -0.5, %v10294_v39  ;;  %10301 = vpow2.f32 %v1633_v18  ;;  %v12858_v27 = vpop.f32.mrf.mxu1 }
 0x26e   : > { %v1635_v30 = vmul.f32 1.442695, %v1510_v1  ;;  %v10296_v63 = vpop.eup %10295  ;;  %v2042_v36 = vmul.f32 %v10290_v58, %v2041_v24  ;;  %v2052_v7 = vand.u32 2147483647, %v10294_v39  ;;  %v1637_v40 = vmul.f32 1.442695, %v1511_v46 }
 0x26f   : > { %v2376_v6 = vsel %vm2312_vm15, %v12635_v12, %v2248_v32  ;;  %10303 = vlog2.f32 %v2046_v51  ;;  %v2055_v41 = vadd.f32 1.0, %v10296_v63  ;;  %v2058_v42 = vmul.f32 -0.5, %v10296_v63  ;;  %v12874_v24 = vpop.f32.mrf.mxu2 }
 0x270   : > { %v2436_v50 = vpack.c.bf16 %v2376_v6, %v2375_v26  ;;  %v2516_v52 = vmul.f32 %v2376_v6, %v2376_v6  ;;  %10305 = vpow2.f32 %v1635_v30  ;;  %v2050_v61 = vadd.f32 1.0, %v2049_v35 }
 0x271   : > { %v10298_v12 = vpop.eup %10297  ;;  %10307 = vlog2.f32 %v2055_v41  ;;  %v2059_v26 = vadd.f32 1.0, %v2058_v42  ;;  %v2061_v0 = vand.u32 2147483647, %v10296_v63  ;;  %vm12869_vm5 = vcmp.lt.f32.partialorder %v2052_v7, 0.0004427343  ;;  %v12876_v51 = vpop.f32.mrf.mxu3 }
 0x272   : > { %v10300_v8 = vpop.eup %10299  ;;  %2468 = vst [vmem:[#allocation2 + $0x78] sm:$0xff] %v2436_v50  ;;  %v2564_v4 = vpack.c.bf16 %v2516_v52, %v2515_v57  ;;  %v2039_v15 = vmul.f32 0.6931472, %v10298_v12  ;;  %10309 = vpow2.f32 %v1637_v40  ;;  %v2051_v46 = vmul.f32 %v10294_v39, %v2050_v61 }
 0x273   : > { %v2064_v29 = vadd.f32 1.0, %v10300_v8  ;;  %v12865_v16 = vpop.eup %10301  ;;  %v2067_v18 = vmul.f32 -0.5, %v10300_v8  ;;  %v2070_v54 = vand.u32 2147483647, %v10300_v8  ;;  %vm2327_vm10 = vcmp.gt.f32.partialorder %v12792_v28, 20.0 }
 0x274   : > { %2596 = vst [vmem:[#allocation2 + $0x178] sm:$0xff] %v2564_v4  ;;  %v2045_v58 = vsel %vm12860_vm9, %v2042_v36, %v2039_v15  ;;  %v2181_v32 = vadd.f32 1.0, %v12865_v16  ;;  %v2184_v50 = vmul.f32 -0.5, %v12865_v16  ;;  %v12887_v12 = vmul.f32 100.0, %v12854_v13  ;;  %v12889_v36 = vpop.f32.mrf.mxu0 }
 0x275   : > { %v10304_v3 = vpop.eup %10303  ;;  %v2261_v1 = vmul.f32 0.01, %v2045_v58  ;;  %10311 = vlog2.f32 %v2064_v29  ;;  %v2068_v6 = vadd.f32 1.0, %v2067_v18  ;;  %v12891_v7 = vpop.f32.mrf.mxu1  ;;  %v2060_v41 = vmul.f32 %v10296_v63, %v2059_v26 }
 0x276   : > { %v12878_v35 = vpop.eup %10305  ;;  %v2048_v30 = vmul.f32 0.6931472, %v10304_v3  ;;  %10313 = vlog2.f32 %v2181_v32  ;;  %vm12895_vm12 = vcmp.lt.f32.partialorder %v2061_v0, 0.0004427343  ;;  %vm12899_vm11 = vcmp.lt.f32.partialorder %v2070_v54, 0.0004427343 }
 0x277   : > { %v2389_v52 = vsel %vm2325_vm3, %v12683_v60, %v2261_v1  ;;  %v2190_v49 = vadd.f32 1.0, %v12878_v35  ;;  %vm2328_vm14 = vcmp.gt.f32.partialorder %v12795_v59, 20.0  ;;  %v10308_v2 = vpop.eup %10307  ;;  %v2185_v15 = vadd.f32 1.0, %v2184_v50  ;;  %v12932_v50 = vpop.f32.mrf.mxu2 }
 0x278   : > { %v2054_v39 = vsel %vm12869_vm5, %v2051_v46, %v2048_v30  ;;  %v2193_v61 = vmul.f32 -0.5, %v12878_v35  ;;  %v12909_v63 = vpop.eup %10309  ;;  %v2529_v40 = vmul.f32 %v2389_v52, %v2389_v52  ;;  %v2057_v26 = vmul.f32 0.6931472, %v10308_v2 }
 0x279   : > { %v2262_v4 = vmul.f32 0.01, %v2054_v39  ;;  %10315 = vlog2.f32 %v2190_v49  ;;  %9084 = vmatmul.msk.bf16.gmra.mxu0 %vm3106_vm13, %v12478_v20  ;;  %9090 = vmatmul.msk.bf16.gmra.mxu1 %vm3106_vm13, %v12478_v20  ;;  %v2069_v0 = vmul.f32 %v10300_v8, %v2068_v6  ;;  %v2187_v29 = vand.u32 2147483647, %v12865_v16  ;;  %v12921_v20 = vld [vmem:[%s16314_s2 + $0x20] sm:$0xff]  ;;  %v12934_v49 = vpop.f32.mrf.mxu3 }
 0x27a   : > { %vm2341_vm15 = vcmp.gt.f32.partialorder %v12798_v53, 20.0  ;;  %v2194_v54 = vadd.f32 1.0, %v2193_v61  ;;  %v2199_v3 = vadd.f32 1.0, %v12909_v63  ;;  %v1512_v1 = vmin.f32 %v12887_v12, 20.0 }
 0x27b   : > { %v10312_v58 = vpop.eup %10311  ;;  %v2390_v18 = vsel %vm2326_vm4, %v12762_v45, %v2262_v4  ;;  %9096 = vmatmul.msk.bf16.gmra.mxu2 %vm3106_vm13, %v12921_v20  ;;  %9102 = vmatmul.msk.bf16.gmra.mxu3 %vm3106_vm13, %v12921_v20  ;;  %v2063_v45 = vsel %vm12895_vm12, %v2060_v41, %v2057_v26  ;;  %vm2342_vm3 = vcmp.gt.f32.partialorder %v12827_v11, 20.0  ;;  %v2186_v46 = vmul.f32 %v12865_v16, %v2185_v15 }
 0x27c   : > { %v2443_v8 = vpack.c.bf16 %v2390_v18, %v2389_v52  ;;  %v2530_v57 = vmul.f32 %v2390_v18, %v2390_v18  ;;  %v2066_v34 = vmul.f32 0.6931472, %v10312_v58  ;;  %v10314_v32 = vpop.eup %10313  ;;  %v2263_v30 = vmul.f32 0.01, %v2063_v45  ;;  %v12942_v61 = vpop.f32.mrf.mxu0 }
 0x27d   : > { %v2196_v6 = vand.u32 2147483647, %v12878_v35  ;;  %10317 = vlog2.f32 %v2199_v3  ;;  %v2183_v41 = vmul.f32 0.6931472, %v10314_v32  ;;  %v2202_v42 = vmul.f32 -0.5, %v12909_v63  ;;  %v12944_v26 = vpop.f32.mrf.mxu1 }
 0x27e   : > { %2475 = vst [vmem:[#allocation2 + $0xb0] sm:$0xff] %v2443_v8  ;;  %v2571_v52 = vpack.c.bf16 %v2530_v57, %v2529_v40  ;;  %v2072_v39 = vsel %vm12899_vm11, %v2069_v0, %v2066_v34  ;;  %v2391_v16 = vsel %vm2327_vm10, %v12766_v31, %v2263_v30  ;;  %vm2188_vm9 = vcmp.lt.f32.partialorder %v2187_v29, 0.0004427343  ;;  %v2638_v31 = vld [vmem:[#allocation2 + $0x230] sm:$0x11] }
 0x27f   : > { %v10316_v2 = vpop.eup %10315  ;;  %v2264_v4 = vmul.f32 0.01, %v2072_v39  ;;  %v1639_v15 = vmul.f32 1.442695, %v1512_v1  ;;  %v2531_v40 = vmul.f32 %v2391_v16, %v2391_v16  ;;  %v2189_v58 = vsel %vm2188_vm9, %v2186_v46, %v2183_v41 }
 0x280   : > { %2603 = vst [vmem:[#allocation2 + $0x1b0] sm:$0xff] %v2571_v52  ;;  %v2192_v60 = vmul.f32 0.6931472, %v10316_v2  ;;  %v2195_v0 = vmul.f32 %v12878_v35, %v2194_v54  ;;  %v2277_v3 = vmul.f32 0.01, %v2189_v58  ;;  %v2203_v8 = vadd.f32 1.0, %v2202_v42 }
 0x281   : > { %v2392_v18 = vsel %vm2328_vm14, %v12773_v33, %v2264_v4  ;;  %vm2197_vm4 = vcmp.lt.f32.partialorder %v2196_v6, 0.0004427343  ;;  %10319 = vpow2.f32 %v1639_v15  ;;  %v2205_v35 = vand.u32 2147483647, %v12909_v63  ;;  %v2641_v54 = vld [vmem:[#allocation2 + $0x238] sm:$0x11]  ;;  %v12959_v6 = vpop.f32.mrf.mxu2  ;;  %v12961_v53 = vpop.f32.mrf.mxu3 }
 0x282   : > { %v2444_v28 = vpack.c.bf16 %v2392_v18, %v2391_v16  ;;  %v2532_v29 = vmul.f32 %v2392_v18, %v2392_v18  ;;  %v2198_v1 = vsel %vm2197_vm4, %v2195_v0, %v2192_v60  ;;  %v2405_v45 = vsel %vm2341_vm15, %v12776_v56, %v2277_v3 }
 0x283   : > { %v10318_v57 = vpop.eup %10317  ;;  %v2278_v34 = vmul.f32 0.01, %v2198_v1  ;;  %v2545_v33 = vmul.f32 %v2405_v45, %v2405_v45  ;;  %v2639_v30 = vsel %vm11615_vm1, 1065369472, %v2638_v31  ;;  %v2204_v39 = vmul.f32 %v12909_v63, %v2203_v8  ;;  %v12973_v63 = vld [vmem:[%s16314_s2 + $0x28] sm:$0xff] }
 0x284   : > { %2476 = vst [vmem:[#allocation2 + $0xb8] sm:$0xff] %v2444_v28  ;;  %v2572_v59 = vpack.c.bf16 %v2532_v29, %v2531_v40  ;;  %v2201_v32 = vmul.f32 0.6931472, %v10318_v57  ;;  %v2642_v41 = vsel %vm11615_vm1, 1065369472, %v2641_v54  ;;  %v12966_v2 = vpop.f32.mrf.mxu0  ;;  %vm2343_vm10 = vcmp.gt.f32.partialorder %v12831_v62, 20.0 }
 0x285   : > { %v2406_v46 = vsel %vm2342_vm3, %v12816_v25, %v2278_v34  ;;  %2640 = vst [vmem:[#allocation2 + $0x230] sm:$0x11] %v2639_v30  ;;  %vm2206_vm5 = vcmp.lt.f32.partialorder %v2205_v35, 0.0004427343  ;;  %v12968_v16 = vpop.f32.mrf.mxu1  ;;  %vm2344_vm11 = vcmp.gt.f32.partialorder %v12887_v12, 20.0 }
 0x286   : > { %2604 = vst [vmem:[#allocation2 + $0x1b8] sm:$0xff] %v2572_v59  ;;  %v2451_v56 = vpack.c.bf16 %v2406_v46, %v2405_v45  ;;  %v2546_v52 = vmul.f32 %v2406_v46, %v2406_v46  ;;  %v2207_v11 = vsel %vm2206_vm5, %v2204_v39, %v2201_v32  ;;  %v8978_v12 = vld [vmem:[#allocation2 + $0x130] sm:$0xf] }
 0x287   : > { %v10320_v42 = vpop.eup %10319  ;;  %2643 = vst [vmem:[#allocation2 + $0x238] sm:$0x11] %v2642_v41  ;;  %v2279_v40 = vmul.f32 0.01, %v2207_v11  ;;  %v9882_v11 = vld [vmem:[#allocation2 + $0x1b4] sm:$0xf] }
 0x288   : > { %2483 = vst [vmem:[#allocation2 + $0xf0] sm:$0xff] %v2451_v56  ;;  %v2579_v25 = vpack.c.bf16 %v2546_v52, %v2545_v33  ;;  %v2208_v4 = vadd.f32 1.0, %v10320_v42  ;;  %v2211_v15 = vmul.f32 -0.5, %v10320_v42  ;;  %v2214_v1 = vand.u32 2147483647, %v10320_v42 }
 0x289   : > { %9085 = vmatmul.msk.bf16.gmra.mxu0 %vm3106_vm13, %v12973_v63  ;;  %9091 = vmatmul.msk.bf16.gmra.mxu1 %vm3106_vm13, %v12973_v63  ;;  %v12985_v28 = vpop.f32.mrf.mxu2  ;;  %v12987_v29 = vpop.f32.mrf.mxu3  ;;  %v2407_v54 = vsel %vm2343_vm10, %v12820_v55, %v2279_v40  ;;  %v9042_v33 = vld [vmem:[#allocation2 + $0x1b0] sm:$0xf] }
 0x28a   : > { %2611 = vst [vmem:[#allocation2 + $0x1f0] sm:$0xff] %v2579_v25  ;;  %10321 = vlog2.f32 %v2208_v4  ;;  %v2212_v58 = vadd.f32 1.0, %v2211_v15  ;;  %vm2215_vm12 = vcmp.lt.f32.partialorder %v2214_v1, 0.0004427343 }
 0x28b   : > { %9097 = vmatmul.msk.bf16.gmra.mxu2 %vm3106_vm13, %v12973_v63  ;;  %9103 = vmatmul.msk.bf16.gmra.mxu3 %vm3106_vm13, %v12973_v63 }
 0x28c   : > { %v2714_v60 = vld [vmem:[#allocation2 + $0x230] sm:$0x11]  ;;  %v12990_v45 = vpop.f32.mrf.mxu0  ;;  %v2213_v59 = vmul.f32 %v10320_v42, %v2212_v58 }
 0x28d   : > { %v5175_v0 = vld [vmem:[#allocation2 + $0x230] sm:$0x11]  ;;  %v2958_v18 = vunpack.c.l.b16 %v2714_v60  ;;  %v2959_v31 = vunpack.c.h.b16 %v2714_v60  ;;  %v12992_v34 = vpop.f32.mrf.mxu1 }
 0x28e   : > { %v5176_v3 = vsel %vm11615_vm1, 1065369472, %v5175_v0  ;;  %v2715_v32 = vld [vmem:[#allocation2 + $0x238] sm:$0x11]  ;;  %v2547_v0 = vmul.f32 %v2407_v54, %v2407_v54 }
 0x28f   : > { %5177 = vst [vmem:[#allocation2 + $0x230] sm:$0x11] %v5176_v3  ;;  %v3038_v8 = vpack.c.b16 %v2958_v18, %v2958_v18  ;;  %v3039_v57 = vpack.c.b16 %v2959_v31, %v2959_v31  ;;  %v5178_v30 = vld [vmem:[#allocation2 + $0x238] sm:$0x11]  ;;  %v2960_v41 = vunpack.c.l.b16 %v2715_v32  ;;  %v2961_v15 = vunpack.c.h.b16 %v2715_v32 }
 0x290   : > { %v10322_v35 = vpop.eup %10321  ;;  %v5179_v4 = vsel %vm11615_vm1, 1065369472, %v5178_v30 }
 0x291   : > { %v2210_v46 = vmul.f32 0.6931472, %v10322_v35  ;;  %v3165_v56 = vand.u32 %v11665_v21, %v3038_v8  ;;  %v3168_v52 = vand.u32 %v11665_v21, %v3039_v57  ;;  %v9890_v39 = vld [vmem:[#allocation2 + $0x1ec] sm:$0xf0]  ;;  %v9044_v62 = vld [vmem:[#allocation2 + $0x1f0] sm:$0xf0]  ;;  %v3040_v40 = vpack.c.b16 %v2960_v41, %v2960_v41  ;;  %v13001_v3 = vpop.f32.mrf.mxu2  ;;  %v13003_v31 = vpop.f32.mrf.mxu3 }
 0x292   : > { %v9043_v25 = vor.u32 %v9890_v39, %v9042_v33  ;;  %v9047_v42 = vor.u32 %v9882_v11, %v9044_v62  ;;  %5180 = vst [vmem:[#allocation2 + $0x238] sm:$0x11] %v5179_v4  ;;  %v3041_v60 = vpack.c.b16 %v2961_v15, %v2961_v15  ;;  %v9874_v57 = vld [vmem:[#allocation2 + $0x16c] sm:$0xf0]  ;;  %v8980_v35 = vld [vmem:[#allocation2 + $0x170] sm:$0xf0] }
 0x293   : > { %v2216_v55 = vsel %vm2215_vm12, %v2213_v59, %v2210_v46  ;;  %3647 = vmatpush.bf16.msrb.mxu0 %v3165_v56  ;;  %3686 = vmatpush.bf16.msrb.mxu1 %v3168_v52  ;;  %v3171_v18 = vand.u32 %v11665_v21, %v3040_v40  ;;  %v9866_v46 = vld [vmem:[#allocation2 + $0x134] sm:$0xf]  ;;  %v8979_v52 = vor.u32 %v9874_v57, %v8978_v12  ;;  %v9858_v39 = vld [vmem:[#allocation2 + $0xec] sm:$0xf0] }
 0x294   : > { %v2280_v58 = vmul.f32 0.01, %v2216_v55  ;;  %v3174_v8 = vand.u32 %v11665_v21, %v3041_v60  ;;  %v13007_v32 = vpop.f32.mrf.mxu0  ;;  %v8916_v62 = vld [vmem:[#allocation2 + $0xf0] sm:$0xf0]  ;;  %v3800_v55 = vmul.f32 %v12942_v61, %v12778_v19  ;;  %v9842_v40 = vld [vmem:[#allocation2 + $0x6c] sm:$0xf0] }
 0x295   : > { %v13009_v30 = vpop.f32.mrf.mxu1  ;;  %3725 = vmatpush.bf16.msrb.mxu2 %v3171_v18  ;;  %v9850_v41 = vld [vmem:[#allocation2 + $0xb4] sm:$0xf]  ;;  %v9050_v61 = vld [vmem:[#allocation2 + $0x1b8] sm:$0xf] }
 0x296   : > { %v2408_v1 = vsel %vm2344_vm11, %v12854_v13, %v2280_v58  ;;  %3764 = vmatpush.bf16.msrb.mxu3 %v3174_v8  ;;  %v8983_v13 = vor.u32 %v9866_v46, %v8980_v35  ;;  %v8919_v11 = vor.u32 %v9850_v41, %v8916_v62  ;;  %v8852_v58 = vld [vmem:[#allocation2 + $0x70] sm:$0xf0]  ;;  %v3816_v41 = vmul.f32 %v12966_v2, %v12810_v17 }
 0x297   : > { %v2452_v59 = vpack.c.bf16 %v2408_v1, %v2407_v54  ;;  %v2548_v33 = vmul.f32 %v2408_v1, %v2408_v1  ;;  %3648 = vmatpush.bf16.msrb.mxu0 %v9043_v25  ;;  %3687 = vmatpush.bf16.msrb.mxu1 %v9047_v42  ;;  %v8914_v54 = vld [vmem:[#allocation2 + $0xb0] sm:$0xf]  ;;  %v3801_v42 = vmul.f32 %v12944_v26, %v12780_v43  ;;  %v9834_v8 = vld [vmem:[#allocation2 + $0x34] sm:$0xf]  ;;  %v9883_v43 = vld [vmem:[#allocation2 + $0x1bc] sm:$0xf] }
 0x298   : > { %v8915_v25 = vor.u32 %v9858_v39, %v8914_v54  ;;  %v8850_v1 = vld [vmem:[#allocation2 + $0x30] sm:$0xf]  ;;  %v8855_v35 = vor.u32 %v9834_v8, %v8852_v58  ;;  %v8988_v39 = vld [vmem:[#allocation2 + $0x178] sm:$0xf0]  ;;  %v9843_v58 = vld [vmem:[#allocation2 + $0x74] sm:$0xf0] }
 0x299   : > { %2484 = vst [vmem:[#allocation2 + $0xf8] sm:$0xff] %v2452_v59  ;;  %v2580_v56 = vpack.c.bf16 %v2548_v33, %v2547_v0  ;;  %9104 = vmatmul.msk.bf16.vlgmr.msra.gmra.mxu0 %vm3106_vm13, %v12577_v37  ;;  %9110 = vmatmul.msk.bf16.vlgmr.msra.gmra.mxu1 %vm3106_vm13, %v12577_v37  ;;  %v3280_v4 = vpop.f32.mrf.mxu2  ;;  %v3319_v15 = vpop.f32.mrf.mxu3  ;;  %v8851_v26 = vor.u32 %v9842_v40, %v8850_v1 }
 0x29a   : > { %v13024_v60 = vmul.f32 %v3280_v4, %v12932_v50  ;;  %v13027_v0 = vmul.f32 %v3319_v15, %v12934_v49  ;;  %v9867_v15 = vld [vmem:[#allocation2 + $0x13c] sm:$0xf] }
 0x29b   : > { %2612 = vst [vmem:[#allocation2 + $0x1f8] sm:$0xff] %v2580_v56  ;;  %3649 = vmatpush.bf16.msrb.mxu0 %v8979_v52  ;;  %3688 = vmatpush.bf16.msrb.mxu1 %v8983_v13  ;;  %v3802_v56 = vmul.f32 %v12959_v6, %v12800_v22  ;;  %v3803_v52 = vmul.f32 %v12961_v53, %v12802_v23  ;;  %v9875_v13 = vld [vmem:[#allocation2 + $0x174] sm:$0xf0] }
 0x29c   : > { %9116 = vmatmul.msk.bf16.vlgmr.msra.gmra.mxu2 %vm3106_vm13, %v12577_v37  ;;  %9122 = vmatmul.msk.bf16.vlgmr.msra.gmra.mxu3 %vm3106_vm13, %v12577_v37  ;;  %v3205_v37 = vpop.f32.mrf.mxu0  ;;  %v3817_v53 = vmul.f32 %v12968_v16, %v12812_v44  ;;  %v8991_v40 = vor.u32 %v9867_v15, %v8988_v39  ;;  %v8860_v44 = vld [vmem:[#allocation2 + $0x78] sm:$0xf0]  ;;  %v3818_v39 = vmul.f32 %v12985_v28, %v12843_v47 }
 0x29d   : > { %v3244_v18 = vpop.f32.mrf.mxu1  ;;  %v13029_v57 = vadd.f32 %v3800_v55, %v3205_v37 }
 0x29e   : > { %v13031_v19 = vadd.f32 %v3801_v42, %v3244_v18 }
 0x29f   : > { %3650 = vmatpush.bf16.msrb.mxu0 %v8915_v25  ;;  %3689 = vmatpush.bf16.msrb.mxu1 %v8919_v11  ;;  %v13034_v33 = vmul.f32 100.0, %v13029_v57  ;;  %v8986_v25 = vld [vmem:[#allocation2 + $0x138] sm:$0xf] }
 0x2a0   : > { %v13037_v49 = vmul.f32 100.0, %v13031_v19  ;;  %v8987_v42 = vor.u32 %v9875_v13, %v8986_v25  ;;  %v9859_v2 = vld [vmem:[#allocation2 + $0xf4] sm:$0xf0]  ;;  %v8924_v18 = vld [vmem:[#allocation2 + $0xf8] sm:$0xf0] }
 0x2a1   : > { %v3992_v62 = vmin.f32 %v13034_v33, 20.0  ;;  %v3283_v11 = vpop.f32.mrf.mxu2  ;;  %v3322_v4 = vpop.f32.mrf.mxu3  ;;  %vm4824_vm15 = vcmp.gt.f32.partialorder %v13034_v33, 20.0 }
 0x2a2   : > { %v9891_v59 = vld [vmem:[#allocation2 + $0x1f4] sm:$0xf0]  ;;  %v9052_v50 = vld [vmem:[#allocation2 + $0x1f8] sm:$0xf0]  ;;  %v3993_v54 = vmin.f32 %v13037_v49, 20.0  ;;  %v13047_v6 = vadd.f32 %v3802_v56, %v3283_v11  ;;  %v13049_v23 = vadd.f32 %v3803_v52, %v3322_v4  ;;  %v3832_v11 = vmul.f32 %v12990_v45, %v12856_v48 }
 0x2a3   : > { %v9051_v12 = vor.u32 %v9891_v59, %v9050_v61  ;;  %v9055_v46 = vor.u32 %v9883_v43, %v9052_v50  ;;  %3651 = vmatpush.bf16.msrb.mxu0 %v8851_v26  ;;  %3690 = vmatpush.bf16.msrb.mxu1 %v8855_v35  ;;  %v4056_v55 = vmul.f32 1.442695, %v3992_v62  ;;  %v8858_v43 = vld [vmem:[#allocation2 + $0x38] sm:$0xf]  ;;  %v9851_v35 = vld [vmem:[#allocation2 + $0xbc] sm:$0xf]  ;;  %v3819_v62 = vmul.f32 %v12987_v29, %v12845_v14 }
 0x2a4   : > { %v4058_v22 = vmul.f32 1.442695, %v3993_v54  ;;  %v3207_v37 = vpop.f32.mrf.mxu0  ;;  %v13054_v1 = vmul.f32 100.0, %v13047_v6  ;;  %v13057_v8 = vmul.f32 100.0, %v13049_v23  ;;  %v8922_v26 = vld [vmem:[#allocation2 + $0xb8] sm:$0xf]  ;;  %v8859_v59 = vor.u32 %v9843_v58, %v8858_v43 }
 0x2a5   : > { %3726 = vmatpush.bf16.msrb.mxu2 %v9051_v12  ;;  %3765 = vmatpush.bf16.msrb.mxu3 %v9055_v46  ;;  %v3246_v17 = vpop.f32.mrf.mxu1  ;;  %10323 = vpow2.f32 %v4056_v55  ;;  %v13059_v61 = vadd.f32 %v3816_v41, %v3207_v37  ;;  %v8923_v46 = vor.u32 %v9859_v2, %v8922_v26  ;;  %v8927_v56 = vor.u32 %v9851_v35, %v8924_v18  ;;  %v9835_v54 = vld [vmem:[#allocation2 + $0x3c] sm:$0xf] }
 0x2a6   : > { %10325 = vpow2.f32 %v4058_v22  ;;  %v13061_v16 = vadd.f32 %v3817_v53, %v3246_v17  ;;  %v3994_v50 = vmin.f32 %v13054_v1, 20.0  ;;  %v3995_v12 = vmin.f32 %v13057_v8, 20.0 }
 0x2a7   : > { %v13070_v52 = vmul.f32 100.0, %v13059_v61  ;;  %v8863_v4 = vor.u32 %v9835_v54, %v8860_v44  ;;  %v13089_v55 = vmul.f32 %v12992_v34, %v12858_v27  ;;  %v13097_v2 = vmul.f32 %v13001_v3, %v12874_v24 }
 0x2a8   : > { %v13073_v13 = vmul.f32 100.0, %v13061_v16  ;;  %v4060_v41 = vmul.f32 1.442695, %v3994_v50  ;;  %v4062_v25 = vmul.f32 1.442695, %v3995_v12  ;;  %v13101_v18 = vmul.f32 %v13003_v31, %v12876_v51 }
 0x2a9   : > { %3727 = vmatpush.bf16.msrb.mxu2 %v8987_v42  ;;  %3766 = vmatpush.bf16.msrb.mxu3 %v8991_v40  ;;  %v4008_v47 = vmin.f32 %v13070_v52, 20.0  ;;  %v3285_v14 = vpop.f32.mrf.mxu2  ;;  %v3324_v29 = vpop.f32.mrf.mxu3  ;;  %v13105_v43 = vmul.f32 %v13007_v32, %v12889_v36  ;;  %vm4825_vm9 = vcmp.gt.f32.partialorder %v13037_v49, 20.0  ;;  %vm4826_vm10 = vcmp.gt.f32.partialorder %v13054_v1, 20.0 }
 0x2aa   : > { %9105 = vmatmul.msk.bf16.gmra.mxu0 %vm3106_vm13, %v12655_v38  ;;  %9111 = vmatmul.msk.bf16.gmra.mxu1 %vm3106_vm13, %v12655_v38  ;;  %v4009_v28 = vmin.f32 %v13073_v13, 20.0  ;;  %10327 = vpow2.f32 %v4060_v41  ;;  %v13091_v22 = vadd.f32 %v3818_v39, %v3285_v14  ;;  %vm4827_vm12 = vcmp.gt.f32.partialorder %v13057_v8, 20.0 }
 0x2ab   : > { %v10324_v15 = vpop.eup %10323  ;;  %10329 = vpow2.f32 %v4062_v25  ;;  %v4088_v17 = vmul.f32 1.442695, %v4008_v47 }
 0x2ac   : > { %9117 = vmatmul.msk.bf16.gmra.mxu2 %vm3106_vm13, %v12655_v38  ;;  %9123 = vmatmul.msk.bf16.gmra.mxu3 %vm3106_vm13, %v12655_v38  ;;  %v13093_v38 = vadd.f32 %v3819_v62, %v3324_v29  ;;  %v10326_v48 = vpop.eup %10325  ;;  %v4184_v45 = vadd.f32 1.0, %v10324_v15  ;;  %v4187_v53 = vmul.f32 -0.5, %v10324_v15  ;;  %v4190_v42 = vand.u32 2147483647, %v10324_v15  ;;  %v3210_v32 = vpop.f32.mrf.mxu0 }
 0x2ad   : > { %3728 = vmatpush.bf16.msrb.mxu2 %v8923_v46  ;;  %3767 = vmatpush.bf16.msrb.mxu3 %v8927_v56  ;;  %v4193_v40 = vadd.f32 1.0, %v10326_v48  ;;  %v4196_v58 = vmul.f32 -0.5, %v10326_v48  ;;  %v4199_v37 = vand.u32 2147483647, %v10326_v48  ;;  %v4090_v34 = vmul.f32 1.442695, %v4009_v28 }
 0x2ae   : > { %10331 = vlog2.f32 %v4184_v45  ;;  %v4188_v27 = vadd.f32 1.0, %v4187_v53  ;;  %v13108_v44 = vmul.f32 100.0, %v13091_v22  ;;  %vm13110_vm14 = vcmp.lt.f32.partialorder %v4190_v42, 0.0004427343 }
 0x2af   : > { %10333 = vlog2.f32 %v4193_v40  ;;  %v4197_v3 = vadd.f32 1.0, %v4196_v58  ;;  %v13115_v26 = vmul.f32 100.0, %v13093_v38  ;;  %vm13118_vm3 = vcmp.lt.f32.partialorder %v4199_v37, 0.0004427343 }
 0x2b0   : > { %10335 = vpow2.f32 %v4088_v17  ;;  %v10328_v35 = vpop.eup %10327  ;;  %v4189_v51 = vmul.f32 %v10324_v15, %v4188_v27  ;;  %v4010_v31 = vmin.f32 %v13108_v44, 20.0  ;;  %v13127_v14 = vadd.f32 %v3832_v11, %v3210_v32 }
 0x2b1   : > { %3729 = vmatpush.bf16.msrb.mxu2 %v8859_v59  ;;  %3768 = vmatpush.bf16.msrb.mxu3 %v8863_v4  ;;  %10337 = vpow2.f32 %v4090_v34  ;;  %v13123_v59 = vpop.f32.mrf.mxu1  ;;  %v10330_v50 = vpop.eup %10329  ;;  %v4202_v12 = vadd.f32 1.0, %v10328_v35  ;;  %v4205_v46 = vmul.f32 -0.5, %v10328_v35  ;;  %v4208_v56 = vand.u32 2147483647, %v10328_v35 }
 0x2b2   : > { %v4011_v39 = vmin.f32 %v13115_v26, 20.0  ;;  %v4211_v62 = vadd.f32 1.0, %v10330_v50  ;;  %v4214_v54 = vmul.f32 -0.5, %v10330_v50  ;;  %v4217_v41 = vand.u32 2147483647, %v10330_v50 }
 0x2b3   : > { %v4092_v25 = vmul.f32 1.442695, %v4010_v31  ;;  %v4198_v47 = vmul.f32 %v10326_v48, %v4197_v3  ;;  %10339 = vlog2.f32 %v4202_v12  ;;  %v4206_v28 = vadd.f32 1.0, %v4205_v46  ;;  %v13144_v3 = vpop.f32.mrf.mxu2  ;;  %v13146_v31 = vpop.f32.mrf.mxu3 }
 0x2b4   : > { %v10332_v4 = vpop.eup %10331  ;;  %vm13129_vm4 = vcmp.lt.f32.partialorder %v4208_v56, 0.0004427343  ;;  %10341 = vlog2.f32 %v4211_v62  ;;  %v13133_v53 = vmul.f32 1.442695, %v4011_v39  ;;  %v4215_v58 = vadd.f32 1.0, %v4214_v54 }
 0x2b5   : > { %v10334_v29 = vpop.eup %10333  ;;  %v4186_v15 = vmul.f32 0.6931472, %v10332_v4  ;;  %vm13135_vm5 = vcmp.lt.f32.partialorder %v4217_v41, 0.0004427343  ;;  %10343 = vpow2.f32 %v4092_v25  ;;  %v4207_v17 = vmul.f32 %v10328_v35, %v4206_v28 }
 0x2b6   : > { %v10336_v42 = vpop.eup %10335  ;;  %v4195_v40 = vmul.f32 0.6931472, %v10334_v29  ;;  %v4216_v62 = vmul.f32 %v10330_v50, %v4215_v58  ;;  %v13189_v37 = vmul.f32 100.0, %v13127_v14  ;;  %v13214_v28 = vadd.f32 %v13097_v2, %v13144_v3 }
 0x2b7   : > { %v13139_v48 = vpop.eup %10337  ;;  %v4192_v11 = vsel %vm13110_vm14, %v4189_v51, %v4186_v15  ;;  %v4328_v27 = vadd.f32 1.0, %v10336_v42  ;;  %v4331_v34 = vmul.f32 -0.5, %v10336_v42  ;;  %v4334_v35 = vand.u32 2147483647, %v10336_v42 }
 0x2b8   : > { %v4760_v32 = vmul.f32 0.01, %v4192_v11  ;;  %v4201_v24 = vsel %vm13118_vm3, %v4198_v47, %v4195_v40  ;;  %v4337_v51 = vadd.f32 1.0, %v13139_v48  ;;  %v4340_v56 = vmul.f32 -0.5, %v13139_v48 }
 0x2b9   : > { %v4761_v12 = vmul.f32 0.01, %v4201_v24  ;;  %10345 = vlog2.f32 %v4328_v27  ;;  %v4332_v46 = vadd.f32 1.0, %v4331_v34  ;;  %v10340_v39 = vpop.eup %10339  ;;  %v4343_v54 = vand.u32 2147483647, %v13139_v48  ;;  %v13172_v29 = vpop.f32.mrf.mxu1 }
 0x2ba   : > { %9106 = vmatmul.msk.bf16.gmra.mxu0 %vm3106_vm13, %v12745_v5  ;;  %9112 = vmatmul.msk.bf16.gmra.mxu1 %vm3106_vm13, %v12745_v5  ;;  %v4888_v36 = vsel %vm4824_vm15, %v13029_v57, %v4760_v32  ;;  %10347 = vlog2.f32 %v4337_v51  ;;  %v10342_v41 = vpop.eup %10341  ;;  %v4204_v47 = vmul.f32 0.6931472, %v10340_v39  ;;  %vm13168_vm11 = vcmp.lt.f32.partialorder %v4334_v35, 0.0004427343 }
 0x2bb   : > { %v5029_v25 = vmul.f32 %v4888_v36, %v4888_v36  ;;  %v4889_v4 = vsel %vm4825_vm9, %v13031_v19, %v4761_v12  ;;  %v10344_v33 = vpop.eup %10343  ;;  %v4213_v15 = vmul.f32 0.6931472, %v10342_v41  ;;  %v4333_v40 = vmul.f32 %v10336_v42, %v4332_v46  ;;  %v13197_v41 = vpop.f32.mrf.mxu3 }
 0x2bc   : > { %9118 = vmatmul.msk.bf16.gmra.mxu2 %vm3106_vm13, %v12745_v5  ;;  %9124 = vmatmul.msk.bf16.gmra.mxu3 %vm3106_vm13, %v12745_v5  ;;  %v3212_v5 = vpop.f32.mrf.mxu0  ;;  %v4965_v57 = vpack.c.bf16 %v4889_v4, %v4888_v36  ;;  %v5030_v50 = vmul.f32 %v4889_v4, %v4889_v4  ;;  %vm4840_vm14 = vcmp.gt.f32.partialorder %v13070_v52, 20.0  ;;  %v4210_v58 = vsel %vm13129_vm4, %v4207_v17, %v4204_v47 }
 0x2bd   : > { %v4341_v49 = vadd.f32 1.0, %v4340_v56  ;;  %vm4841_vm15 = vcmp.gt.f32.partialorder %v13073_v13, 20.0  ;;  %v4346_v19 = vadd.f32 1.0, %v10344_v33  ;;  %v4349_v11 = vmul.f32 -0.5, %v10344_v33 }
 0x2be   : > { %4997 = vst [vmem:[#allocation2] sm:$0xff] %v4965_v57  ;;  %v5093_v27 = vpack.c.bf16 %v5030_v50, %v5029_v25  ;;  %v4762_v34 = vmul.f32 0.01, %v4210_v58  ;;  %v4219_v32 = vsel %vm13135_vm5, %v4216_v62, %v4213_v15  ;;  %vm13180_vm3 = vcmp.lt.f32.partialorder %v4343_v54, 0.0004427343  ;;  %v13195_v54 = vpop.f32.mrf.mxu2 }
 0x2bf   : > { %v10346_v42 = vpop.eup %10345  ;;  %v4763_v35 = vmul.f32 0.01, %v4219_v32  ;;  %10349 = vlog2.f32 %v4346_v19  ;;  %v4350_v45 = vadd.f32 1.0, %v4349_v11  ;;  %v4352_v17 = vand.u32 2147483647, %v10344_v33 }
 0x2c0   : > { %v10348_v51 = vpop.eup %10347  ;;  %5125 = vst [vmem:[#allocation2 + $0x100] sm:$0xff] %v5093_v27  ;;  %v4890_v12 = vsel %vm4826_vm10, %v13047_v6, %v4762_v34  ;;  %v4330_v46 = vmul.f32 0.6931472, %v10346_v42  ;;  %10351 = vpow2.f32 %v13133_v53  ;;  %v4342_v62 = vmul.f32 %v13139_v48, %v4341_v49 }
 0x2c1   : > { %v5031_v56 = vmul.f32 %v4890_v12, %v4890_v12  ;;  %v4891_v39 = vsel %vm4827_vm12, %v13049_v23, %v4763_v35  ;;  %v4339_v36 = vmul.f32 0.6931472, %v10348_v51  ;;  %v4351_v25 = vmul.f32 %v10344_v33, %v4350_v45 }
 0x2c2   : > { %v4966_v1 = vpack.c.bf16 %v4891_v39, %v4890_v12  ;;  %v5032_v6 = vmul.f32 %v4891_v39, %v4891_v39  ;;  %v4336_v53 = vsel %vm13168_vm11, %v4333_v40, %v4330_v46  ;;  %vm13203_vm9 = vcmp.lt.f32.partialorder %v4352_v17, 0.0004427343 }
 0x2c3   : > { %v4776_v4 = vmul.f32 0.01, %v4336_v53  ;;  %v4345_v47 = vsel %vm13180_vm3, %v4342_v62, %v4339_v36  ;;  %v4024_v23 = vmin.f32 %v13189_v37, 20.0  ;;  %v13210_v50 = vadd.f32 %v13089_v55, %v13123_v59  ;;  %v13228_v55 = vpop.f32.mrf.mxu1  ;;  %v13258_v17 = vpop.f32.mrf.mxu3 }
 0x2c4   : > { %4998 = vst [vmem:[#allocation2 + $0x8] sm:$0xff] %v4966_v1  ;;  %v5094_v48 = vpack.c.bf16 %v5032_v6, %v5031_v56  ;;  %v4777_v57 = vmul.f32 0.01, %v4345_v47  ;;  %v13221_v58 = vadd.f32 %v13101_v18, %v13146_v31  ;;  %v13224_v49 = vadd.f32 %v13105_v43, %v3212_v5  ;;  %v13226_v19 = vpop.f32.mrf.mxu0 }
 0x2c5   : > { %v10350_v33 = vpop.eup %10349  ;;  %v4904_v15 = vsel %vm4840_vm14, %v13059_v61, %v4776_v4  ;;  %v4120_v40 = vmul.f32 1.442695, %v4024_v23  ;;  %v13234_v3 = vmul.f32 100.0, %v13210_v50  ;;  %v13248_v32 = vmul.f32 100.0, %v13214_v28 }
 0x2c6   : > { %v10352_v59 = vpop.eup %10351  ;;  %5126 = vst [vmem:[#allocation2 + $0x108] sm:$0xff] %v5094_v48  ;;  %v5045_v2 = vmul.f32 %v4904_v15, %v4904_v15  ;;  %v4905_v52 = vsel %vm4841_vm15, %v13061_v16, %v4777_v57  ;;  %v4348_v61 = vmul.f32 0.6931472, %v10350_v33  ;;  %v13251_v42 = vmul.f32 100.0, %v13221_v58  ;;  %v13256_v45 = vpop.f32.mrf.mxu2 }
 0x2c7   : > { %v4973_v18 = vpack.c.bf16 %v4905_v52, %v4904_v15  ;;  %v5046_v31 = vmul.f32 %v4905_v52, %v4905_v52  ;;  %v4355_v11 = vadd.f32 1.0, %v10352_v59  ;;  %v4358_v43 = vmul.f32 -0.5, %v10352_v59 }
 0x2c8   : > { %v4354_v5 = vsel %vm13203_vm9, %v4351_v25, %v4348_v61  ;;  %10353 = vpow2.f32 %v4120_v40  ;;  %v4025_v16 = vmin.f32 %v13234_v3, 20.0  ;;  %v13254_v35 = vmul.f32 100.0, %v13224_v49 }
 0x2c9   : > { %5005 = vst [vmem:[#allocation2 + $0x40] sm:$0xff] %v4973_v18  ;;  %v5101_v13 = vpack.c.bf16 %v5046_v31, %v5045_v2  ;;  %10355 = vlog2.f32 %v4355_v11  ;;  %v4778_v27 = vmul.f32 0.01, %v4354_v5  ;;  %v4359_v24 = vadd.f32 1.0, %v4358_v43 }
 0x2ca   : > { %9107 = vmatmul.msk.bf16.gmra.mxu0 %vm3106_vm13, %v12836_v9  ;;  %9113 = vmatmul.msk.bf16.gmra.mxu1 %vm3106_vm13, %v12836_v9  ;;  %v4122_v34 = vmul.f32 1.442695, %v4025_v16  ;;  %v4026_v51 = vmin.f32 %v13248_v32, 20.0  ;;  %vm4842_vm4 = vcmp.gt.f32.partialorder %v13108_v44, 20.0  ;;  %v4361_v12 = vand.u32 2147483647, %v10352_v59 }
 0x2cb   : > { %5133 = vst [vmem:[#allocation2 + $0x140] sm:$0xff] %v5101_v13  ;;  %v4027_v46 = vmin.f32 %v13251_v42, 20.0  ;;  %v4040_v56 = vmin.f32 %v13254_v35, 20.0  ;;  %v13268_v36 = vpop.f32.mrf.mxu1  ;;  %v4906_v1 = vsel %vm4842_vm4, %v13091_v22, %v4778_v27  ;;  %v4360_v53 = vmul.f32 %v10352_v59, %v4359_v24  ;;  %v13288_v52 = vpop.f32.mrf.mxu3 }
 0x2cc   : > { %9119 = vmatmul.msk.bf16.gmra.mxu2 %vm3106_vm13, %v12836_v9  ;;  %9125 = vmatmul.msk.bf16.gmra.mxu3 %vm3106_vm13, %v12836_v9  ;;  %v3849_v9 = vmul.f32 %v13009_v30, %v12891_v7  ;;  %10357 = vpow2.f32 %v4122_v34  ;;  %v13266_v39 = vpop.f32.mrf.mxu0  ;;  %v4124_v6 = vmul.f32 1.442695, %v4026_v51  ;;  %v13276_v30 = vadd.f32 %v13024_v60, %v13195_v54 }
 0x2cd   : > { %v4126_v47 = vmul.f32 1.442695, %v4027_v46  ;;  %v4152_v23 = vmul.f32 1.442695, %v4040_v56  ;;  %vm4362_vm5 = vcmp.lt.f32.partialorder %v4361_v12, 0.0004427343  ;;  %v13301_v24 = vadd.f32 %v13027_v0, %v13197_v41 }
 0x2ce   : > { %v10354_v62 = vpop.eup %10353  ;;  %v13272_v7 = vadd.f32 %v3849_v9, %v13172_v29  ;;  %10359 = vpow2.f32 %v4124_v6  ;;  %vm4843_vm10 = vcmp.gt.f32.partialorder %v13115_v26, 20.0  ;;  %v13283_v22 = vmul.f32 100.0, %v13276_v30  ;;  %v13286_v2 = vpop.f32.mrf.mxu2 }
 0x2cf   : > { %v10356_v44 = vpop.eup %10355  ;;  %v4472_v25 = vadd.f32 1.0, %v10354_v62  ;;  %v4475_v4 = vmul.f32 -0.5, %v10354_v62  ;;  %v5047_v29 = vmul.f32 %v4906_v1, %v4906_v1  ;;  %v4478_v15 = vand.u32 2147483647, %v10354_v62 }
 0x2d0   : > { %v4357_v8 = vmul.f32 0.6931472, %v10356_v44  ;;  %v13279_v48 = vmul.f32 100.0, %v13272_v7  ;;  %v4042_v31 = vmin.f32 %v13283_v22, 20.0  ;;  %vm4856_vm12 = vcmp.gt.f32.partialorder %v13189_v37, 20.0 }
 0x2d1   : > { %10361 = vlog2.f32 %v4472_v25  ;;  %v4476_v61 = vadd.f32 1.0, %v4475_v4  ;;  %vm13303_vm11 = vcmp.lt.f32.partialorder %v4478_v15, 0.0004427343  ;;  %vm4857_vm14 = vcmp.gt.f32.partialorder %v13234_v3, 20.0 }
 0x2d2   : > { %v10358_v60 = vpop.eup %10357  ;;  %v4363_v54 = vsel %vm4362_vm5, %v4360_v53, %v4357_v8  ;;  %10363 = vpow2.f32 %v4126_v47  ;;  %v4041_v57 = vmin.f32 %v13279_v48, 20.0  ;;  %v4156_v41 = vmul.f32 1.442695, %v4042_v31 }
 0x2d3   : > { %v4779_v33 = vmul.f32 0.01, %v4363_v54  ;;  %v4481_v40 = vadd.f32 1.0, %v10358_v60  ;;  %v4484_v59 = vmul.f32 -0.5, %v10358_v60  ;;  %10365 = vpow2.f32 %v4152_v23  ;;  %v13297_v16 = vpop.f32.mrf.mxu1 }
 0x2d4   : > { %v4154_v18 = vmul.f32 1.442695, %v4041_v57  ;;  %v4487_v43 = vand.u32 2147483647, %v10358_v60  ;;  %v13295_v5 = vpop.f32.mrf.mxu0  ;;  %v10360_v13 = vpop.eup %10359  ;;  %v4477_v0 = vmul.f32 %v10354_v62, %v4476_v61  ;;  %vm4858_vm3 = vcmp.gt.f32.partialorder %v13248_v32, 20.0 }
 0x2d5   : > { %v4907_v11 = vsel %vm4843_vm10, %v13093_v38, %v4779_v33  ;;  %10367 = vlog2.f32 %v4481_v40  ;;  %v4485_v38 = vadd.f32 1.0, %v4484_v59  ;;  %v4490_v51 = vadd.f32 1.0, %v10360_v13  ;;  %v13324_v33 = vpop.f32.mrf.mxu3 }
 0x2d6   : > { %v4974_v27 = vpack.c.bf16 %v4907_v11, %v4906_v1  ;;  %v5048_v34 = vmul.f32 %v4907_v11, %v4907_v11  ;;  %10369 = vpow2.f32 %v4154_v18  ;;  %v4493_v12 = vmul.f32 -0.5, %v10360_v13  ;;  %v13322_v57 = vpop.f32.mrf.mxu2 }
 0x2d7   : > { %v10362_v9 = vpop.eup %10361  ;;  %vm13312_vm15 = vcmp.lt.f32.partialorder %v4487_v43, 0.0004427343  ;;  %10371 = vlog2.f32 %v4490_v51  ;;  %v4496_v44 = vand.u32 2147483647, %v10360_v13  ;;  %vm4859_vm4 = vcmp.gt.f32.partialorder %v13251_v42, 20.0 }
 0x2d8   : > { %v10364_v46 = vpop.eup %10363  ;;  %5006 = vst [vmem:[#allocation2 + $0x48] sm:$0xff] %v4974_v27  ;;  %v5102_v56 = vpack.c.bf16 %v5048_v34, %v5047_v29  ;;  %v4474_v1 = vmul.f32 0.6931472, %v10362_v9  ;;  %v4494_v4 = vadd.f32 1.0, %v4493_v12  ;;  %10373 = vpow2.f32 %v4156_v41 }
 0x2d9   : > { %v4499_v53 = vadd.f32 1.0, %v10364_v46  ;;  %v10366_v25 = vpop.eup %10365  ;;  %v4502_v47 = vmul.f32 -0.5, %v10364_v46  ;;  %v4486_v29 = vmul.f32 %v10358_v60, %v4485_v38  ;;  %v4505_v59 = vand.u32 2147483647, %v10364_v46 }
 0x2da   : > { %9108 = vmatmul.msk.bf16.gmra.mxu0 %vm3106_vm13, %v12921_v20  ;;  %9114 = vmatmul.msk.bf16.gmra.mxu1 %vm3106_vm13, %v12921_v20  ;;  %5134 = vst [vmem:[#allocation2 + $0x148] sm:$0xff] %v5102_v56  ;;  %v4480_v62 = vsel %vm13303_vm11, %v4477_v0, %v4474_v1  ;;  %v4616_v54 = vadd.f32 1.0, %v10366_v25  ;;  %v4619_v61 = vmul.f32 -0.5, %v10366_v25  ;;  %v13331_v60 = vmul.f32 100.0, %v13301_v24 }
 0x2db   : > { %v10368_v8 = vpop.eup %10367  ;;  %v4792_v23 = vmul.f32 0.01, %v4480_v62  ;;  %10375 = vlog2.f32 %v4499_v53  ;;  %v13335_v43 = vpop.f32.mrf.mxu1  ;;  %v4495_v34 = vmul.f32 %v10360_v13, %v4494_v4  ;;  %vm13339_vm9 = vcmp.lt.f32.partialorder %v4496_v44, 0.0004427343 }
 0x2dc   : > { %9120 = vmatmul.msk.bf16.gmra.mxu2 %vm3106_vm13, %v12921_v20  ;;  %9126 = vmatmul.msk.bf16.gmra.mxu3 %vm3106_vm13, %v12921_v20  ;;  %v10370_v15 = vpop.eup %10369  ;;  %v4483_v40 = vmul.f32 0.6931472, %v10368_v8  ;;  %v4503_v20 = vadd.f32 1.0, %v4502_v47  ;;  %10377 = vlog2.f32 %v4616_v54  ;;  %v13333_v11 = vpop.f32.mrf.mxu0  ;;  %v4620_v38 = vadd.f32 1.0, %v4619_v61 }
 0x2dd   : > { %v4920_v18 = vsel %vm4856_vm12, %v13127_v14, %v4792_v23  ;;  %v4625_v31 = vadd.f32 1.0, %v10370_v15  ;;  %v4622_v14 = vand.u32 2147483647, %v10366_v25  ;;  %v10372_v37 = vpop.eup %10371  ;;  %v4628_v51 = vmul.f32 -0.5, %v10370_v15 }
 0x2de   : > { %v4489_v27 = vsel %vm13312_vm15, %v4486_v29, %v4483_v40  ;;  %v13344_v12 = vpop.eup %10373  ;;  %v5061_v56 = vmul.f32 %v4920_v18, %v4920_v18  ;;  %v4492_v1 = vmul.f32 0.6931472, %v10372_v37  ;;  %v4504_v0 = vmul.f32 %v10364_v46, %v4503_v20  ;;  %v13363_v20 = vpop.f32.mrf.mxu3 }
 0x2df   : > { %v4793_v26 = vmul.f32 0.01, %v4489_v27  ;;  %10379 = vlog2.f32 %v4625_v31  ;;  %vm13346_vm5 = vcmp.lt.f32.partialorder %v4505_v59, 0.0004427343  ;;  %v4629_v44 = vadd.f32 1.0, %v4628_v51 }
 0x2e0   : > { %v4634_v53 = vadd.f32 1.0, %v13344_v12  ;;  %v4043_v62 = vmin.f32 %v13331_v60, 20.0  ;;  %v4498_v8 = vsel %vm13339_vm9, %v4495_v34, %v4492_v1  ;;  %v4621_v54 = vmul.f32 %v10366_v25, %v4620_v38  ;;  %v5245_v1 = vld [vmem:[#allocation2 + $0x200] sm:$0x11] }
 0x2e1   : > { %v10376_v13 = vpop.eup %10375  ;;  %v4921_v6 = vsel %vm4857_vm14, %v13210_v50, %v4793_v26  ;;  %v4794_v29 = vmul.f32 0.01, %v4498_v8  ;;  %vm13357_vm10 = vcmp.lt.f32.partialorder %v4622_v14, 0.0004427343  ;;  %v4631_v3 = vand.u32 2147483647, %v10370_v15  ;;  %v13361_v50 = vpop.f32.mrf.mxu2 }
 0x2e2   : > { %v4981_v4 = vpack.c.bf16 %v4921_v6, %v4920_v18  ;;  %v5062_v47 = vmul.f32 %v4921_v6, %v4921_v6  ;;  %v4501_v46 = vmul.f32 0.6931472, %v10376_v13  ;;  %v10378_v23 = vpop.eup %10377  ;;  %10381 = vlog2.f32 %v4634_v53  ;;  %v5246_v6 = vld [vmem:[#allocation2 + $0x208] sm:$0x11] }
 0x2e3   : > { %v4618_v18 = vmul.f32 0.6931472, %v10378_v23  ;;  %v4922_v25 = vsel %vm4858_vm3, %v13214_v28, %v4794_v29  ;;  %v4637_v34 = vmul.f32 -0.5, %v13344_v12  ;;  %v4158_v9 = vmul.f32 1.442695, %v4043_v62  ;;  %v13373_v37 = vpop.f32.mrf.mxu1 }
 0x2e4   : > { %5013 = vst [vmem:[#allocation2 + $0x80] sm:$0xff] %v4981_v4  ;;  %v5109_v59 = vpack.c.bf16 %v5062_v47, %v5061_v56  ;;  %v4507_v61 = vsel %vm13346_vm5, %v4504_v0, %v4501_v46  ;;  %v13371_v14 = vpop.f32.mrf.mxu0  ;;  %v5063_v26 = vmul.f32 %v4922_v25, %v4922_v25  ;;  %v4630_v56 = vmul.f32 %v10370_v15, %v4629_v44  ;;  %v7678_v15 = vld [vmem:[#allocation2 + $0x200] sm:$0x11] }
 0x2e5   : > { %v10380_v31 = vpop.eup %10379  ;;  %v4795_v27 = vmul.f32 0.01, %v4507_v61  ;;  %v4624_v38 = vsel %vm13357_vm10, %v4621_v54, %v4618_v18  ;;  %vm4632_vm12 = vcmp.lt.f32.partialorder %v4631_v3, 0.0004427343  ;;  %10383 = vpow2.f32 %v4158_v9 }
 0x2e6   : > { %5141 = vst [vmem:[#allocation2 + $0x180] sm:$0xff] %v5109_v59  ;;  %v4627_v51 = vmul.f32 0.6931472, %v10380_v31  ;;  %v4808_v28 = vmul.f32 0.01, %v4624_v38  ;;  %vm4872_vm11 = vcmp.gt.f32.partialorder %v13254_v35, 20.0  ;;  %v5483_v35 = vunpack.c.l.b16 %v5245_v1 }
 0x2e7   : > { %v4923_v32 = vsel %vm4859_vm4, %v13221_v58, %v4795_v27  ;;  %vm4873_vm14 = vcmp.gt.f32.partialorder %v13279_v48, 20.0  ;;  %v4638_v4 = vadd.f32 1.0, %v4637_v34  ;;  %v5484_v8 = vunpack.c.h.b16 %v5245_v1  ;;  %v13396_v48 = vpop.f32.mrf.mxu3  ;;  %v7681_v34 = vld [vmem:[#allocation2 + $0x208] sm:$0x11] }
 0x2e8   : > { %v4982_v0 = vpack.c.bf16 %v4923_v32, %v4922_v25  ;;  %v5064_v41 = vmul.f32 %v4923_v32, %v4923_v32  ;;  %v4633_v13 = vsel %vm4632_vm12, %v4630_v56, %v4627_v51  ;;  %v4936_v42 = vsel %vm4872_vm11, %v13224_v49, %v4808_v28  ;;  %v10382_v44 = vpop.eup %10381 }
 0x2e9   : > { %v4809_v58 = vmul.f32 0.01, %v4633_v13  ;;  %v5077_v62 = vmul.f32 %v4936_v42, %v4936_v42  ;;  %v7679_v49 = vsel %vm11615_vm1, 1065369472, %v7678_v15  ;;  %v13394_v46 = vpop.f32.mrf.mxu2  ;;  %v5485_v23 = vunpack.c.l.b16 %v5246_v6 }
 0x2ea   : > { %9109 = vmatmul.msk.bf16.gmra.mxu0 %vm3106_vm13, %v12973_v63  ;;  %9115 = vmatmul.msk.bf16.gmra.mxu1 %vm3106_vm13, %v12973_v63  ;;  %5014 = vst [vmem:[#allocation2 + $0x88] sm:$0xff] %v4982_v0  ;;  %v5110_v53 = vpack.c.bf16 %v5064_v41, %v5063_v26  ;;  %v4640_v54 = vand.u32 2147483647, %v13344_v12  ;;  %v5563_v40 = vpack.c.b16 %v5483_v35, %v5483_v35  ;;  %v4636_v59 = vmul.f32 0.6931472, %v10382_v44 }
 0x2eb   : > { %v4937_v47 = vsel %vm4873_vm14, %v13272_v7, %v4809_v58  ;;  %v10384_v3 = vpop.eup %10383  ;;  %7680 = vst [vmem:[#allocation2 + $0x200] sm:$0x11] %v7679_v49  ;;  %v5564_v61 = vpack.c.b16 %v5484_v8, %v5484_v8  ;;  %v13401_v18 = vpop.f32.mrf.mxu1  ;;  %v4639_v25 = vmul.f32 %v13344_v12, %v4638_v4  ;;  %v5565_v51 = vpack.c.b16 %v5485_v23, %v5485_v23  ;;  %v10848_v23 = vld [vmem:[%s16314_s2] sm:$0xff] }
 0x2ec   : > { %9121 = vmatmul.msk.bf16.gmra.mxu2 %vm3106_vm13, %v12973_v63  ;;  %9127 = vmatmul.msk.bf16.gmra.mxu3 %vm3106_vm13, %v12973_v63  ;;  %5142 = vst [vmem:[#allocation2 + $0x188] sm:$0xff] %v5110_v53  ;;  %v4989_v29 = vpack.c.bf16 %v4937_v47, %v4936_v42  ;;  %v5078_v63 = vmul.f32 %v4937_v47, %v4937_v47  ;;  %v13399_v7 = vpop.f32.mrf.mxu0  ;;  %v4643_v27 = vadd.f32 1.0, %v10384_v3  ;;  %v4646_v9 = vmul.f32 -0.5, %v10384_v3 }
 0x2ed   : > { %v5662_v26 = vand.u32 %v5563_v40, %v11665_v21  ;;  %v5665_v38 = vand.u32 %v5564_v61, %v11665_v21  ;;  %vm4641_vm15 = vcmp.lt.f32.partialorder %v4640_v54, 0.0004427343  ;;  %v5668_v32 = vand.u32 %v5565_v51, %v11665_v21  ;;  %v9946_v4 = vld [vmem:[#allocation2 + $0x184] sm:$0xf]  ;;  %v9938_v40 = vld [vmem:[#allocation2 + $0x13c] sm:$0xf0] }
 0x2ee   : > { %5021 = vst [vmem:[#allocation2 + $0xc0] sm:$0xff] %v4989_v29  ;;  %v5117_v31 = vpack.c.bf16 %v5078_v63, %v5077_v62  ;;  %10385 = vlog2.f32 %v4643_v27  ;;  %v4642_v56 = vsel %vm4641_vm15, %v4639_v25, %v4636_v59  ;;  %v7682_v28 = vsel %vm11615_vm1, 1065369472, %v7681_v34  ;;  %v9320_v59 = vld [vmem:[#allocation2 + $0x140] sm:$0xf0] }
 0x2ef   : > { %5712 = vmatpush.bf16.msra.mxu0 %v5662_v26  ;;  %5751 = vmatpush.bf16.msra.mxu1 %v5665_v38  ;;  %v5486_v12 = vunpack.c.h.b16 %v5246_v6  ;;  %7683 = vst [vmem:[#allocation2 + $0x208] sm:$0x11] %v7682_v28  ;;  %v4647_v1 = vadd.f32 1.0, %v4646_v9  ;;  %v13411_v13 = vpop.f32.mrf.mxu3  ;;  %v4810_v15 = vmul.f32 0.01, %v4642_v56  ;;  %vm4874_vm3 = vcmp.gt.f32.partialorder %v13283_v22, 20.0 }
 0x2f0   : > { %5149 = vst [vmem:[#allocation2 + $0x1c0] sm:$0xff] %v5117_v31  ;;  %5790 = vmatpush.bf16.msra.mxu2 %v5668_v32  ;;  %v4649_v42 = vand.u32 2147483647, %v10384_v3  ;;  %v9382_v6 = vld [vmem:[#allocation2 + $0x180] sm:$0xf]  ;;  %vm4875_vm4 = vcmp.gt.f32.partialorder %v13331_v60, 20.0 }
 0x2f1   : > { %v5566_v0 = vpack.c.b16 %v5486_v12, %v5486_v12  ;;  %v13409_v41 = vpop.f32.mrf.mxu2  ;;  %v4648_v47 = vmul.f32 %v10384_v3, %v4647_v1  ;;  %v4938_v29 = vsel %vm4874_vm3, %v13276_v30, %v4810_v15  ;;  %v9318_v31 = vld [vmem:[#allocation2 + $0x100] sm:$0xf]  ;;  %v9930_v30 = vld [vmem:[#allocation2 + $0x104] sm:$0xf] }
 0x2f2   : > { %vm4650_vm9 = vcmp.lt.f32.partialorder %v4649_v42, 0.0004427343  ;;  %v5079_v61 = vmul.f32 %v4938_v29, %v4938_v29  ;;  %v9319_v9 = vor.u32 %v9938_v40, %v9318_v31  ;;  %v9323_v26 = vor.u32 %v9930_v30, %v9320_v59  ;;  %v9254_v1 = vld [vmem:[#allocation2 + $0x80] sm:$0xf] }
 0x2f3   : > { %v5671_v58 = vand.u32 %v5566_v0, %v11665_v21  ;;  %v13416_v53 = vpop.f32.mrf.mxu1  ;;  %v9914_v0 = vld [vmem:[#allocation2 + $0x84] sm:$0xf]  ;;  %v3806_v30 = vmul.f32 %v13394_v46, %v13256_v45 }
 0x2f4   : > { %v13414_v44 = vpop.f32.mrf.mxu0  ;;  %v10386_v62 = vpop.eup %10385  ;;  %v10849_v40 = vld [vmem:[%s16314_s2 + $0x8] sm:$0xff] }
 0x2f5   : > { %v4645_v35 = vmul.f32 0.6931472, %v10386_v62  ;;  %5829 = vmatpush.bf16.msra.mxu3 %v5671_v58  ;;  %v9922_v56 = vld [vmem:[#allocation2 + $0xbc] sm:$0xf0]  ;;  %v9256_v32 = vld [vmem:[#allocation2 + $0xc0] sm:$0xf0]  ;;  %v3804_v62 = vmul.f32 %v13371_v14, %v13226_v19 }
 0x2f6   : > { %v9255_v15 = vor.u32 %v9922_v56, %v9254_v1  ;;  %v9259_v42 = vor.u32 %v9914_v0, %v9256_v32  ;;  %v9192_v58 = vld [vmem:[#allocation2 + $0x40] sm:$0xf0]  ;;  %v3820_v56 = vmul.f32 %v13399_v7, %v13266_v39  ;;  %v9326_v32 = vld [vmem:[#allocation2 + $0x108] sm:$0xf]  ;;  %v9931_v0 = vld [vmem:[#allocation2 + $0x10c] sm:$0xf] }
 0x2f7   : > { %v9954_v49 = vld [vmem:[#allocation2 + $0x1bc] sm:$0xf0]  ;;  %v9384_v8 = vld [vmem:[#allocation2 + $0x1c0] sm:$0xf0]  ;;  %v4651_v22 = vsel %vm4650_vm9, %v4648_v47, %v4645_v35  ;;  %v13430_v27 = vpop.f32.mrf.mxu3 }
 0x2f8   : > { %v9383_v63 = vor.u32 %v9954_v49, %v9382_v6  ;;  %v9387_v54 = vor.u32 %v9946_v4, %v9384_v8  ;;  %v4811_v3 = vmul.f32 0.01, %v4651_v22  ;;  %v3805_v6 = vmul.f32 %v13373_v37, %v13228_v55  ;;  %v9190_v4 = vld [vmem:[#allocation2] sm:$0xf]  ;;  %v9898_v35 = vld [vmem:[#allocation2 + $0x4] sm:$0xf] }
 0x2f9   : > { %v13428_v25 = vpop.f32.mrf.mxu2  ;;  %v9390_v55 = vld [vmem:[#allocation2 + $0x188] sm:$0xf]  ;;  %v9947_v37 = vld [vmem:[#allocation2 + $0x18c] sm:$0xf] }
 0x2fa   : > { %9128 = vmatmul.msk.bf16.vlgmr.msrb.gmra.mxu0 %vm3106_vm13, %v10848_v23  ;;  %9134 = vmatmul.msk.bf16.vlgmr.msrb.gmra.mxu1 %vm3106_vm13, %v10848_v23  ;;  %v4939_v34 = vsel %vm4875_vm4, %v13301_v24, %v4811_v3  ;;  %v9906_v24 = vld [vmem:[#allocation2 + $0x3c] sm:$0xf0] }
 0x2fb   : > { %5713 = vmatpush.bf16.msra.mxu0 %v9383_v63  ;;  %5752 = vmatpush.bf16.msra.mxu1 %v9387_v54  ;;  %v4990_v38 = vpack.c.bf16 %v4939_v34, %v4938_v29  ;;  %v5080_v51 = vmul.f32 %v4939_v34, %v4939_v34  ;;  %v13435_v12 = vpop.f32.mrf.mxu1  ;;  %v9191_v8 = vor.u32 %v9906_v24, %v9190_v4 }
 0x2fc   : > { %9140 = vmatmul.msk.bf16.vlgmr.msrb.gmra.mxu2 %vm3106_vm13, %v10848_v23  ;;  %9146 = vmatmul.msk.bf16.vlgmr.msrb.gmra.mxu3 %vm3106_vm13, %v10848_v23  ;;  %v13433_v28 = vpop.f32.mrf.mxu0  ;;  %v9195_v23 = vor.u32 %v9898_v35, %v9192_v58  ;;  %v3807_v34 = vmul.f32 %v13396_v48, %v13258_v17  ;;  %v3821_v48 = vmul.f32 %v13401_v18, %v13268_v36 }
 0x2fd   : > { %5022 = vst [vmem:[#allocation2 + $0xc8] sm:$0xff] %v4990_v38  ;;  %v5118_v60 = vpack.c.bf16 %v5080_v51, %v5079_v61  ;;  %v3822_v18 = vmul.f32 %v13409_v41, %v13286_v2  ;;  %v9899_v2 = vld [vmem:[#allocation2 + $0xc] sm:$0xf] }
 0x2ff   : > { %5714 = vmatpush.bf16.msra.mxu0 %v9319_v9  ;;  %5753 = vmatpush.bf16.msra.mxu1 %v9323_v26  ;;  %5150 = vst [vmem:[#allocation2 + $0x1c8] sm:$0xff] %v5118_v60  ;;  %v3475_v49 = vpop.f32.mrf.mxu3  ;;  %v9939_v9 = vld [vmem:[#allocation2 + $0x144] sm:$0xf0]  ;;  %v9328_v26 = vld [vmem:[#allocation2 + $0x148] sm:$0xf0] }
 0x300   : > { %v13445_v63 = vmul.f32 %v3475_v49, %v13363_v20  ;;  %v9331_v24 = vor.u32 %v9931_v0, %v9328_v26  ;;  %v9200_v49 = vld [vmem:[#allocation2 + $0x48] sm:$0xf0] }
 0x301   : > { %v3436_v47 = vpop.f32.mrf.mxu2 }
 0x302   : > { %v13442_v29 = vmul.f32 %v3436_v47, %v13361_v50  ;;  %v9907_v47 = vld [vmem:[#allocation2 + $0x44] sm:$0xf0] }
 0x303   : > { %5715 = vmatpush.bf16.msra.mxu0 %v9255_v15  ;;  %5754 = vmatpush.bf16.msra.mxu1 %v9259_v42  ;;  %v3400_v22 = vpop.f32.mrf.mxu1  ;;  %v9327_v42 = vor.u32 %v9939_v9, %v9326_v32  ;;  %v9203_v9 = vor.u32 %v9899_v2, %v9200_v49 }
 0x304   : > { %v3361_v54 = vpop.f32.mrf.mxu0  ;;  %v13449_v14 = vadd.f32 %v3805_v6, %v3400_v22  ;;  %v9923_v39 = vld [vmem:[#allocation2 + $0xc4] sm:$0xf0]  ;;  %v9264_v7 = vld [vmem:[#allocation2 + $0xc8] sm:$0xf0] }
 0x305   : > { %v13447_v19 = vadd.f32 %v3804_v62, %v3361_v54 }
 0x306   : > { %v9955_v50 = vld [vmem:[#allocation2 + $0x1c4] sm:$0xf0]  ;;  %v9392_v59 = vld [vmem:[#allocation2 + $0x1c8] sm:$0xf0]  ;;  %v13459_v3 = vmul.f32 100.0, %v13449_v14 }
 0x307   : > { %5716 = vmatpush.bf16.msra.mxu0 %v9191_v8  ;;  %5755 = vmatpush.bf16.msra.mxu1 %v9195_v23  ;;  %v13456_v20 = vmul.f32 100.0, %v13447_v19  ;;  %v9391_v61 = vor.u32 %v9955_v50, %v9390_v55  ;;  %v9395_v31 = vor.u32 %v9947_v37, %v9392_v59  ;;  %v3478_v1 = vpop.f32.mrf.mxu3  ;;  %v9262_v8 = vld [vmem:[#allocation2 + $0x88] sm:$0xf]  ;;  %v9915_v23 = vld [vmem:[#allocation2 + $0x8c] sm:$0xf] }
 0x308   : > { %v3997_v51 = vmin.f32 %v13459_v3, 20.0  ;;  %v13474_v17 = vadd.f32 %v3807_v34, %v3478_v1  ;;  %v9263_v55 = vor.u32 %v9923_v39, %v9262_v8  ;;  %v9267_v37 = vor.u32 %v9915_v23, %v9264_v7 }
 0x309   : > { %v3996_v38 = vmin.f32 %v13456_v20, 20.0  ;;  %5791 = vmatpush.bf16.msra.mxu2 %v9391_v61  ;;  %5830 = vmatpush.bf16.msra.mxu3 %v9395_v31  ;;  %v3439_v60 = vpop.f32.mrf.mxu2  ;;  %v3823_v61 = vmul.f32 %v13411_v13, %v13288_v52  ;;  %v13502_v34 = vmul.f32 %v13414_v44, %v13295_v5  ;;  %v13508_v52 = vmul.f32 %v13416_v53, %v13297_v16 }
 0x30a   : > { %9129 = vmatmul.msk.bf16.gmra.mxu0 %vm3106_vm13, %v10849_v40  ;;  %9135 = vmatmul.msk.bf16.gmra.mxu1 %vm3106_vm13, %v10849_v40  ;;  %v4066_v45 = vmul.f32 1.442695, %v3997_v51  ;;  %v13472_v46 = vadd.f32 %v3806_v30, %v3439_v60  ;;  %v13482_v4 = vmul.f32 100.0, %v13474_v17  ;;  %vm4828_vm10 = vcmp.gt.f32.partialorder %v13456_v20, 20.0 }
 0x30b   : > { %v4064_v15 = vmul.f32 1.442695, %v3996_v38  ;;  %v3402_v62 = vpop.f32.mrf.mxu1  ;;  %vm4829_vm11 = vcmp.gt.f32.partialorder %v13459_v3, 20.0 }
 0x30c   : > { %9141 = vmatmul.msk.bf16.gmra.mxu2 %vm3106_vm13, %v10849_v40  ;;  %9147 = vmatmul.msk.bf16.gmra.mxu3 %vm3106_vm13, %v10849_v40  ;;  %v3363_v58 = vpop.f32.mrf.mxu0  ;;  %v13479_v6 = vmul.f32 100.0, %v13472_v46  ;;  %v13486_v36 = vadd.f32 %v3821_v48, %v3402_v62  ;;  %v3999_v22 = vmin.f32 %v13482_v4, 20.0  ;;  %v9198_v40 = vld [vmem:[#allocation2 + $0x8] sm:$0xf]  ;;  %v13524_v62 = vmul.f32 %v13433_v28, %v13333_v11 }
 0x30d   : > { %10387 = vpow2.f32 %v4064_v15  ;;  %v13484_v35 = vadd.f32 %v3820_v56, %v3363_v58  ;;  %5792 = vmatpush.bf16.msra.mxu2 %v9327_v42  ;;  %5831 = vmatpush.bf16.msra.mxu3 %v9331_v24  ;;  %v9199_v31 = vor.u32 %v9907_v47, %v9198_v40  ;;  %v13516_v24 = vmul.f32 %v13428_v25, %v13322_v57  ;;  %v10850_v57 = vld [vmem:[%s16314_s2 + $0x10] sm:$0xff] }
 0x30e   : > { %10389 = vpow2.f32 %v4066_v45  ;;  %v3998_v54 = vmin.f32 %v13479_v6, 20.0  ;;  %v13496_v59 = vmul.f32 100.0, %v13486_v36  ;;  %v4070_v30 = vmul.f32 1.442695, %v3999_v22 }
 0x30f   : > { %v13493_v50 = vmul.f32 100.0, %v13484_v35  ;;  %v3480_v56 = vpop.f32.mrf.mxu3  ;;  %v13520_v58 = vmul.f32 %v13430_v27, %v13324_v33  ;;  %vm4830_vm3 = vcmp.gt.f32.partialorder %v13479_v6, 20.0  ;;  %vm4831_vm9 = vcmp.gt.f32.partialorder %v13482_v4, 20.0 }
 0x310   : > { %v4068_v41 = vmul.f32 1.442695, %v3998_v54  ;;  %v4013_v38 = vmin.f32 %v13496_v59, 20.0  ;;  %v13512_v60 = vadd.f32 %v3823_v61, %v3480_v56 }
 0x311   : > { %5793 = vmatpush.bf16.msra.mxu2 %v9263_v55  ;;  %5832 = vmatpush.bf16.msra.mxu3 %v9267_v37  ;;  %v4012_v26 = vmin.f32 %v13493_v50, 20.0  ;;  %v3441_v51 = vpop.f32.mrf.mxu2 }
 0x312   : > { %10391 = vpow2.f32 %v4068_v41  ;;  %v13510_v13 = vadd.f32 %v3822_v18, %v3441_v51  ;;  %v4098_v53 = vmul.f32 1.442695, %v4013_v38  ;;  %v13539_v11 = vmul.f32 100.0, %v13512_v60 }
 0x313   : > { %v10388_v32 = vpop.eup %10387  ;;  %10393 = vpow2.f32 %v4070_v30  ;;  %v4096_v42 = vmul.f32 1.442695, %v4012_v26  ;;  %v13549_v18 = vpop.f32.mrf.mxu1 }
 0x314   : > { %v10390_v5 = vpop.eup %10389  ;;  %v4220_v44 = vadd.f32 1.0, %v10388_v32  ;;  %v4223_v1 = vmul.f32 -0.5, %v10388_v32  ;;  %v4226_v0 = vand.u32 2147483647, %v10388_v32  ;;  %v13527_v39 = vmul.f32 100.0, %v13510_v13  ;;  %v3366_v49 = vpop.f32.mrf.mxu0 }
 0x315   : > { %v4229_v15 = vadd.f32 1.0, %v10390_v5  ;;  %v4232_v45 = vmul.f32 -0.5, %v10390_v5  ;;  %v4235_v48 = vand.u32 2147483647, %v10390_v5  ;;  %5794 = vmatpush.bf16.msra.mxu2 %v9199_v31  ;;  %5833 = vmatpush.bf16.msra.mxu3 %v9203_v9  ;;  %v4015_v55 = vmin.f32 %v13539_v11, 20.0 }
 0x316   : > { %10395 = vlog2.f32 %v4220_v44  ;;  %v4224_v16 = vadd.f32 1.0, %v4223_v1  ;;  %vm13534_vm5 = vcmp.lt.f32.partialorder %v4226_v0, 0.0004427343  ;;  %v4014_v47 = vmin.f32 %v13527_v39, 20.0 }
 0x317   : > { %10397 = vlog2.f32 %v4229_v15  ;;  %v4233_v33 = vadd.f32 1.0, %v4232_v45  ;;  %vm13544_vm12 = vcmp.lt.f32.partialorder %v4235_v48, 0.0004427343  ;;  %v13554_v9 = vadd.f32 %v13502_v34, %v3366_v49 }
 0x318   : > { %10399 = vpow2.f32 %v4096_v42  ;;  %v10392_v27 = vpop.eup %10391  ;;  %v4225_v28 = vmul.f32 %v10388_v32, %v4224_v16  ;;  %v4100_v31 = vmul.f32 1.442695, %v4014_v47  ;;  %v13560_v56 = vmul.f32 1.442695, %v4015_v55  ;;  %v13573_v16 = vpop.f32.mrf.mxu3 }
 0x319   : > { %10401 = vpow2.f32 %v4098_v53  ;;  %v10394_v8 = vpop.eup %10393  ;;  %v4238_v23 = vadd.f32 1.0, %v10392_v27  ;;  %v4241_v54 = vmul.f32 -0.5, %v10392_v27  ;;  %v4244_v22 = vand.u32 2147483647, %v10392_v27  ;;  %v13571_v42 = vpop.f32.mrf.mxu2 }
 0x31a   : > { %9130 = vmatmul.msk.bf16.gmra.mxu0 %vm3106_vm13, %v10850_v57  ;;  %9136 = vmatmul.msk.bf16.gmra.mxu1 %vm3106_vm13, %v10850_v57  ;;  %v4247_v37 = vadd.f32 1.0, %v10394_v8  ;;  %v4250_v40 = vmul.f32 -0.5, %v10394_v8  ;;  %v4253_v61 = vand.u32 2147483647, %v10394_v8  ;;  %v4234_v41 = vmul.f32 %v10390_v5, %v4233_v33 }
 0x31b   : > { %10403 = vlog2.f32 %v4238_v23  ;;  %v4242_v30 = vadd.f32 1.0, %v4241_v54  ;;  %vm13556_vm14 = vcmp.lt.f32.partialorder %v4244_v22, 0.0004427343 }
 0x31c   : > { %9142 = vmatmul.msk.bf16.gmra.mxu2 %vm3106_vm13, %v10850_v57  ;;  %9148 = vmatmul.msk.bf16.gmra.mxu3 %vm3106_vm13, %v10850_v57  ;;  %v10396_v2 = vpop.eup %10395  ;;  %10405 = vlog2.f32 %v4247_v37  ;;  %v4251_v1 = vadd.f32 1.0, %v4250_v40  ;;  %vm13562_vm15 = vcmp.lt.f32.partialorder %v4253_v61, 0.0004427343  ;;  %v13638_v61 = vadd.f32 %v13516_v24, %v13571_v42 }
 0x31d   : > { %v10398_v26 = vpop.eup %10397  ;;  %v4222_v38 = vmul.f32 0.6931472, %v10396_v2  ;;  %10407 = vpow2.f32 %v4100_v31  ;;  %v4243_v15 = vmul.f32 %v10392_v27, %v4242_v30  ;;  %v3368_v31 = vpop.f32.mrf.mxu0 }
 0x31e   : > { %v10400_v32 = vpop.eup %10399  ;;  %v4231_v44 = vmul.f32 0.6931472, %v10398_v26  ;;  %v4252_v54 = vmul.f32 %v10394_v8, %v4251_v1  ;;  %v13591_v2 = vpop.f32.mrf.mxu1 }
 0x31f   : > { %v13566_v5 = vpop.eup %10401  ;;  %v4228_v34 = vsel %vm13534_vm5, %v4225_v28, %v4222_v38  ;;  %v4364_v45 = vadd.f32 1.0, %v10400_v32  ;;  %v4367_v48 = vmul.f32 -0.5, %v10400_v32  ;;  %v4370_v33 = vand.u32 2147483647, %v10400_v32 }
 0x320   : > { %v4764_v53 = vmul.f32 0.01, %v4228_v34  ;;  %v4237_v57 = vsel %vm13544_vm12, %v4234_v41, %v4231_v44  ;;  %v4373_v47 = vadd.f32 1.0, %v13566_v5  ;;  %v4376_v28 = vmul.f32 -0.5, %v13566_v5 }
 0x321   : > { %v4765_v25 = vmul.f32 0.01, %v4237_v57  ;;  %10409 = vlog2.f32 %v4364_v45  ;;  %v4368_v27 = vadd.f32 1.0, %v4367_v48  ;;  %v10404_v49 = vpop.eup %10403  ;;  %v4379_v7 = vand.u32 2147483647, %v13566_v5  ;;  %v3446_v6 = vpop.f32.mrf.mxu2 }
 0x322   : > { %v4892_v23 = vsel %vm4828_vm10, %v13447_v19, %v4764_v53  ;;  %10411 = vlog2.f32 %v4373_v47  ;;  %v10406_v22 = vpop.eup %10405  ;;  %v4240_v40 = vmul.f32 0.6931472, %v10404_v49  ;;  %vm13587_vm4 = vcmp.lt.f32.partialorder %v4370_v33, 0.0004427343  ;;  %v10851_v53 = vld [vmem:[%s16314_s2 + $0x18] sm:$0xff] }
 0x323   : > { %v5033_v55 = vmul.f32 %v4892_v23, %v4892_v23  ;;  %v4893_v37 = vsel %vm4829_vm11, %v13449_v14, %v4765_v25  ;;  %v10408_v20 = vpop.eup %10407  ;;  %v4249_v41 = vmul.f32 0.6931472, %v10406_v22  ;;  %v4369_v30 = vmul.f32 %v10400_v32, %v4368_v27 }
 0x324   : > { %v4967_v19 = vpack.c.bf16 %v4893_v37, %v4892_v23  ;;  %v5034_v8 = vmul.f32 %v4893_v37, %v4893_v37  ;;  %vm4844_vm5 = vcmp.gt.f32.partialorder %v13493_v50, 20.0  ;;  %v4246_v26 = vsel %vm13556_vm14, %v4243_v15, %v4240_v40 }
 0x325   : > { %v4377_v3 = vadd.f32 1.0, %v4376_v28  ;;  %vm4845_vm10 = vcmp.gt.f32.partialorder %v13496_v59, 20.0  ;;  %v4382_v14 = vadd.f32 1.0, %v10408_v20  ;;  %v4385_v38 = vmul.f32 -0.5, %v10408_v20 }
 0x326   : > { %4999 = vst [vmem:[#allocation2 + $0x10] sm:$0xff] %v4967_v19  ;;  %v5095_v44 = vpack.c.bf16 %v5034_v8, %v5033_v55  ;;  %v4766_v1 = vmul.f32 0.01, %v4246_v26  ;;  %v4255_v34 = vsel %vm13562_vm15, %v4252_v54, %v4249_v41  ;;  %vm13599_vm12 = vcmp.lt.f32.partialorder %v4379_v7, 0.0004427343  ;;  %v13650_v26 = vpop.f32.mrf.mxu0 }
 0x327   : > { %v10410_v32 = vpop.eup %10409  ;;  %v4767_v48 = vmul.f32 0.01, %v4255_v34  ;;  %10413 = vlog2.f32 %v4382_v14  ;;  %v4386_v51 = vadd.f32 1.0, %v4385_v38  ;;  %v4388_v15 = vand.u32 2147483647, %v10408_v20 }
 0x328   : > { %v10412_v57 = vpop.eup %10411  ;;  %5127 = vst [vmem:[#allocation2 + $0x110] sm:$0xff] %v5095_v44  ;;  %v4894_v0 = vsel %vm4830_vm3, %v13472_v46, %v4766_v1  ;;  %v4366_v33 = vmul.f32 0.6931472, %v10410_v32  ;;  %10415 = vpow2.f32 %v13560_v56  ;;  %v13613_v47 = vmul.f32 100.0, %v13554_v9  ;;  %v13621_v46 = vpop.f32.mrf.mxu3 }
 0x329   : > { %v5035_v25 = vmul.f32 %v4894_v0, %v4894_v0  ;;  %v4895_v27 = vsel %vm4831_vm9, %v13474_v17, %v4767_v48  ;;  %v4375_v28 = vmul.f32 0.6931472, %v10412_v57  ;;  %v4378_v49 = vmul.f32 %v13566_v5, %v4377_v3  ;;  %v13672_v32 = vpop.f32.mrf.mxu2 }
 0x32a   : > { %9131 = vmatmul.msk.bf16.gmra.mxu0 %vm3106_vm13, %v10851_v53  ;;  %9137 = vmatmul.msk.bf16.gmra.mxu1 %vm3106_vm13, %v10851_v53  ;;  %v4968_v23 = vpack.c.bf16 %v4895_v27, %v4894_v0  ;;  %v5036_v56 = vmul.f32 %v4895_v27, %v4895_v27  ;;  %v4372_v54 = vsel %vm13587_vm4, %v4369_v30, %v4366_v33  ;;  %vm13627_vm11 = vcmp.lt.f32.partialorder %v4388_v15, 0.0004427343 }
 0x32b   : > { %v4387_v7 = vmul.f32 %v10408_v20, %v4386_v51  ;;  %v4780_v22 = vmul.f32 0.01, %v4372_v54  ;;  %v4381_v55 = vsel %vm13599_vm12, %v4378_v49, %v4375_v28  ;;  %v4028_v17 = vmin.f32 %v13613_v47, 20.0 }
 0x32c   : > { %9143 = vmatmul.msk.bf16.gmra.mxu2 %vm3106_vm13, %v10851_v53  ;;  %9149 = vmatmul.msk.bf16.gmra.mxu3 %vm3106_vm13, %v10851_v53  ;;  %5000 = vst [vmem:[#allocation2 + $0x18] sm:$0xff] %v4968_v23  ;;  %v5096_v4 = vpack.c.bf16 %v5036_v56, %v5035_v25  ;;  %v4781_v5 = vmul.f32 0.01, %v4381_v55  ;;  %v13634_v40 = vadd.f32 %v13508_v52, %v13549_v18  ;;  %v13652_v52 = vpop.f32.mrf.mxu1  ;;  %vm4846_vm14 = vcmp.gt.f32.partialorder %v13527_v39, 20.0 }
 0x32d   : > { %v10414_v20 = vpop.eup %10413  ;;  %v4908_v19 = vsel %vm4844_vm5, %v13484_v35, %v4780_v22  ;;  %v4128_v8 = vmul.f32 1.442695, %v4028_v17  ;;  %v13645_v41 = vadd.f32 %v13520_v58, %v13573_v16  ;;  %v13648_v30 = vadd.f32 %v13524_v62, %v3368_v31  ;;  %v10852_v22 = vld [vmem:[%s16314_s2 + $0x20] sm:$0xff] }
 0x32e   : > { %v10416_v18 = vpop.eup %10415  ;;  %5128 = vst [vmem:[#allocation2 + $0x118] sm:$0xff] %v5096_v4  ;;  %v5049_v24 = vmul.f32 %v4908_v19, %v4908_v19  ;;  %v4909_v50 = vsel %vm4845_vm10, %v13486_v36, %v4781_v5  ;;  %v4384_v35 = vmul.f32 0.6931472, %v10414_v20  ;;  %v13658_v42 = vmul.f32 100.0, %v13634_v40  ;;  %v13682_v33 = vpop.f32.mrf.mxu0 }
 0x32f   : > { %v4975_v58 = vpack.c.bf16 %v4909_v50, %v4908_v19  ;;  %v5050_v16 = vmul.f32 %v4909_v50, %v4909_v50  ;;  %v4391_v3 = vadd.f32 1.0, %v10416_v18  ;;  %v4394_v62 = vmul.f32 -0.5, %v10416_v18 }
 0x330   : > { %v4390_v31 = vsel %vm13627_vm11, %v4387_v7, %v4384_v35  ;;  %10417 = vpow2.f32 %v4128_v8  ;;  %v4029_v14 = vmin.f32 %v13658_v42, 20.0  ;;  %v13664_v36 = vmul.f32 100.0, %v13638_v61  ;;  %v13674_v48 = vpop.f32.mrf.mxu3 }
 0x331   : > { %5007 = vst [vmem:[#allocation2 + $0x50] sm:$0xff] %v4975_v58  ;;  %v5103_v38 = vpack.c.bf16 %v5050_v16, %v5049_v24  ;;  %10419 = vlog2.f32 %v4391_v3  ;;  %v4782_v44 = vmul.f32 0.01, %v4390_v31  ;;  %v4395_v1 = vadd.f32 1.0, %v4394_v62 }
 0x332   : > { %v4130_v59 = vmul.f32 1.442695, %v4029_v14  ;;  %v13667_v34 = vmul.f32 100.0, %v13645_v41  ;;  %v13670_v45 = vmul.f32 100.0, %v13648_v30  ;;  %v3853_v51 = vmul.f32 %v13435_v12, %v13335_v43 }
 0x333   : > { %5135 = vst [vmem:[#allocation2 + $0x150] sm:$0xff] %v5103_v38  ;;  %v4030_v15 = vmin.f32 %v13664_v36, 20.0  ;;  %v4397_v53 = vand.u32 2147483647, %v10416_v18  ;;  %v4910_v28 = vsel %vm4846_vm14, %v13510_v13, %v4782_v44  ;;  %v13691_v12 = vadd.f32 %v13442_v29, %v3446_v6 }
 0x334   : > { %10421 = vpow2.f32 %v4130_v59  ;;  %v4031_v57 = vmin.f32 %v13667_v34, 20.0  ;;  %v4044_v0 = vmin.f32 %v13670_v45, 20.0  ;;  %v13684_v25 = vpop.f32.mrf.mxu1  ;;  %v13688_v43 = vadd.f32 %v3853_v51, %v13591_v2 }
 0x335   : > { %v4132_v49 = vmul.f32 1.442695, %v4030_v15  ;;  %v4396_v23 = vmul.f32 %v10416_v18, %v4395_v1  ;;  %vm4398_vm15 = vcmp.lt.f32.partialorder %v4397_v53, 0.0004427343  ;;  %vm4847_vm3 = vcmp.gt.f32.partialorder %v13539_v11, 20.0  ;;  %v13708_v18 = vpop.f32.mrf.mxu2 }
 0x336   : > { %v10418_v27 = vpop.eup %10417  ;;  %v4134_v7 = vmul.f32 1.442695, %v4031_v57  ;;  %v4160_v2 = vmul.f32 1.442695, %v4044_v0  ;;  %v13699_v55 = vmul.f32 100.0, %v13688_v43  ;;  %v13705_v29 = vmul.f32 100.0, %v13691_v12  ;;  %v13717_v62 = vpop.f32.mrf.mxu0 }
 0x337   : > { %v10420_v39 = vpop.eup %10419  ;;  %v4508_v56 = vadd.f32 1.0, %v10418_v27  ;;  %v4511_v54 = vmul.f32 -0.5, %v10418_v27  ;;  %10423 = vpow2.f32 %v4132_v49  ;;  %v5051_v37 = vmul.f32 %v4910_v28, %v4910_v28 }
 0x338   : > { %v4393_v13 = vmul.f32 0.6931472, %v10420_v39  ;;  %v4045_v4 = vmin.f32 %v13699_v55, 20.0  ;;  %v4514_v20 = vand.u32 2147483647, %v10418_v27  ;;  %v13710_v24 = vpop.f32.mrf.mxu3  ;;  %v4046_v58 = vmin.f32 %v13705_v29, 20.0 }
 0x339   : > { %10425 = vlog2.f32 %v4508_v56  ;;  %v4512_v50 = vadd.f32 1.0, %v4511_v54  ;;  %vm4860_vm9 = vcmp.gt.f32.partialorder %v13613_v47, 20.0  ;;  %v13723_v59 = vadd.f32 %v13445_v63, %v13621_v46 }
 0x33a   : > { %9132 = vmatmul.msk.bf16.gmra.mxu0 %vm3106_vm13, %v10852_v22  ;;  %9138 = vmatmul.msk.bf16.gmra.mxu1 %vm3106_vm13, %v10852_v22  ;;  %v10422_v6 = vpop.eup %10421  ;;  %v4399_v17 = vsel %vm4398_vm15, %v4396_v23, %v4393_v13  ;;  %10427 = vpow2.f32 %v4134_v7  ;;  %v4162_v35 = vmul.f32 1.442695, %v4045_v4  ;;  %vm13725_vm4 = vcmp.lt.f32.partialorder %v4514_v20, 0.0004427343 }
 0x33b   : > { %v4783_v5 = vmul.f32 0.01, %v4399_v17  ;;  %v4517_v19 = vadd.f32 1.0, %v10422_v6  ;;  %v4520_v8 = vmul.f32 -0.5, %v10422_v6  ;;  %10429 = vpow2.f32 %v4160_v2 }
 0x33c   : > { %9144 = vmatmul.msk.bf16.gmra.mxu2 %vm3106_vm13, %v10852_v22  ;;  %9150 = vmatmul.msk.bf16.gmra.mxu3 %vm3106_vm13, %v10852_v22  ;;  %v4523_v3 = vand.u32 2147483647, %v10422_v6  ;;  %v13719_v31 = vpop.f32.mrf.mxu1  ;;  %v4513_v49 = vmul.f32 %v10418_v27, %v4512_v50  ;;  %vm4861_vm5 = vcmp.gt.f32.partialorder %v13658_v42, 20.0  ;;  %vm4862_vm12 = vcmp.gt.f32.partialorder %v13664_v36, 20.0 }
 0x33d   : > { %v4911_v16 = vsel %vm4847_vm3, %v13512_v60, %v4783_v5  ;;  %10431 = vlog2.f32 %v4517_v19  ;;  %v10424_v14 = vpop.eup %10423  ;;  %v4521_v60 = vadd.f32 1.0, %v4520_v8  ;;  %vm4863_vm14 = vcmp.gt.f32.partialorder %v13667_v34, 20.0 }
 0x33e   : > { %v4976_v38 = vpack.c.bf16 %v4911_v16, %v4910_v28  ;;  %v5052_v44 = vmul.f32 %v4911_v16, %v4911_v16  ;;  %10433 = vpow2.f32 %v4162_v35  ;;  %v4526_v51 = vadd.f32 1.0, %v10424_v14 }
 0x33f   : > { %v10426_v1 = vpop.eup %10425  ;;  %v4529_v15 = vmul.f32 -0.5, %v10424_v14  ;;  %v4164_v28 = vmul.f32 1.442695, %v4046_v58  ;;  %vm13730_vm10 = vcmp.lt.f32.partialorder %v4523_v3, 0.0004427343  ;;  %v4522_v13 = vmul.f32 %v10422_v6, %v4521_v60  ;;  %v13750_v58 = vpop.f32.mrf.mxu0 }
 0x340   : > { %v10428_v53 = vpop.eup %10427  ;;  %5008 = vst [vmem:[#allocation2 + $0x58] sm:$0xff] %v4976_v38  ;;  %v5104_v57 = vpack.c.bf16 %v5052_v44, %v5051_v37  ;;  %v4510_v0 = vmul.f32 0.6931472, %v10426_v1  ;;  %10435 = vlog2.f32 %v4526_v51  ;;  %v4532_v63 = vand.u32 2147483647, %v10424_v14  ;;  %v13736_v37 = vpop.f32.mrf.mxu2  ;;  %v10853_v51 = vld [vmem:[%s16314_s2 + $0x28] sm:$0xff] }
 0x341   : > { %v4535_v46 = vadd.f32 1.0, %v10428_v53  ;;  %v10430_v23 = vpop.eup %10429  ;;  %v4530_v54 = vadd.f32 1.0, %v4529_v15  ;;  %v4538_v7 = vmul.f32 -0.5, %v10428_v53  ;;  %10437 = vpow2.f32 %v4164_v28  ;;  %v13738_v17 = vpop.f32.mrf.mxu3 }
 0x342   : > { %5136 = vst [vmem:[#allocation2 + $0x158] sm:$0xff] %v5104_v57  ;;  %v4516_v56 = vsel %vm13725_vm4, %v4513_v49, %v4510_v0  ;;  %v4652_v2 = vadd.f32 1.0, %v10430_v23  ;;  %v4541_v19 = vand.u32 2147483647, %v10428_v53  ;;  %v4655_v8 = vmul.f32 -0.5, %v10430_v23 }
 0x343   : > { %v10432_v22 = vpop.eup %10431  ;;  %v4796_v27 = vmul.f32 0.01, %v4516_v56  ;;  %10439 = vlog2.f32 %v4535_v46  ;;  %v4539_v20 = vadd.f32 1.0, %v4538_v7  ;;  %v13748_v35 = vmul.f32 100.0, %v13723_v59 }
 0x344   : > { %v13740_v4 = vpop.eup %10433  ;;  %v4519_v5 = vmul.f32 0.6931472, %v10432_v22  ;;  %10441 = vlog2.f32 %v4652_v2  ;;  %v13752_v16 = vpop.f32.mrf.mxu1  ;;  %v4531_v38 = vmul.f32 %v10424_v14, %v4530_v54  ;;  %vm13756_vm11 = vcmp.lt.f32.partialorder %v4532_v63, 0.0004427343 }
 0x345   : > { %v4924_v50 = vsel %vm4860_vm9, %v13554_v9, %v4796_v27  ;;  %v4661_v6 = vadd.f32 1.0, %v13740_v4  ;;  %v4658_v9 = vand.u32 2147483647, %v10430_v23  ;;  %v4656_v11 = vadd.f32 1.0, %v4655_v8 }
 0x346   : > { %v4525_v3 = vsel %vm13730_vm10, %v4522_v13, %v4519_v5  ;;  %v10436_v47 = vpop.eup %10435  ;;  %v4664_v60 = vmul.f32 -0.5, %v13740_v4  ;;  %v5065_v15 = vmul.f32 %v4924_v50, %v4924_v50  ;;  %v4540_v0 = vmul.f32 %v10428_v53, %v4539_v20 }
 0x347   : > { %v4797_v1 = vmul.f32 0.01, %v4525_v3  ;;  %10443 = vlog2.f32 %v4661_v6  ;;  %v13767_v14 = vpop.eup %10437  ;;  %v4528_v57 = vmul.f32 0.6931472, %v10436_v47  ;;  %vm13769_vm15 = vcmp.lt.f32.partialorder %v4541_v19, 0.0004427343 }
 0x348   : > { %v4665_v63 = vadd.f32 1.0, %v4664_v60  ;;  %v4670_v46 = vadd.f32 1.0, %v13767_v14  ;;  %v4047_v56 = vmin.f32 %v13748_v35, 20.0  ;;  %v4657_v2 = vmul.f32 %v10430_v23, %v4656_v11  ;;  %v13787_v42 = vpop.f32.mrf.mxu2 }
 0x349   : > { %v10440_v28 = vpop.eup %10439  ;;  %v4925_v39 = vsel %vm4861_vm5, %v13634_v40, %v4797_v1  ;;  %v4534_v7 = vsel %vm13756_vm11, %v4531_v38, %v4528_v57  ;;  %vm13782_vm3 = vcmp.lt.f32.partialorder %v4658_v9, 0.0004427343  ;;  %v4667_v40 = vand.u32 2147483647, %v13740_v4  ;;  %v13789_v20 = vpop.f32.mrf.mxu3 }
 0x34a   : > { %9133 = vmatmul.msk.bf16.gmra.mxu0 %vm3106_vm13, %v10853_v51  ;;  %9139 = vmatmul.msk.bf16.gmra.mxu1 %vm3106_vm13, %v10853_v51  ;;  %v4983_v54 = vpack.c.bf16 %v4925_v39, %v4924_v50  ;;  %v5066_v53 = vmul.f32 %v4925_v39, %v4925_v39  ;;  %v4537_v22 = vmul.f32 0.6931472, %v10440_v28  ;;  %v10442_v27 = vpop.eup %10441  ;;  %v4798_v13 = vmul.f32 0.01, %v4534_v7  ;;  %v13797_v9 = vpop.f32.mrf.mxu0  ;;  %v7684_v28 = vld [vmem:[#allocation2 + $0x210] sm:$0x11] }
 0x34b   : > { %v4654_v50 = vmul.f32 0.6931472, %v10442_v27  ;;  %10445 = vlog2.f32 %v4670_v46  ;;  %v4673_v38 = vmul.f32 -0.5, %v13767_v14  ;;  %v4166_v44 = vmul.f32 1.442695, %v4047_v56 }
 0x34c   : > { %9145 = vmatmul.msk.bf16.gmra.mxu2 %vm3106_vm13, %v10853_v51  ;;  %9151 = vmatmul.msk.bf16.gmra.mxu3 %vm3106_vm13, %v10853_v51  ;;  %5015 = vst [vmem:[#allocation2 + $0x90] sm:$0xff] %v4983_v54  ;;  %v5111_v19 = vpack.c.bf16 %v5066_v53, %v5065_v15  ;;  %v4543_v8 = vsel %vm13769_vm15, %v4540_v0, %v4537_v22  ;;  %v13799_v47 = vpop.f32.mrf.mxu1  ;;  %vm4668_vm9 = vcmp.lt.f32.partialorder %v4667_v40, 0.0004427343  ;;  %v5247_v15 = vld [vmem:[#allocation2 + $0x210] sm:$0x11]  ;;  %vm4876_vm4 = vcmp.gt.f32.partialorder %v13670_v45, 20.0 }
 0x34d   : > { %v10444_v6 = vpop.eup %10443  ;;  %v4926_v23 = vsel %vm4862_vm12, %v13638_v61, %v4798_v13  ;;  %v4799_v3 = vmul.f32 0.01, %v4543_v8  ;;  %v4660_v11 = vsel %vm13782_vm3, %v4657_v2, %v4654_v50  ;;  %v4666_v51 = vmul.f32 %v13740_v4, %v4665_v63  ;;  %v5248_v39 = vld [vmem:[#allocation2 + $0x218] sm:$0x11] }
 0x34e   : > { %5143 = vst [vmem:[#allocation2 + $0x190] sm:$0xff] %v5111_v19  ;;  %v5067_v1 = vmul.f32 %v4926_v23, %v4926_v23  ;;  %v4663_v60 = vmul.f32 0.6931472, %v10444_v6  ;;  %v4812_v36 = vmul.f32 0.01, %v4660_v11  ;;  %10447 = vpow2.f32 %v4166_v44 }
 0x34f   : > { %v4927_v61 = vsel %vm4863_vm14, %v13645_v41, %v4799_v3  ;;  %vm4877_vm5 = vcmp.gt.f32.partialorder %v13699_v55, 20.0  ;;  %v4674_v63 = vadd.f32 1.0, %v4673_v38  ;;  %v5487_v54 = vunpack.c.l.b16 %v5247_v15  ;;  %v7687_v38 = vld [vmem:[#allocation2 + $0x218] sm:$0x11] }
 0x350   : > { %v4984_v57 = vpack.c.bf16 %v4927_v61, %v4926_v23  ;;  %v5068_v0 = vmul.f32 %v4927_v61, %v4927_v61  ;;  %v4669_v49 = vsel %vm4668_vm9, %v4666_v51, %v4663_v60  ;;  %v4940_v46 = vsel %vm4876_vm4, %v13648_v30, %v4812_v36  ;;  %v13813_v22 = vpop.f32.mrf.mxu2 }
 0x351   : > { %v4813_v56 = vmul.f32 0.01, %v4669_v49  ;;  %v10446_v4 = vpop.eup %10445  ;;  %v5081_v41 = vmul.f32 %v4940_v46, %v4940_v46  ;;  %v7685_v7 = vsel %vm11615_vm1, 1065369472, %v7684_v28  ;;  %v5488_v45 = vunpack.c.h.b16 %v5247_v15  ;;  %v13815_v27 = vpop.f32.mrf.mxu3 }
 0x352   : > { %5016 = vst [vmem:[#allocation2 + $0x98] sm:$0xff] %v4984_v57  ;;  %v5112_v34 = vpack.c.bf16 %v5068_v0, %v5067_v1  ;;  %v5489_v30 = vunpack.c.l.b16 %v5248_v39  ;;  %v4676_v2 = vand.u32 2147483647, %v13767_v14  ;;  %v5567_v5 = vpack.c.b16 %v5487_v54, %v5487_v54 }
 0x353   : > { %v4941_v53 = vsel %vm4877_vm5, %v13688_v43, %v4813_v56  ;;  %v4672_v19 = vmul.f32 0.6931472, %v10446_v4  ;;  %7686 = vst [vmem:[#allocation2 + $0x210] sm:$0x11] %v7685_v7  ;;  %v5568_v8 = vpack.c.b16 %v5488_v45, %v5488_v45  ;;  %v13818_v43 = vpop.f32.mrf.mxu0  ;;  %v4675_v23 = vmul.f32 %v13767_v14, %v4674_v63 }
 0x354   : > { %5144 = vst [vmem:[#allocation2 + $0x198] sm:$0xff] %v5112_v34  ;;  %v4991_v13 = vpack.c.bf16 %v4941_v53, %v4940_v46  ;;  %v5082_v55 = vmul.f32 %v4941_v53, %v4941_v53  ;;  %v10448_v40 = vpop.eup %10447  ;;  %v13820_v50 = vpop.f32.mrf.mxu1  ;;  %v5674_v1 = vand.u32 %v5567_v5, %v11665_v21  ;;  %v5569_v60 = vpack.c.b16 %v5489_v30, %v5489_v30  ;;  %v9940_v5 = vld [vmem:[#allocation2 + $0x14c] sm:$0xf0] }
 0x355   : > { %v4679_v3 = vadd.f32 1.0, %v10448_v40  ;;  %v4682_v44 = vmul.f32 -0.5, %v10448_v40  ;;  %v5677_v11 = vand.u32 %v5568_v8, %v11665_v21  ;;  %vm4677_vm10 = vcmp.lt.f32.partialorder %v4676_v2, 0.0004427343  ;;  %v9948_v63 = vld [vmem:[#allocation2 + $0x194] sm:$0xf] }
 0x356   : > { %5023 = vst [vmem:[#allocation2 + $0xd0] sm:$0xff] %v4991_v13  ;;  %v5119_v6 = vpack.c.bf16 %v5082_v55, %v5081_v41  ;;  %v4678_v51 = vsel %vm4677_vm10, %v4675_v23, %v4672_v19  ;;  %5868 = vmatpush.bf16.msrb.mxu0 %v5674_v1  ;;  %v5680_v61 = vand.u32 %v5569_v60, %v11665_v21  ;;  %v7688_v36 = vsel %vm11615_vm1, 1065369472, %v7687_v38  ;;  %v9336_v19 = vld [vmem:[#allocation2 + $0x150] sm:$0xf0] }
 0x357   : > { %10449 = vlog2.f32 %v4679_v3  ;;  %5907 = vmatpush.bf16.msrb.mxu1 %v5677_v11  ;;  %v5490_v14 = vunpack.c.h.b16 %v5248_v39  ;;  %7689 = vst [vmem:[#allocation2 + $0x218] sm:$0x11] %v7688_v36  ;;  %v4683_v15 = vadd.f32 1.0, %v4682_v44  ;;  %v4814_v28 = vmul.f32 0.01, %v4678_v51 }
 0x358   : > { %5151 = vst [vmem:[#allocation2 + $0x1d0] sm:$0xff] %v5119_v6  ;;  %5946 = vmatpush.bf16.msrb.mxu2 %v5680_v61  ;;  %v13828_v0 = vpop.f32.mrf.mxu2  ;;  %v4685_v46 = vand.u32 2147483647, %v10448_v40  ;;  %vm4878_vm12 = vcmp.gt.f32.partialorder %v13705_v29, 20.0  ;;  %v9398_v39 = vld [vmem:[#allocation2 + $0x190] sm:$0xf] }
 0x359   : > { %v5570_v57 = vpack.c.b16 %v5490_v14, %v5490_v14  ;;  %v13830_v49 = vpop.f32.mrf.mxu3  ;;  %v4684_v53 = vmul.f32 %v10448_v40, %v4683_v15  ;;  %v4942_v30 = vsel %vm4878_vm12, %v13691_v12, %v4814_v28  ;;  %vm4879_vm14 = vcmp.gt.f32.partialorder %v13748_v35, 20.0  ;;  %v9334_v29 = vld [vmem:[#allocation2 + $0x110] sm:$0xf]  ;;  %v9932_v23 = vld [vmem:[#allocation2 + $0x114] sm:$0xf] }
 0x35a   : > { %vm4686_vm11 = vcmp.lt.f32.partialorder %v4685_v46, 0.0004427343  ;;  %v5083_v6 = vmul.f32 %v4942_v30, %v4942_v30  ;;  %v9335_v38 = vor.u32 %v9940_v5, %v9334_v29  ;;  %v9339_v44 = vor.u32 %v9932_v23, %v9336_v19  ;;  %v9270_v14 = vld [vmem:[#allocation2 + $0x90] sm:$0xf]  ;;  %v9916_v15 = vld [vmem:[#allocation2 + $0x94] sm:$0xf] }
 0x35b   : > { %v5683_v56 = vand.u32 %v5570_v57, %v11665_v21  ;;  %v13833_v4 = vpop.f32.mrf.mxu0  ;;  %v9208_v46 = vld [vmem:[#allocation2 + $0x50] sm:$0xf0]  ;;  %v9949_v5 = vld [vmem:[#allocation2 + $0x19c] sm:$0xf]  ;;  %v3810_v23 = vmul.f32 %v13813_v22, %v13672_v32 }
 0x35c   : > { %v13835_v34 = vpop.f32.mrf.mxu1 }
 0x35d   : > { %v10450_v41 = vpop.eup %10449  ;;  %5985 = vmatpush.bf16.msrb.mxu3 %v5683_v56  ;;  %v9924_v60 = vld [vmem:[#allocation2 + $0xcc] sm:$0xf0]  ;;  %v9272_v51 = vld [vmem:[#allocation2 + $0xd0] sm:$0xf0]  ;;  %v3808_v56 = vmul.f32 %v13797_v9, %v13650_v26 }
 0x35e   : > { %v4681_v54 = vmul.f32 0.6931472, %v10450_v41  ;;  %v9271_v57 = vor.u32 %v9924_v60, %v9270_v14  ;;  %v9275_v28 = vor.u32 %v9916_v15, %v9272_v51  ;;  %v3809_v41 = vmul.f32 %v13799_v47, %v13652_v52  ;;  %v9892_v52 = vld [vmem:[%s16314_s2 + $0x30] sm:$0xff]  ;;  %v9406_v47 = vld [vmem:[#allocation2 + $0x198] sm:$0xf] }
 0x35f   : > { %v9956_v7 = vld [vmem:[#allocation2 + $0x1cc] sm:$0xf0]  ;;  %v9400_v45 = vld [vmem:[#allocation2 + $0x1d0] sm:$0xf0]  ;;  %9444 = vmatmul.msk.bf16.vlgmr.msra.gmra.mxu0 %vm3106_vm13, %v9892_v52  ;;  %9450 = vmatmul.msk.bf16.vlgmr.msra.gmra.mxu1 %vm3106_vm13, %v9892_v52  ;;  %v3824_v60 = vmul.f32 %v13818_v43, %v13682_v33  ;;  %v9342_v51 = vld [vmem:[#allocation2 + $0x118] sm:$0xf] }
 0x360   : > { %v9399_v13 = vor.u32 %v9956_v7, %v9398_v39  ;;  %v9403_v55 = vor.u32 %v9948_v63, %v9400_v45  ;;  %v4687_v2 = vsel %vm4686_vm11, %v4684_v53, %v4681_v54  ;;  %v13840_v40 = vpop.f32.mrf.mxu2  ;;  %v9206_v39 = vld [vmem:[#allocation2 + $0x10] sm:$0xf]  ;;  %v9900_v63 = vld [vmem:[#allocation2 + $0x14] sm:$0xf]  ;;  %9456 = vmatmul.msk.bf16.vlgmr.msra.gmra.mxu2 %vm3106_vm13, %v9892_v52  ;;  %9462 = vmatmul.msk.bf16.vlgmr.msra.gmra.mxu3 %vm3106_vm13, %v9892_v52  ;;  %v9933_v15 = vld [vmem:[#allocation2 + $0x11c] sm:$0xf] }
 0x361   : > { %v4815_v8 = vmul.f32 0.01, %v4687_v2  ;;  %v13842_v3 = vpop.f32.mrf.mxu3  ;;  %v9211_v45 = vor.u32 %v9900_v63, %v9208_v46 }
 0x362   : > { %5869 = vmatpush.bf16.msrb.mxu0 %v9399_v13  ;;  %5908 = vmatpush.bf16.msrb.mxu1 %v9403_v55 }
 0x363   : > { %v4943_v12 = vsel %vm4879_vm14, %v13723_v59, %v4815_v8  ;;  %v13845_v61 = vpop.f32.mrf.mxu0  ;;  %v9908_v59 = vld [vmem:[#allocation2 + $0x4c] sm:$0xf0] }
 0x364   : > { %v4992_v1 = vpack.c.bf16 %v4943_v12, %v4942_v30  ;;  %v5084_v11 = vmul.f32 %v4943_v12, %v4943_v12  ;;  %v13847_v36 = vpop.f32.mrf.mxu1  ;;  %v9207_v7 = vor.u32 %v9908_v59, %v9206_v39  ;;  %v3811_v12 = vmul.f32 %v13815_v27, %v13674_v48 }
 0x365   : > { %v3825_v27 = vmul.f32 %v13820_v50, %v13684_v25  ;;  %v3826_v50 = vmul.f32 %v13828_v0, %v13708_v18  ;;  %v9901_v18 = vld [vmem:[#allocation2 + $0x1c] sm:$0xf] }
 0x366   : > { %5870 = vmatpush.bf16.msrb.mxu0 %v9335_v38  ;;  %5909 = vmatpush.bf16.msrb.mxu1 %v9339_v44  ;;  %5024 = vst [vmem:[#allocation2 + $0xd8] sm:$0xff] %v4992_v1  ;;  %v5120_v35 = vpack.c.bf16 %v5084_v11, %v5083_v6  ;;  %v9941_v38 = vld [vmem:[#allocation2 + $0x154] sm:$0xf0]  ;;  %v9344_v44 = vld [vmem:[#allocation2 + $0x158] sm:$0xf0] }
 0x367   : > { %v9347_v59 = vor.u32 %v9933_v15, %v9344_v44 }
 0x368   : > { %5152 = vst [vmem:[#allocation2 + $0x1d8] sm:$0xff] %v5120_v35  ;;  %v3592_v54 = vpop.f32.mrf.mxu2 }
 0x369   : > { %v3631_v53 = vpop.f32.mrf.mxu3  ;;  %v13854_v30 = vmul.f32 %v3592_v54, %v13787_v42  ;;  %v9909_v54 = vld [vmem:[#allocation2 + $0x54] sm:$0xf0] }
 0x36a   : > { %5871 = vmatpush.bf16.msrb.mxu0 %v9271_v57  ;;  %5910 = vmatpush.bf16.msrb.mxu1 %v9275_v28  ;;  %v13857_v13 = vmul.f32 %v3631_v53, %v13789_v20  ;;  %v9343_v28 = vor.u32 %v9941_v38, %v9342_v51  ;;  %v9216_v53 = vld [vmem:[#allocation2 + $0x58] sm:$0xf0] }
 0x36b   : > { %v3517_v55 = vpop.f32.mrf.mxu0  ;;  %v9219_v38 = vor.u32 %v9901_v18, %v9216_v53 }
 0x36c   : > { %v3556_v2 = vpop.f32.mrf.mxu1  ;;  %v13859_v26 = vadd.f32 %v3808_v56, %v3517_v55 }
 0x36d   : > { %v13861_v9 = vadd.f32 %v3809_v41, %v3556_v2  ;;  %v9925_v33 = vld [vmem:[#allocation2 + $0xd4] sm:$0xf0]  ;;  %v9280_v43 = vld [vmem:[#allocation2 + $0xd8] sm:$0xf0] }
 0x36e   : > { %5872 = vmatpush.bf16.msrb.mxu0 %v9207_v7  ;;  %5911 = vmatpush.bf16.msrb.mxu1 %v9211_v45  ;;  %v13867_v8 = vmul.f32 100.0, %v13859_v26  ;;  %v9278_v7 = vld [vmem:[#allocation2 + $0x98] sm:$0xf]  ;;  %v9917_v45 = vld [vmem:[#allocation2 + $0x9c] sm:$0xf] }
 0x36f   : > { %v9957_v19 = vld [vmem:[#allocation2 + $0x1d4] sm:$0xf0]  ;;  %v9408_v42 = vld [vmem:[#allocation2 + $0x1d8] sm:$0xf0]  ;;  %v13870_v20 = vmul.f32 100.0, %v13861_v9  ;;  %v9279_v52 = vor.u32 %v9925_v33, %v9278_v7  ;;  %v13939_v33 = vmul.f32 %v13845_v61, %v13750_v58 }
 0x370   : > { %v9407_v6 = vor.u32 %v9957_v19, %v9406_v47  ;;  %v9411_v29 = vor.u32 %v9949_v5, %v9408_v42  ;;  %v4000_v1 = vmin.f32 %v13867_v8, 20.0  ;;  %v3595_v35 = vpop.f32.mrf.mxu2  ;;  %v9283_v47 = vor.u32 %v9917_v45, %v9280_v43  ;;  %v9214_v5 = vld [vmem:[#allocation2 + $0x18] sm:$0xf] }
 0x371   : > { %v4001_v11 = vmin.f32 %v13870_v20, 20.0  ;;  %v3634_v14 = vpop.f32.mrf.mxu3  ;;  %v13884_v22 = vadd.f32 %v3810_v23, %v3595_v35  ;;  %vm4832_vm3 = vcmp.gt.f32.partialorder %v13867_v8, 20.0  ;;  %vm4833_vm4 = vcmp.gt.f32.partialorder %v13870_v20, 20.0 }
 0x372   : > { %5947 = vmatpush.bf16.msrb.mxu2 %v9407_v6  ;;  %5986 = vmatpush.bf16.msrb.mxu3 %v9411_v29  ;;  %v4072_v57 = vmul.f32 1.442695, %v4000_v1  ;;  %v13886_v48 = vadd.f32 %v3811_v12, %v3634_v14  ;;  %v3827_v6 = vmul.f32 %v13830_v49, %v13710_v24  ;;  %v9215_v29 = vor.u32 %v9909_v54, %v9214_v5 }
 0x373   : > { %v4074_v32 = vmul.f32 1.442695, %v4001_v11  ;;  %v3519_v46 = vpop.f32.mrf.mxu0  ;;  %v13891_v41 = vmul.f32 100.0, %v13884_v22  ;;  %v13914_v12 = vmul.f32 %v13833_v4, %v13717_v62  ;;  %v13920_v24 = vmul.f32 %v13835_v34, %v13719_v31 }
 0x374   : > { %v3558_v56 = vpop.f32.mrf.mxu1  ;;  %10451 = vpow2.f32 %v4072_v57  ;;  %v13894_v39 = vmul.f32 100.0, %v13886_v48  ;;  %v13896_v63 = vadd.f32 %v3824_v60, %v3519_v46  ;;  %v9893_v46 = vld [vmem:[%s16314_s2 + $0x38] sm:$0xff] }
 0x375   : > { %10453 = vpow2.f32 %v4074_v32  ;;  %v13898_v25 = vadd.f32 %v3825_v27, %v3558_v56  ;;  %v4002_v55 = vmin.f32 %v13891_v41, 20.0  ;;  %v13935_v56 = vmul.f32 %v13842_v3, %v13738_v17  ;;  %9445 = vmatmul.msk.bf16.gmra.mxu0 %vm3106_vm13, %v9893_v46  ;;  %9451 = vmatmul.msk.bf16.gmra.mxu1 %vm3106_vm13, %v9893_v46 }
 0x376   : > { %5948 = vmatpush.bf16.msrb.mxu2 %v9343_v28  ;;  %5987 = vmatpush.bf16.msrb.mxu3 %v9347_v59  ;;  %v4003_v2 = vmin.f32 %v13894_v39, 20.0  ;;  %v13905_v19 = vmul.f32 100.0, %v13896_v63  ;;  %v13928_v59 = vmul.f32 %v13840_v40, %v13736_v37  ;;  %vm4834_vm12 = vcmp.gt.f32.partialorder %v13891_v41, 20.0 }
 0x377   : > { %v13908_v42 = vmul.f32 100.0, %v13898_v25  ;;  %v4076_v0 = vmul.f32 1.442695, %v4002_v55  ;;  %9457 = vmatmul.msk.bf16.gmra.mxu2 %vm3106_vm13, %v9893_v46  ;;  %9463 = vmatmul.msk.bf16.gmra.mxu3 %vm3106_vm13, %v9893_v46  ;;  %vm4835_vm11 = vcmp.gt.f32.partialorder %v13894_v39, 20.0 }
 0x378   : > { %v4078_v23 = vmul.f32 1.442695, %v4003_v2  ;;  %v4016_v44 = vmin.f32 %v13905_v19, 20.0  ;;  %v3597_v11 = vpop.f32.mrf.mxu2 }
 0x379   : > { %v4017_v1 = vmin.f32 %v13908_v42, 20.0  ;;  %v3636_v60 = vpop.f32.mrf.mxu3  ;;  %10455 = vpow2.f32 %v4076_v0  ;;  %v13922_v49 = vadd.f32 %v3826_v50, %v3597_v11 }
 0x37a   : > { %5949 = vmatpush.bf16.msrb.mxu2 %v9279_v52  ;;  %5988 = vmatpush.bf16.msrb.mxu3 %v9283_v47  ;;  %v10452_v51 = vpop.eup %10451  ;;  %v13924_v35 = vadd.f32 %v3827_v6, %v3636_v60  ;;  %10457 = vpow2.f32 %v4078_v23  ;;  %v4104_v28 = vmul.f32 1.442695, %v4016_v44 }
 0x37b   : > { %v10454_v62 = vpop.eup %10453  ;;  %v4256_v4 = vadd.f32 1.0, %v10452_v51  ;;  %v4259_v14 = vmul.f32 -0.5, %v10452_v51  ;;  %v4262_v15 = vand.u32 2147483647, %v10452_v51  ;;  %v4106_v34 = vmul.f32 1.442695, %v4017_v1  ;;  %v3522_v53 = vpop.f32.mrf.mxu0 }
 0x37c   : > { %v4265_v57 = vadd.f32 1.0, %v10454_v62  ;;  %v4268_v32 = vmul.f32 -0.5, %v10454_v62  ;;  %v4271_v27 = vand.u32 2147483647, %v10454_v62  ;;  %v13942_v37 = vmul.f32 100.0, %v13922_v49  ;;  %v13959_v50 = vpop.f32.mrf.mxu1 }
 0x37d   : > { %10459 = vlog2.f32 %v4256_v4  ;;  %v4260_v31 = vadd.f32 1.0, %v4259_v14  ;;  %vm13944_vm15 = vcmp.lt.f32.partialorder %v4262_v15, 0.0004427343  ;;  %v13949_v54 = vmul.f32 100.0, %v13924_v35 }
 0x37e   : > { %5950 = vmatpush.bf16.msrb.mxu2 %v9215_v29  ;;  %5989 = vmatpush.bf16.msrb.mxu3 %v9219_v38  ;;  %10461 = vlog2.f32 %v4265_v57  ;;  %v4269_v43 = vadd.f32 1.0, %v4268_v32  ;;  %vm13954_vm9 = vcmp.lt.f32.partialorder %v4271_v27, 0.0004427343  ;;  %v4018_v61 = vmin.f32 %v13942_v37, 20.0 }
 0x37f   : > { %10463 = vpow2.f32 %v4104_v28  ;;  %v10456_v17 = vpop.eup %10455  ;;  %v4261_v58 = vmul.f32 %v10452_v51, %v4260_v31  ;;  %v4019_v52 = vmin.f32 %v13949_v54, 20.0  ;;  %v13966_v38 = vadd.f32 %v13914_v12, %v3522_v53 }
 0x380   : > { %10465 = vpow2.f32 %v4106_v34  ;;  %v10458_v7 = vpop.eup %10457  ;;  %v4274_v45 = vadd.f32 1.0, %v10456_v17  ;;  %v4277_v55 = vmul.f32 -0.5, %v10456_v17  ;;  %v4280_v2 = vand.u32 2147483647, %v10456_v17  ;;  %v13979_v28 = vpop.f32.mrf.mxu2 }
 0x381   : > { %v4283_v47 = vadd.f32 1.0, %v10458_v7  ;;  %v4286_v5 = vmul.f32 -0.5, %v10458_v7  ;;  %v4289_v6 = vand.u32 2147483647, %v10458_v7  ;;  %v4108_v29 = vmul.f32 1.442695, %v4018_v61  ;;  %v13981_v31 = vpop.f32.mrf.mxu3 }
 0x382   : > { %v4270_v0 = vmul.f32 %v10454_v62, %v4269_v43  ;;  %10467 = vlog2.f32 %v4274_v45  ;;  %v4278_v23 = vadd.f32 1.0, %v4277_v55  ;;  %vm13968_vm5 = vcmp.lt.f32.partialorder %v4280_v2, 0.0004427343 }
 0x383   : > { %v10460_v18 = vpop.eup %10459  ;;  %10469 = vlog2.f32 %v4283_v47  ;;  %v4110_v60 = vmul.f32 1.442695, %v4019_v52  ;;  %v4287_v14 = vadd.f32 1.0, %v4286_v5  ;;  %vm13972_vm10 = vcmp.lt.f32.partialorder %v4289_v6, 0.0004427343 }
 0x384   : > { %v10462_v44 = vpop.eup %10461  ;;  %v4258_v1 = vmul.f32 0.6931472, %v10460_v18  ;;  %10471 = vpow2.f32 %v4108_v29  ;;  %v4279_v57 = vmul.f32 %v10456_v17, %v4278_v23  ;;  %v3524_v29 = vpop.f32.mrf.mxu0  ;;  %v14012_v15 = vmul.f32 100.0, %v13966_v38 }
 0x385   : > { %v10464_v51 = vpop.eup %10463  ;;  %v4267_v4 = vmul.f32 0.6931472, %v10462_v44  ;;  %v4288_v55 = vmul.f32 %v10458_v7, %v4287_v14  ;;  %v13996_v18 = vpop.f32.mrf.mxu1 }
 0x386   : > { %v10466_v62 = vpop.eup %10465  ;;  %v4264_v12 = vsel %vm13944_vm15, %v4261_v58, %v4258_v1  ;;  %v4400_v32 = vadd.f32 1.0, %v10464_v51  ;;  %v4403_v27 = vmul.f32 -0.5, %v10464_v51  ;;  %v4406_v43 = vand.u32 2147483647, %v10464_v51 }
 0x387   : > { %v4768_v34 = vmul.f32 0.01, %v4264_v12  ;;  %v4273_v46 = vsel %vm13954_vm9, %v4270_v0, %v4267_v4  ;;  %v4409_v61 = vadd.f32 1.0, %v10466_v62  ;;  %v4412_v17 = vmul.f32 -0.5, %v10466_v62 }
 0x388   : > { %v4769_v53 = vmul.f32 0.01, %v4273_v46  ;;  %10473 = vlog2.f32 %v4400_v32  ;;  %v4404_v40 = vadd.f32 1.0, %v4403_v27  ;;  %v10468_v58 = vpop.eup %10467  ;;  %v4415_v2 = vand.u32 2147483647, %v10466_v62 }
 0x389   : > { %v4896_v45 = vsel %vm4832_vm3, %v13859_v26, %v4768_v34  ;;  %10475 = vlog2.f32 %v4409_v61  ;;  %v10470_v52 = vpop.eup %10469  ;;  %v4276_v5 = vmul.f32 0.6931472, %v10468_v58  ;;  %vm13992_vm14 = vcmp.lt.f32.partialorder %v4406_v43, 0.0004427343  ;;  %v14017_v58 = vpop.f32.mrf.mxu2 }
 0x38a   : > { %v5037_v47 = vmul.f32 %v4896_v45, %v4896_v45  ;;  %v4897_v3 = vsel %vm4833_vm4, %v13861_v9, %v4769_v53  ;;  %v10472_v0 = vpop.eup %10471  ;;  %v4285_v7 = vmul.f32 0.6931472, %v10470_v52  ;;  %v4405_v23 = vmul.f32 %v10464_v51, %v4404_v40 }
 0x38b   : > { %v4969_v8 = vpack.c.bf16 %v4897_v3, %v4896_v45  ;;  %v5038_v26 = vmul.f32 %v4897_v3, %v4897_v3  ;;  %vm4848_vm15 = vcmp.gt.f32.partialorder %v13905_v19, 20.0  ;;  %v4282_v44 = vsel %vm13968_vm5, %v4279_v57, %v4276_v5  ;;  %v14019_v45 = vpop.f32.mrf.mxu3 }
 0x38c   : > { %v4413_v20 = vadd.f32 1.0, %v4412_v17  ;;  %vm4849_vm3 = vcmp.gt.f32.partialorder %v13908_v42, 20.0  ;;  %v4418_v9 = vadd.f32 1.0, %v10472_v0  ;;  %v4421_v1 = vmul.f32 -0.5, %v10472_v0 }
 0x38d   : > { %5001 = vst [vmem:[#allocation2 + $0x20] sm:$0xff] %v4969_v8  ;;  %v5097_v4 = vpack.c.bf16 %v5038_v26, %v5037_v47  ;;  %v4770_v14 = vmul.f32 0.01, %v4282_v44  ;;  %v4291_v12 = vsel %vm13972_vm10, %v4288_v55, %v4285_v7  ;;  %vm14004_vm9 = vcmp.lt.f32.partialorder %v4415_v2, 0.0004427343 }
 0x38e   : > { %v10474_v51 = vpop.eup %10473  ;;  %v4771_v27 = vmul.f32 0.01, %v4291_v12  ;;  %10477 = vlog2.f32 %v4418_v9  ;;  %v4422_v11 = vadd.f32 1.0, %v4421_v1  ;;  %v4424_v57 = vand.u32 2147483647, %v10472_v0 }
 0x38f   : > { %v10476_v34 = vpop.eup %10475  ;;  %5129 = vst [vmem:[#allocation2 + $0x120] sm:$0xff] %v5097_v4  ;;  %v4898_v46 = vsel %vm4834_vm12, %v13884_v22, %v4770_v14  ;;  %v4402_v43 = vmul.f32 0.6931472, %v10474_v51  ;;  %10479 = vpow2.f32 %v4110_v60  ;;  %v4414_v17 = vmul.f32 %v10466_v62, %v4413_v20 }
 0x390   : > { %v5039_v61 = vmul.f32 %v4898_v46, %v4898_v46  ;;  %v4899_v53 = vsel %vm4835_vm11, %v13886_v48, %v4771_v27  ;;  %v4411_v40 = vmul.f32 0.6931472, %v10476_v34  ;;  %v4423_v41 = vmul.f32 %v10472_v0, %v4422_v11 }
 0x391   : > { %v4970_v55 = vpack.c.bf16 %v4899_v53, %v4898_v46  ;;  %v5040_v2 = vmul.f32 %v4899_v53, %v4899_v53  ;;  %v4408_v22 = vsel %vm13992_vm14, %v4405_v23, %v4402_v43  ;;  %vm14025_vm4 = vcmp.lt.f32.partialorder %v4424_v57, 0.0004427343  ;;  %v14048_v23 = vpop.f32.mrf.mxu0  ;;  %v14083_v51 = vpop.f32.mrf.mxu2 }
 0x392   : > { %v4784_v60 = vmul.f32 0.01, %v4408_v22  ;;  %v4417_v52 = vsel %vm14004_vm9, %v4414_v17, %v4411_v40  ;;  %v4032_v48 = vmin.f32 %v14012_v15, 20.0  ;;  %v14032_v3 = vadd.f32 %v13920_v24, %v13959_v50  ;;  %v14050_v24 = vpop.f32.mrf.mxu1 }
 0x393   : > { %5002 = vst [vmem:[#allocation2 + $0x28] sm:$0xff] %v4970_v55  ;;  %v5098_v39 = vpack.c.bf16 %v5040_v2, %v5039_v61  ;;  %v4785_v62 = vmul.f32 0.01, %v4417_v52  ;;  %v14036_v5 = vadd.f32 %v13928_v59, %v13979_v28  ;;  %v14043_v26 = vadd.f32 %v13935_v56, %v13981_v31  ;;  %v14061_v56 = vld [vmem:[%s16314_s2 + $0x40] sm:$0xff]  ;;  %v14085_v27 = vpop.f32.mrf.mxu3 }
 0x394   : > { %v10478_v6 = vpop.eup %10477  ;;  %v4912_v0 = vsel %vm4848_vm15, %v13896_v63, %v4784_v60  ;;  %v4136_v8 = vmul.f32 1.442695, %v4032_v48  ;;  %v14046_v7 = vadd.f32 %v13939_v33, %v3524_v29  ;;  %v14056_v28 = vmul.f32 100.0, %v14032_v3  ;;  %9446 = vmatmul.msk.bf16.gmra.mxu0 %vm3106_vm13, %v14061_v56  ;;  %9452 = vmatmul.msk.bf16.gmra.mxu1 %vm3106_vm13, %v14061_v56 }
 0x395   : > { %v10480_v50 = vpop.eup %10479  ;;  %5130 = vst [vmem:[#allocation2 + $0x128] sm:$0xff] %v5098_v39  ;;  %v5053_v59 = vmul.f32 %v4912_v0, %v4912_v0  ;;  %v4913_v19 = vsel %vm4849_vm3, %v13898_v25, %v4785_v62  ;;  %v4420_v63 = vmul.f32 0.6931472, %v10478_v6  ;;  %9458 = vmatmul.msk.bf16.gmra.mxu2 %vm3106_vm13, %v14061_v56  ;;  %9464 = vmatmul.msk.bf16.gmra.mxu3 %vm3106_vm13, %v14061_v56  ;;  %v14075_v4 = vmul.f32 100.0, %v14036_v5 }
 0x396   : > { %v4977_v33 = vpack.c.bf16 %v4913_v19, %v4912_v0  ;;  %v5054_v31 = vmul.f32 %v4913_v19, %v4913_v19  ;;  %v4427_v29 = vadd.f32 1.0, %v10480_v50  ;;  %v4430_v44 = vmul.f32 -0.5, %v10480_v50 }
 0x397   : > { %v4426_v20 = vsel %vm14025_vm4, %v4423_v41, %v4420_v63  ;;  %10481 = vpow2.f32 %v4136_v8  ;;  %v4033_v42 = vmin.f32 %v14056_v28, 20.0  ;;  %v14078_v12 = vmul.f32 100.0, %v14043_v26 }
 0x398   : > { %5009 = vst [vmem:[#allocation2 + $0x60] sm:$0xff] %v4977_v33  ;;  %v5105_v25 = vpack.c.bf16 %v5054_v31, %v5053_v59  ;;  %10483 = vlog2.f32 %v4427_v29  ;;  %v4786_v9 = vmul.f32 0.01, %v4426_v20  ;;  %v4431_v14 = vadd.f32 1.0, %v4430_v44 }
 0x399   : > { %v4138_v1 = vmul.f32 1.442695, %v4033_v42  ;;  %v14081_v32 = vmul.f32 100.0, %v14046_v7  ;;  %v3857_v11 = vmul.f32 %v13847_v36, %v13752_v16  ;;  %v4034_v57 = vmin.f32 %v14075_v4, 20.0  ;;  %v14093_v61 = vpop.f32.mrf.mxu0 }
 0x39a   : > { %5137 = vst [vmem:[#allocation2 + $0x160] sm:$0xff] %v5105_v25  ;;  %vm4850_vm5 = vcmp.gt.f32.partialorder %v13942_v37, 20.0  ;;  %v4433_v34 = vand.u32 2147483647, %v10480_v50  ;;  %v4035_v46 = vmin.f32 %v14078_v12, 20.0  ;;  %v14095_v53 = vpop.f32.mrf.mxu1  ;;  %v14103_v36 = vadd.f32 %v13854_v30, %v14017_v58 }
 0x39b   : > { %10485 = vpow2.f32 %v4138_v1  ;;  %v4048_v43 = vmin.f32 %v14081_v32, 20.0  ;;  %v4914_v17 = vsel %vm4850_vm5, %v13922_v49, %v4786_v9  ;;  %v4140_v55 = vmul.f32 1.442695, %v4034_v57  ;;  %v14115_v59 = vpop.f32.mrf.mxu3 }
 0x39c   : > { %v14099_v16 = vadd.f32 %v3857_v11, %v13996_v18  ;;  %v4432_v2 = vmul.f32 %v10480_v50, %v4431_v14  ;;  %v4142_v60 = vmul.f32 1.442695, %v4035_v46  ;;  %vm4434_vm10 = vcmp.lt.f32.partialorder %v4433_v34, 0.0004427343  ;;  %v14113_v50 = vpop.f32.mrf.mxu2 }
 0x39d   : > { %v10482_v40 = vpop.eup %10481  ;;  %10487 = vpow2.f32 %v4140_v55  ;;  %v4168_v47 = vmul.f32 1.442695, %v4048_v43  ;;  %vm4851_vm12 = vcmp.gt.f32.partialorder %v13949_v54, 20.0  ;;  %v14110_v49 = vmul.f32 100.0, %v14103_v36 }
 0x39e   : > { %v10484_v37 = vpop.eup %10483  ;;  %v4544_v22 = vadd.f32 1.0, %v10482_v40  ;;  %v4547_v41 = vmul.f32 -0.5, %v10482_v40  ;;  %v14106_v48 = vmul.f32 100.0, %v14099_v16  ;;  %v5055_v18 = vmul.f32 %v4914_v17, %v4914_v17 }
 0x39f   : > { %v4429_v52 = vmul.f32 0.6931472, %v10484_v37  ;;  %v4550_v6 = vand.u32 2147483647, %v10482_v40  ;;  %v4050_v33 = vmin.f32 %v14110_v49, 20.0  ;;  %vm4864_vm11 = vcmp.gt.f32.partialorder %v14012_v15, 20.0 }
 0x3a0   : > { %10489 = vlog2.f32 %v4544_v22  ;;  %v4049_v39 = vmin.f32 %v14106_v48, 20.0  ;;  %v4548_v19 = vadd.f32 1.0, %v4547_v41  ;;  %v14128_v1 = vadd.f32 %v13857_v13, %v14019_v45 }
 0x3a1   : > { %v10486_v30 = vpop.eup %10485  ;;  %v4435_v58 = vsel %vm4434_vm10, %v4432_v2, %v4429_v52  ;;  %10491 = vpow2.f32 %v4142_v60  ;;  %v14122_v44 = vpop.f32.mrf.mxu0  ;;  %vm14135_vm14 = vcmp.lt.f32.partialorder %v4550_v6, 0.0004427343  ;;  %vm4865_vm15 = vcmp.gt.f32.partialorder %v14056_v28, 20.0 }
 0x3a2   : > { %v4787_v62 = vmul.f32 0.01, %v4435_v58  ;;  %v4553_v0 = vadd.f32 1.0, %v10486_v30  ;;  %v4556_v8 = vmul.f32 -0.5, %v10486_v30  ;;  %10493 = vpow2.f32 %v4168_v47  ;;  %v14124_v20 = vpop.f32.mrf.mxu1 }
 0x3a3   : > { %v4170_v63 = vmul.f32 1.442695, %v4049_v39  ;;  %v4559_v29 = vand.u32 2147483647, %v10486_v30  ;;  %v10488_v42 = vpop.eup %10487  ;;  %v4549_v55 = vmul.f32 %v10482_v40, %v4548_v19  ;;  %v4172_v13 = vmul.f32 1.442695, %v4050_v33 }
 0x3a4   : > { %v4915_v31 = vsel %vm4851_vm12, %v13924_v35, %v4787_v62  ;;  %10495 = vlog2.f32 %v4553_v0  ;;  %v14133_v35 = vld [vmem:[%s16314_s2 + $0x48] sm:$0xff]  ;;  %v4557_v11 = vadd.f32 1.0, %v4556_v8  ;;  %v4562_v57 = vadd.f32 1.0, %v10488_v42  ;;  %v14154_v39 = vpop.f32.mrf.mxu2  ;;  %v14156_v62 = vpop.f32.mrf.mxu3 }
 0x3a5   : > { %v4978_v25 = vpack.c.bf16 %v4915_v31, %v4914_v17  ;;  %v5056_v9 = vmul.f32 %v4915_v31, %v4915_v31  ;;  %10497 = vpow2.f32 %v4170_v63  ;;  %v4565_v34 = vmul.f32 -0.5, %v10488_v42  ;;  %9447 = vmatmul.msk.bf16.gmra.mxu0 %vm3106_vm13, %v14133_v35  ;;  %9453 = vmatmul.msk.bf16.gmra.mxu1 %vm3106_vm13, %v14133_v35 }
 0x3a6   : > { %v10490_v54 = vpop.eup %10489  ;;  %vm14144_vm3 = vcmp.lt.f32.partialorder %v4559_v29, 0.0004427343  ;;  %10499 = vlog2.f32 %v4562_v57  ;;  %v4568_v37 = vand.u32 2147483647, %v10488_v42  ;;  %9459 = vmatmul.msk.bf16.gmra.mxu2 %vm3106_vm13, %v14133_v35  ;;  %9465 = vmatmul.msk.bf16.gmra.mxu3 %vm3106_vm13, %v14133_v35  ;;  %vm4866_vm9 = vcmp.gt.f32.partialorder %v14075_v4, 20.0 }
 0x3a7   : > { %v10492_v46 = vpop.eup %10491  ;;  %5010 = vst [vmem:[#allocation2 + $0x68] sm:$0xff] %v4978_v25  ;;  %v5106_v43 = vpack.c.bf16 %v5056_v9, %v5055_v18  ;;  %v4546_v17 = vmul.f32 0.6931472, %v10490_v54  ;;  %v4566_v41 = vadd.f32 1.0, %v4565_v34  ;;  %10501 = vpow2.f32 %v4172_v13 }
 0x3a8   : > { %v4571_v2 = vadd.f32 1.0, %v10492_v46  ;;  %v10494_v40 = vpop.eup %10493  ;;  %v4574_v60 = vmul.f32 -0.5, %v10492_v46  ;;  %v4558_v18 = vmul.f32 %v10486_v30, %v4557_v11  ;;  %v4577_v19 = vand.u32 2147483647, %v10492_v46 }
 0x3a9   : > { %5138 = vst [vmem:[#allocation2 + $0x168] sm:$0xff] %v5106_v43  ;;  %v4552_v22 = vsel %vm14135_vm14, %v4549_v55, %v4546_v17  ;;  %v4688_v58 = vadd.f32 1.0, %v10494_v40  ;;  %v4691_v63 = vmul.f32 -0.5, %v10494_v40  ;;  %v14166_v31 = vmul.f32 100.0, %v14128_v1  ;;  %v14168_v29 = vpop.f32.mrf.mxu0 }
 0x3aa   : > { %v10496_v52 = vpop.eup %10495  ;;  %v4800_v47 = vmul.f32 0.01, %v4552_v22  ;;  %10503 = vlog2.f32 %v4571_v2  ;;  %v4575_v8 = vadd.f32 1.0, %v4574_v60  ;;  %v14170_v25 = vpop.f32.mrf.mxu1  ;;  %v4567_v54 = vmul.f32 %v10488_v42, %v4566_v41  ;;  %v5249_v42 = vld [vmem:[#allocation2 + $0x220] sm:$0x11] }
 0x3ab   : > { %v14158_v6 = vpop.eup %10497  ;;  %v4555_v0 = vmul.f32 0.6931472, %v10496_v52  ;;  %10505 = vlog2.f32 %v4688_v58  ;;  %vm14174_vm4 = vcmp.lt.f32.partialorder %v4568_v37, 0.0004427343  ;;  %vm4867_vm5 = vcmp.gt.f32.partialorder %v14078_v12, 20.0 }
 0x3ac   : > { %v4928_v33 = vsel %vm4864_vm11, %v13966_v38, %v4800_v47  ;;  %v4697_v30 = vadd.f32 1.0, %v14158_v6  ;;  %v4694_v38 = vand.u32 2147483647, %v10494_v40  ;;  %v10500_v15 = vpop.eup %10499  ;;  %v4692_v57 = vadd.f32 1.0, %v4691_v63  ;;  %v14198_v28 = vpop.f32.mrf.mxu2 }
 0x3ad   : > { %v4561_v9 = vsel %vm14144_vm3, %v4558_v18, %v4555_v0  ;;  %v4700_v34 = vmul.f32 -0.5, %v14158_v6  ;;  %v14180_v43 = vpop.eup %10501  ;;  %v5069_v17 = vmul.f32 %v4928_v33, %v4928_v33  ;;  %v4564_v55 = vmul.f32 0.6931472, %v10500_v15 }
 0x3ae   : > { %v4801_v11 = vmul.f32 0.01, %v4561_v9  ;;  %10507 = vlog2.f32 %v4697_v30  ;;  %v4576_v13 = vmul.f32 %v10492_v46, %v4575_v8  ;;  %vm14182_vm10 = vcmp.lt.f32.partialorder %v4577_v19, 0.0004427343  ;;  %v14200_v19 = vpop.f32.mrf.mxu3 }
 0x3af   : > { %v4701_v2 = vadd.f32 1.0, %v4700_v34  ;;  %v4706_v22 = vadd.f32 1.0, %v14180_v43  ;;  %v4051_v41 = vmin.f32 %v14166_v31, 20.0  ;;  %v4570_v47 = vsel %vm14174_vm4, %v4567_v54, %v4564_v55 }
 0x3b0   : > { %v10504_v45 = vpop.eup %10503  ;;  %v4929_v37 = vsel %vm4865_vm15, %v14032_v3, %v4801_v11  ;;  %v4802_v58 = vmul.f32 0.01, %v4570_v47  ;;  %v4693_v0 = vmul.f32 %v10494_v40, %v4692_v57  ;;  %vm14193_vm12 = vcmp.lt.f32.partialorder %v4694_v38, 0.0004427343  ;;  %v14207_v40 = vld [vmem:[%s16314_s2 + $0x50] sm:$0xff] }
 0x3b1   : > { %v4985_v60 = vpack.c.bf16 %v4929_v37, %v4928_v33  ;;  %v5070_v52 = vmul.f32 %v4929_v37, %v4929_v37  ;;  %v4573_v46 = vmul.f32 0.6931472, %v10504_v45  ;;  %v10506_v18 = vpop.eup %10505  ;;  %v4703_v3 = vand.u32 2147483647, %v14158_v6  ;;  %v14213_v11 = vpop.f32.mrf.mxu0 }
 0x3b2   : > { %v4690_v30 = vmul.f32 0.6931472, %v10506_v18  ;;  %10509 = vlog2.f32 %v4706_v22  ;;  %v4930_v54 = vsel %vm4866_vm9, %v14036_v5, %v4802_v58  ;;  %v4709_v38 = vmul.f32 -0.5, %v14180_v43  ;;  %v14215_v57 = vpop.f32.mrf.mxu1 }
 0x3b3   : > { %5017 = vst [vmem:[#allocation2 + $0xa0] sm:$0xff] %v4985_v60  ;;  %v5113_v63 = vpack.c.bf16 %v5070_v52, %v5069_v17  ;;  %v4579_v33 = vsel %vm14182_vm10, %v4576_v13, %v4573_v46  ;;  %v4174_v15 = vmul.f32 1.442695, %v4051_v41  ;;  %v5071_v34 = vmul.f32 %v4930_v54, %v4930_v54  ;;  %v7690_v41 = vld [vmem:[#allocation2 + $0x220] sm:$0x11] }
 0x3b4   : > { %v10508_v9 = vpop.eup %10507  ;;  %v4803_v14 = vmul.f32 0.01, %v4579_v33  ;;  %v4696_v17 = vsel %vm14193_vm12, %v4693_v0, %v4690_v30  ;;  %v4702_v13 = vmul.f32 %v14158_v6, %v4701_v2  ;;  %vm4704_vm11 = vcmp.lt.f32.partialorder %v4703_v3, 0.0004427343  ;;  %v5250_v6 = vld [vmem:[#allocation2 + $0x228] sm:$0x11]  ;;  %v14237_v58 = vpop.f32.mrf.mxu2 }
 0x3b5   : > { %5145 = vst [vmem:[#allocation2 + $0x1a0] sm:$0xff] %v5113_v63  ;;  %v4699_v55 = vmul.f32 0.6931472, %v10508_v9  ;;  %v4816_v4 = vmul.f32 0.01, %v4696_v17  ;;  %10511 = vpow2.f32 %v4174_v15  ;;  %vm4880_vm14 = vcmp.gt.f32.partialorder %v14081_v32, 20.0  ;;  %9448 = vmatmul.msk.bf16.gmra.mxu0 %vm3106_vm13, %v14207_v40  ;;  %9454 = vmatmul.msk.bf16.gmra.mxu1 %vm3106_vm13, %v14207_v40 }
 0x3b6   : > { %v4931_v5 = vsel %vm4867_vm5, %v14043_v26, %v4803_v14  ;;  %vm4881_vm15 = vcmp.gt.f32.partialorder %v14106_v48, 20.0  ;;  %9460 = vmatmul.msk.bf16.gmra.mxu2 %vm3106_vm13, %v14207_v40  ;;  %9466 = vmatmul.msk.bf16.gmra.mxu3 %vm3106_vm13, %v14207_v40  ;;  %v4710_v52 = vadd.f32 1.0, %v4709_v38  ;;  %v5491_v47 = vunpack.c.l.b16 %v5249_v42  ;;  %v14239_v48 = vpop.f32.mrf.mxu3  ;;  %v7693_v17 = vld [vmem:[#allocation2 + $0x228] sm:$0x11] }
 0x3b7   : > { %v4986_v45 = vpack.c.bf16 %v4931_v5, %v4930_v54  ;;  %v5072_v37 = vmul.f32 %v4931_v5, %v4931_v5  ;;  %v4705_v22 = vsel %vm4704_vm11, %v4702_v13, %v4699_v55  ;;  %v4944_v12 = vsel %vm4880_vm14, %v14046_v7, %v4816_v4 }
 0x3b8   : > { %v4817_v26 = vmul.f32 0.01, %v4705_v22  ;;  %v10510_v32 = vpop.eup %10509  ;;  %v5085_v60 = vmul.f32 %v4944_v12, %v4944_v12  ;;  %v7691_v7 = vsel %vm11615_vm1, 1065369472, %v7690_v41  ;;  %v5492_v18 = vunpack.c.h.b16 %v5249_v42 }
 0x3b9   : > { %5018 = vst [vmem:[#allocation2 + $0xa8] sm:$0xff] %v4986_v45  ;;  %v5114_v2 = vpack.c.bf16 %v5072_v37, %v5071_v34  ;;  %v5493_v0 = vunpack.c.l.b16 %v5250_v6  ;;  %v4712_v63 = vand.u32 2147483647, %v14180_v43  ;;  %v5571_v33 = vpack.c.b16 %v5491_v47, %v5491_v47 }
 0x3ba   : > { %v4945_v46 = vsel %vm4881_vm15, %v14099_v16, %v4817_v26  ;;  %v4708_v9 = vmul.f32 0.6931472, %v10510_v32  ;;  %7692 = vst [vmem:[#allocation2 + $0x220] sm:$0x11] %v7691_v7  ;;  %v5572_v54 = vpack.c.b16 %v5492_v18, %v5492_v18  ;;  %v14242_v16 = vpop.f32.mrf.mxu0  ;;  %v14244_v14 = vpop.f32.mrf.mxu1  ;;  %v4711_v15 = vmul.f32 %v14180_v43, %v4710_v52 }
 0x3bb   : > { %5146 = vst [vmem:[#allocation2 + $0x1a8] sm:$0xff] %v5114_v2  ;;  %v4993_v8 = vpack.c.bf16 %v4945_v46, %v4944_v12  ;;  %v5086_v3 = vmul.f32 %v4945_v46, %v4945_v46  ;;  %v10512_v30 = vpop.eup %10511  ;;  %v5686_v13 = vand.u32 %v5571_v33, %v11665_v21  ;;  %v5573_v4 = vpack.c.b16 %v5493_v0, %v5493_v0 }
 0x3bc   : > { %v4715_v34 = vadd.f32 1.0, %v10512_v30  ;;  %v4718_v55 = vmul.f32 -0.5, %v10512_v30  ;;  %v5689_v5 = vand.u32 %v5572_v54, %v11665_v21  ;;  %vm4713_vm3 = vcmp.lt.f32.partialorder %v4712_v63, 0.0004427343  ;;  %v14252_v12 = vpop.f32.mrf.mxu2  ;;  %v9414_v7 = vld [vmem:[#allocation2 + $0x1a0] sm:$0xf] }
 0x3bd   : > { %5025 = vst [vmem:[#allocation2 + $0xe0] sm:$0xff] %v4993_v8  ;;  %v5121_v38 = vpack.c.bf16 %v5086_v3, %v5085_v60  ;;  %v4714_v42 = vsel %vm4713_vm3, %v4711_v15, %v4708_v9  ;;  %6024 = vmatpush.bf16.msra.mxu0 %v5686_v13  ;;  %v5692_v45 = vand.u32 %v5573_v4, %v11665_v21  ;;  %v7694_v37 = vsel %vm11615_vm1, 1065369472, %v7693_v17  ;;  %v9897_v60 = vld [vmem:[%s16314_s2 + $0x58] sm:$0xff]  ;;  %v9950_v18 = vld [vmem:[#allocation2 + $0x1a4] sm:$0xf] }
 0x3be   : > { %10513 = vlog2.f32 %v4715_v34  ;;  %6063 = vmatpush.bf16.msra.mxu1 %v5689_v5  ;;  %v5494_v43 = vunpack.c.h.b16 %v5250_v6  ;;  %7695 = vst [vmem:[#allocation2 + $0x228] sm:$0x11] %v7694_v37  ;;  %v4719_v22 = vadd.f32 1.0, %v4718_v55  ;;  %v14254_v26 = vpop.f32.mrf.mxu3  ;;  %v4818_v32 = vmul.f32 0.01, %v4714_v42 }
 0x3bf   : > { %5153 = vst [vmem:[#allocation2 + $0x1e0] sm:$0xff] %v5121_v38  ;;  %6102 = vmatpush.bf16.msra.mxu2 %v5692_v45  ;;  %v4721_v2 = vand.u32 2147483647, %v10512_v30  ;;  %vm4882_vm9 = vcmp.gt.f32.partialorder %v14110_v49, 20.0  ;;  %v9942_v15 = vld [vmem:[#allocation2 + $0x15c] sm:$0xf0] }
 0x3c0   : > { %v5574_v41 = vpack.c.b16 %v5494_v43, %v5494_v43  ;;  %v4720_v8 = vmul.f32 %v10512_v30, %v4719_v22  ;;  %v4946_v33 = vsel %vm4882_vm9, %v14103_v36, %v4818_v32  ;;  %v9352_v34 = vld [vmem:[#allocation2 + $0x160] sm:$0xf0]  ;;  %vm4883_vm5 = vcmp.gt.f32.partialorder %v14166_v31, 20.0  ;;  %v9350_v36 = vld [vmem:[#allocation2 + $0x120] sm:$0xf] }
 0x3c1   : > { %vm4722_vm4 = vcmp.lt.f32.partialorder %v4721_v2, 0.0004427343  ;;  %v5087_v30 = vmul.f32 %v4946_v33, %v4946_v33  ;;  %v9934_v17 = vld [vmem:[#allocation2 + $0x124] sm:$0xf]  ;;  %v9351_v4 = vor.u32 %v9942_v15, %v9350_v36  ;;  %v9286_v2 = vld [vmem:[#allocation2 + $0xa0] sm:$0xf] }
 0x3c2   : > { %v5695_v52 = vand.u32 %v5574_v41, %v11665_v21  ;;  %v14260_v47 = vpop.f32.mrf.mxu0  ;;  %v14262_v46 = vpop.f32.mrf.mxu1  ;;  %v9355_v42 = vor.u32 %v9934_v17, %v9352_v34 }
 0x3c4   : > { %v10514_v6 = vpop.eup %10513  ;;  %6141 = vmatpush.bf16.msra.mxu3 %v5695_v52  ;;  %v14271_v55 = vpop.f32.mrf.mxu2  ;;  %v9926_v43 = vld [vmem:[#allocation2 + $0xdc] sm:$0xf0]  ;;  %v9288_v22 = vld [vmem:[#allocation2 + $0xe0] sm:$0xf0] }
 0x3c5   : > { %v4717_v0 = vmul.f32 0.6931472, %v10514_v6  ;;  %9449 = vmatmul.msk.bf16.gmra.mxu0 %vm3106_vm13, %v9897_v60  ;;  %9455 = vmatmul.msk.bf16.gmra.mxu1 %vm3106_vm13, %v9897_v60  ;;  %v9287_v52 = vor.u32 %v9926_v43, %v9286_v2  ;;  %v9360_v43 = vld [vmem:[#allocation2 + $0x168] sm:$0xf0]  ;;  %v3828_v2 = vmul.f32 %v14242_v16, %v14093_v61 }
 0x3c6   : > { %v9958_v3 = vld [vmem:[#allocation2 + $0x1dc] sm:$0xf0]  ;;  %v9416_v63 = vld [vmem:[#allocation2 + $0x1e0] sm:$0xf0]  ;;  %9461 = vmatmul.msk.bf16.gmra.mxu2 %vm3106_vm13, %v9897_v60  ;;  %9467 = vmatmul.msk.bf16.gmra.mxu3 %vm3106_vm13, %v9897_v60  ;;  %v14273_v13 = vpop.f32.mrf.mxu3 }
 0x3c7   : > { %v9415_v9 = vor.u32 %v9958_v3, %v9414_v7  ;;  %v9419_v54 = vor.u32 %v9950_v18, %v9416_v63  ;;  %v4723_v38 = vsel %vm4722_vm4, %v4720_v8, %v4717_v0  ;;  %v9918_v60 = vld [vmem:[#allocation2 + $0xa4] sm:$0xf]  ;;  %v3812_v18 = vmul.f32 %v14213_v11, %v14048_v23  ;;  %v9222_v8 = vld [vmem:[#allocation2 + $0x20] sm:$0xf] }
 0x3c8   : > { %v4819_v49 = vmul.f32 0.01, %v4723_v38  ;;  %v9291_v6 = vor.u32 %v9918_v60, %v9288_v22  ;;  %v9224_v7 = vld [vmem:[#allocation2 + $0x60] sm:$0xf0]  ;;  %v3813_v0 = vmul.f32 %v14215_v57, %v14050_v24  ;;  %v9422_v24 = vld [vmem:[#allocation2 + $0x1a8] sm:$0xf] }
 0x3c9   : > { %6025 = vmatpush.bf16.msra.mxu0 %v9415_v9  ;;  %6064 = vmatpush.bf16.msra.mxu1 %v9419_v54  ;;  %v9902_v3 = vld [vmem:[#allocation2 + $0x24] sm:$0xf]  ;;  %v9951_v57 = vld [vmem:[#allocation2 + $0x1ac] sm:$0xf]  ;;  %v9358_v60 = vld [vmem:[#allocation2 + $0x128] sm:$0xf] }
 0x3ca   : > { %v4947_v5 = vsel %vm4883_vm5, %v14128_v1, %v4819_v49  ;;  %v14276_v41 = vpop.f32.mrf.mxu0  ;;  %v14278_v32 = vpop.f32.mrf.mxu1  ;;  %v9910_v1 = vld [vmem:[#allocation2 + $0x5c] sm:$0xf0]  ;;  %v9227_v54 = vor.u32 %v9902_v3, %v9224_v7 }
 0x3cb   : > { %v4994_v45 = vpack.c.bf16 %v4947_v5, %v4946_v33  ;;  %v5088_v37 = vmul.f32 %v4947_v5, %v4947_v5  ;;  %v9223_v9 = vor.u32 %v9910_v1, %v9222_v8  ;;  %v9935_v1 = vld [vmem:[#allocation2 + $0x12c] sm:$0xf] }
 0x3cc   : > { %v3748_v63 = vpop.f32.mrf.mxu2 }
 0x3cd   : > { %6026 = vmatpush.bf16.msra.mxu0 %v9351_v4  ;;  %6065 = vmatpush.bf16.msra.mxu1 %v9355_v42  ;;  %5026 = vst [vmem:[#allocation2 + $0xe8] sm:$0xff] %v4994_v45  ;;  %v5122_v31 = vpack.c.bf16 %v5088_v37, %v5087_v30  ;;  %v14285_v38 = vmul.f32 %v3748_v63, %v14198_v28  ;;  %v9943_v37 = vld [vmem:[#allocation2 + $0x164] sm:$0xf0] }
 0x3ce   : > { %v3787_v33 = vpop.f32.mrf.mxu3  ;;  %v3814_v42 = vmul.f32 %v14237_v58, %v14083_v51  ;;  %v3815_v45 = vmul.f32 %v14239_v48, %v14085_v27  ;;  %v3829_v48 = vmul.f32 %v14244_v14, %v14095_v53  ;;  %v3830_v14 = vmul.f32 %v14252_v12, %v14113_v50  ;;  %v9903_v50 = vld [vmem:[#allocation2 + $0x2c] sm:$0xf] }
 0x3cf   : > { %5154 = vst [vmem:[#allocation2 + $0x1e8] sm:$0xff] %v5122_v31  ;;  %v14288_v15 = vmul.f32 %v3787_v33, %v14200_v19  ;;  %v14303_v19 = vld [vmem:[%s16314_s2 + $0x30] sm:$0xff] }
 0x3d1   : > { %6027 = vmatpush.bf16.msra.mxu0 %v9287_v52  ;;  %6066 = vmatpush.bf16.msra.mxu1 %v9291_v6 }
 0x3d2   : > { %v3673_v34 = vpop.f32.mrf.mxu0  ;;  %v3712_v49 = vpop.f32.mrf.mxu1 }
 0x3d3   : > { %v14290_v23 = vadd.f32 %v3812_v18, %v3673_v34  ;;  %v14292_v11 = vadd.f32 %v3813_v0, %v3712_v49  ;;  %v9359_v18 = vor.u32 %v9943_v37, %v9358_v60  ;;  %v9363_v0 = vor.u32 %v9935_v1, %v9360_v43  ;;  %v9232_v34 = vld [vmem:[#allocation2 + $0x68] sm:$0xf0]  ;;  %v9294_v49 = vld [vmem:[#allocation2 + $0xa8] sm:$0xf] }
 0x3d4   : > { %v3751_v52 = vpop.f32.mrf.mxu2  ;;  %v9927_v61 = vld [vmem:[#allocation2 + $0xe4] sm:$0xf0]  ;;  %v9296_v16 = vld [vmem:[#allocation2 + $0xe8] sm:$0xf0]  ;;  %v3831_v37 = vmul.f32 %v14254_v26, %v14115_v59  ;;  %v14357_v59 = vmul.f32 %v14262_v46, %v14124_v20 }
 0x3d5   : > { %6028 = vmatpush.bf16.msra.mxu0 %v9223_v9  ;;  %6067 = vmatpush.bf16.msra.mxu1 %v9227_v54  ;;  %v14295_v17 = vmul.f32 100.0, %v14290_v23  ;;  %v14298_v28 = vmul.f32 100.0, %v14292_v11  ;;  %v14321_v58 = vadd.f32 %v3814_v42, %v3751_v52  ;;  %v9911_v54 = vld [vmem:[#allocation2 + $0x64] sm:$0xf0] }
 0x3d6   : > { %v9959_v30 = vld [vmem:[#allocation2 + $0x1e4] sm:$0xf0]  ;;  %v9424_v36 = vld [vmem:[#allocation2 + $0x1e8] sm:$0xf0]  ;;  %9468 = vmatmul.msk.bf16.vlgmr.msrb.gmra.mxu0 %vm3106_vm13, %v14303_v19  ;;  %9474 = vmatmul.msk.bf16.vlgmr.msrb.gmra.mxu1 %vm3106_vm13, %v14303_v19  ;;  %v3790_v6 = vpop.f32.mrf.mxu3 }
 0x3d7   : > { %v9423_v5 = vor.u32 %v9959_v30, %v9422_v24  ;;  %v9427_v4 = vor.u32 %v9951_v57, %v9424_v36  ;;  %9480 = vmatmul.msk.bf16.vlgmr.msrb.gmra.mxu2 %vm3106_vm13, %v14303_v19  ;;  %9486 = vmatmul.msk.bf16.vlgmr.msrb.gmra.mxu3 %vm3106_vm13, %v14303_v19  ;;  %v4004_v22 = vmin.f32 %v14295_v17, 20.0  ;;  %v4005_v31 = vmin.f32 %v14298_v28, 20.0  ;;  %v9919_v24 = vld [vmem:[#allocation2 + $0xac] sm:$0xf] }
 0x3d8   : > { %v14323_v27 = vadd.f32 %v3815_v45, %v3790_v6  ;;  %v14328_v63 = vmul.f32 100.0, %v14321_v58  ;;  %v9295_v36 = vor.u32 %v9927_v61, %v9294_v49  ;;  %vm4836_vm12 = vcmp.gt.f32.partialorder %v14295_v17, 20.0 }
 0x3d9   : > { %6103 = vmatpush.bf16.msra.mxu2 %v9423_v5  ;;  %6142 = vmatpush.bf16.msra.mxu3 %v9427_v4  ;;  %v4080_v7 = vmul.f32 1.442695, %v4004_v22  ;;  %v4082_v51 = vmul.f32 1.442695, %v4005_v31  ;;  %v9299_v5 = vor.u32 %v9919_v24, %v9296_v16  ;;  %v9230_v4 = vld [vmem:[#allocation2 + $0x28] sm:$0xf]  ;;  %v14351_v31 = vmul.f32 %v14260_v47, %v14122_v44 }
 0x3da   : > { %v3675_v8 = vpop.f32.mrf.mxu0  ;;  %v3714_v3 = vpop.f32.mrf.mxu1  ;;  %v14331_v33 = vmul.f32 100.0, %v14323_v27  ;;  %v4006_v57 = vmin.f32 %v14328_v63, 20.0  ;;  %v9231_v43 = vor.u32 %v9911_v54, %v9230_v4  ;;  %v14365_v16 = vmul.f32 %v14271_v55, %v14154_v39  ;;  %v14381_v39 = vld [vmem:[%s16314_s2 + $0x38] sm:$0xff] }
 0x3db   : > { %10515 = vpow2.f32 %v4080_v7  ;;  %v14333_v9 = vadd.f32 %v3828_v2, %v3675_v8  ;;  %v14335_v53 = vadd.f32 %v3829_v48, %v3714_v3  ;;  %v9235_v2 = vor.u32 %v9903_v50, %v9232_v34 }
 0x3dc   : > { %10517 = vpow2.f32 %v4082_v51  ;;  %v4007_v30 = vmin.f32 %v14331_v33, 20.0  ;;  %v4084_v12 = vmul.f32 1.442695, %v4006_v57  ;;  %v3753_v6 = vpop.f32.mrf.mxu2  ;;  %v14369_v54 = vmul.f32 %v14273_v13, %v14156_v62 }
 0x3dd   : > { %6104 = vmatpush.bf16.msra.mxu2 %v9359_v18  ;;  %6143 = vmatpush.bf16.msra.mxu3 %v9363_v0  ;;  %v14342_v42 = vmul.f32 100.0, %v14333_v9  ;;  %v14345_v45 = vmul.f32 100.0, %v14335_v53  ;;  %v14359_v26 = vadd.f32 %v3830_v14, %v3753_v6  ;;  %v14373_v34 = vmul.f32 %v14276_v41, %v14168_v29 }
 0x3de   : > { %v4086_v22 = vmul.f32 1.442695, %v4007_v30  ;;  %v3792_v1 = vpop.f32.mrf.mxu3  ;;  %10519 = vpow2.f32 %v4084_v12  ;;  %vm4837_vm14 = vcmp.gt.f32.partialorder %v14298_v28, 20.0  ;;  %vm4838_vm9 = vcmp.gt.f32.partialorder %v14328_v63, 20.0 }
 0x3df   : > { %v4020_v60 = vmin.f32 %v14342_v42, 20.0  ;;  %v4021_v52 = vmin.f32 %v14345_v45, 20.0  ;;  %v14361_v51 = vadd.f32 %v3831_v37, %v3792_v1  ;;  %v14376_v14 = vmul.f32 100.0, %v14359_v26 }
 0x3e0   : > { %10521 = vpow2.f32 %v4086_v22  ;;  %vm4839_vm4 = vcmp.gt.f32.partialorder %v14331_v33, 20.0 }
 0x3e1   : > { %6105 = vmatpush.bf16.msra.mxu2 %v9295_v36  ;;  %6144 = vmatpush.bf16.msra.mxu3 %v9299_v5  ;;  %v10516_v7 = vpop.eup %10515  ;;  %v4112_v61 = vmul.f32 1.442695, %v4020_v60  ;;  %v4114_v46 = vmul.f32 1.442695, %v4021_v52  ;;  %v14392_v55 = vmul.f32 100.0, %v14361_v51  ;;  %v4022_v24 = vmin.f32 %v14376_v14, 20.0 }
 0x3e2   : > { %v10518_v44 = vpop.eup %10517  ;;  %v4292_v47 = vadd.f32 1.0, %v10516_v7  ;;  %v4295_v48 = vmul.f32 -0.5, %v10516_v7  ;;  %v4298_v18 = vand.u32 2147483647, %v10516_v7  ;;  %v3678_v57 = vpop.f32.mrf.mxu0 }
 0x3e3   : > { %v4301_v0 = vadd.f32 1.0, %v10518_v44  ;;  %v4304_v8 = vmul.f32 -0.5, %v10518_v44  ;;  %v4307_v3 = vand.u32 2147483647, %v10518_v44  ;;  %v14404_v30 = vpop.f32.mrf.mxu1  ;;  %v14409_v1 = vadd.f32 %v14351_v31, %v3678_v57 }
 0x3e4   : > { %10523 = vlog2.f32 %v4292_v47  ;;  %v4296_v20 = vadd.f32 1.0, %v4295_v48  ;;  %vm14387_vm10 = vcmp.lt.f32.partialorder %v4298_v18, 0.0004427343  ;;  %v10520_v13 = vpop.eup %10519 }
 0x3e5   : > { %6106 = vmatpush.bf16.msra.mxu2 %v9231_v43  ;;  %6145 = vmatpush.bf16.msra.mxu3 %v9235_v2  ;;  %10525 = vlog2.f32 %v4301_v0  ;;  %v4305_v29 = vadd.f32 1.0, %v4304_v8  ;;  %vm14399_vm11 = vcmp.lt.f32.partialorder %v4307_v3, 0.0004427343  ;;  %v4310_v5 = vadd.f32 1.0, %v10520_v13 }
 0x3e6   : > { %9469 = vmatmul.msk.bf16.gmra.mxu0 %vm3106_vm13, %v14381_v39  ;;  %9475 = vmatmul.msk.bf16.gmra.mxu1 %vm3106_vm13, %v14381_v39  ;;  %10527 = vpow2.f32 %v4112_v61  ;;  %v4297_v41 = vmul.f32 %v10516_v7, %v4296_v20  ;;  %v10522_v36 = vpop.eup %10521  ;;  %v4313_v4 = vmul.f32 -0.5, %v10520_v13  ;;  %v4316_v37 = vand.u32 2147483647, %v10520_v13  ;;  %v14426_v57 = vpop.f32.mrf.mxu3 }
 0x3e7   : > { %9481 = vmatmul.msk.bf16.gmra.mxu2 %vm3106_vm13, %v14381_v39  ;;  %9487 = vmatmul.msk.bf16.gmra.mxu3 %vm3106_vm13, %v14381_v39  ;;  %10529 = vpow2.f32 %v4114_v46  ;;  %v4023_v43 = vmin.f32 %v14392_v55, 20.0  ;;  %v4319_v50 = vadd.f32 1.0, %v10522_v36  ;;  %v4322_v12 = vmul.f32 -0.5, %v10522_v36 }
 0x3e8   : > { %v4325_v22 = vand.u32 2147483647, %v10522_v36  ;;  %v4116_v2 = vmul.f32 1.442695, %v4022_v24  ;;  %v4306_v52 = vmul.f32 %v10518_v44, %v4305_v29  ;;  %10531 = vlog2.f32 %v4310_v5  ;;  %v14424_v24 = vpop.f32.mrf.mxu2 }
 0x3e9   : > { %v4314_v6 = vadd.f32 1.0, %v4313_v4  ;;  %vm14411_vm15 = vcmp.lt.f32.partialorder %v4316_v37, 0.0004427343  ;;  %10533 = vlog2.f32 %v4319_v50  ;;  %v4118_v18 = vmul.f32 1.442695, %v4023_v43 }
 0x3ea   : > { %v10524_v60 = vpop.eup %10523  ;;  %v4323_v3 = vadd.f32 1.0, %v4322_v12  ;;  %vm14415_vm3 = vcmp.lt.f32.partialorder %v4325_v22, 0.0004427343  ;;  %10535 = vpow2.f32 %v4116_v2 }
 0x3eb   : > { %v10526_v7 = vpop.eup %10525  ;;  %v4294_v47 = vmul.f32 0.6931472, %v10524_v60  ;;  %v4315_v20 = vmul.f32 %v10520_v13, %v4314_v6 }
 0x3ec   : > { %v10528_v0 = vpop.eup %10527  ;;  %v4303_v8 = vmul.f32 0.6931472, %v10526_v7  ;;  %v4324_v22 = vmul.f32 %v10522_v36, %v4323_v3  ;;  %v14491_v7 = vadd.f32 %v14365_v16, %v14424_v24 }
 0x3ed   : > { %v14419_v44 = vpop.eup %10529  ;;  %v4300_v31 = vsel %vm14387_vm10, %v4297_v41, %v4294_v47  ;;  %v4436_v46 = vadd.f32 1.0, %v10528_v0  ;;  %v4439_v29 = vmul.f32 -0.5, %v10528_v0  ;;  %v4442_v37 = vand.u32 2147483647, %v10528_v0  ;;  %v3680_v47 = vpop.f32.mrf.mxu0 }
 0x3ee   : > { %v4772_v5 = vmul.f32 0.01, %v4300_v31  ;;  %v4309_v4 = vsel %vm14399_vm11, %v4306_v52, %v4303_v8  ;;  %v4445_v43 = vadd.f32 1.0, %v14419_v44  ;;  %v4448_v41 = vmul.f32 -0.5, %v14419_v44  ;;  %v10532_v50 = vpop.eup %10531  ;;  %v14444_v8 = vpop.f32.mrf.mxu1 }
 0x3ef   : > { %v4773_v62 = vmul.f32 0.01, %v4309_v4  ;;  %10537 = vlog2.f32 %v4436_v46  ;;  %v4440_v13 = vadd.f32 1.0, %v4439_v29  ;;  %v4451_v49 = vand.u32 2147483647, %v14419_v44  ;;  %v10534_v2 = vpop.eup %10533 }
 0x3f0   : > { %v4900_v12 = vsel %vm4836_vm12, %v14290_v23, %v4772_v5  ;;  %10539 = vlog2.f32 %v4445_v43  ;;  %v4312_v6 = vmul.f32 0.6931472, %v10532_v50  ;;  %vm14440_vm5 = vcmp.lt.f32.partialorder %v4442_v37, 0.0004427343  ;;  %v10536_v17 = vpop.eup %10535 }
 0x3f1   : > { %v5041_v60 = vmul.f32 %v4900_v12, %v4900_v12  ;;  %v4901_v52 = vsel %vm4837_vm14, %v14292_v11, %v4773_v62  ;;  %v4321_v3 = vmul.f32 0.6931472, %v10534_v2  ;;  %v4441_v31 = vmul.f32 %v10528_v0, %v4440_v13  ;;  %v14474_v2 = vpop.f32.mrf.mxu3 }
 0x3f2   : > { %v4971_v23 = vpack.c.bf16 %v4901_v52, %v4900_v12  ;;  %v5042_v36 = vmul.f32 %v4901_v52, %v4901_v52  ;;  %vm4852_vm10 = vcmp.gt.f32.partialorder %v14342_v42, 20.0  ;;  %v4318_v46 = vsel %vm14411_vm15, %v4315_v20, %v4312_v6 }
 0x3f3   : > { %v4449_v28 = vadd.f32 1.0, %v4448_v41  ;;  %vm4853_vm12 = vcmp.gt.f32.partialorder %v14345_v45, 20.0  ;;  %v4454_v11 = vadd.f32 1.0, %v10536_v17  ;;  %v4457_v29 = vmul.f32 -0.5, %v10536_v17 }
 0x3f4   : > { %5003 = vst [vmem:[#allocation2 + $0x30] sm:$0xff] %v4971_v23  ;;  %v5099_v5 = vpack.c.bf16 %v5042_v36, %v5041_v60  ;;  %v4774_v4 = vmul.f32 0.01, %v4318_v46  ;;  %v4327_v37 = vsel %vm14415_vm3, %v4324_v22, %v4321_v3  ;;  %vm14452_vm11 = vcmp.lt.f32.partialorder %v4451_v49, 0.0004427343 }
 0x3f5   : > { %v10538_v0 = vpop.eup %10537  ;;  %v4775_v62 = vmul.f32 0.01, %v4327_v37  ;;  %10541 = vlog2.f32 %v4454_v11  ;;  %v4458_v48 = vadd.f32 1.0, %v4457_v29  ;;  %v4460_v20 = vand.u32 2147483647, %v10536_v17  ;;  %v14503_v29 = vpop.f32.mrf.mxu0 }
 0x3f6   : > { %9470 = vmatmul.msk.bf16.gmra.mxu0 %vm3106_vm13, %v14061_v56  ;;  %9476 = vmatmul.msk.bf16.gmra.mxu1 %vm3106_vm13, %v14061_v56  ;;  %v10540_v13 = vpop.eup %10539  ;;  %5131 = vst [vmem:[#allocation2 + $0x130] sm:$0xff] %v5099_v5  ;;  %v4902_v61 = vsel %vm4838_vm9, %v14321_v58, %v4774_v4  ;;  %v4438_v41 = vmul.f32 0.6931472, %v10538_v0  ;;  %10543 = vpow2.f32 %v4118_v18  ;;  %v14464_v50 = vmul.f32 100.0, %v14409_v1  ;;  %v3758_v58 = vpop.f32.mrf.mxu2 }
 0x3f7   : > { %9482 = vmatmul.msk.bf16.gmra.mxu2 %vm3106_vm13, %v14061_v56  ;;  %9488 = vmatmul.msk.bf16.gmra.mxu3 %vm3106_vm13, %v14061_v56  ;;  %v5043_v12 = vmul.f32 %v4902_v61, %v4902_v61  ;;  %v4903_v22 = vsel %vm4839_vm4, %v14323_v27, %v4775_v62  ;;  %v4447_v49 = vmul.f32 0.6931472, %v10540_v13  ;;  %v4450_v63 = vmul.f32 %v14419_v44, %v4449_v28 }
 0x3f8   : > { %v4972_v18 = vpack.c.bf16 %v4903_v22, %v4902_v61  ;;  %v5044_v60 = vmul.f32 %v4903_v22, %v4903_v22  ;;  %v4444_v52 = vsel %vm14440_vm5, %v4441_v31, %v4438_v41  ;;  %v4459_v6 = vmul.f32 %v10536_v17, %v4458_v48 }
 0x3f9   : > { %v4788_v23 = vmul.f32 0.01, %v4444_v52  ;;  %v4453_v56 = vsel %vm14452_vm11, %v4450_v63, %v4447_v49  ;;  %vm14480_vm14 = vcmp.lt.f32.partialorder %v4460_v20, 0.0004427343  ;;  %v4036_v27 = vmin.f32 %v14464_v50, 20.0  ;;  %v14527_v13 = vpop.f32.mrf.mxu3 }
 0x3fa   : > { %5004 = vst [vmem:[#allocation2 + $0x38] sm:$0xff] %v4972_v18  ;;  %v5100_v33 = vpack.c.bf16 %v5044_v60, %v5043_v12  ;;  %v4789_v44 = vmul.f32 0.01, %v4453_v56  ;;  %v14487_v3 = vadd.f32 %v14357_v59, %v14404_v30  ;;  %v14498_v28 = vadd.f32 %v14369_v54, %v14426_v57  ;;  %v14505_v59 = vpop.f32.mrf.mxu1 }
 0x3fb   : > { %v10542_v17 = vpop.eup %10541  ;;  %v4916_v31 = vsel %vm4852_vm10, %v14333_v9, %v4788_v23  ;;  %v4144_v46 = vmul.f32 1.442695, %v4036_v27  ;;  %v14501_v11 = vadd.f32 %v14373_v34, %v3680_v47  ;;  %v3861_v61 = vmul.f32 %v14278_v32, %v14170_v25 }
 0x3fc   : > { %v10544_v30 = vpop.eup %10543  ;;  %5132 = vst [vmem:[#allocation2 + $0x138] sm:$0xff] %v5100_v33  ;;  %v5057_v16 = vmul.f32 %v4916_v31, %v4916_v31  ;;  %v4917_v42 = vsel %vm4853_vm12, %v14335_v53, %v4789_v44  ;;  %v4456_v9 = vmul.f32 0.6931472, %v10542_v17  ;;  %v14511_v24 = vmul.f32 100.0, %v14487_v3 }
 0x3fd   : > { %v4979_v54 = vpack.c.bf16 %v4917_v42, %v4916_v31  ;;  %v5058_v57 = vmul.f32 %v4917_v42, %v4917_v42  ;;  %v4463_v5 = vadd.f32 1.0, %v10544_v30  ;;  %v4466_v34 = vmul.f32 -0.5, %v10544_v30  ;;  %v14535_v63 = vpop.f32.mrf.mxu0 }
 0x3fe   : > { %v4462_v47 = vsel %vm14480_vm14, %v4459_v6, %v4456_v9  ;;  %10545 = vpow2.f32 %v4144_v46  ;;  %v4037_v4 = vmin.f32 %v14511_v24, 20.0  ;;  %v14517_v53 = vmul.f32 100.0, %v14491_v7  ;;  %v14525_v20 = vpop.f32.mrf.mxu2 }
 0x3ff   : > { %5011 = vst [vmem:[#allocation2 + $0x70] sm:$0xff] %v4979_v54  ;;  %v5107_v37 = vpack.c.bf16 %v5058_v57, %v5057_v16  ;;  %10547 = vlog2.f32 %v4463_v5  ;;  %v4790_v43 = vmul.f32 0.01, %v4462_v47  ;;  %v4467_v0 = vadd.f32 1.0, %v4466_v34 }
 0x400   : > { %v4146_v45 = vmul.f32 1.442695, %v4037_v4  ;;  %v14520_v62 = vmul.f32 100.0, %v14498_v28  ;;  %v14523_v48 = vmul.f32 100.0, %v14501_v11  ;;  %v4038_v41 = vmin.f32 %v14517_v53, 20.0 }
 0x401   : > { %5139 = vst [vmem:[#allocation2 + $0x170] sm:$0xff] %v5107_v37  ;;  %vm4854_vm15 = vcmp.gt.f32.partialorder %v14376_v14, 20.0  ;;  %v4469_v12 = vand.u32 2147483647, %v10544_v30  ;;  %v14541_v25 = vadd.f32 %v3861_v61, %v14444_v8  ;;  %v14544_v32 = vadd.f32 %v14285_v38, %v3758_v58 }
 0x402   : > { %10549 = vpow2.f32 %v4146_v45  ;;  %v4039_v22 = vmin.f32 %v14520_v62, 20.0  ;;  %v4052_v49 = vmin.f32 %v14523_v48, 20.0  ;;  %v14537_v18 = vpop.f32.mrf.mxu1  ;;  %v4918_v52 = vsel %vm4854_vm15, %v14359_v26, %v4790_v43 }
 0x403   : > { %v4148_v6 = vmul.f32 1.442695, %v4038_v41  ;;  %v4468_v23 = vmul.f32 %v10544_v30, %v4467_v0  ;;  %v14551_v8 = vmul.f32 100.0, %v14541_v25  ;;  %vm4470_vm3 = vcmp.lt.f32.partialorder %v4469_v12, 0.0004427343 }
 0x404   : > { %v10546_v60 = vpop.eup %10545  ;;  %v4150_v27 = vmul.f32 1.442695, %v4039_v22  ;;  %v4176_v26 = vmul.f32 1.442695, %v4052_v49  ;;  %vm4855_vm9 = vcmp.gt.f32.partialorder %v14392_v55, 20.0  ;;  %v14559_v38 = vmul.f32 100.0, %v14544_v32 }
 0x405   : > { %v10548_v14 = vpop.eup %10547  ;;  %v4580_v56 = vadd.f32 1.0, %v10546_v60  ;;  %v4583_v36 = vmul.f32 -0.5, %v10546_v60  ;;  %10551 = vpow2.f32 %v4148_v6  ;;  %v5059_v44 = vmul.f32 %v4918_v52, %v4918_v52  ;;  %v14571_v4 = vpop.f32.mrf.mxu0 }
 0x406   : > { %9471 = vmatmul.msk.bf16.gmra.mxu0 %vm3106_vm13, %v14133_v35  ;;  %9477 = vmatmul.msk.bf16.gmra.mxu1 %vm3106_vm13, %v14133_v35  ;;  %v4465_v33 = vmul.f32 0.6931472, %v10548_v14  ;;  %v4053_v31 = vmin.f32 %v14551_v8, 20.0  ;;  %v4586_v30 = vand.u32 2147483647, %v10546_v60  ;;  %v14562_v9 = vpop.f32.mrf.mxu2  ;;  %v4054_v5 = vmin.f32 %v14559_v38, 20.0 }
 0x407   : > { %9483 = vmatmul.msk.bf16.gmra.mxu2 %vm3106_vm13, %v14133_v35  ;;  %9489 = vmatmul.msk.bf16.gmra.mxu3 %vm3106_vm13, %v14133_v35  ;;  %10553 = vlog2.f32 %v4580_v56  ;;  %v14564_v35 = vpop.f32.mrf.mxu3  ;;  %v4584_v54 = vadd.f32 1.0, %v4583_v36  ;;  %vm4868_vm4 = vcmp.gt.f32.partialorder %v14464_v50, 20.0  ;;  %v14577_v61 = vadd.f32 %v14288_v15, %v14474_v2  ;;  %v5251_v56 = vld [vmem:[#allocation2 + $0x230] sm:$0x11] }
 0x408   : > { %v10550_v58 = vpop.eup %10549  ;;  %v4471_v17 = vsel %vm4470_vm3, %v4468_v23, %v4465_v33  ;;  %10555 = vpow2.f32 %v4150_v27  ;;  %v4178_v57 = vmul.f32 1.442695, %v4053_v31  ;;  %vm14579_vm5 = vcmp.lt.f32.partialorder %v4586_v30, 0.0004427343 }
 0x409   : > { %v4791_v46 = vmul.f32 0.01, %v4471_v17  ;;  %v4589_v16 = vadd.f32 1.0, %v10550_v58  ;;  %v4592_v42 = vmul.f32 -0.5, %v10550_v58  ;;  %10557 = vpow2.f32 %v4176_v26 }
 0x40a   : > { %v4595_v47 = vand.u32 2147483647, %v10550_v58  ;;  %v14573_v37 = vpop.f32.mrf.mxu1  ;;  %v4585_v23 = vmul.f32 %v10546_v60, %v4584_v54  ;;  %vm4869_vm10 = vcmp.gt.f32.partialorder %v14511_v24, 20.0  ;;  %vm4870_vm11 = vcmp.gt.f32.partialorder %v14517_v53, 20.0 }
 0x40b   : > { %v4919_v34 = vsel %vm4855_vm9, %v14361_v51, %v4791_v46  ;;  %10559 = vlog2.f32 %v4589_v16  ;;  %v10552_v43 = vpop.eup %10551  ;;  %v4593_v51 = vadd.f32 1.0, %v4592_v42  ;;  %vm4871_vm15 = vcmp.gt.f32.partialorder %v14520_v62, 20.0 }
 0x40c   : > { %v4980_v45 = vpack.c.bf16 %v4919_v34, %v4918_v52  ;;  %v5060_v0 = vmul.f32 %v4919_v34, %v4919_v34  ;;  %10561 = vpow2.f32 %v4178_v57  ;;  %v4598_v12 = vadd.f32 1.0, %v10552_v43 }
 0x40d   : > { %v10554_v41 = vpop.eup %10553  ;;  %v4601_v22 = vmul.f32 -0.5, %v10552_v43  ;;  %v4180_v52 = vmul.f32 1.442695, %v4054_v5  ;;  %vm14584_vm12 = vcmp.lt.f32.partialorder %v4595_v47, 0.0004427343  ;;  %v4594_v17 = vmul.f32 %v10550_v58, %v4593_v51 }
 0x40e   : > { %v10556_v49 = vpop.eup %10555  ;;  %5012 = vst [vmem:[#allocation2 + $0x78] sm:$0xff] %v4980_v45  ;;  %v5108_v6 = vpack.c.bf16 %v5060_v0, %v5059_v44  ;;  %v4582_v14 = vmul.f32 0.6931472, %v10554_v41  ;;  %10563 = vlog2.f32 %v4598_v12  ;;  %v4604_v15 = vand.u32 2147483647, %v10552_v43  ;;  %v14590_v46 = vpop.f32.mrf.mxu2 }
 0x40f   : > { %v4607_v2 = vadd.f32 1.0, %v10556_v49  ;;  %v10558_v36 = vpop.eup %10557  ;;  %v4602_v33 = vadd.f32 1.0, %v4601_v22  ;;  %v4610_v26 = vmul.f32 -0.5, %v10556_v49  ;;  %10565 = vpow2.f32 %v4180_v52  ;;  %v14592_v30 = vpop.f32.mrf.mxu3 }
 0x410   : > { %5140 = vst [vmem:[#allocation2 + $0x178] sm:$0xff] %v5108_v6  ;;  %v4588_v27 = vsel %vm14579_vm5, %v4585_v23, %v4582_v14  ;;  %v4724_v31 = vadd.f32 1.0, %v10558_v36  ;;  %v4613_v57 = vand.u32 2147483647, %v10556_v49  ;;  %v4727_v5 = vmul.f32 -0.5, %v10558_v36  ;;  %v14604_v45 = vpop.f32.mrf.mxu0 }
 0x411   : > { %v10560_v44 = vpop.eup %10559  ;;  %v4804_v60 = vmul.f32 0.01, %v4588_v27  ;;  %10567 = vlog2.f32 %v4607_v2  ;;  %v4611_v54 = vadd.f32 1.0, %v4610_v26  ;;  %v14602_v47 = vmul.f32 100.0, %v14577_v61 }
 0x412   : > { %v14594_v16 = vpop.eup %10561  ;;  %v4591_v42 = vmul.f32 0.6931472, %v10560_v44  ;;  %10569 = vlog2.f32 %v4724_v31  ;;  %v14606_v0 = vpop.f32.mrf.mxu1  ;;  %v4603_v55 = vmul.f32 %v10552_v43, %v4602_v33  ;;  %vm14610_vm14 = vcmp.lt.f32.partialorder %v4604_v15, 0.0004427343  ;;  %v14631_v15 = vld [vmem:[%s16314_s2 + $0x50] sm:$0xff] }
 0x413   : > { %v4932_v34 = vsel %vm4868_vm4, %v14409_v1, %v4804_v60  ;;  %v4733_v58 = vadd.f32 1.0, %v14594_v16  ;;  %v4730_v1 = vand.u32 2147483647, %v10558_v36  ;;  %v4728_v22 = vadd.f32 1.0, %v4727_v5 }
 0x414   : > { %v4597_v41 = vsel %vm14584_vm12, %v4594_v17, %v4591_v42  ;;  %v10564_v50 = vpop.eup %10563  ;;  %v4736_v6 = vmul.f32 -0.5, %v14594_v16  ;;  %v5073_v14 = vmul.f32 %v4932_v34, %v4932_v34  ;;  %v4612_v52 = vmul.f32 %v10556_v49, %v4611_v54 }
 0x415   : > { %v4805_v12 = vmul.f32 0.01, %v4597_v41  ;;  %10571 = vlog2.f32 %v4733_v58  ;;  %v14620_v43 = vpop.eup %10565  ;;  %v4600_v23 = vmul.f32 0.6931472, %v10564_v50  ;;  %vm14622_vm3 = vcmp.lt.f32.partialorder %v4613_v57, 0.0004427343 }
 0x416   : > { %9472 = vmatmul.msk.bf16.gmra.mxu0 %vm3106_vm13, %v14207_v40  ;;  %9478 = vmatmul.msk.bf16.gmra.mxu1 %vm3106_vm13, %v14207_v40  ;;  %v4737_v27 = vadd.f32 1.0, %v4736_v6  ;;  %v4742_v33 = vadd.f32 1.0, %v14620_v43  ;;  %v4055_v26 = vmin.f32 %v14602_v47, 20.0  ;;  %v4729_v54 = vmul.f32 %v10558_v36, %v4728_v22  ;;  %v14647_v24 = vpop.f32.mrf.mxu2 }
 0x417   : > { %9484 = vmatmul.msk.bf16.gmra.mxu2 %vm3106_vm13, %v14207_v40  ;;  %9490 = vmatmul.msk.bf16.gmra.mxu3 %vm3106_vm13, %v14631_v15  ;;  %v10568_v2 = vpop.eup %10567  ;;  %v4933_v49 = vsel %vm4869_vm10, %v14487_v3, %v4805_v12  ;;  %v4606_v60 = vsel %vm14610_vm14, %v4603_v55, %v4600_v23  ;;  %vm14642_vm9 = vcmp.lt.f32.partialorder %v4730_v1, 0.0004427343  ;;  %v4739_v3 = vand.u32 2147483647, %v14594_v16  ;;  %v14649_v5 = vpop.f32.mrf.mxu3 }
 0x418   : > { %v4987_v44 = vpack.c.bf16 %v4933_v49, %v4932_v34  ;;  %v5074_v40 = vmul.f32 %v4933_v49, %v4933_v49  ;;  %v4609_v17 = vmul.f32 0.6931472, %v10568_v2  ;;  %v10570_v31 = vpop.eup %10569  ;;  %v4806_v42 = vmul.f32 0.01, %v4606_v60  ;;  %v14657_v12 = vpop.f32.mrf.mxu0 }
 0x419   : > { %v4726_v41 = vmul.f32 0.6931472, %v10570_v31  ;;  %10573 = vlog2.f32 %v4742_v33  ;;  %v4745_v1 = vmul.f32 -0.5, %v14620_v43  ;;  %v4182_v50 = vmul.f32 1.442695, %v4055_v26 }
 0x41a   : > { %5019 = vst [vmem:[#allocation2 + $0xb0] sm:$0xff] %v4987_v44  ;;  %v5115_v34 = vpack.c.bf16 %v5074_v40, %v5073_v14  ;;  %v4615_v58 = vsel %vm14622_vm3, %v4612_v52, %v4609_v17  ;;  %v4934_v36 = vsel %vm4870_vm11, %v14491_v7, %v4806_v42  ;;  %v14659_v22 = vpop.f32.mrf.mxu1  ;;  %v4738_v52 = vmul.f32 %v14594_v16, %v4737_v27  ;;  %v7696_v26 = vld [vmem:[#allocation2 + $0x230] sm:$0x11]  ;;  %v5252_v44 = vld [vmem:[#allocation2 + $0x238] sm:$0x11] }
 0x41b   : > { %v10572_v55 = vpop.eup %10571  ;;  %v4807_v51 = vmul.f32 0.01, %v4615_v58  ;;  %v5075_v6 = vmul.f32 %v4934_v36, %v4934_v36  ;;  %v4732_v14 = vsel %vm14642_vm9, %v4729_v54, %v4726_v41  ;;  %vm4740_vm4 = vcmp.lt.f32.partialorder %v4739_v3, 0.0004427343 }
 0x41c   : > { %5147 = vst [vmem:[#allocation2 + $0x1b0] sm:$0xff] %v5115_v34  ;;  %v4735_v23 = vmul.f32 0.6931472, %v10572_v55  ;;  %v4820_v53 = vmul.f32 0.01, %v4732_v14  ;;  %10575 = vpow2.f32 %v4182_v50  ;;  %vm4884_vm5 = vcmp.gt.f32.partialorder %v14523_v48, 20.0 }
 0x41d   : > { %v4935_v7 = vsel %vm4871_vm15, %v14498_v28, %v4807_v51  ;;  %vm4885_vm10 = vcmp.gt.f32.partialorder %v14551_v8, 20.0  ;;  %v4746_v27 = vadd.f32 1.0, %v4745_v1  ;;  %v5495_v17 = vunpack.c.l.b16 %v5251_v56  ;;  %v7699_v14 = vld [vmem:[#allocation2 + $0x238] sm:$0x11] }
 0x41e   : > { %v4988_v2 = vpack.c.bf16 %v4935_v7, %v4934_v36  ;;  %v5076_v49 = vmul.f32 %v4935_v7, %v4935_v7  ;;  %v4741_v33 = vsel %vm4740_vm4, %v4738_v52, %v4735_v23  ;;  %v4948_v40 = vsel %vm4884_vm5, %v14501_v11, %v4820_v53  ;;  %v14673_v54 = vpop.f32.mrf.mxu2 }
 0x41f   : > { %v4821_v60 = vmul.f32 0.01, %v4741_v33  ;;  %v10574_v16 = vpop.eup %10573  ;;  %v5089_v28 = vmul.f32 %v4948_v40, %v4948_v40  ;;  %v7697_v42 = vsel %vm11615_vm1, 1065369472, %v7696_v26  ;;  %v5496_v48 = vunpack.c.h.b16 %v5251_v56  ;;  %v14675_v57 = vpop.f32.mrf.mxu3  ;;  %v14688_v56 = vld [vmem:[%s16314_s2 + $0x58] sm:$0xff] }
 0x420   : > { %5020 = vst [vmem:[#allocation2 + $0xb8] sm:$0xff] %v4988_v2  ;;  %v5116_v62 = vpack.c.bf16 %v5076_v49, %v5075_v6  ;;  %v5497_v11 = vunpack.c.l.b16 %v5252_v44  ;;  %v4748_v34 = vand.u32 2147483647, %v14620_v43  ;;  %v5575_v58 = vpack.c.b16 %v5495_v17, %v5495_v17 }
 0x421   : > { %v4949_v31 = vsel %vm4885_vm10, %v14541_v25, %v4821_v60  ;;  %v4744_v55 = vmul.f32 0.6931472, %v10574_v16  ;;  %7698 = vst [vmem:[#allocation2 + $0x230] sm:$0x11] %v7697_v42  ;;  %v5576_v36 = vpack.c.b16 %v5496_v48, %v5496_v48  ;;  %v14678_v25 = vpop.f32.mrf.mxu0  ;;  %v4747_v50 = vmul.f32 %v14620_v43, %v4746_v27 }
 0x422   : > { %5148 = vst [vmem:[#allocation2 + $0x1b8] sm:$0xff] %v5116_v62  ;;  %v4995_v3 = vpack.c.bf16 %v4949_v31, %v4948_v40  ;;  %v5090_v8 = vmul.f32 %v4949_v31, %v4949_v31  ;;  %v10576_v41 = vpop.eup %10575  ;;  %v14680_v51 = vpop.f32.mrf.mxu1  ;;  %v5698_v52 = vand.u32 %v5575_v58, %v11665_v21  ;;  %v5577_v53 = vpack.c.b16 %v5497_v11, %v5497_v11 }
 0x423   : > { %v4751_v6 = vadd.f32 1.0, %v10576_v41  ;;  %v4754_v23 = vmul.f32 -0.5, %v10576_v41  ;;  %v5701_v7 = vand.u32 %v5576_v36, %v11665_v21  ;;  %vm14692_vm12 = vcmp.lt.f32.partialorder %v4748_v34, 0.0004427343  ;;  %v9430_v42 = vld [vmem:[#allocation2 + $0x1b0] sm:$0xf] }
 0x424   : > { %5027 = vst [vmem:[#allocation2 + $0xf0] sm:$0xff] %v4995_v3  ;;  %v5123_v1 = vpack.c.bf16 %v5090_v8, %v5089_v28  ;;  %v4750_v43 = vsel %vm14692_vm12, %v4747_v50, %v4744_v55  ;;  %6180 = vmatpush.bf16.msrb.mxu0 %v5698_v52  ;;  %v5704_v49 = vand.u32 %v5577_v53, %v11665_v21  ;;  %v7700_v33 = vsel %vm11615_vm1, 1065369472, %v7699_v14  ;;  %v9952_v48 = vld [vmem:[#allocation2 + $0x1b4] sm:$0xf] }
 0x425   : > { %10577 = vlog2.f32 %v4751_v6  ;;  %6219 = vmatpush.bf16.msrb.mxu1 %v5701_v7  ;;  %v5498_v26 = vunpack.c.h.b16 %v5252_v44  ;;  %7701 = vst [vmem:[#allocation2 + $0x238] sm:$0x11] %v7700_v33  ;;  %v4755_v40 = vadd.f32 1.0, %v4754_v23  ;;  %v4822_v28 = vmul.f32 0.01, %v4750_v43 }
 0x426   : > { %9473 = vmatmul.msk.bf16.gmra.mxu0 %vm3106_vm13, %v14688_v56  ;;  %5155 = vst [vmem:[#allocation2 + $0x1f0] sm:$0xff] %v5123_v1  ;;  %9479 = vmatmul.msk.bf16.gmra.mxu1 %vm3106_vm13, %v14688_v56  ;;  %v14705_v16 = vpop.f32.mrf.mxu2  ;;  %v4757_v27 = vand.u32 2147483647, %v10576_v41  ;;  %vm4886_vm1 = vcmp.gt.f32.partialorder %v14559_v38, 20.0  ;;  %v9944_v50 = vld [vmem:[#allocation2 + $0x16c] sm:$0xf0] }
 0x427   : > { %9485 = vmatmul.msk.bf16.gmra.mxu2 %vm3106_vm13, %v14688_v56  ;;  %v5578_v60 = vpack.c.b16 %v5498_v26, %v5498_v26  ;;  %v14707_v62 = vpop.f32.mrf.mxu3  ;;  %9491 = vmatmul.msk.bf16.gmra.mxu3 %vm3106_vm13, %v14688_v56  ;;  %v4756_v3 = vmul.f32 %v10576_v41, %v4755_v40  ;;  %v4950_v58 = vsel %vm4886_vm1, %v14544_v32, %v4822_v28  ;;  %v9368_v6 = vld [vmem:[#allocation2 + $0x170] sm:$0xf0]  ;;  %vm4887_vm14 = vcmp.gt.f32.partialorder %v14602_v47, 20.0  ;;  %v9366_v38 = vld [vmem:[#allocation2 + $0x130] sm:$0xf] }
 0x428   : > { %6258 = vmatpush.bf16.msrb.mxu2 %v5704_v49  ;;  %vm4758_vm11 = vcmp.lt.f32.partialorder %v4757_v27, 0.0004427343  ;;  %v5091_v23 = vmul.f32 %v4950_v58, %v4950_v58  ;;  %v9936_v52 = vld [vmem:[#allocation2 + $0x134] sm:$0xf]  ;;  %v9367_v53 = vor.u32 %v9944_v50, %v9366_v38  ;;  %v9302_v28 = vld [vmem:[#allocation2 + $0xb0] sm:$0xf] }
 0x429   : > { %v5707_v17 = vand.u32 %v5578_v60, %v11665_v21  ;;  %v14712_v31 = vpop.f32.mrf.mxu0  ;;  %v9371_v2 = vor.u32 %v9936_v52, %v9368_v6  ;;  %v9920_v27 = vld [vmem:[#allocation2 + $0xb4] sm:$0xf]  ;;  %v14747_v50 = vld [vmem:[%s16314_s2 + $0x30] sm:$0xff]  ;;  %v9953_v6 = vld [vmem:[#allocation2 + $0x1bc] sm:$0xf] }
 0x42a   : > { %v14714_v10 = vpop.f32.mrf.mxu1 }
 0x42b   : > { %v10578_v44 = vpop.eup %10577  ;;  %6297 = vmatpush.bf16.msrb.mxu3 %v5707_v17  ;;  %v9928_v33 = vld [vmem:[#allocation2 + $0xec] sm:$0xf0]  ;;  %v9304_v26 = vld [vmem:[#allocation2 + $0xf0] sm:$0xf0] }
 0x42c   : > { %v4753_v11 = vmul.f32 0.6931472, %v10578_v44  ;;  %v9307_v17 = vor.u32 %v9920_v27, %v9304_v26  ;;  %v9912_v44 = vld [vmem:[#allocation2 + $0x6c] sm:$0xf0] }
 0x42d   : > { %v9960_v8 = vld [vmem:[#allocation2 + $0x1ec] sm:$0xf0]  ;;  %v9432_v34 = vld [vmem:[#allocation2 + $0x1f0] sm:$0xf0] }
 0x42e   : > { %v9431_v55 = vor.u32 %v9960_v8, %v9430_v42  ;;  %v9435_v36 = vor.u32 %v9952_v48, %v9432_v34  ;;  %v4759_v1 = vsel %vm4758_vm11, %v4756_v3, %v4753_v11  ;;  %v14719_v41 = vpop.f32.mrf.mxu2  ;;  %v9240_v42 = vld [vmem:[#allocation2 + $0x70] sm:$0xf0]  ;;  %v6333_v48 = vmul.f32 %v14657_v12, %v14503_v29  ;;  %v9238_v3 = vld [vmem:[#allocation2 + $0x30] sm:$0xf] }
 0x42f   : > { %v4823_v14 = vmul.f32 0.01, %v4759_v1  ;;  %v14721_v7 = vpop.f32.mrf.mxu3  ;;  %v6334_v11 = vmul.f32 %v14659_v22, %v14505_v59  ;;  %v9904_v8 = vld [vmem:[#allocation2 + $0x34] sm:$0xf] }
 0x430   : > { %6181 = vmatpush.bf16.msrb.mxu0 %v9431_v55  ;;  %6220 = vmatpush.bf16.msrb.mxu1 %v9435_v36  ;;  %v9239_v55 = vor.u32 %v9912_v44, %v9238_v3  ;;  %v9243_v36 = vor.u32 %v9904_v8, %v9240_v42 }
 0x431   : > { %v4951_v32 = vsel %vm4887_vm14, %v14577_v61, %v4823_v14  ;;  %v14724_v40 = vpop.f32.mrf.mxu0  ;;  %v9303_v61 = vor.u32 %v9928_v33, %v9302_v28  ;;  %v9374_v28 = vld [vmem:[#allocation2 + $0x138] sm:$0xf] }
 0x432   : > { %v4996_v43 = vpack.c.bf16 %v4951_v32, %v4950_v58  ;;  %v5092_v49 = vmul.f32 %v4951_v32, %v4951_v32  ;;  %v14726_v60 = vpop.f32.mrf.mxu1 }
 0x434   : > { %6182 = vmatpush.bf16.msrb.mxu0 %v9367_v53  ;;  %6221 = vmatpush.bf16.msrb.mxu1 %v9371_v2  ;;  %5028 = vst [vmem:[#allocation2 + $0xf8] sm:$0xff] %v4996_v43  ;;  %v5124_v47 = vpack.c.bf16 %v5092_v49, %v5091_v23  ;;  %v6335_v53 = vmul.f32 %v14673_v54, %v14525_v20  ;;  %v9945_v43 = vld [vmem:[#allocation2 + $0x174] sm:$0xf0]  ;;  %v9376_v49 = vld [vmem:[#allocation2 + $0x178] sm:$0xf0] }
 0x435   : > { %v6336_v2 = vmul.f32 %v14675_v57, %v14527_v13  ;;  %v6350_v57 = vmul.f32 %v14680_v51, %v14537_v18  ;;  %v9375_v42 = vor.u32 %v9945_v43, %v9374_v28  ;;  %v6351_v51 = vmul.f32 %v14705_v16, %v14562_v9 }
 0x436   : > { %9492 = vmatmul.msk.bf16.vlgmr.msra.gmra.mxu0 %vm3106_vm13, %v14303_v19  ;;  %9498 = vmatmul.msk.bf16.vlgmr.msra.gmra.mxu1 %vm3106_vm13, %v14303_v19  ;;  %5156 = vst [vmem:[#allocation2 + $0x1f8] sm:$0xff] %v5124_v47  ;;  %v5813_v34 = vpop.f32.mrf.mxu2  ;;  %v6349_v47 = vmul.f32 %v14678_v25, %v14535_v63  ;;  %v6352_v16 = vmul.f32 %v14707_v62, %v14564_v35 }
 0x437   : > { %9504 = vmatmul.msk.bf16.vlgmr.msra.gmra.mxu2 %vm3106_vm13, %v14303_v19  ;;  %v5852_v58 = vpop.f32.mrf.mxu3  ;;  %v14739_v1 = vmul.f32 %v5813_v34, %v14647_v24  ;;  %9510 = vmatmul.msk.bf16.vlgmr.msra.gmra.mxu3 %vm3106_vm13, %v14747_v50  ;;  %v9438_v24 = vld [vmem:[#allocation2 + $0x1b8] sm:$0xf]  ;;  %v14809_v35 = vmul.f32 %v14714_v10, %v14573_v37 }
 0x438   : > { %6183 = vmatpush.bf16.msrb.mxu0 %v9303_v61  ;;  %6222 = vmatpush.bf16.msrb.mxu1 %v9307_v17  ;;  %v14742_v19 = vmul.f32 %v5852_v58, %v14649_v5  ;;  %v9937_v17 = vld [vmem:[#allocation2 + $0x13c] sm:$0xf] }
 0x439   : > { %v5738_v29 = vpop.f32.mrf.mxu0 }
 0x43a   : > { %v5777_v59 = vpop.f32.mrf.mxu1  ;;  %v14751_v12 = vadd.f32 %v6333_v48, %v5738_v29  ;;  %v9379_v48 = vor.u32 %v9937_v17, %v9376_v49  ;;  %v9310_v29 = vld [vmem:[#allocation2 + $0xb8] sm:$0xf] }
 0x43b   : > { %v14753_v22 = vadd.f32 %v6334_v11, %v5777_v59  ;;  %v9929_v63 = vld [vmem:[#allocation2 + $0xf4] sm:$0xf0]  ;;  %v9312_v25 = vld [vmem:[#allocation2 + $0xf8] sm:$0xf0] }
 0x43c   : > { %6184 = vmatpush.bf16.msrb.mxu0 %v9239_v55  ;;  %6223 = vmatpush.bf16.msrb.mxu1 %v9243_v36  ;;  %v14756_v23 = vmul.f32 100.0, %v14751_v12  ;;  %v9913_v55 = vld [vmem:[#allocation2 + $0x74] sm:$0xf0]  ;;  %v9248_v36 = vld [vmem:[#allocation2 + $0x78] sm:$0xf0] }
 0x43d   : > { %v9961_v5 = vld [vmem:[#allocation2 + $0x1f4] sm:$0xf0]  ;;  %v9440_v14 = vld [vmem:[#allocation2 + $0x1f8] sm:$0xf0]  ;;  %v14759_v38 = vmul.f32 100.0, %v14753_v22 }
 0x43e   : > { %v9439_v52 = vor.u32 %v9961_v5, %v9438_v24  ;;  %v9443_v32 = vor.u32 %v9953_v6, %v9440_v14  ;;  %v6525_v33 = vmin.f32 %v14756_v23, 20.0  ;;  %v5816_v27 = vpop.f32.mrf.mxu2  ;;  %v9921_v59 = vld [vmem:[#allocation2 + $0xbc] sm:$0xf]  ;;  %v9311_v5 = vor.u32 %v9929_v63, %v9310_v29 }
 0x43f   : > { %v6526_v26 = vmin.f32 %v14759_v38, 20.0  ;;  %v5855_v61 = vpop.f32.mrf.mxu3  ;;  %v14769_v54 = vadd.f32 %v6335_v53, %v5816_v27  ;;  %v9315_v14 = vor.u32 %v9921_v59, %v9312_v25  ;;  %v14828_v25 = vmul.f32 %v14721_v7, %v14592_v30 }
 0x440   : > { %6259 = vmatpush.bf16.msrb.mxu2 %v9439_v52  ;;  %6298 = vmatpush.bf16.msrb.mxu3 %v9443_v32  ;;  %v6589_v44 = vmul.f32 1.442695, %v6525_v33  ;;  %v14771_v13 = vadd.f32 %v6336_v2, %v5855_v61  ;;  %v9246_v52 = vld [vmem:[#allocation2 + $0x38] sm:$0xf]  ;;  %v9905_v2 = vld [vmem:[#allocation2 + $0x3c] sm:$0xf]  ;;  %v6365_v33 = vmul.f32 %v14712_v31, %v14571_v4 }
 0x441   : > { %v6591_v20 = vmul.f32 1.442695, %v6526_v26  ;;  %v5740_v11 = vpop.f32.mrf.mxu0  ;;  %v14776_v8 = vmul.f32 100.0, %v14769_v54  ;;  %v9247_v53 = vor.u32 %v9913_v55, %v9246_v52  ;;  %v9251_v26 = vor.u32 %v9905_v2, %v9248_v36  ;;  %v14818_v4 = vld [vmem:[%s16314_s2 + $0x38] sm:$0xff] }
 0x442   : > { %v5779_v3 = vpop.f32.mrf.mxu1  ;;  %10579 = vpow2.f32 %v6589_v44  ;;  %v14779_v34 = vmul.f32 100.0, %v14771_v13  ;;  %v14781_v58 = vadd.f32 %v6349_v47, %v5740_v11  ;;  %v14824_v11 = vmul.f32 %v14719_v41, %v14590_v46 }
 0x443   : > { %10581 = vpow2.f32 %v6591_v20  ;;  %v14783_v18 = vadd.f32 %v6350_v57, %v5779_v3  ;;  %v6527_v24 = vmin.f32 %v14776_v8, 20.0  ;;  %v14832_v55 = vmul.f32 %v14724_v40, %v14604_v45 }
 0x444   : > { %6260 = vmatpush.bf16.msrb.mxu2 %v9375_v42  ;;  %6299 = vmatpush.bf16.msrb.mxu3 %v9379_v48  ;;  %v6528_v6 = vmin.f32 %v14779_v34, 20.0  ;;  %v14794_v32 = vmul.f32 100.0, %v14781_v58  ;;  %vm7357_vm3 = vcmp.gt.f32.partialorder %v14756_v23, 20.0  ;;  %vm7358_vm4 = vcmp.gt.f32.partialorder %v14759_v38, 20.0 }
 0x445   : > { %v14797_v9 = vmul.f32 100.0, %v14783_v18  ;;  %v6593_v43 = vmul.f32 1.442695, %v6527_v24  ;;  %vm7359_vm12 = vcmp.gt.f32.partialorder %v14776_v8, 20.0  ;;  %vm7360_vm1 = vcmp.gt.f32.partialorder %v14779_v34, 20.0 }
 0x446   : > { %9493 = vmatmul.msk.bf16.gmra.mxu0 %vm3106_vm13, %v14381_v39  ;;  %9499 = vmatmul.msk.bf16.gmra.mxu1 %vm3106_vm13, %v14381_v39  ;;  %v6595_v49 = vmul.f32 1.442695, %v6528_v6  ;;  %v6541_v47 = vmin.f32 %v14794_v32, 20.0  ;;  %v5818_v27 = vpop.f32.mrf.mxu2  ;;  %vm7373_vm14 = vcmp.gt.f32.partialorder %v14794_v32, 20.0 }
 0x447   : > { %9505 = vmatmul.msk.bf16.gmra.mxu2 %vm3106_vm13, %v14381_v39  ;;  %v6542_v28 = vmin.f32 %v14797_v9, 20.0  ;;  %v5857_v61 = vpop.f32.mrf.mxu3  ;;  %10583 = vpow2.f32 %v6593_v43  ;;  %v14811_v62 = vadd.f32 %v6351_v51, %v5818_v27  ;;  %9511 = vmatmul.msk.bf16.gmra.mxu3 %vm3106_vm13, %v14818_v4 }
 0x448   : > { %6261 = vmatpush.bf16.msrb.mxu2 %v9311_v5  ;;  %6300 = vmatpush.bf16.msrb.mxu3 %v9315_v14  ;;  %v10580_v39 = vpop.eup %10579  ;;  %v14813_v17 = vadd.f32 %v6352_v16, %v5857_v61  ;;  %10585 = vpow2.f32 %v6595_v49  ;;  %v6621_v48 = vmul.f32 1.442695, %v6541_v47 }
 0x449   : > { %v10582_v31 = vpop.eup %10581  ;;  %v6717_v44 = vadd.f32 1.0, %v10580_v39  ;;  %v6720_v20 = vmul.f32 -0.5, %v10580_v39  ;;  %v6723_v57 = vand.u32 2147483647, %v10580_v39  ;;  %v6623_v63 = vmul.f32 1.442695, %v6542_v28  ;;  %v5743_v40 = vpop.f32.mrf.mxu0 }
 0x44a   : > { %v6726_v37 = vadd.f32 1.0, %v10582_v31  ;;  %v6729_v10 = vmul.f32 -0.5, %v10582_v31  ;;  %v6732_v42 = vand.u32 2147483647, %v10582_v31  ;;  %v14835_v36 = vmul.f32 100.0, %v14811_v62  ;;  %v14850_v59 = vpop.f32.mrf.mxu1 }
 0x44b   : > { %10587 = vlog2.f32 %v6717_v44  ;;  %v6721_v3 = vadd.f32 1.0, %v6720_v20  ;;  %vm14837_vm15 = vcmp.lt.f32.partialorder %v6723_v57, 0.0004427343  ;;  %v14842_v51 = vmul.f32 100.0, %v14813_v17 }
 0x44c   : > { %6262 = vmatpush.bf16.msrb.mxu2 %v9247_v53  ;;  %6301 = vmatpush.bf16.msrb.mxu3 %v9251_v26  ;;  %10589 = vlog2.f32 %v6726_v37  ;;  %v6730_v41 = vadd.f32 1.0, %v6729_v10  ;;  %vm14845_vm9 = vcmp.lt.f32.partialorder %v6732_v42, 0.0004427343  ;;  %v6543_v7 = vmin.f32 %v14835_v36, 20.0 }
 0x44d   : > { %10591 = vpow2.f32 %v6621_v48  ;;  %v10584_v29 = vpop.eup %10583  ;;  %v6722_v30 = vmul.f32 %v10580_v39, %v6721_v3  ;;  %v6544_v52 = vmin.f32 %v14842_v51, 20.0  ;;  %v14854_v28 = vadd.f32 %v6365_v33, %v5743_v40 }
 0x44e   : > { %10593 = vpow2.f32 %v6623_v63  ;;  %v10586_v24 = vpop.eup %10585  ;;  %v6735_v6 = vadd.f32 1.0, %v10584_v29  ;;  %v6738_v5 = vmul.f32 -0.5, %v10584_v29  ;;  %v6741_v14 = vand.u32 2147483647, %v10584_v29  ;;  %v14871_v63 = vpop.f32.mrf.mxu2 }
 0x44f   : > { %v6744_v16 = vadd.f32 1.0, %v10586_v24  ;;  %v6747_v53 = vmul.f32 -0.5, %v10586_v24  ;;  %v6750_v2 = vand.u32 2147483647, %v10586_v24  ;;  %v6625_v43 = vmul.f32 1.442695, %v6543_v7 }
 0x450   : > { %v6731_v26 = vmul.f32 %v10582_v31, %v6730_v41  ;;  %10595 = vlog2.f32 %v6735_v6  ;;  %v6739_v47 = vadd.f32 1.0, %v6738_v5  ;;  %vm14856_vm5 = vcmp.lt.f32.partialorder %v6741_v14, 0.0004427343  ;;  %v14873_v41 = vpop.f32.mrf.mxu3  ;;  %v14878_v7 = vld [vmem:[%s16314_s2 + $0x40] sm:$0xff] }
 0x451   : > { %v10588_v49 = vpop.eup %10587  ;;  %10597 = vlog2.f32 %v6744_v16  ;;  %v14860_v44 = vmul.f32 1.442695, %v6544_v52  ;;  %v6748_v37 = vadd.f32 1.0, %v6747_v53  ;;  %vm14862_vm10 = vcmp.lt.f32.partialorder %v6750_v2, 0.0004427343 }
 0x452   : > { %v10590_v27 = vpop.eup %10589  ;;  %v6719_v61 = vmul.f32 0.6931472, %v10588_v49  ;;  %10599 = vpow2.f32 %v6625_v43  ;;  %v6740_v42 = vmul.f32 %v10584_v29, %v6739_v47  ;;  %v14921_v10 = vmul.f32 100.0, %v14854_v28 }
 0x453   : > { %v10592_v20 = vpop.eup %10591  ;;  %v6728_v57 = vmul.f32 0.6931472, %v10590_v27  ;;  %v6749_v45 = vmul.f32 %v10586_v24, %v6748_v37  ;;  %v5745_v27 = vpop.f32.mrf.mxu0  ;;  %v14946_v47 = vadd.f32 %v14824_v11, %v14871_v63 }
 0x454   : > { %v14866_v31 = vpop.eup %10593  ;;  %v6725_v33 = vsel %vm14837_vm15, %v6722_v30, %v6719_v61  ;;  %v6861_v48 = vadd.f32 1.0, %v10592_v20  ;;  %v6864_v3 = vmul.f32 -0.5, %v10592_v20  ;;  %v6867_v30 = vand.u32 2147483647, %v10592_v20  ;;  %v14902_v61 = vpop.f32.mrf.mxu1 }
 0x455   : > { %v7293_v46 = vmul.f32 0.01, %v6725_v33  ;;  %v6734_v29 = vsel %vm14845_vm9, %v6731_v26, %v6728_v57  ;;  %v6870_v40 = vadd.f32 1.0, %v14866_v31  ;;  %v6873_v14 = vmul.f32 -0.5, %v14866_v31 }
 0x456   : > { %9494 = vmatmul.msk.bf16.gmra.mxu0 %vm3106_vm13, %v14878_v7  ;;  %9500 = vmatmul.msk.bf16.gmra.mxu1 %vm3106_vm13, %v14878_v7  ;;  %v7294_v6 = vmul.f32 0.01, %v6734_v29  ;;  %10601 = vlog2.f32 %v6861_v48  ;;  %v6865_v5 = vadd.f32 1.0, %v6864_v3  ;;  %v10596_v52 = vpop.eup %10595  ;;  %v6876_v53 = vand.u32 2147483647, %v14866_v31 }
 0x457   : > { %9506 = vmatmul.msk.bf16.gmra.mxu2 %vm3106_vm13, %v14878_v7  ;;  %v7421_v16 = vsel %vm7357_vm3, %v14751_v12, %v7293_v46  ;;  %10603 = vlog2.f32 %v6870_v40  ;;  %v10598_v2 = vpop.eup %10597  ;;  %v6737_v26 = vmul.f32 0.6931472, %v10596_v52  ;;  %vm14898_vm11 = vcmp.lt.f32.partialorder %v6867_v30, 0.0004427343  ;;  %9512 = vmatmul.msk.bf16.gmra.mxu3 %vm3106_vm13, %v14878_v7 }
 0x458   : > { %v7550_v43 = vmul.f32 %v7421_v16, %v7421_v16  ;;  %v7422_v49 = vsel %vm7358_vm4, %v14753_v22, %v7294_v6  ;;  %v10600_v12 = vpop.eup %10599  ;;  %v6746_v57 = vmul.f32 0.6931472, %v10598_v2  ;;  %v6866_v37 = vmul.f32 %v10592_v20, %v6865_v5  ;;  %v14927_v2 = vpop.f32.mrf.mxu2 }
 0x459   : > { %v7486_v23 = vpack.c.bf16 %v7422_v49, %v7421_v16  ;;  %v7551_v24 = vmul.f32 %v7422_v49, %v7422_v49  ;;  %v6743_v22 = vsel %vm14856_vm5, %v6740_v42, %v6737_v26  ;;  %v6874_v38 = vadd.f32 1.0, %v6873_v14 }
 0x45a   : > { %vm7374_vm15 = vcmp.gt.f32.partialorder %v14797_v9, 20.0  ;;  %v6879_v33 = vadd.f32 1.0, %v10600_v12  ;;  %v6882_v48 = vmul.f32 -0.5, %v10600_v12  ;;  %v7295_v46 = vmul.f32 0.01, %v6743_v22 }
 0x45b   : > { %v7614_v3 = vpack.c.bf16 %v7551_v24, %v7550_v43  ;;  %7518 = vst [vmem:[#allocation2] sm:$0xff] %v7486_v23  ;;  %v6752_v29 = vsel %vm14862_vm10, %v6749_v45, %v6746_v57  ;;  %vm14912_vm3 = vcmp.lt.f32.partialorder %v6876_v53, 0.0004427343  ;;  %v6885_v42 = vand.u32 2147483647, %v10600_v12  ;;  %v14929_v43 = vpop.f32.mrf.mxu3 }
 0x45c   : > { %v10602_v20 = vpop.eup %10601  ;;  %v7296_v40 = vmul.f32 0.01, %v6752_v29  ;;  %10605 = vlog2.f32 %v6879_v33  ;;  %v6883_v39 = vadd.f32 1.0, %v6882_v48  ;;  %v7423_v5 = vsel %vm7359_vm12, %v14769_v54, %v7295_v46  ;;  %v14958_v48 = vpop.f32.mrf.mxu0 }
 0x45d   : > { %v10604_v6 = vpop.eup %10603  ;;  %7646 = vst [vmem:[#allocation2 + $0x100] sm:$0xff] %v7614_v3  ;;  %v6863_v14 = vmul.f32 0.6931472, %v10602_v20  ;;  %10607 = vpow2.f32 %v14860_v44  ;;  %v7552_v52 = vmul.f32 %v7423_v5, %v7423_v5  ;;  %v6875_v53 = vmul.f32 %v14866_v31, %v6874_v38 }
 0x45e   : > { %v7424_v16 = vsel %vm7360_vm1, %v14771_v13, %v7296_v40  ;;  %v6872_v45 = vmul.f32 0.6931472, %v10604_v6  ;;  %v6884_v49 = vmul.f32 %v10600_v12, %v6883_v39  ;;  %vm14935_vm9 = vcmp.lt.f32.partialorder %v6885_v42, 0.0004427343 }
 0x45f   : > { %v7487_v8 = vpack.c.bf16 %v7424_v16, %v7423_v5  ;;  %v7553_v54 = vmul.f32 %v7424_v16, %v7424_v16  ;;  %v6869_v44 = vsel %vm14898_vm11, %v6866_v37, %v6863_v14  ;;  %v6557_v13 = vmin.f32 %v14921_v10, 20.0 }
 0x460   : > { %v7309_v26 = vmul.f32 0.01, %v6869_v44  ;;  %v6878_v23 = vsel %vm14912_vm3, %v6875_v53, %v6872_v45  ;;  %v14942_v57 = vadd.f32 %v14809_v35, %v14850_v59  ;;  %v14953_v38 = vadd.f32 %v14828_v25, %v14873_v41  ;;  %v14960_v35 = vpop.f32.mrf.mxu1  ;;  %v14991_v6 = vpop.f32.mrf.mxu2 }
 0x461   : > { %v7615_v31 = vpack.c.bf16 %v7553_v54, %v7552_v52  ;;  %7519 = vst [vmem:[#allocation2 + $0x8] sm:$0xff] %v7487_v8  ;;  %v7310_v24 = vmul.f32 0.01, %v6878_v23  ;;  %v6653_v22 = vmul.f32 1.442695, %v6557_v13  ;;  %v14956_v33 = vadd.f32 %v14832_v55, %v5745_v27  ;;  %v14971_v27 = vld [vmem:[%s16314_s2 + $0x48] sm:$0xff] }
 0x462   : > { %v10606_v12 = vpop.eup %10605  ;;  %v7437_v37 = vsel %vm7373_vm14, %v14781_v58, %v7309_v26  ;;  %v14966_v63 = vmul.f32 100.0, %v14942_v57  ;;  %v14983_v20 = vmul.f32 100.0, %v14946_v47  ;;  %v14986_v39 = vmul.f32 100.0, %v14953_v38 }
 0x463   : > { %v10608_v59 = vpop.eup %10607  ;;  %7647 = vst [vmem:[#allocation2 + $0x108] sm:$0xff] %v7615_v31  ;;  %v7566_v11 = vmul.f32 %v7437_v37, %v7437_v37  ;;  %v7438_v32 = vsel %vm7374_vm15, %v14783_v18, %v7310_v24  ;;  %v6881_v58 = vmul.f32 0.6931472, %v10606_v12  ;;  %10609 = vpow2.f32 %v6653_v22  ;;  %v14993_v5 = vpop.f32.mrf.mxu3 }
 0x464   : > { %v7494_v25 = vpack.c.bf16 %v7438_v32, %v7437_v37  ;;  %v7567_v41 = vmul.f32 %v7438_v32, %v7438_v32  ;;  %v6888_v3 = vadd.f32 1.0, %v10608_v59  ;;  %v6891_v55 = vmul.f32 -0.5, %v10608_v59  ;;  %v15003_v8 = vpop.f32.mrf.mxu0 }
 0x465   : > { %v6887_v18 = vsel %vm14935_vm9, %v6884_v49, %v6881_v58  ;;  %v6558_v9 = vmin.f32 %v14966_v63, 20.0  ;;  %v14989_v42 = vmul.f32 100.0, %v14956_v33  ;;  %v6382_v14 = vmul.f32 %v14726_v60, %v14606_v0 }
 0x466   : > { %9495 = vmatmul.msk.bf16.gmra.mxu0 %vm3106_vm13, %v14971_v27  ;;  %9501 = vmatmul.msk.bf16.gmra.mxu1 %vm3106_vm13, %v14971_v27  ;;  %7526 = vst [vmem:[#allocation2 + $0x40] sm:$0xff] %v7494_v25  ;;  %v7622_v46 = vpack.c.bf16 %v7567_v41, %v7566_v11  ;;  %10611 = vlog2.f32 %v6888_v3  ;;  %v7311_v29 = vmul.f32 0.01, %v6887_v18  ;;  %v6892_v40 = vadd.f32 1.0, %v6891_v55 }
 0x467   : > { %9507 = vmatmul.msk.bf16.gmra.mxu2 %vm3106_vm13, %v14971_v27  ;;  %v6655_v30 = vmul.f32 1.442695, %v6558_v9  ;;  %9513 = vmatmul.msk.bf16.gmra.mxu3 %vm3106_vm13, %v14971_v27  ;;  %v6559_v52 = vmin.f32 %v14983_v20, 20.0  ;;  %vm7375_vm4 = vcmp.gt.f32.partialorder %v14835_v36, 20.0  ;;  %v6894_v16 = vand.u32 2147483647, %v10608_v59 }
 0x468   : > { %7654 = vst [vmem:[#allocation2 + $0x140] sm:$0xff] %v7622_v46  ;;  %v6560_v45 = vmin.f32 %v14986_v39, 20.0  ;;  %v6573_v53 = vmin.f32 %v14989_v42, 20.0  ;;  %v15005_v54 = vpop.f32.mrf.mxu1  ;;  %v7439_v49 = vsel %vm7375_vm4, %v14811_v62, %v7311_v29  ;;  %v15009_v0 = vadd.f32 %v6382_v14, %v14902_v61  ;;  %v15023_v25 = vpop.f32.mrf.mxu2 }
 0x469   : > { %10613 = vpow2.f32 %v6655_v30  ;;  %v10610_v44 = vpop.eup %10609  ;;  %v6657_v26 = vmul.f32 1.442695, %v6559_v52  ;;  %v15013_v60 = vadd.f32 %v14739_v1, %v14927_v2  ;;  %v6893_v23 = vmul.f32 %v10608_v59, %v6892_v40 }
 0x46a   : > { %v7005_v34 = vadd.f32 1.0, %v10610_v44  ;;  %v7008_v13 = vmul.f32 -0.5, %v10610_v44  ;;  %v6659_v31 = vmul.f32 1.442695, %v6560_v45  ;;  %v6685_v12 = vmul.f32 1.442695, %v6573_v53 }
 0x46b   : > { %10615 = vpow2.f32 %v6657_v26  ;;  %v15016_v37 = vmul.f32 100.0, %v15009_v0  ;;  %vm6895_vm5 = vcmp.lt.f32.partialorder %v6894_v16, 0.0004427343  ;;  %vm7376_vm10 = vcmp.gt.f32.partialorder %v14842_v51, 20.0  ;;  %v15025_v41 = vpop.f32.mrf.mxu3 }
 0x46c   : > { %v10612_v36 = vpop.eup %10611  ;;  %10617 = vlog2.f32 %v7005_v34  ;;  %v15020_v62 = vmul.f32 100.0, %v15013_v60  ;;  %v7568_v61 = vmul.f32 %v7439_v49, %v7439_v49  ;;  %v7011_v11 = vand.u32 2147483647, %v10610_v44  ;;  %v15032_v29 = vpop.f32.mrf.mxu0 }
 0x46d   : > { %v6890_v24 = vmul.f32 0.6931472, %v10612_v36  ;;  %10619 = vpow2.f32 %v6659_v31  ;;  %v6574_v22 = vmin.f32 %v15016_v37, 20.0  ;;  %v7009_v3 = vadd.f32 1.0, %v7008_v13 }
 0x46e   : > { %10621 = vpow2.f32 %v6685_v12  ;;  %v6575_v18 = vmin.f32 %v15020_v62, 20.0  ;;  %vm7389_vm12 = vcmp.gt.f32.partialorder %v14921_v10, 20.0  ;;  %v15038_v16 = vadd.f32 %v14742_v19, %v14929_v43 }
 0x46f   : > { %v10614_v1 = vpop.eup %10613  ;;  %v6896_v2 = vsel %vm6895_vm5, %v6893_v23, %v6890_v24  ;;  %v6687_v55 = vmul.f32 1.442695, %v6574_v22  ;;  %vm15040_vm1 = vcmp.lt.f32.partialorder %v7011_v11, 0.0004427343  ;;  %v7010_v19 = vmul.f32 %v10610_v44, %v7009_v3 }
 0x470   : > { %v7312_v59 = vmul.f32 0.01, %v6896_v2  ;;  %v7014_v32 = vadd.f32 1.0, %v10614_v1  ;;  %v7017_v58 = vmul.f32 -0.5, %v10614_v1  ;;  %v7020_v46 = vand.u32 2147483647, %v10614_v1  ;;  %v15034_v30 = vpop.f32.mrf.mxu1 }
 0x471   : > { %v10616_v40 = vpop.eup %10615  ;;  %vm7390_vm11 = vcmp.gt.f32.partialorder %v14966_v63, 20.0  ;;  %v6689_v43 = vmul.f32 1.442695, %v6575_v18  ;;  %vm7391_vm15 = vcmp.gt.f32.partialorder %v14983_v20, 20.0  ;;  %vm7392_vm9 = vcmp.gt.f32.partialorder %v14986_v39, 20.0 }
 0x472   : > { %v7440_v9 = vsel %vm7376_vm10, %v14813_v17, %v7312_v59  ;;  %10623 = vlog2.f32 %v7014_v32  ;;  %v10618_v45 = vpop.eup %10617  ;;  %v7018_v17 = vadd.f32 1.0, %v7017_v58  ;;  %v7023_v53 = vadd.f32 1.0, %v10616_v40  ;;  %v15057_v32 = vpop.f32.mrf.mxu2 }
 0x473   : > { %v7495_v14 = vpack.c.bf16 %v7440_v9, %v7439_v49  ;;  %v7569_v52 = vmul.f32 %v7440_v9, %v7440_v9  ;;  %10625 = vpow2.f32 %v6687_v55  ;;  %v7026_v26 = vmul.f32 -0.5, %v10616_v40  ;;  %v10620_v49 = vpop.eup %10619  ;;  %v15059_v58 = vpop.f32.mrf.mxu3 }
 0x474   : > { %v7007_v23 = vmul.f32 0.6931472, %v10618_v45  ;;  %vm15051_vm14 = vcmp.lt.f32.partialorder %v7020_v46, 0.0004427343  ;;  %10627 = vlog2.f32 %v7023_v53  ;;  %v7029_v13 = vand.u32 2147483647, %v10616_v40  ;;  %v10622_v24 = vpop.eup %10621  ;;  %v15070_v45 = vpop.f32.mrf.mxu0 }
 0x475   : > { %7527 = vst [vmem:[#allocation2 + $0x48] sm:$0xff] %v7495_v14  ;;  %v7623_v36 = vpack.c.bf16 %v7569_v52, %v7568_v61  ;;  %v7032_v31 = vadd.f32 1.0, %v10620_v49  ;;  %v7027_v61 = vadd.f32 1.0, %v7026_v26  ;;  %v7035_v44 = vmul.f32 -0.5, %v10620_v49 }
 0x476   : > { %9496 = vmatmul.msk.bf16.gmra.mxu0 %vm3106_vm13, %v14631_v15  ;;  %9502 = vmatmul.msk.bf16.gmra.mxu1 %vm3106_vm13, %v14631_v15  ;;  %v7013_v12 = vsel %vm15040_vm1, %v7010_v19, %v7007_v23  ;;  %10629 = vpow2.f32 %v6689_v43  ;;  %v7019_v59 = vmul.f32 %v10614_v1, %v7018_v17  ;;  %v7149_v11 = vadd.f32 1.0, %v10622_v24 }
 0x477   : > { %9508 = vmatmul.msk.bf16.gmra.mxu2 %vm3106_vm13, %v14631_v15  ;;  %7655 = vst [vmem:[#allocation2 + $0x148] sm:$0xff] %v7623_v36  ;;  %v7325_v22 = vmul.f32 0.01, %v7013_v12  ;;  %10631 = vlog2.f32 %v7032_v31  ;;  %9514 = vmatmul.msk.bf16.gmra.mxu3 %vm3106_vm13, %v14631_v15  ;;  %v7036_v18 = vadd.f32 1.0, %v7035_v44  ;;  %v7038_v9 = vand.u32 2147483647, %v10620_v49 }
 0x478   : > { %v10624_v2 = vpop.eup %10623  ;;  %v7152_v46 = vmul.f32 -0.5, %v10622_v24  ;;  %10633 = vlog2.f32 %v7149_v11  ;;  %v15068_v52 = vmul.f32 100.0, %v15038_v16  ;;  %v15072_v51 = vpop.f32.mrf.mxu1  ;;  %v7028_v17 = vmul.f32 %v10616_v40, %v7027_v61 }
 0x479   : > { %v10626_v3 = vpop.eup %10625  ;;  %v7016_v55 = vmul.f32 0.6931472, %v10624_v2  ;;  %v7453_v1 = vsel %vm7389_vm12, %v14854_v28, %v7325_v22  ;;  %vm15076_vm3 = vcmp.lt.f32.partialorder %v7029_v13, 0.0004427343  ;;  %v7155_v28 = vand.u32 2147483647, %v10622_v24 }
 0x47a   : > { %v7158_v14 = vadd.f32 1.0, %v10626_v3  ;;  %v10628_v10 = vpop.eup %10627  ;;  %v7153_v36 = vadd.f32 1.0, %v7152_v46  ;;  %v7161_v23 = vmul.f32 -0.5, %v10626_v3  ;;  %v7582_v43 = vmul.f32 %v7453_v1, %v7453_v1 }
 0x47b   : > { %v7022_v15 = vsel %vm15051_vm14, %v7019_v59, %v7016_v55  ;;  %v7025_v31 = vmul.f32 0.6931472, %v10628_v10  ;;  %v7037_v12 = vmul.f32 %v10620_v49, %v7036_v18  ;;  %vm15083_vm4 = vcmp.lt.f32.partialorder %v7038_v9, 0.0004427343 }
 0x47c   : > { %v7326_v26 = vmul.f32 0.01, %v7022_v15  ;;  %10635 = vlog2.f32 %v7158_v14  ;;  %v15081_v19 = vpop.eup %10629  ;;  %v7162_v61 = vadd.f32 1.0, %v7161_v23  ;;  %v6576_v2 = vmin.f32 %v15068_v52, 20.0  ;;  %v15100_v14 = vpop.f32.mrf.mxu3 }
 0x47d   : > { %v10632_v40 = vpop.eup %10631  ;;  %v7167_v44 = vadd.f32 1.0, %v15081_v19  ;;  %v7031_v11 = vsel %vm15076_vm3, %v7028_v17, %v7025_v31  ;;  %v7154_v9 = vmul.f32 %v10622_v24, %v7153_v36  ;;  %vm15094_vm5 = vcmp.lt.f32.partialorder %v7155_v28, 0.0004427343  ;;  %v15108_v36 = vpop.f32.mrf.mxu0 }
 0x47e   : > { %v7454_v13 = vsel %vm7390_vm11, %v14942_v57, %v7326_v26  ;;  %v7034_v49 = vmul.f32 0.6931472, %v10632_v40  ;;  %v10634_v55 = vpop.eup %10633  ;;  %v7327_v18 = vmul.f32 0.01, %v7031_v11  ;;  %v7164_v63 = vand.u32 2147483647, %v10626_v3  ;;  %v15098_v57 = vpop.f32.mrf.mxu2 }
 0x47f   : > { %v7502_v22 = vpack.c.bf16 %v7454_v13, %v7453_v1  ;;  %v7583_v59 = vmul.f32 %v7454_v13, %v7454_v13  ;;  %v7151_v53 = vmul.f32 0.6931472, %v10634_v55  ;;  %10637 = vlog2.f32 %v7167_v44  ;;  %v7766_v40 = vld [vmem:[#allocation2 + $0x200] sm:$0x11] }
 0x480   : > { %v7040_v1 = vsel %vm15083_vm4, %v7037_v12, %v7034_v49  ;;  %v7455_v24 = vsel %vm7391_vm15, %v14946_v47, %v7327_v18  ;;  %v7170_v10 = vmul.f32 -0.5, %v15081_v19  ;;  %v6691_v26 = vmul.f32 1.442695, %v6576_v2  ;;  %v15110_v23 = vpop.f32.mrf.mxu1 }
 0x481   : > { %7534 = vst [vmem:[#allocation2 + $0x80] sm:$0xff] %v7502_v22  ;;  %v7630_v15 = vpack.c.bf16 %v7583_v59, %v7582_v43  ;;  %v7328_v28 = vmul.f32 0.01, %v7040_v1  ;;  %v7584_v43 = vmul.f32 %v7455_v24, %v7455_v24  ;;  %v7157_v31 = vsel %vm15094_vm5, %v7154_v9, %v7151_v53 }
 0x482   : > { %v10636_v17 = vpop.eup %10635  ;;  %v7163_v34 = vmul.f32 %v10626_v3, %v7162_v61  ;;  %v7341_v47 = vmul.f32 0.01, %v7157_v31  ;;  %vm7165_vm10 = vcmp.lt.f32.partialorder %v7164_v63, 0.0004427343  ;;  %10639 = vpow2.f32 %v6691_v26  ;;  %v7767_v3 = vld [vmem:[#allocation2 + $0x208] sm:$0x11] }
 0x483   : > { %7662 = vst [vmem:[#allocation2 + $0x180] sm:$0xff] %v7630_v15  ;;  %v7160_v12 = vmul.f32 0.6931472, %v10636_v17  ;;  %v7456_v20 = vsel %vm7392_vm9, %v14953_v38, %v7328_v28  ;;  %vm7405_vm12 = vcmp.gt.f32.partialorder %v14989_v42, 20.0  ;;  %vm7406_vm1 = vcmp.gt.f32.partialorder %v15016_v37, 20.0 }
 0x484   : > { %v7503_v13 = vpack.c.bf16 %v7456_v20, %v7455_v24  ;;  %v7585_v44 = vmul.f32 %v7456_v20, %v7456_v20  ;;  %v7469_v38 = vsel %vm7405_vm12, %v14956_v33, %v7341_v47  ;;  %v7171_v11 = vadd.f32 1.0, %v7170_v10  ;;  %v15129_v9 = vpop.f32.mrf.mxu3 }
 0x485   : > { %v7166_v2 = vsel %vm7165_vm10, %v7163_v34, %v7160_v12  ;;  %v10638_v61 = vpop.eup %10637  ;;  %v7598_v59 = vmul.f32 %v7469_v38, %v7469_v38  ;;  %v7974_v49 = vunpack.c.l.b16 %v7766_v40  ;;  %v7975_v18 = vunpack.c.h.b16 %v7766_v40 }
 0x486   : > { %9497 = vmatmul.msk.bf16.gmra.mxu0 %vm3106_vm13, %v14688_v56  ;;  %9503 = vmatmul.msk.bf16.gmra.mxu1 %vm3106_vm13, %v14688_v56  ;;  %v7342_v39 = vmul.f32 0.01, %v7166_v2  ;;  %7535 = vst [vmem:[#allocation2 + $0x88] sm:$0xff] %v7503_v13  ;;  %v7631_v22 = vpack.c.bf16 %v7585_v44, %v7584_v43  ;;  %v15127_v42 = vpop.f32.mrf.mxu2  ;;  %v7976_v46 = vunpack.c.l.b16 %v7767_v3  ;;  %v7173_v63 = vand.u32 2147483647, %v15081_v19 }
 0x487   : > { %9509 = vmatmul.msk.bf16.gmra.mxu2 %vm3106_vm13, %v14688_v56  ;;  %9515 = vmatmul.msk.bf16.gmra.mxu3 %vm3106_vm13, %v14688_v56  ;;  %v8054_v15 = vpack.c.b16 %v7974_v49, %v7974_v49  ;;  %v7169_v53 = vmul.f32 0.6931472, %v10638_v61  ;;  %v8055_v17 = vpack.c.b16 %v7975_v18, %v7975_v18  ;;  %v7977_v24 = vunpack.c.h.b16 %v7767_v3 }
 0x488   : > { %v7470_v55 = vsel %vm7406_vm1, %v15009_v0, %v7342_v39  ;;  %7663 = vst [vmem:[#allocation2 + $0x188] sm:$0xff] %v7631_v22  ;;  %v10640_v1 = vpop.eup %10639  ;;  %v15134_v0 = vpop.f32.mrf.mxu0  ;;  %v7172_v26 = vmul.f32 %v15081_v19, %v7171_v11  ;;  %v8056_v34 = vpack.c.b16 %v7976_v46, %v7976_v46  ;;  %vm7174_vm11 = vcmp.lt.f32.partialorder %v7173_v63, 0.0004427343 }
 0x489   : > { %v7510_v33 = vpack.c.bf16 %v7470_v55, %v7469_v38  ;;  %v7599_v37 = vmul.f32 %v7470_v55, %v7470_v55  ;;  %v15136_v28 = vpop.f32.mrf.mxu1  ;;  %v7176_v43 = vadd.f32 1.0, %v10640_v1  ;;  %v7179_v56 = vmul.f32 -0.5, %v10640_v1 }
 0x48a   : > { %v8138_v31 = vand.u32 %v8054_v15, %v11665_v21  ;;  %v8141_v12 = vand.u32 %v8055_v17, %v11665_v21  ;;  %v7175_v20 = vsel %vm7174_vm11, %v7172_v26, %v7169_v53  ;;  %v8144_v47 = vand.u32 %v8056_v34, %v11665_v21  ;;  %v10010_v11 = vld [vmem:[#allocation2 + $0x184] sm:$0xf]  ;;  %v10002_v15 = vld [vmem:[#allocation2 + $0x13c] sm:$0xf0] }
 0x48b   : > { %7542 = vst [vmem:[#allocation2 + $0xc0] sm:$0xff] %v7510_v33  ;;  %v7638_v10 = vpack.c.bf16 %v7599_v37, %v7598_v59  ;;  %10641 = vlog2.f32 %v7176_v43  ;;  %v8057_v40 = vpack.c.b16 %v7977_v24, %v7977_v24  ;;  %v7180_v13 = vadd.f32 1.0, %v7179_v56  ;;  %v9734_v59 = vld [vmem:[#allocation2 + $0x180] sm:$0xf]  ;;  %v9672_v53 = vld [vmem:[#allocation2 + $0x140] sm:$0xf0] }
 0x48c   : > { %8188 = vmatpush.bf16.msra.mxu0 %v8138_v31  ;;  %8201 = vmatpush.bf16.msra.mxu1 %v8141_v12  ;;  %v15145_v2 = vpop.f32.mrf.mxu3  ;;  %v7343_v3 = vmul.f32 0.01, %v7175_v20  ;;  %v7182_v38 = vand.u32 2147483647, %v10640_v1  ;;  %vm7407_vm14 = vcmp.gt.f32.partialorder %v15020_v62, 20.0  ;;  %vm7408_vm3 = vcmp.gt.f32.partialorder %v15068_v52, 20.0 }
 0x48d   : > { %7670 = vst [vmem:[#allocation2 + $0x1c0] sm:$0xff] %v7638_v10  ;;  %8214 = vmatpush.bf16.msra.mxu2 %v8144_v47  ;;  %v8147_v19 = vand.u32 %v8057_v40, %v11665_v21  ;;  %v7181_v55 = vmul.f32 %v10640_v1, %v7180_v13  ;;  %v9670_v24 = vld [vmem:[#allocation2 + $0x100] sm:$0xf]  ;;  %v9994_v10 = vld [vmem:[#allocation2 + $0x104] sm:$0xf] }
 0x48e   : > { %v15143_v44 = vpop.f32.mrf.mxu2  ;;  %v7471_v33 = vsel %vm7407_vm14, %v15013_v60, %v7343_v3  ;;  %vm7183_vm15 = vcmp.lt.f32.partialorder %v7182_v38, 0.0004427343  ;;  %v9671_v56 = vor.u32 %v10002_v15, %v9670_v24  ;;  %v9675_v31 = vor.u32 %v9994_v10, %v9672_v53  ;;  %v9978_v3 = vld [vmem:[#allocation2 + $0x84] sm:$0xf] }
 0x48f   : > { %8227 = vmatpush.bf16.msra.mxu3 %v8147_v19  ;;  %v7600_v17 = vmul.f32 %v7471_v33, %v7471_v33  ;;  %v9606_v19 = vld [vmem:[#allocation2 + $0x80] sm:$0xf] }
 0x490   : > { %v15147_v39 = vpop.f32.mrf.mxu0 }
 0x491   : > { %v15149_v61 = vpop.f32.mrf.mxu1  ;;  %v10642_v22 = vpop.eup %10641 }
 0x492   : > { %v7178_v49 = vmul.f32 0.6931472, %v10642_v22  ;;  %v9986_v20 = vld [vmem:[#allocation2 + $0xbc] sm:$0xf0]  ;;  %v9608_v47 = vld [vmem:[#allocation2 + $0xc0] sm:$0xf0] }
 0x493   : > { %v9607_v38 = vor.u32 %v9986_v20, %v9606_v19  ;;  %v9544_v22 = vld [vmem:[#allocation2 + $0x40] sm:$0xf0] }
 0x494   : > { %v10018_v18 = vld [vmem:[#allocation2 + $0x1bc] sm:$0xf0]  ;;  %v9736_v46 = vld [vmem:[#allocation2 + $0x1c0] sm:$0xf0]  ;;  %v7184_v62 = vsel %vm7183_vm15, %v7181_v55, %v7178_v49  ;;  %v15162_v60 = vpop.f32.mrf.mxu3 }
 0x495   : > { %v9735_v37 = vor.u32 %v10018_v18, %v9734_v59  ;;  %v9739_v63 = vor.u32 %v10010_v11, %v9736_v46  ;;  %v7344_v1 = vmul.f32 0.01, %v7184_v62  ;;  %v6337_v59 = vmul.f32 %v15108_v36, %v14958_v48  ;;  %v9542_v49 = vld [vmem:[#allocation2] sm:$0xf]  ;;  %v9962_v55 = vld [vmem:[#allocation2 + $0x4] sm:$0xf] }
 0x496   : > { %9516 = vmatmul.msk.bf16.vlgmr.msrb.gmra.mxu0 %vm3106_vm13, %v14747_v50  ;;  %9522 = vmatmul.msk.bf16.vlgmr.msrb.gmra.mxu1 %vm3106_vm13, %v14747_v50  ;;  %v15160_v26 = vpop.f32.mrf.mxu2  ;;  %v6338_v11 = vmul.f32 %v15110_v23, %v14960_v35  ;;  %v9742_v35 = vld [vmem:[#allocation2 + $0x188] sm:$0xf]  ;;  %v10011_v23 = vld [vmem:[#allocation2 + $0x18c] sm:$0xf] }
 0x497   : > { %9528 = vmatmul.msk.bf16.vlgmr.msrb.gmra.mxu2 %vm3106_vm13, %v14747_v50  ;;  %8189 = vmatpush.bf16.msra.mxu0 %v9735_v37  ;;  %v7472_v43 = vsel %vm7408_vm3, %v15038_v16, %v7344_v1  ;;  %v9970_v16 = vld [vmem:[#allocation2 + $0x3c] sm:$0xf0]  ;;  %v9547_v37 = vor.u32 %v9962_v55, %v9544_v22 }
 0x498   : > { %8202 = vmatpush.bf16.msra.mxu1 %v9739_v63  ;;  %9534 = vmatmul.msk.bf16.vlgmr.msrb.gmra.mxu3 %vm3106_vm13, %v14747_v50  ;;  %v7511_v12 = vpack.c.bf16 %v7472_v43, %v7471_v33  ;;  %v7601_v34 = vmul.f32 %v7472_v43, %v7472_v43  ;;  %v15167_v40 = vpop.f32.mrf.mxu0  ;;  %v9611_v50 = vor.u32 %v9978_v3, %v9608_v47 }
 0x499   : > { %v15169_v52 = vpop.f32.mrf.mxu1  ;;  %v9543_v33 = vor.u32 %v9970_v16, %v9542_v49  ;;  %v6339_v43 = vmul.f32 %v15127_v42, %v14991_v6  ;;  %v6353_v47 = vmul.f32 %v15134_v0, %v15003_v8 }
 0x49a   : > { %7543 = vst [vmem:[#allocation2 + $0xc8] sm:$0xff] %v7511_v12  ;;  %v7639_v13 = vpack.c.bf16 %v7601_v34, %v7600_v17  ;;  %v9680_v12 = vld [vmem:[#allocation2 + $0x148] sm:$0xf0] }
 0x49b   : > { %8190 = vmatpush.bf16.msra.mxu0 %v9671_v56  ;;  %v6340_v56 = vmul.f32 %v15129_v9, %v14993_v5  ;;  %v6354_v9 = vmul.f32 %v15136_v28, %v15005_v54  ;;  %v6355_v28 = vmul.f32 %v15143_v44, %v15023_v25  ;;  %v9963_v25 = vld [vmem:[#allocation2 + $0xc] sm:$0xf] }
 0x49c   : > { %8203 = vmatpush.bf16.msra.mxu1 %v9675_v31  ;;  %7671 = vst [vmem:[#allocation2 + $0x1c8] sm:$0xff] %v7639_v13  ;;  %v6008_v46 = vpop.f32.mrf.mxu3  ;;  %v10003_v31 = vld [vmem:[#allocation2 + $0x144] sm:$0xf0] }
 0x49d   : > { %v15179_v62 = vmul.f32 %v6008_v46, %v15100_v14  ;;  %v9678_v13 = vld [vmem:[#allocation2 + $0x108] sm:$0xf]  ;;  %v9552_v46 = vld [vmem:[#allocation2 + $0x48] sm:$0xf0] }
 0x49e   : > { %v5969_v18 = vpop.f32.mrf.mxu2  ;;  %v9679_v16 = vor.u32 %v10003_v31, %v9678_v13  ;;  %v6369_v31 = vmul.f32 %v15147_v39, %v15032_v29 }
 0x49f   : > { %8191 = vmatpush.bf16.msra.mxu0 %v9607_v38  ;;  %v15176_v63 = vmul.f32 %v5969_v18, %v15098_v57  ;;  %v9995_v38 = vld [vmem:[#allocation2 + $0x10c] sm:$0xf] }
 0x4a0   : > { %8204 = vmatpush.bf16.msra.mxu1 %v9611_v50  ;;  %v5894_v15 = vpop.f32.mrf.mxu0  ;;  %v9683_v8 = vor.u32 %v9995_v38, %v9680_v12  ;;  %v9555_v12 = vor.u32 %v9963_v25, %v9552_v46 }
 0x4a1   : > { %v5933_v53 = vpop.f32.mrf.mxu1  ;;  %v15181_v48 = vadd.f32 %v6337_v59, %v5894_v15  ;;  %v9987_v59 = vld [vmem:[#allocation2 + $0xc4] sm:$0xf0] }
 0x4a2   : > { %v15183_v36 = vadd.f32 %v6338_v11, %v5933_v53  ;;  %v9616_v11 = vld [vmem:[#allocation2 + $0xc8] sm:$0xf0] }
 0x4a3   : > { %8192 = vmatpush.bf16.msra.mxu0 %v9543_v33  ;;  %v10019_v57 = vld [vmem:[#allocation2 + $0x1c4] sm:$0xf0]  ;;  %v9744_v1 = vld [vmem:[#allocation2 + $0x1c8] sm:$0xf0]  ;;  %v15190_v14 = vmul.f32 100.0, %v15181_v48 }
 0x4a4   : > { %8205 = vmatpush.bf16.msra.mxu1 %v9547_v37  ;;  %v15193_v17 = vmul.f32 100.0, %v15183_v36  ;;  %v9743_v24 = vor.u32 %v10019_v57, %v9742_v35  ;;  %v9747_v10 = vor.u32 %v10011_v23, %v9744_v1  ;;  %v6011_v3 = vpop.f32.mrf.mxu3  ;;  %v9614_v33 = vld [vmem:[#allocation2 + $0x88] sm:$0xf]  ;;  %v9979_v37 = vld [vmem:[#allocation2 + $0x8c] sm:$0xf] }
 0x4a5   : > { %v6529_v34 = vmin.f32 %v15190_v14, 20.0  ;;  %v15207_v5 = vadd.f32 %v6340_v56, %v6011_v3  ;;  %v9615_v35 = vor.u32 %v9987_v59, %v9614_v33  ;;  %v9619_v23 = vor.u32 %v9979_v37, %v9616_v11  ;;  %v9550_v57 = vld [vmem:[#allocation2 + $0x8] sm:$0xf] }
 0x4a6   : > { %9517 = vmatmul.msk.bf16.gmra.mxu0 %vm3106_vm13, %v14818_v4  ;;  %9523 = vmatmul.msk.bf16.gmra.mxu1 %vm3106_vm13, %v14818_v4  ;;  %v6530_v20 = vmin.f32 %v15193_v17, 20.0  ;;  %v5972_v19 = vpop.f32.mrf.mxu2  ;;  %v15257_v59 = vmul.f32 %v15167_v40, %v15070_v45  ;;  %vm7361_vm4 = vcmp.gt.f32.partialorder %v15190_v14, 20.0  ;;  %vm7362_vm10 = vcmp.gt.f32.partialorder %v15193_v17, 20.0 }
 0x4a7   : > { %9529 = vmatmul.msk.bf16.gmra.mxu2 %vm3106_vm13, %v14818_v4  ;;  %8228 = vmatpush.bf16.msra.mxu3 %v9747_v10  ;;  %v6597_v50 = vmul.f32 1.442695, %v6529_v34  ;;  %v15205_v42 = vadd.f32 %v6339_v43, %v5972_v19  ;;  %v15217_v55 = vmul.f32 100.0, %v15207_v5  ;;  %v6356_v10 = vmul.f32 %v15145_v2, %v15025_v41 }
 0x4a8   : > { %8215 = vmatpush.bf16.msra.mxu2 %v9743_v24  ;;  %v6599_v6 = vmul.f32 1.442695, %v6530_v20  ;;  %9535 = vmatmul.msk.bf16.gmra.mxu3 %vm3106_vm13, %v14818_v4  ;;  %v5896_v0 = vpop.f32.mrf.mxu0  ;;  %v9971_v4 = vld [vmem:[#allocation2 + $0x44] sm:$0xf0]  ;;  %v15241_v41 = vmul.f32 %v15149_v61, %v15034_v30 }
 0x4a9   : > { %v5935_v22 = vpop.f32.mrf.mxu1  ;;  %10643 = vpow2.f32 %v6597_v50  ;;  %v15214_v49 = vmul.f32 100.0, %v15205_v42  ;;  %v15219_v18 = vadd.f32 %v6353_v47, %v5896_v0  ;;  %v6532_v53 = vmin.f32 %v15217_v55, 20.0 }
 0x4aa   : > { %10645 = vpow2.f32 %v6599_v6  ;;  %v15221_v54 = vadd.f32 %v6354_v9, %v5935_v22  ;;  %v9551_v43 = vor.u32 %v9971_v4, %v9550_v57  ;;  %v15249_v0 = vmul.f32 %v15160_v26, %v15057_v32 }
 0x4ab   : > { %8229 = vmatpush.bf16.msra.mxu3 %v9683_v8  ;;  %v6531_v15 = vmin.f32 %v15214_v49, 20.0  ;;  %v15228_v1 = vmul.f32 100.0, %v15219_v18  ;;  %v6603_v56 = vmul.f32 1.442695, %v6532_v53  ;;  %v15253_v22 = vmul.f32 %v15162_v60, %v15059_v58 }
 0x4ac   : > { %8216 = vmatpush.bf16.msra.mxu2 %v9679_v16  ;;  %v15231_v24 = vmul.f32 100.0, %v15221_v54  ;;  %v6013_v13 = vpop.f32.mrf.mxu3  ;;  %vm7363_vm11 = vcmp.gt.f32.partialorder %v15214_v49, 20.0  ;;  %vm7364_vm14 = vcmp.gt.f32.partialorder %v15217_v55, 20.0 }
 0x4ad   : > { %v6601_v44 = vmul.f32 1.442695, %v6531_v15  ;;  %v6545_v34 = vmin.f32 %v15228_v1, 20.0  ;;  %v15245_v3 = vadd.f32 %v6356_v10, %v6013_v13  ;;  %vm7377_vm3 = vcmp.gt.f32.partialorder %v15228_v1, 20.0 }
 0x4ae   : > { %v6546_v20 = vmin.f32 %v15231_v24, 20.0  ;;  %v5974_v47 = vpop.f32.mrf.mxu2 }
 0x4af   : > { %8230 = vmatpush.bf16.msra.mxu3 %v9619_v23  ;;  %v10644_v19 = vpop.eup %10643  ;;  %10647 = vpow2.f32 %v6601_v44  ;;  %v15243_v2 = vadd.f32 %v6355_v28, %v5974_v47  ;;  %v6629_v8 = vmul.f32 1.442695, %v6545_v34  ;;  %v15271_v26 = vmul.f32 100.0, %v15245_v3 }
 0x4b0   : > { %8217 = vmatpush.bf16.msra.mxu2 %v9615_v35  ;;  %v10646_v29 = vpop.eup %10645  ;;  %v6753_v39 = vadd.f32 1.0, %v10644_v19  ;;  %v6756_v38 = vmul.f32 -0.5, %v10644_v19  ;;  %v6759_v50 = vand.u32 2147483647, %v10644_v19  ;;  %10649 = vpow2.f32 %v6603_v56  ;;  %v5899_v46 = vpop.f32.mrf.mxu0 }
 0x4b1   : > { %v6762_v6 = vadd.f32 1.0, %v10646_v29  ;;  %v6765_v9 = vmul.f32 -0.5, %v10646_v29  ;;  %v6768_v16 = vand.u32 2147483647, %v10646_v29  ;;  %v6631_v61 = vmul.f32 1.442695, %v6546_v20  ;;  %v15281_v28 = vpop.f32.mrf.mxu1 }
 0x4b2   : > { %10651 = vlog2.f32 %v6753_v39  ;;  %v6757_v30 = vadd.f32 1.0, %v6756_v38  ;;  %v15260_v11 = vmul.f32 100.0, %v15243_v2  ;;  %vm15266_vm9 = vcmp.lt.f32.partialorder %v6759_v50, 0.0004427343 }
 0x4b3   : > { %8231 = vmatpush.bf16.msra.mxu3 %v9555_v12  ;;  %10653 = vlog2.f32 %v6762_v6  ;;  %v6766_v58 = vadd.f32 1.0, %v6765_v9  ;;  %vm15276_vm5 = vcmp.lt.f32.partialorder %v6768_v16, 0.0004427343  ;;  %v6548_v35 = vmin.f32 %v15271_v26, 20.0 }
 0x4b4   : > { %8218 = vmatpush.bf16.msra.mxu2 %v9551_v43  ;;  %10655 = vpow2.f32 %v6629_v8  ;;  %v6758_v60 = vmul.f32 %v10644_v19, %v6757_v30  ;;  %v6547_v4 = vmin.f32 %v15260_v11, 20.0  ;;  %v15287_v12 = vadd.f32 %v6369_v31, %v5899_v46  ;;  %v15302_v8 = vpop.f32.mrf.mxu3 }
 0x4b5   : > { %v10648_v45 = vpop.eup %10647  ;;  %10657 = vpow2.f32 %v6631_v61  ;;  %v6767_v44 = vmul.f32 %v10646_v29, %v6766_v58  ;;  %v6635_v13 = vmul.f32 1.442695, %v6548_v35 }
 0x4b6   : > { %9518 = vmatmul.msk.bf16.gmra.mxu0 %vm3106_vm13, %v14878_v7  ;;  %9524 = vmatmul.msk.bf16.gmra.mxu1 %vm3106_vm13, %v14878_v7  ;;  %v10650_v33 = vpop.eup %10649  ;;  %v6771_v37 = vadd.f32 1.0, %v10648_v45  ;;  %v6774_v15 = vmul.f32 -0.5, %v10648_v45  ;;  %v6777_v53 = vand.u32 2147483647, %v10648_v45  ;;  %v6633_v43 = vmul.f32 1.442695, %v6547_v4  ;;  %v15300_v16 = vpop.f32.mrf.mxu2 }
 0x4b7   : > { %9530 = vmatmul.msk.bf16.gmra.mxu2 %vm3106_vm13, %v14878_v7  ;;  %v6780_v23 = vadd.f32 1.0, %v10650_v33  ;;  %v6783_v57 = vmul.f32 -0.5, %v10650_v33  ;;  %v6786_v10 = vand.u32 2147483647, %v10650_v33 }
 0x4b8   : > { %9536 = vmatmul.msk.bf16.gmra.mxu3 %vm3106_vm13, %v14878_v7  ;;  %v10652_v25 = vpop.eup %10651  ;;  %10659 = vlog2.f32 %v6771_v37  ;;  %v6775_v56 = vadd.f32 1.0, %v6774_v15  ;;  %vm15289_vm12 = vcmp.lt.f32.partialorder %v6777_v53, 0.0004427343 }
 0x4b9   : > { %v10654_v34 = vpop.eup %10653  ;;  %v6755_v20 = vmul.f32 0.6931472, %v10652_v25  ;;  %10661 = vlog2.f32 %v6780_v23  ;;  %v6784_v38 = vadd.f32 1.0, %v6783_v57  ;;  %vm15293_vm1 = vcmp.lt.f32.partialorder %v6786_v10, 0.0004427343  ;;  %v15317_v25 = vpop.f32.mrf.mxu1 }
 0x4ba   : > { %v10656_v19 = vpop.eup %10655  ;;  %v6764_v39 = vmul.f32 0.6931472, %v10654_v34  ;;  %10663 = vpow2.f32 %v6633_v43  ;;  %v6776_v29 = vmul.f32 %v10648_v45, %v6775_v56  ;;  %v5901_v43 = vpop.f32.mrf.mxu0 }
 0x4bb   : > { %v10658_v7 = vpop.eup %10657  ;;  %v6761_v31 = vsel %vm15266_vm9, %v6758_v60, %v6755_v20  ;;  %v6897_v6 = vadd.f32 1.0, %v10656_v19  ;;  %v6900_v9 = vmul.f32 -0.5, %v10656_v19  ;;  %v6903_v58 = vand.u32 2147483647, %v10656_v19 }
 0x4bc   : > { %v7297_v30 = vmul.f32 0.01, %v6761_v31  ;;  %v6770_v61 = vsel %vm15276_vm5, %v6767_v44, %v6764_v39  ;;  %v6906_v4 = vadd.f32 1.0, %v10658_v7  ;;  %v6909_v45 = vmul.f32 -0.5, %v10658_v7 }
 0x4bd   : > { %v7298_v46 = vmul.f32 0.01, %v6770_v61  ;;  %10665 = vlog2.f32 %v6897_v6  ;;  %v6901_v32 = vadd.f32 1.0, %v6900_v9  ;;  %v6785_v15 = vmul.f32 %v10650_v33, %v6784_v38 }
 0x4be   : > { %v10660_v60 = vpop.eup %10659  ;;  %v7425_v37 = vsel %vm7361_vm4, %v15181_v48, %v7297_v30  ;;  %10667 = vlog2.f32 %v6906_v4  ;;  %v6912_v53 = vand.u32 2147483647, %v10658_v7  ;;  %vm15313_vm15 = vcmp.lt.f32.partialorder %v6903_v58, 0.0004427343 }
 0x4bf   : > { %v10662_v35 = vpop.eup %10661  ;;  %v7554_v23 = vmul.f32 %v7425_v37, %v7425_v37  ;;  %v7426_v40 = vsel %vm7362_vm10, %v15183_v36, %v7298_v46  ;;  %v6773_v57 = vmul.f32 0.6931472, %v10660_v60  ;;  %v6902_v56 = vmul.f32 %v10656_v19, %v6901_v32  ;;  %v5979_v60 = vpop.f32.mrf.mxu2 }
 0x4c0   : > { %v10664_v44 = vpop.eup %10663  ;;  %v7488_v14 = vpack.c.bf16 %v7426_v40, %v7425_v37  ;;  %v7555_v48 = vmul.f32 %v7426_v40, %v7426_v40  ;;  %v6782_v33 = vmul.f32 0.6931472, %v10662_v35  ;;  %v6910_v17 = vadd.f32 1.0, %v6909_v45  ;;  %v15344_v37 = vpop.f32.mrf.mxu3 }
 0x4c1   : > { %v6779_v34 = vsel %vm15289_vm12, %v6776_v29, %v6773_v57  ;;  %vm7378_vm9 = vcmp.gt.f32.partialorder %v15231_v24, 20.0  ;;  %v6915_v36 = vadd.f32 1.0, %v10664_v44  ;;  %v6918_v20 = vmul.f32 -0.5, %v10664_v44 }
 0x4c2   : > { %v7616_v39 = vpack.c.bf16 %v7555_v48, %v7554_v23  ;;  %7520 = vst [vmem:[#allocation2 + $0x10] sm:$0xff] %v7488_v14  ;;  %v7299_v38 = vmul.f32 0.01, %v6779_v34  ;;  %v6788_v31 = vsel %vm15293_vm1, %v6785_v15, %v6782_v33  ;;  %vm15325_vm4 = vcmp.lt.f32.partialorder %v6912_v53, 0.0004427343  ;;  %v15375_v33 = vpop.f32.mrf.mxu0 }
 0x4c3   : > { %v10666_v19 = vpop.eup %10665  ;;  %v7300_v9 = vmul.f32 0.01, %v6788_v31  ;;  %10669 = vlog2.f32 %v6915_v36  ;;  %v6919_v47 = vadd.f32 1.0, %v6918_v20  ;;  %v6921_v29 = vand.u32 2147483647, %v10664_v44 }
 0x4c4   : > { %v10668_v30 = vpop.eup %10667  ;;  %7648 = vst [vmem:[#allocation2 + $0x110] sm:$0xff] %v7616_v39  ;;  %v7427_v50 = vsel %vm7363_vm11, %v15205_v42, %v7299_v38  ;;  %v6899_v61 = vmul.f32 0.6931472, %v10666_v19  ;;  %10671 = vpow2.f32 %v6635_v13  ;;  %v15337_v58 = vmul.f32 100.0, %v15287_v12 }
 0x4c5   : > { %v7556_v4 = vmul.f32 %v7427_v50, %v7427_v50  ;;  %v7428_v46 = vsel %vm7364_vm14, %v15207_v5, %v7300_v9  ;;  %v6908_v32 = vmul.f32 0.6931472, %v10668_v30  ;;  %v6911_v45 = vmul.f32 %v10658_v7, %v6910_v17 }
 0x4c6   : > { %9519 = vmatmul.msk.bf16.gmra.mxu0 %vm3106_vm13, %v14971_v27  ;;  %9525 = vmatmul.msk.bf16.gmra.mxu1 %vm3106_vm13, %v14971_v27  ;;  %v7489_v49 = vpack.c.bf16 %v7428_v46, %v7427_v50  ;;  %v7557_v42 = vmul.f32 %v7428_v46, %v7428_v46  ;;  %v6905_v13 = vsel %vm15313_vm15, %v6902_v56, %v6899_v61  ;;  %vm15350_vm5 = vcmp.lt.f32.partialorder %v6921_v29, 0.0004427343 }
 0x4c7   : > { %9531 = vmatmul.msk.bf16.gmra.mxu2 %vm3106_vm13, %v14971_v27  ;;  %v6920_v15 = vmul.f32 %v10664_v44, %v6919_v47  ;;  %v7313_v53 = vmul.f32 0.01, %v6905_v13  ;;  %v6914_v35 = vsel %vm15325_vm4, %v6911_v45, %v6908_v32  ;;  %v6561_v5 = vmin.f32 %v15337_v58, 20.0  ;;  %v15397_v31 = vpop.f32.mrf.mxu2 }
 0x4c8   : > { %9537 = vmatmul.msk.bf16.gmra.mxu3 %vm3106_vm13, %v14971_v27  ;;  %v7617_v55 = vpack.c.bf16 %v7557_v42, %v7556_v4  ;;  %7521 = vst [vmem:[#allocation2 + $0x18] sm:$0xff] %v7489_v49  ;;  %v7314_v7 = vmul.f32 0.01, %v6914_v35  ;;  %v15359_v40 = vadd.f32 %v15241_v41, %v15281_v28  ;;  %v15363_v57 = vadd.f32 %v15249_v0, %v15300_v16  ;;  %v15377_v41 = vpop.f32.mrf.mxu1  ;;  %v15399_v6 = vpop.f32.mrf.mxu3 }
 0x4c9   : > { %v10670_v10 = vpop.eup %10669  ;;  %v7441_v44 = vsel %vm7377_vm3, %v15219_v18, %v7313_v53  ;;  %v6661_v14 = vmul.f32 1.442695, %v6561_v5  ;;  %v15370_v27 = vadd.f32 %v15253_v22, %v15302_v8  ;;  %v15373_v48 = vadd.f32 %v15257_v59, %v5901_v43 }
 0x4ca   : > { %v10672_v28 = vpop.eup %10671  ;;  %7649 = vst [vmem:[#allocation2 + $0x118] sm:$0xff] %v7617_v55  ;;  %v7570_v0 = vmul.f32 %v7441_v44, %v7441_v44  ;;  %v7442_v1 = vsel %vm7378_vm9, %v15221_v54, %v7314_v7  ;;  %v6917_v18 = vmul.f32 0.6931472, %v10670_v10  ;;  %v15383_v16 = vmul.f32 100.0, %v15359_v40  ;;  %v15407_v50 = vpop.f32.mrf.mxu0 }
 0x4cb   : > { %v7496_v22 = vpack.c.bf16 %v7442_v1, %v7441_v44  ;;  %v7571_v8 = vmul.f32 %v7442_v1, %v7442_v1  ;;  %v6924_v56 = vadd.f32 1.0, %v10672_v28  ;;  %v6927_v59 = vmul.f32 -0.5, %v10672_v28 }
 0x4cc   : > { %v6923_v43 = vsel %vm15350_vm5, %v6920_v15, %v6917_v18  ;;  %10673 = vpow2.f32 %v6661_v14  ;;  %v6562_v34 = vmin.f32 %v15383_v16, 20.0  ;;  %v15389_v54 = vmul.f32 100.0, %v15363_v57  ;;  %v10862_v15 = vld [vmem:[%s16314_s2 + $0x50] sm:$0xff] }
 0x4cd   : > { %7528 = vst [vmem:[#allocation2 + $0x50] sm:$0xff] %v7496_v22  ;;  %v7624_v17 = vpack.c.bf16 %v7571_v8, %v7570_v0  ;;  %10675 = vlog2.f32 %v6924_v56  ;;  %v7315_v36 = vmul.f32 0.01, %v6923_v43  ;;  %v6928_v20 = vadd.f32 1.0, %v6927_v59 }
 0x4ce   : > { %v6663_v24 = vmul.f32 1.442695, %v6562_v34  ;;  %v15392_v39 = vmul.f32 100.0, %v15370_v27  ;;  %v15395_v38 = vmul.f32 100.0, %v15373_v48  ;;  %v6386_v19 = vmul.f32 %v15169_v52, %v15072_v51 }
 0x4cf   : > { %7656 = vst [vmem:[#allocation2 + $0x150] sm:$0xff] %v7624_v17  ;;  %v6563_v9 = vmin.f32 %v15389_v54, 20.0  ;;  %vm7379_vm10 = vcmp.gt.f32.partialorder %v15260_v11, 20.0  ;;  %v6930_v47 = vand.u32 2147483647, %v10672_v28  ;;  %v15416_v52 = vadd.f32 %v15176_v63, %v5979_v60  ;;  %v15432_v14 = vpop.f32.mrf.mxu2 }
 0x4d0   : > { %10677 = vpow2.f32 %v6663_v24  ;;  %v6564_v29 = vmin.f32 %v15392_v39, 20.0  ;;  %v6577_v30 = vmin.f32 %v15395_v38, 20.0  ;;  %v15409_v61 = vpop.f32.mrf.mxu1  ;;  %v7443_v46 = vsel %vm7379_vm10, %v15243_v2, %v7315_v36 }
 0x4d1   : > { %v6665_v32 = vmul.f32 1.442695, %v6563_v9  ;;  %v15413_v51 = vadd.f32 %v6386_v19, %v15317_v25  ;;  %v6929_v45 = vmul.f32 %v10672_v28, %v6928_v20  ;;  %vm6931_vm12 = vcmp.lt.f32.partialorder %v6930_v47, 0.0004427343  ;;  %v15434_v28 = vpop.f32.mrf.mxu3 }
 0x4d2   : > { %v10674_v4 = vpop.eup %10673  ;;  %v6667_v13 = vmul.f32 1.442695, %v6564_v29  ;;  %v6693_v25 = vmul.f32 1.442695, %v6577_v30  ;;  %vm7380_vm1 = vcmp.gt.f32.partialorder %v15271_v26, 20.0  ;;  %v15429_v63 = vmul.f32 100.0, %v15416_v52  ;;  %v15442_v56 = vpop.f32.mrf.mxu0 }
 0x4d3   : > { %v10676_v11 = vpop.eup %10675  ;;  %v7041_v49 = vadd.f32 1.0, %v10674_v4  ;;  %v7044_v42 = vmul.f32 -0.5, %v10674_v4  ;;  %10679 = vpow2.f32 %v6665_v32  ;;  %v15424_v53 = vmul.f32 100.0, %v15413_v51 }
 0x4d4   : > { %v6926_v2 = vmul.f32 0.6931472, %v10676_v11  ;;  %v7572_v35 = vmul.f32 %v7443_v46, %v7443_v46  ;;  %v7047_v7 = vand.u32 2147483647, %v10674_v4  ;;  %v6579_v18 = vmin.f32 %v15429_v63, 20.0 }
 0x4d5   : > { %10681 = vlog2.f32 %v7041_v49  ;;  %v6578_v5 = vmin.f32 %v15424_v53, 20.0  ;;  %v7045_v0 = vadd.f32 1.0, %v7044_v42  ;;  %vm7393_vm11 = vcmp.gt.f32.partialorder %v15337_v58, 20.0 }
 0x4d6   : > { %9520 = vmatmul.msk.bf16.gmra.mxu0 %vm3106_vm13, %v10862_v15  ;;  %9526 = vmatmul.msk.bf16.gmra.mxu1 %vm3106_vm13, %v10862_v15  ;;  %v10678_v60 = vpop.eup %10677  ;;  %v6932_v23 = vsel %vm6931_vm12, %v6929_v45, %v6926_v2  ;;  %10683 = vpow2.f32 %v6667_v13  ;;  %v15448_v36 = vadd.f32 %v15179_v62, %v15344_v37  ;;  %vm15450_vm14 = vcmp.lt.f32.partialorder %v7047_v7, 0.0004427343 }
 0x4d7   : > { %9532 = vmatmul.msk.bf16.gmra.mxu2 %vm3106_vm13, %v10862_v15  ;;  %v7316_v55 = vmul.f32 0.01, %v6932_v23  ;;  %v7050_v10 = vadd.f32 1.0, %v10678_v60  ;;  %v7053_v44 = vmul.f32 -0.5, %v10678_v60  ;;  %10685 = vpow2.f32 %v6693_v25  ;;  %v15461_v25 = vpop.f32.mrf.mxu2 }
 0x4d8   : > { %9538 = vmatmul.msk.bf16.gmra.mxu3 %vm3106_vm13, %v10862_v15  ;;  %v6695_v1 = vmul.f32 1.442695, %v6578_v5  ;;  %v7056_v8 = vand.u32 2147483647, %v10678_v60  ;;  %v15444_v59 = vpop.f32.mrf.mxu1  ;;  %v7046_v30 = vmul.f32 %v10674_v4, %v7045_v0  ;;  %vm7394_vm15 = vcmp.gt.f32.partialorder %v15383_v16, 20.0 }
 0x4d9   : > { %v7444_v22 = vsel %vm7380_vm1, %v15245_v3, %v7316_v55  ;;  %10687 = vlog2.f32 %v7050_v10  ;;  %v10680_v43 = vpop.eup %10679  ;;  %v7054_v3 = vadd.f32 1.0, %v7053_v44  ;;  %vm7395_vm9 = vcmp.gt.f32.partialorder %v15389_v54, 20.0 }
 0x4da   : > { %v7497_v34 = vpack.c.bf16 %v7444_v22, %v7443_v46  ;;  %v7573_v17 = vmul.f32 %v7444_v22, %v7444_v22  ;;  %10689 = vpow2.f32 %v6695_v1  ;;  %v7059_v20 = vadd.f32 1.0, %v10680_v43  ;;  %v15475_v1 = vpop.f32.mrf.mxu0 }
 0x4db   : > { %v10682_v24 = vpop.eup %10681  ;;  %v7062_v19 = vmul.f32 -0.5, %v10680_v43  ;;  %v6697_v46 = vmul.f32 1.442695, %v6579_v18  ;;  %vm15455_vm3 = vcmp.lt.f32.partialorder %v7056_v8, 0.0004427343  ;;  %v7055_v15 = vmul.f32 %v10678_v60, %v7054_v3  ;;  %v10863_v3 = vld [vmem:[%s16314_s2 + $0x58] sm:$0xff] }
 0x4dc   : > { %v10684_v9 = vpop.eup %10683  ;;  %7529 = vst [vmem:[#allocation2 + $0x58] sm:$0xff] %v7497_v34  ;;  %v7625_v47 = vpack.c.bf16 %v7573_v17, %v7572_v35  ;;  %v7043_v29 = vmul.f32 0.6931472, %v10682_v24  ;;  %10691 = vlog2.f32 %v7059_v20  ;;  %v7065_v62 = vand.u32 2147483647, %v10680_v43  ;;  %v15463_v35 = vpop.f32.mrf.mxu3 }
 0x4dd   : > { %v7068_v37 = vadd.f32 1.0, %v10684_v9  ;;  %v10686_v11 = vpop.eup %10685  ;;  %v7063_v49 = vadd.f32 1.0, %v7062_v19  ;;  %v7071_v42 = vmul.f32 -0.5, %v10684_v9  ;;  %10693 = vpow2.f32 %v6697_v46 }
 0x4de   : > { %7657 = vst [vmem:[#allocation2 + $0x158] sm:$0xff] %v7625_v47  ;;  %v7049_v45 = vsel %vm15450_vm14, %v7046_v30, %v7043_v29  ;;  %v7185_v2 = vadd.f32 1.0, %v10686_v11  ;;  %v7074_v7 = vand.u32 2147483647, %v10684_v9  ;;  %v7188_v10 = vmul.f32 -0.5, %v10686_v11 }
 0x4df   : > { %v10688_v13 = vpop.eup %10687  ;;  %v7329_v4 = vmul.f32 0.01, %v7049_v45  ;;  %10695 = vlog2.f32 %v7068_v37  ;;  %v7072_v55 = vadd.f32 1.0, %v7071_v42  ;;  %v15473_v0 = vmul.f32 100.0, %v15448_v36  ;;  %v15511_v16 = vpop.f32.mrf.mxu2  ;;  %v7769_v29 = vld [vmem:[#allocation2 + $0x218] sm:$0x11] }
 0x4e0   : > { %v15465_v23 = vpop.eup %10689  ;;  %v7052_v5 = vmul.f32 0.6931472, %v10688_v13  ;;  %10697 = vlog2.f32 %v7185_v2  ;;  %v15477_v18 = vpop.f32.mrf.mxu1  ;;  %v7064_v8 = vmul.f32 %v10680_v43, %v7063_v49  ;;  %vm15481_vm4 = vcmp.lt.f32.partialorder %v7065_v62, 0.0004427343 }
 0x4e1   : > { %v7457_v44 = vsel %vm7393_vm11, %v15287_v12, %v7329_v4  ;;  %v7194_v60 = vadd.f32 1.0, %v15465_v23  ;;  %vm7396_vm5 = vcmp.gt.f32.partialorder %v15392_v39, 20.0  ;;  %v7191_v12 = vand.u32 2147483647, %v10686_v11 }
 0x4e2   : > { %v7058_v22 = vsel %vm15455_vm3, %v7055_v15, %v7052_v5  ;;  %v10692_v58 = vpop.eup %10691  ;;  %v7189_v24 = vadd.f32 1.0, %v7188_v10  ;;  %v7197_v26 = vmul.f32 -0.5, %v15465_v23  ;;  %v7586_v20 = vmul.f32 %v7457_v44, %v7457_v44  ;;  %v15522_v34 = vpop.f32.mrf.mxu0 }
 0x4e3   : > { %v7330_v17 = vmul.f32 0.01, %v7058_v22  ;;  %10699 = vlog2.f32 %v7194_v60  ;;  %v15492_v43 = vpop.eup %10693  ;;  %v7061_v19 = vmul.f32 0.6931472, %v10692_v58  ;;  %v7073_v47 = vmul.f32 %v10684_v9, %v7072_v55 }
 0x4e4   : > { %vm15494_vm10 = vcmp.lt.f32.partialorder %v7074_v7, 0.0004427343  ;;  %v7198_v32 = vadd.f32 1.0, %v7197_v26  ;;  %v7203_v62 = vadd.f32 1.0, %v15492_v43  ;;  %v6580_v37 = vmin.f32 %v15473_v0, 20.0  ;;  %v15513_v5 = vpop.f32.mrf.mxu3 }
 0x4e5   : > { %v10696_v30 = vpop.eup %10695  ;;  %v7458_v46 = vsel %vm7394_vm15, %v15359_v40, %v7330_v17  ;;  %v7067_v9 = vsel %vm15481_vm4, %v7064_v8, %v7061_v19  ;;  %v7190_v15 = vmul.f32 %v10686_v11, %v7189_v24  ;;  %vm15506_vm12 = vcmp.lt.f32.partialorder %v7191_v12, 0.0004427343 }
 0x4e6   : > { %9521 = vmatmul.msk.bf16.gmra.mxu0 %vm3106_vm13, %v10863_v3  ;;  %9527 = vmatmul.msk.bf16.gmra.mxu1 %vm3106_vm13, %v10863_v3  ;;  %v7504_v45 = vpack.c.bf16 %v7458_v46, %v7457_v44  ;;  %v7587_v49 = vmul.f32 %v7458_v46, %v7458_v46  ;;  %v7070_v42 = vmul.f32 0.6931472, %v10696_v30  ;;  %v10698_v13 = vpop.eup %10697  ;;  %v7331_v4 = vmul.f32 0.01, %v7067_v9 }
 0x4e7   : > { %9533 = vmatmul.msk.bf16.gmra.mxu2 %vm3106_vm13, %v10863_v3  ;;  %v7200_v40 = vand.u32 2147483647, %v15465_v23  ;;  %v7187_v10 = vmul.f32 0.6931472, %v10698_v13  ;;  %10701 = vlog2.f32 %v7203_v62  ;;  %v7206_v22 = vmul.f32 -0.5, %v15492_v43 }
 0x4e8   : > { %9539 = vmatmul.msk.bf16.gmra.mxu3 %vm3106_vm13, %v10863_v3  ;;  %7536 = vst [vmem:[#allocation2 + $0x90] sm:$0xff] %v7504_v45  ;;  %v7632_v55 = vpack.c.bf16 %v7587_v49, %v7586_v20  ;;  %v7076_v7 = vsel %vm15494_vm10, %v7073_v47, %v7070_v42  ;;  %v7459_v44 = vsel %vm7395_vm9, %v15363_v57, %v7331_v4  ;;  %v6699_v8 = vmul.f32 1.442695, %v6580_v37  ;;  %v15524_v12 = vpop.f32.mrf.mxu1  ;;  %v7768_v3 = vld [vmem:[#allocation2 + $0x210] sm:$0x11]  ;;  %v15536_v49 = vpop.f32.mrf.mxu2 }
 0x4e9   : > { %v10700_v11 = vpop.eup %10699  ;;  %v7332_v60 = vmul.f32 0.01, %v7076_v7  ;;  %v7588_v58 = vmul.f32 %v7459_v44, %v7459_v44  ;;  %v7193_v17 = vsel %vm15506_vm12, %v7190_v15, %v7187_v10  ;;  %v7199_v26 = vmul.f32 %v15465_v23, %v7198_v32 }
 0x4ea   : > { %7664 = vst [vmem:[#allocation2 + $0x190] sm:$0xff] %v7632_v55  ;;  %v7196_v24 = vmul.f32 0.6931472, %v10700_v11  ;;  %v7345_v54 = vmul.f32 0.01, %v7193_v17  ;;  %10703 = vpow2.f32 %v6699_v8  ;;  %vm7409_vm11 = vcmp.gt.f32.partialorder %v15395_v38, 20.0  ;;  %v15541_v55 = vpop.f32.mrf.mxu0 }
 0x4eb   : > { %v7460_v57 = vsel %vm7396_vm5, %v15370_v27, %v7332_v60  ;;  %vm7201_vm1 = vcmp.lt.f32.partialorder %v7200_v40, 0.0004427343  ;;  %vm7410_vm14 = vcmp.gt.f32.partialorder %v15424_v53, 20.0  ;;  %v7207_v27 = vadd.f32 1.0, %v7206_v22 }
 0x4ec   : > { %v7505_v20 = vpack.c.bf16 %v7460_v57, %v7459_v44  ;;  %v7589_v19 = vmul.f32 %v7460_v57, %v7460_v57  ;;  %v7202_v47 = vsel %vm7201_vm1, %v7199_v26, %v7196_v24  ;;  %v7473_v30 = vsel %vm7409_vm11, %v15373_v48, %v7345_v54  ;;  %v15538_v9 = vpop.f32.mrf.mxu3 }
 0x4ed   : > { %v7346_v46 = vmul.f32 0.01, %v7202_v47  ;;  %v10702_v23 = vpop.eup %10701  ;;  %v7602_v39 = vmul.f32 %v7473_v30, %v7473_v30  ;;  %v7978_v62 = vunpack.c.l.b16 %v7768_v3  ;;  %v7979_v45 = vunpack.c.h.b16 %v7768_v3 }
 0x4ee   : > { %7537 = vst [vmem:[#allocation2 + $0x98] sm:$0xff] %v7505_v20  ;;  %v7633_v32 = vpack.c.bf16 %v7589_v19, %v7588_v58  ;;  %v7980_v38 = vunpack.c.l.b16 %v7769_v29  ;;  %v7209_v13 = vand.u32 2147483647, %v15492_v43  ;;  %v7205_v15 = vmul.f32 0.6931472, %v10702_v23 }
 0x4ef   : > { %v7474_v37 = vsel %vm7410_vm14, %v15413_v51, %v7346_v46  ;;  %v8058_v53 = vpack.c.b16 %v7978_v62, %v7978_v62  ;;  %v8059_v2 = vpack.c.b16 %v7979_v45, %v7979_v45  ;;  %v7981_v40 = vunpack.c.h.b16 %v7769_v29 }
 0x4f0   : > { %7665 = vst [vmem:[#allocation2 + $0x198] sm:$0xff] %v7633_v32  ;;  %v7512_v42 = vpack.c.bf16 %v7474_v37, %v7473_v30  ;;  %v7603_v48 = vmul.f32 %v7474_v37, %v7474_v37  ;;  %v10704_v4 = vpop.eup %10703  ;;  %v15543_v7 = vpop.f32.mrf.mxu1  ;;  %v7208_v10 = vmul.f32 %v15492_v43, %v7207_v27  ;;  %v8060_v8 = vpack.c.b16 %v7980_v38, %v7980_v38 }
 0x4f1   : > { %v7212_v11 = vadd.f32 1.0, %v10704_v4  ;;  %v7215_v44 = vmul.f32 -0.5, %v10704_v4  ;;  %v8150_v60 = vand.u32 %v8058_v53, %v11665_v21  ;;  %v8153_v22 = vand.u32 %v8059_v2, %v11665_v21  ;;  %v15550_v57 = vpop.f32.mrf.mxu2  ;;  %v9750_v30 = vld [vmem:[#allocation2 + $0x190] sm:$0xf]  ;;  %v10012_v46 = vld [vmem:[#allocation2 + $0x194] sm:$0xf] }
 0x4f2   : > { %7544 = vst [vmem:[#allocation2 + $0xd0] sm:$0xff] %v7512_v42  ;;  %v7640_v51 = vpack.c.bf16 %v7603_v48, %v7602_v39  ;;  %vm7210_vm15 = vcmp.lt.f32.partialorder %v7209_v13, 0.0004427343  ;;  %v8156_v17 = vand.u32 %v8060_v8, %v11665_v21  ;;  %v8061_v24 = vpack.c.b16 %v7981_v40, %v7981_v40  ;;  %v15554_v19 = vpop.f32.mrf.mxu0  ;;  %v10004_v42 = vld [vmem:[#allocation2 + $0x14c] sm:$0xf0] }
 0x4f3   : > { %10705 = vlog2.f32 %v7212_v11  ;;  %v7211_v58 = vsel %vm7210_vm15, %v7208_v10, %v7205_v15  ;;  %8240 = vmatpush.bf16.msrb.mxu0 %v8150_v60  ;;  %8253 = vmatpush.bf16.msrb.mxu1 %v8153_v22  ;;  %v7216_v26 = vadd.f32 1.0, %v7215_v44  ;;  %v7218_v20 = vand.u32 2147483647, %v10704_v4  ;;  %v9688_v48 = vld [vmem:[#allocation2 + $0x150] sm:$0xf0] }
 0x4f4   : > { %7672 = vst [vmem:[#allocation2 + $0x1d0] sm:$0xff] %v7640_v51  ;;  %8266 = vmatpush.bf16.msrb.mxu2 %v8156_v17  ;;  %v8159_v43 = vand.u32 %v8061_v24, %v11665_v21  ;;  %v15552_v54 = vpop.f32.mrf.mxu3  ;;  %v7347_v3 = vmul.f32 0.01, %v7211_v58  ;;  %vm7411_vm3 = vcmp.gt.f32.partialorder %v15429_v63, 20.0  ;;  %vm7412_vm4 = vcmp.gt.f32.partialorder %v15473_v0, 20.0 }
 0x4f5   : > { %v7217_v32 = vmul.f32 %v10704_v4, %v7216_v26  ;;  %vm7219_vm9 = vcmp.lt.f32.partialorder %v7218_v20, 0.0004427343  ;;  %v9686_v63 = vld [vmem:[#allocation2 + $0x110] sm:$0xf]  ;;  %v9996_v15 = vld [vmem:[#allocation2 + $0x114] sm:$0xf] }
 0x4f6   : > { %8279 = vmatpush.bf16.msrb.mxu3 %v8159_v43  ;;  %v7475_v62 = vsel %vm7411_vm3, %v15416_v52, %v7347_v3  ;;  %v9687_v40 = vor.u32 %v10004_v42, %v9686_v63  ;;  %v9691_v51 = vor.u32 %v9996_v15, %v9688_v48  ;;  %v9622_v58 = vld [vmem:[#allocation2 + $0x90] sm:$0xf]  ;;  %v9980_v17 = vld [vmem:[#allocation2 + $0x94] sm:$0xf]  ;;  %v6344_v63 = vmul.f32 %v15538_v9, %v15399_v6  ;;  %v10005_v15 = vld [vmem:[#allocation2 + $0x154] sm:$0xf0] }
 0x4f7   : > { %v7604_v53 = vmul.f32 %v7475_v62, %v7475_v62  ;;  %v9560_v43 = vld [vmem:[#allocation2 + $0x50] sm:$0xf0]  ;;  %v9558_v3 = vld [vmem:[#allocation2 + $0x10] sm:$0xf]  ;;  %v10013_v42 = vld [vmem:[#allocation2 + $0x19c] sm:$0xf]  ;;  %v6358_v9 = vmul.f32 %v15543_v7, %v15409_v61  ;;  %v6359_v7 = vmul.f32 %v15550_v57, %v15432_v14 }
 0x4f8   : > { %v15556_v47 = vpop.f32.mrf.mxu1  ;;  %v9964_v20 = vld [vmem:[#allocation2 + $0x14] sm:$0xf]  ;;  %v9965_v14 = vld [vmem:[#allocation2 + $0x1c] sm:$0xf] }
 0x4f9   : > { %v10706_v29 = vpop.eup %10705  ;;  %v15561_v2 = vpop.f32.mrf.mxu2  ;;  %v9988_v44 = vld [vmem:[#allocation2 + $0xcc] sm:$0xf0]  ;;  %v9624_v60 = vld [vmem:[#allocation2 + $0xd0] sm:$0xf0] }
 0x4fa   : > { %v7214_v23 = vmul.f32 0.6931472, %v10706_v29  ;;  %v15566_v22 = vpop.f32.mrf.mxu0  ;;  %v9623_v24 = vor.u32 %v9988_v44, %v9622_v58  ;;  %v9627_v26 = vor.u32 %v9980_v17, %v9624_v60 }
 0x4fb   : > { %v10020_v39 = vld [vmem:[#allocation2 + $0x1cc] sm:$0xf0]  ;;  %v9752_v27 = vld [vmem:[#allocation2 + $0x1d0] sm:$0xf0] }
 0x4fc   : > { %v9751_v37 = vor.u32 %v10020_v39, %v9750_v30  ;;  %v9755_v45 = vor.u32 %v10012_v46, %v9752_v27  ;;  %v7220_v38 = vsel %vm7219_vm9, %v7217_v32, %v7214_v23  ;;  %v15563_v4 = vpop.f32.mrf.mxu3  ;;  %v6341_v46 = vmul.f32 %v15522_v34, %v15375_v33 }
 0x4fd   : > { %v7348_v13 = vmul.f32 0.01, %v7220_v38  ;;  %v6342_v23 = vmul.f32 %v15524_v12, %v15377_v41  ;;  %v9563_v39 = vor.u32 %v9964_v20, %v9560_v43  ;;  %v9758_v38 = vld [vmem:[#allocation2 + $0x198] sm:$0xf]  ;;  %v6343_v12 = vmul.f32 %v15536_v49, %v15397_v31 }
 0x4fe   : > { %8241 = vmatpush.bf16.msrb.mxu0 %v9751_v37  ;;  %8254 = vmatpush.bf16.msrb.mxu1 %v9755_v45 }
 0x4ff   : > { %v7476_v52 = vsel %vm7412_vm4, %v15448_v36, %v7348_v13  ;;  %v9972_v36 = vld [vmem:[#allocation2 + $0x4c] sm:$0xf0] }
 0x500   : > { %v7513_v10 = vpack.c.bf16 %v7476_v52, %v7475_v62  ;;  %v7605_v11 = vmul.f32 %v7476_v52, %v7476_v52  ;;  %v15568_v8 = vpop.f32.mrf.mxu1  ;;  %v9559_v32 = vor.u32 %v9972_v36, %v9558_v3  ;;  %v9696_v52 = vld [vmem:[#allocation2 + $0x158] sm:$0xf0] }
 0x501   : > { %v15570_v29 = vpop.f32.mrf.mxu2 }
 0x502   : > { %8242 = vmatpush.bf16.msrb.mxu0 %v9687_v40  ;;  %8255 = vmatpush.bf16.msrb.mxu1 %v9691_v51  ;;  %7545 = vst [vmem:[#allocation2 + $0xd8] sm:$0xff] %v7513_v10  ;;  %v7641_v0 = vpack.c.bf16 %v7605_v11, %v7604_v53  ;;  %v6050_v27 = vpop.f32.mrf.mxu0  ;;  %v6357_v10 = vmul.f32 %v15541_v55, %v15407_v50  ;;  %v9694_v11 = vld [vmem:[#allocation2 + $0x118] sm:$0xf] }
 0x503   : > { %v15578_v37 = vadd.f32 %v6341_v46, %v6050_v27  ;;  %v9695_v17 = vor.u32 %v10005_v15, %v9694_v11  ;;  %v9973_v46 = vld [vmem:[#allocation2 + $0x54] sm:$0xf0]  ;;  %v6373_v15 = vmul.f32 %v15554_v19, %v15442_v56 }
 0x504   : > { %7673 = vst [vmem:[#allocation2 + $0x1d8] sm:$0xff] %v7641_v0  ;;  %v15572_v30 = vpop.f32.mrf.mxu3  ;;  %v9997_v0 = vld [vmem:[#allocation2 + $0x11c] sm:$0xf] }
 0x505   : > { %v15583_v53 = vmul.f32 100.0, %v15578_v37 }
 0x506   : > { %8243 = vmatpush.bf16.msrb.mxu0 %v9623_v24  ;;  %8256 = vmatpush.bf16.msrb.mxu1 %v9627_v26  ;;  %v9699_v24 = vor.u32 %v9997_v0, %v9696_v52 }
 0x507   : > { %v6533_v40 = vmin.f32 %v15583_v53, 20.0  ;;  %vm7365_vm10 = vcmp.gt.f32.partialorder %v15583_v53, 20.0 }
 0x508   : > { %v6089_v62 = vpop.f32.mrf.mxu1 }
 0x509   : > { %v15580_v45 = vadd.f32 %v6342_v23, %v6089_v62  ;;  %v6128_v44 = vpop.f32.mrf.mxu2  ;;  %v6605_v58 = vmul.f32 1.442695, %v6533_v40  ;;  %v9989_v50 = vld [vmem:[#allocation2 + $0xd4] sm:$0xf0]  ;;  %v9632_v55 = vld [vmem:[#allocation2 + $0xd8] sm:$0xf0] }
 0x50a   : > { %8244 = vmatpush.bf16.msrb.mxu0 %v9559_v32  ;;  %8257 = vmatpush.bf16.msrb.mxu1 %v9563_v39  ;;  %v15596_v49 = vadd.f32 %v6343_v12, %v6128_v44  ;;  %v6052_v26 = vpop.f32.mrf.mxu0  ;;  %v9568_v23 = vld [vmem:[#allocation2 + $0x58] sm:$0xf0]  ;;  %v9630_v32 = vld [vmem:[#allocation2 + $0x98] sm:$0xf] }
 0x50b   : > { %v10021_v48 = vld [vmem:[#allocation2 + $0x1d4] sm:$0xf0]  ;;  %v9760_v13 = vld [vmem:[#allocation2 + $0x1d8] sm:$0xf0]  ;;  %v15586_v33 = vmul.f32 100.0, %v15580_v45  ;;  %10707 = vpow2.f32 %v6605_v58  ;;  %v15608_v20 = vadd.f32 %v6357_v10, %v6052_v26  ;;  %v9571_v52 = vor.u32 %v9965_v14, %v9568_v23 }
 0x50c   : > { %v9759_v41 = vor.u32 %v10021_v48, %v9758_v38  ;;  %v9763_v34 = vor.u32 %v10013_v42, %v9760_v13  ;;  %v6167_v60 = vpop.f32.mrf.mxu3  ;;  %v15603_v43 = vmul.f32 100.0, %v15596_v49  ;;  %v9981_v39 = vld [vmem:[#allocation2 + $0x9c] sm:$0xf]  ;;  %v9631_v38 = vor.u32 %v9989_v50, %v9630_v32  ;;  %v9566_v48 = vld [vmem:[#allocation2 + $0x18] sm:$0xf] }
 0x50d   : > { %v6534_v51 = vmin.f32 %v15586_v33, 20.0  ;;  %v15598_v6 = vadd.f32 %v6344_v63, %v6167_v60  ;;  %v9635_v42 = vor.u32 %v9981_v39, %v9632_v55  ;;  %v15617_v13 = vmul.f32 100.0, %v15608_v20 }
 0x50e   : > { %8267 = vmatpush.bf16.msrb.mxu2 %v9759_v41  ;;  %8280 = vmatpush.bf16.msrb.mxu3 %v9763_v34  ;;  %v6535_v27 = vmin.f32 %v15603_v43, 20.0  ;;  %v6360_v34 = vmul.f32 %v15552_v54, %v15434_v28  ;;  %v9567_v12 = vor.u32 %v9973_v46, %v9566_v48  ;;  %v15630_v28 = vmul.f32 %v15556_v47, %v15444_v59 }
 0x50f   : > { %v6607_v31 = vmul.f32 1.442695, %v6534_v51  ;;  %v15606_v3 = vmul.f32 100.0, %v15598_v6  ;;  %v6549_v40 = vmin.f32 %v15617_v13, 20.0  ;;  %v15638_v26 = vmul.f32 %v15561_v2, %v15461_v25 }
 0x510   : > { %v6091_v36 = vpop.f32.mrf.mxu1  ;;  %v6609_v57 = vmul.f32 1.442695, %v6535_v27  ;;  %v15646_v50 = vmul.f32 %v15566_v22, %v15475_v1  ;;  %vm7366_vm1 = vcmp.gt.f32.partialorder %v15586_v33, 20.0  ;;  %vm7367_vm15 = vcmp.gt.f32.partialorder %v15603_v43, 20.0 }
 0x511   : > { %10709 = vpow2.f32 %v6607_v31  ;;  %v15610_v61 = vadd.f32 %v6358_v9, %v6091_v36  ;;  %v6536_v62 = vmin.f32 %v15606_v3, 20.0  ;;  %v6130_v10 = vpop.f32.mrf.mxu2  ;;  %v10708_v44 = vpop.eup %10707  ;;  %v15642_v36 = vmul.f32 %v15563_v4, %v15463_v35 }
 0x512   : > { %8268 = vmatpush.bf16.msrb.mxu2 %v9695_v17  ;;  %8281 = vmatpush.bf16.msrb.mxu3 %v9699_v24  ;;  %10711 = vpow2.f32 %v6609_v57  ;;  %v15632_v54 = vadd.f32 %v6359_v7, %v6130_v10  ;;  %v6789_v19 = vadd.f32 1.0, %v10708_v44  ;;  %v6792_v0 = vmul.f32 -0.5, %v10708_v44  ;;  %v6055_v22 = vpop.f32.mrf.mxu0 }
 0x513   : > { %v15620_v41 = vmul.f32 100.0, %v15610_v61  ;;  %v6611_v63 = vmul.f32 1.442695, %v6536_v62  ;;  %v6795_v58 = vand.u32 2147483647, %v10708_v44  ;;  %vm7368_vm3 = vcmp.gt.f32.partialorder %v15606_v3, 20.0 }
 0x514   : > { %v6169_v11 = vpop.f32.mrf.mxu3  ;;  %v6637_v24 = vmul.f32 1.442695, %v6549_v40  ;;  %v6793_v59 = vadd.f32 1.0, %v6792_v0  ;;  %v15649_v55 = vmul.f32 100.0, %v15632_v54  ;;  %vm7381_vm4 = vcmp.gt.f32.partialorder %v15617_v13, 20.0 }
 0x515   : > { %v6550_v51 = vmin.f32 %v15620_v41, 20.0  ;;  %v15634_v60 = vadd.f32 %v6360_v34, %v6169_v11  ;;  %10713 = vpow2.f32 %v6611_v63  ;;  %vm15651_vm5 = vcmp.lt.f32.partialorder %v6795_v58, 0.0004427343 }
 0x516   : > { %8269 = vmatpush.bf16.msrb.mxu2 %v9631_v38  ;;  %8282 = vmatpush.bf16.msrb.mxu3 %v9635_v42  ;;  %10715 = vlog2.f32 %v6789_v19  ;;  %v6794_v35 = vmul.f32 %v10708_v44, %v6793_v59  ;;  %v6551_v4 = vmin.f32 %v15649_v55, 20.0 }
 0x517   : > { %v10710_v56 = vpop.eup %10709  ;;  %v6639_v47 = vmul.f32 1.442695, %v6550_v51  ;;  %v15656_v46 = vmul.f32 100.0, %v15634_v60 }
 0x518   : > { %v6798_v31 = vadd.f32 1.0, %v10710_v56  ;;  %v6801_v9 = vmul.f32 -0.5, %v10710_v56  ;;  %v6804_v17 = vand.u32 2147483647, %v10710_v56  ;;  %v10712_v23 = vpop.eup %10711  ;;  %v15664_v7 = vpop.f32.mrf.mxu1 }
 0x519   : > { %v6807_v39 = vadd.f32 1.0, %v10712_v23  ;;  %v6810_v27 = vmul.f32 -0.5, %v10712_v23  ;;  %v6813_v62 = vand.u32 2147483647, %v10712_v23  ;;  %v6552_v38 = vmin.f32 %v15656_v46, 20.0 }
 0x51a   : > { %8270 = vmatpush.bf16.msrb.mxu2 %v9567_v12  ;;  %8283 = vmatpush.bf16.msrb.mxu3 %v9571_v52  ;;  %10717 = vlog2.f32 %v6798_v31  ;;  %v6802_v2 = vadd.f32 1.0, %v6801_v9  ;;  %vm15659_vm12 = vcmp.lt.f32.partialorder %v6804_v17, 0.0004427343  ;;  %v6641_v12 = vmul.f32 1.442695, %v6551_v4 }
 0x51b   : > { %10719 = vpow2.f32 %v6637_v24  ;;  %v10714_v32 = vpop.eup %10713  ;;  %v6811_v63 = vadd.f32 1.0, %v6810_v27  ;;  %v15668_v52 = vadd.f32 %v6373_v15, %v6055_v22  ;;  %vm15670_vm11 = vcmp.lt.f32.partialorder %v6813_v62, 0.0004427343  ;;  %v15681_v24 = vpop.f32.mrf.mxu2 }
 0x51c   : > { %10721 = vpow2.f32 %v6639_v47  ;;  %v6816_v42 = vadd.f32 1.0, %v10714_v32  ;;  %v6819_v48 = vmul.f32 -0.5, %v10714_v32  ;;  %v6822_v34 = vand.u32 2147483647, %v10714_v32  ;;  %v10716_v14 = vpop.eup %10715  ;;  %v15683_v59 = vpop.f32.mrf.mxu3 }
 0x51d   : > { %v6803_v57 = vmul.f32 %v10710_v56, %v6802_v2  ;;  %10723 = vlog2.f32 %v6807_v39  ;;  %v6791_v51 = vmul.f32 0.6931472, %v10716_v14  ;;  %v6643_v11 = vmul.f32 1.442695, %v6552_v38  ;;  %v6057_v14 = vpop.f32.mrf.mxu0 }
 0x51e   : > { %10725 = vlog2.f32 %v6816_v42  ;;  %v6820_v0 = vadd.f32 1.0, %v6819_v48  ;;  %vm15674_vm14 = vcmp.lt.f32.partialorder %v6822_v34, 0.0004427343  ;;  %v6812_v31 = vmul.f32 %v10712_v23, %v6811_v63 }
 0x51f   : > { %10727 = vpow2.f32 %v6641_v12  ;;  %v6797_v15 = vsel %vm15651_vm5, %v6794_v35, %v6791_v51  ;;  %vm7382_vm5 = vcmp.gt.f32.partialorder %v15620_v41, 20.0  ;;  %v15714_v58 = vmul.f32 100.0, %v15668_v52 }
 0x520   : > { %v10718_v40 = vpop.eup %10717  ;;  %v7301_v47 = vmul.f32 0.01, %v6797_v15  ;;  %v6821_v62 = vmul.f32 %v10714_v32, %v6820_v0  ;;  %v15736_v12 = vadd.f32 %v15638_v26, %v15681_v24 }
 0x521   : > { %v10720_v44 = vpop.eup %10719  ;;  %v6800_v19 = vmul.f32 0.6931472, %v10718_v40 }
 0x522   : > { %v10722_v56 = vpop.eup %10721  ;;  %v6933_v9 = vadd.f32 1.0, %v10720_v44  ;;  %v6936_v17 = vmul.f32 -0.5, %v10720_v44  ;;  %v6939_v4 = vand.u32 2147483647, %v10720_v44  ;;  %v7429_v27 = vsel %vm7365_vm10, %v15578_v37, %v7301_v47 }
 0x523   : > { %v6806_v2 = vsel %vm15659_vm12, %v6803_v57, %v6800_v19  ;;  %v6942_v22 = vadd.f32 1.0, %v10722_v56  ;;  %v6945_v23 = vmul.f32 -0.5, %v10722_v56  ;;  %v10724_v35 = vpop.eup %10723  ;;  %v6948_v38 = vand.u32 2147483647, %v10722_v56  ;;  %v15698_v57 = vpop.f32.mrf.mxu1 }
 0x524   : > { %v7302_v39 = vmul.f32 0.01, %v6806_v2  ;;  %10729 = vlog2.f32 %v6933_v9  ;;  %v6937_v25 = vadd.f32 1.0, %v6936_v17  ;;  %v10726_v42 = vpop.eup %10725  ;;  %v7558_v48 = vmul.f32 %v7429_v27, %v7429_v27 }
 0x525   : > { %10731 = vlog2.f32 %v6942_v22  ;;  %v6809_v34 = vmul.f32 0.6931472, %v10724_v35  ;;  %vm15694_vm9 = vcmp.lt.f32.partialorder %v6939_v4, 0.0004427343  ;;  %v10728_v63 = vpop.eup %10727  ;;  %v6818_v32 = vmul.f32 0.6931472, %v10726_v42 }
 0x526   : > { %v7430_v1 = vsel %vm7366_vm1, %v15580_v45, %v7302_v39  ;;  %v6938_v40 = vmul.f32 %v10720_v44, %v6937_v25  ;;  %v6946_v33 = vadd.f32 1.0, %v6945_v23  ;;  %v6951_v45 = vadd.f32 1.0, %v10728_v63 }
 0x527   : > { %v7490_v53 = vpack.c.bf16 %v7430_v1, %v7429_v27  ;;  %v7559_v37 = vmul.f32 %v7430_v1, %v7430_v1  ;;  %v6815_v51 = vsel %vm15670_vm11, %v6812_v31, %v6809_v34  ;;  %v6954_v19 = vmul.f32 -0.5, %v10728_v63  ;;  %v6135_v27 = vpop.f32.mrf.mxu2 }
 0x528   : > { %v7303_v15 = vmul.f32 0.01, %v6815_v51  ;;  %v6824_v9 = vsel %vm15674_vm14, %v6821_v62, %v6818_v32  ;;  %vm15706_vm10 = vcmp.lt.f32.partialorder %v6948_v38, 0.0004427343  ;;  %10733 = vlog2.f32 %v6951_v45  ;;  %v15719_v62 = vpop.f32.mrf.mxu3  ;;  %v15748_v51 = vpop.f32.mrf.mxu0 }
 0x529   : > { %v7618_v0 = vpack.c.bf16 %v7559_v37, %v7558_v48  ;;  %7522 = vst [vmem:[#allocation2 + $0x20] sm:$0xff] %v7490_v53  ;;  %v7304_v47 = vmul.f32 0.01, %v6824_v9  ;;  %v6955_v10 = vadd.f32 1.0, %v6954_v19  ;;  %v6957_v31 = vand.u32 2147483647, %v10728_v63 }
 0x52a   : > { %v10730_v44 = vpop.eup %10729  ;;  %v7431_v4 = vsel %vm7367_vm15, %v15596_v49, %v7303_v15  ;;  %10735 = vpow2.f32 %v6643_v11  ;;  %v6947_v35 = vmul.f32 %v10722_v56, %v6946_v33  ;;  %v15732_v34 = vadd.f32 %v15630_v28, %v15664_v7 }
 0x52b   : > { %v10732_v2 = vpop.eup %10731  ;;  %7650 = vst [vmem:[#allocation2 + $0x120] sm:$0xff] %v7618_v0  ;;  %v6935_v22 = vmul.f32 0.6931472, %v10730_v44  ;;  %v7560_v39 = vmul.f32 %v7431_v4, %v7431_v4  ;;  %v7432_v25 = vsel %vm7368_vm3, %v15598_v6, %v7304_v47  ;;  %v6956_v43 = vmul.f32 %v10728_v63, %v6955_v10  ;;  %v15750_v28 = vpop.f32.mrf.mxu1 }
 0x52c   : > { %v6944_v23 = vmul.f32 0.6931472, %v10732_v2  ;;  %v7491_v38 = vpack.c.bf16 %v7432_v25, %v7431_v4  ;;  %v7561_v42 = vmul.f32 %v7432_v25, %v7432_v25  ;;  %vm15725_vm12 = vcmp.lt.f32.partialorder %v6957_v31, 0.0004427343 }
 0x52d   : > { %v6941_v49 = vsel %vm15694_vm9, %v6938_v40, %v6935_v22  ;;  %v6565_v6 = vmin.f32 %v15714_v58, 20.0  ;;  %v15743_v32 = vadd.f32 %v15642_v36, %v15683_v59  ;;  %v15746_v40 = vadd.f32 %v15646_v50, %v6057_v14 }
 0x52e   : > { %v7317_v11 = vmul.f32 0.01, %v6941_v49  ;;  %v6950_v48 = vsel %vm15706_vm10, %v6947_v35, %v6944_v23  ;;  %v7619_v3 = vpack.c.bf16 %v7561_v42, %v7560_v39  ;;  %7523 = vst [vmem:[#allocation2 + $0x28] sm:$0xff] %v7491_v38  ;;  %v10734_v63 = vpop.eup %10733  ;;  %v15756_v24 = vmul.f32 100.0, %v15732_v34 }
 0x52f   : > { %v7318_v56 = vmul.f32 0.01, %v6950_v48  ;;  %v6669_v37 = vmul.f32 1.442695, %v6565_v6  ;;  %v6390_v15 = vmul.f32 %v15568_v8, %v15477_v18  ;;  %v15767_v17 = vmul.f32 100.0, %v15743_v32  ;;  %v15772_v47 = vpop.f32.mrf.mxu2 }
 0x530   : > { %v7445_v53 = vsel %vm7381_vm4, %v15608_v20, %v7317_v11  ;;  %v10736_v7 = vpop.eup %10735  ;;  %7651 = vst [vmem:[#allocation2 + $0x128] sm:$0xff] %v7619_v3  ;;  %v6953_v20 = vmul.f32 0.6931472, %v10734_v63  ;;  %v6566_v45 = vmin.f32 %v15756_v24, 20.0  ;;  %v15770_v44 = vmul.f32 100.0, %v15746_v40  ;;  %v15774_v10 = vpop.f32.mrf.mxu3 }
 0x531   : > { %v7574_v26 = vmul.f32 %v7445_v53, %v7445_v53  ;;  %v7446_v13 = vsel %vm7382_vm5, %v15610_v61, %v7318_v56  ;;  %v6960_v33 = vadd.f32 1.0, %v10736_v7  ;;  %v6963_v50 = vmul.f32 -0.5, %v10736_v7  ;;  %v15784_v39 = vpop.f32.mrf.mxu0 }
 0x532   : > { %v7498_v36 = vpack.c.bf16 %v7446_v13, %v7445_v53  ;;  %v7575_v59 = vmul.f32 %v7446_v13, %v7446_v13  ;;  %v6959_v14 = vsel %vm15725_vm12, %v6956_v43, %v6953_v20  ;;  %10737 = vpow2.f32 %v6669_v37 }
 0x533   : > { %10739 = vlog2.f32 %v6960_v33  ;;  %v7319_v0 = vmul.f32 0.01, %v6959_v14  ;;  %v6671_v41 = vmul.f32 1.442695, %v6566_v45  ;;  %v15762_v61 = vmul.f32 100.0, %v15736_v12  ;;  %v15786_v25 = vpop.f32.mrf.mxu1 }
 0x534   : > { %7530 = vst [vmem:[#allocation2 + $0x60] sm:$0xff] %v7498_v36  ;;  %v7626_v19 = vpack.c.bf16 %v7575_v59, %v7574_v26  ;;  %v6964_v9 = vadd.f32 1.0, %v6963_v50  ;;  %v6391_v31 = vmul.f32 %v15570_v29, %v15511_v16  ;;  %v6392_v2 = vmul.f32 %v15572_v30, %v15513_v5 }
 0x535   : > { %10741 = vpow2.f32 %v6671_v41  ;;  %v6567_v18 = vmin.f32 %v15762_v61, 20.0  ;;  %vm7383_vm1 = vcmp.gt.f32.partialorder %v15649_v55, 20.0  ;;  %v6966_v8 = vand.u32 2147483647, %v10736_v7 }
 0x536   : > { %7658 = vst [vmem:[#allocation2 + $0x160] sm:$0xff] %v7626_v19  ;;  %v6568_v4 = vmin.f32 %v15767_v17, 20.0  ;;  %v6581_v22 = vmin.f32 %v15770_v44, 20.0  ;;  %v7447_v16 = vsel %vm7383_vm1, %v15632_v54, %v7319_v0  ;;  %v15790_v5 = vadd.f32 %v6390_v15, %v15698_v57 }
 0x537   : > { %v6673_v29 = vmul.f32 1.442695, %v6567_v18  ;;  %v15792_v30 = vadd.f32 %v6391_v31, %v6135_v27  ;;  %v6965_v55 = vmul.f32 %v10736_v7, %v6964_v9  ;;  %vm6967_vm11 = vcmp.lt.f32.partialorder %v6966_v8, 0.0004427343  ;;  %v15802_v37 = vpop.f32.mrf.mxu2 }
 0x538   : > { %v10738_v23 = vpop.eup %10737  ;;  %v6675_v49 = vmul.f32 1.442695, %v6568_v4  ;;  %v6701_v11 = vmul.f32 1.442695, %v6581_v22  ;;  %v15795_v48 = vmul.f32 100.0, %v15790_v5  ;;  %vm7384_vm14 = vcmp.gt.f32.partialorder %v15656_v46, 20.0  ;;  %v15804_v7 = vpop.f32.mrf.mxu3 }
 0x539   : > { %v10740_v35 = vpop.eup %10739  ;;  %v7077_v38 = vadd.f32 1.0, %v10738_v23  ;;  %v7080_v42 = vmul.f32 -0.5, %v10738_v23  ;;  %10743 = vpow2.f32 %v6673_v29  ;;  %v15799_v54 = vmul.f32 100.0, %v15792_v30  ;;  %v15811_v33 = vpop.f32.mrf.mxu0 }
 0x53a   : > { %v6962_v43 = vmul.f32 0.6931472, %v10740_v35  ;;  %v7576_v27 = vmul.f32 %v7447_v16, %v7447_v16  ;;  %v6582_v6 = vmin.f32 %v15795_v48, 20.0  ;;  %v7083_v56 = vand.u32 2147483647, %v10738_v23 }
 0x53b   : > { %10745 = vlog2.f32 %v7077_v38  ;;  %v10742_v57 = vpop.eup %10741  ;;  %v7081_v26 = vadd.f32 1.0, %v7080_v42  ;;  %v6583_v20 = vmin.f32 %v15799_v54, 20.0  ;;  %vm7397_vm15 = vcmp.gt.f32.partialorder %v15714_v58, 20.0  ;;  %v15813_v50 = vpop.f32.mrf.mxu1 }
 0x53c   : > { %v6968_v1 = vsel %vm6967_vm11, %v6965_v55, %v6962_v43  ;;  %10747 = vpow2.f32 %v6675_v49  ;;  %v7086_v63 = vadd.f32 1.0, %v10742_v57  ;;  %v7089_v53 = vmul.f32 -0.5, %v10742_v57 }
 0x53d   : > { %v7320_v3 = vmul.f32 0.01, %v6968_v1  ;;  %10749 = vpow2.f32 %v6701_v11  ;;  %v6703_v13 = vmul.f32 1.442695, %v6582_v6  ;;  %v7092_v59 = vand.u32 2147483647, %v10742_v57 }
 0x53e   : > { %10751 = vlog2.f32 %v7086_v63  ;;  %v15816_v0 = vadd.f32 %v6392_v2, %v15719_v62  ;;  %vm15818_vm3 = vcmp.lt.f32.partialorder %v7083_v56, 0.0004427343  ;;  %v7082_v4 = vmul.f32 %v10738_v23, %v7081_v26 }
 0x53f   : > { %v7448_v36 = vsel %vm7384_vm14, %v15634_v60, %v7320_v3  ;;  %v10744_v14 = vpop.eup %10743  ;;  %10753 = vpow2.f32 %v6703_v13  ;;  %v7090_v60 = vadd.f32 1.0, %v7089_v53  ;;  %vm7398_vm9 = vcmp.gt.f32.partialorder %v15756_v24, 20.0  ;;  %v15829_v11 = vpop.f32.mrf.mxu2 }
 0x540   : > { %v7499_v45 = vpack.c.bf16 %v7448_v36, %v7447_v16  ;;  %v7577_v19 = vmul.f32 %v7448_v36, %v7448_v36  ;;  %v7095_v46 = vadd.f32 1.0, %v10744_v14  ;;  %v7098_v9 = vmul.f32 -0.5, %v10744_v14 }
 0x541   : > { %v10746_v41 = vpop.eup %10745  ;;  %v6705_v22 = vmul.f32 1.442695, %v6583_v20  ;;  %vm15823_vm4 = vcmp.lt.f32.partialorder %v7092_v59, 0.0004427343  ;;  %v7101_v62 = vand.u32 2147483647, %v10744_v14  ;;  %v7091_v49 = vmul.f32 %v10742_v57, %v7090_v60  ;;  %v15843_v13 = vpop.f32.mrf.mxu0 }
 0x542   : > { %v10748_v31 = vpop.eup %10747  ;;  %7531 = vst [vmem:[#allocation2 + $0x68] sm:$0xff] %v7499_v45  ;;  %v7627_v18 = vpack.c.bf16 %v7577_v19, %v7576_v27  ;;  %v7079_v8 = vmul.f32 0.6931472, %v10746_v41  ;;  %10755 = vlog2.f32 %v7095_v46  ;;  %v7099_v55 = vadd.f32 1.0, %v7098_v9  ;;  %v15831_v27 = vpop.f32.mrf.mxu3 }
 0x543   : > { %v7104_v2 = vadd.f32 1.0, %v10748_v31  ;;  %v10750_v29 = vpop.eup %10749  ;;  %v7107_v38 = vmul.f32 -0.5, %v10748_v31  ;;  %10757 = vpow2.f32 %v6705_v22  ;;  %vm7399_vm5 = vcmp.gt.f32.partialorder %v15762_v61, 20.0  ;;  %v15845_v20 = vpop.f32.mrf.mxu1 }
 0x544   : > { %7659 = vst [vmem:[#allocation2 + $0x168] sm:$0xff] %v7627_v18  ;;  %v7085_v35 = vsel %vm15818_vm3, %v7082_v4, %v7079_v8  ;;  %v10752_v42 = vpop.eup %10751  ;;  %v7221_v43 = vadd.f32 1.0, %v10750_v29  ;;  %v7110_v56 = vand.u32 2147483647, %v10748_v31  ;;  %v7224_v63 = vmul.f32 -0.5, %v10750_v29 }
 0x545   : > { %v7333_v23 = vmul.f32 0.01, %v7085_v35  ;;  %10759 = vlog2.f32 %v7104_v2  ;;  %v15833_v1 = vpop.eup %10753  ;;  %v7088_v6 = vmul.f32 0.6931472, %v10752_v42  ;;  %v7108_v3 = vadd.f32 1.0, %v7107_v38 }
 0x546   : > { %10761 = vlog2.f32 %v7221_v43  ;;  %v7230_v57 = vadd.f32 1.0, %v15833_v1  ;;  %v15841_v26 = vmul.f32 100.0, %v15816_v0  ;;  %v7100_v59 = vmul.f32 %v10744_v14, %v7099_v55  ;;  %v15869_v2 = vld [vmem:[%s16315_s3] sm:$0x3] }
 0x547   : > { %v7461_v53 = vsel %vm7397_vm15, %v15668_v52, %v7333_v23  ;;  %v7094_v36 = vsel %vm15823_vm4, %v7091_v49, %v7088_v6  ;;  %vm15849_vm10 = vcmp.lt.f32.partialorder %v7101_v62, 0.0004427343  ;;  %vm7400_vm12 = vcmp.gt.f32.partialorder %v15767_v17, 20.0  ;;  %9796 = vmatmul.msk.bf16.vlgmr.msra.gmra.mxu0 %vm3106_vm13, %v15869_v2  ;;  %9797 = vmatmul.msk.bf16.vlgmr.msra.gmra.mxu1 %vm3106_vm13, %v15869_v2  ;;  %v15882_v43 = vpop.f32.mrf.mxu2 }
 0x548   : > { %v7227_v52 = vand.u32 2147483647, %v10750_v29  ;;  %v10756_v58 = vpop.eup %10755  ;;  %v7334_v19 = vmul.f32 0.01, %v7094_v36  ;;  %v7225_v41 = vadd.f32 1.0, %v7224_v63  ;;  %10763 = vlog2.f32 %v7230_v57  ;;  %9798 = vmatmul.msk.bf16.vlgmr.msra.gmra.mxu2 %vm3106_vm13, %v15869_v2  ;;  %9799 = vmatmul.msk.bf16.vlgmr.msra.gmra.mxu3 %vm3106_vm13, %v15869_v2 }
 0x549   : > { %v7233_v15 = vmul.f32 -0.5, %v15833_v1  ;;  %v15855_v60 = vpop.eup %10757  ;;  %v7590_v46 = vmul.f32 %v7461_v53, %v7461_v53  ;;  %v7097_v9 = vmul.f32 0.6931472, %v10756_v58  ;;  %v7109_v18 = vmul.f32 %v10748_v31, %v7108_v3  ;;  %v15896_v45 = vpop.f32.mrf.mxu0 }
 0x54a   : > { %vm15857_vm1 = vcmp.lt.f32.partialorder %v7110_v56, 0.0004427343  ;;  %v7462_v4 = vsel %vm7398_vm9, %v15732_v34, %v7334_v19  ;;  %v7239_v16 = vadd.f32 1.0, %v15855_v60  ;;  %v6584_v62 = vmin.f32 %v15841_v26, 20.0  ;;  %v15884_v6 = vpop.f32.mrf.mxu3 }
 0x54b   : > { %v10760_v8 = vpop.eup %10759  ;;  %v7234_v22 = vadd.f32 1.0, %v7233_v15  ;;  %v7506_v31 = vpack.c.bf16 %v7462_v4, %v7461_v53  ;;  %v7591_v35 = vmul.f32 %v7462_v4, %v7462_v4  ;;  %v7103_v55 = vsel %vm15849_vm10, %v7100_v59, %v7097_v9 }
 0x54c   : > { %v7106_v38 = vmul.f32 0.6931472, %v10760_v8  ;;  %v10762_v34 = vpop.eup %10761  ;;  %v7335_v24 = vmul.f32 0.01, %v7103_v55  ;;  %v7226_v42 = vmul.f32 %v10750_v29, %v7225_v41  ;;  %vm15877_vm11 = vcmp.lt.f32.partialorder %v7227_v52, 0.0004427343  ;;  %v15898_v52 = vpop.f32.mrf.mxu1 }
 0x54d   : > { %v7236_v49 = vand.u32 2147483647, %v15833_v1  ;;  %7538 = vst [vmem:[#allocation2 + $0xa0] sm:$0xff] %v7506_v31  ;;  %v7634_v3 = vpack.c.bf16 %v7591_v35, %v7590_v46  ;;  %v7223_v56 = vmul.f32 0.6931472, %v10762_v34  ;;  %10765 = vlog2.f32 %v7239_v16 }
 0x54e   : > { %v7112_v29 = vsel %vm15857_vm1, %v7109_v18, %v7106_v38  ;;  %v10764_v63 = vpop.eup %10763  ;;  %v7463_v53 = vsel %vm7399_vm5, %v15736_v12, %v7335_v24  ;;  %v7242_v36 = vmul.f32 -0.5, %v15855_v60  ;;  %v6707_v59 = vmul.f32 1.442695, %v6584_v62  ;;  %v7770_v46 = vld [vmem:[#allocation2 + $0x220] sm:$0x11] }
 0x54f   : > { %v7336_v57 = vmul.f32 0.01, %v7112_v29  ;;  %7666 = vst [vmem:[#allocation2 + $0x1a0] sm:$0xff] %v7634_v3  ;;  %v7592_v58 = vmul.f32 %v7463_v53, %v7463_v53  ;;  %v7229_v19 = vsel %vm15877_vm11, %v7226_v42, %v7223_v56  ;;  %v7232_v41 = vmul.f32 0.6931472, %v10764_v63  ;;  %v15910_v55 = vpop.f32.mrf.mxu2 }
 0x550   : > { %v7235_v15 = vmul.f32 %v15833_v1, %v7234_v22  ;;  %v7349_v61 = vmul.f32 0.01, %v7229_v19  ;;  %vm7237_vm14 = vcmp.lt.f32.partialorder %v7236_v49, 0.0004427343  ;;  %10767 = vpow2.f32 %v6707_v59  ;;  %v7771_v8 = vld [vmem:[#allocation2 + $0x228] sm:$0x11] }
 0x551   : > { %v7464_v12 = vsel %vm7400_vm12, %v15743_v32, %v7336_v57  ;;  %vm7413_vm15 = vcmp.gt.f32.partialorder %v15770_v44, 20.0  ;;  %vm7414_vm3 = vcmp.gt.f32.partialorder %v15795_v48, 20.0  ;;  %v7243_v32 = vadd.f32 1.0, %v7242_v36  ;;  %v15915_v29 = vpop.f32.mrf.mxu0 }
 0x552   : > { %v7507_v9 = vpack.c.bf16 %v7464_v12, %v7463_v53  ;;  %v7593_v18 = vmul.f32 %v7464_v12, %v7464_v12  ;;  %v7238_v14 = vsel %vm7237_vm14, %v7235_v15, %v7232_v41  ;;  %v7477_v4 = vsel %vm7413_vm15, %v15746_v40, %v7349_v61  ;;  %v15912_v38 = vpop.f32.mrf.mxu3 }
 0x553   : > { %v7350_v16 = vmul.f32 0.01, %v7238_v14  ;;  %v10766_v1 = vpop.eup %10765  ;;  %v7606_v17 = vmul.f32 %v7477_v4, %v7477_v4  ;;  %v7982_v62 = vunpack.c.l.b16 %v7770_v46  ;;  %v7983_v35 = vunpack.c.h.b16 %v7770_v46 }
 0x554   : > { %7539 = vst [vmem:[#allocation2 + $0xa8] sm:$0xff] %v7507_v9  ;;  %v7635_v22 = vpack.c.bf16 %v7593_v18, %v7592_v58  ;;  %v7984_v44 = vunpack.c.l.b16 %v7771_v8  ;;  %v7245_v24 = vand.u32 2147483647, %v15855_v60  ;;  %v7241_v23 = vmul.f32 0.6931472, %v10766_v1  ;;  %v15917_v56 = vpop.f32.mrf.mxu1 }
 0x555   : > { %v7478_v31 = vsel %vm7414_vm3, %v15790_v5, %v7350_v16  ;;  %v8062_v48 = vpack.c.b16 %v7982_v62, %v7982_v62  ;;  %v8063_v49 = vpack.c.b16 %v7983_v35, %v7983_v35  ;;  %v7985_v3 = vunpack.c.h.b16 %v7771_v8 }
 0x556   : > { %7667 = vst [vmem:[#allocation2 + $0x1a8] sm:$0xff] %v7635_v22  ;;  %v7514_v34 = vpack.c.bf16 %v7478_v31, %v7477_v4  ;;  %v7607_v40 = vmul.f32 %v7478_v31, %v7478_v31  ;;  %v10768_v42 = vpop.eup %10767  ;;  %v7244_v63 = vmul.f32 %v15855_v60, %v7243_v32  ;;  %v8064_v58 = vpack.c.b16 %v7984_v44, %v7984_v44  ;;  %v9766_v16 = vld [vmem:[#allocation2 + $0x1a0] sm:$0xf]  ;;  %v10014_v1 = vld [vmem:[#allocation2 + $0x1a4] sm:$0xf] }
 0x557   : > { %v7248_v53 = vadd.f32 1.0, %v10768_v42  ;;  %v7251_v57 = vmul.f32 -0.5, %v10768_v42  ;;  %v8162_v36 = vand.u32 %v8062_v48, %v11665_v21  ;;  %v8165_v59 = vand.u32 %v8063_v49, %v11665_v21  ;;  %9800 = vmatmul.msk.bf16.vlgmr.msrb.gmra.mxu0 %vm3106_vm13, %v15869_v2  ;;  %v15926_v61 = vpop.f32.mrf.mxu2  ;;  %9801 = vmatmul.msk.bf16.vlgmr.msrb.gmra.mxu1 %vm3106_vm13, %v15869_v2  ;;  %v9998_v49 = vld [vmem:[#allocation2 + $0x124] sm:$0xf] }
 0x558   : > { %7546 = vst [vmem:[#allocation2 + $0xe0] sm:$0xff] %v7514_v34  ;;  %v7642_v5 = vpack.c.bf16 %v7607_v40, %v7606_v17  ;;  %vm7246_vm9 = vcmp.lt.f32.partialorder %v7245_v24, 0.0004427343  ;;  %v8168_v41 = vand.u32 %v8064_v58, %v11665_v21  ;;  %v8065_v15 = vpack.c.b16 %v7985_v3, %v7985_v3  ;;  %9802 = vmatmul.msk.bf16.vlgmr.msrb.gmra.mxu2 %vm3106_vm13, %v15869_v2  ;;  %v10006_v40 = vld [vmem:[#allocation2 + $0x15c] sm:$0xf0] }
 0x559   : > { %10769 = vlog2.f32 %v7248_v53  ;;  %v7247_v19 = vsel %vm7246_vm9, %v7244_v63, %v7241_v23  ;;  %8292 = vmatpush.bf16.msra.mxu0 %v8162_v36  ;;  %8305 = vmatpush.bf16.msra.mxu1 %v8165_v59  ;;  %v7252_v60 = vadd.f32 1.0, %v7251_v57  ;;  %v7254_v18 = vand.u32 2147483647, %v10768_v42  ;;  %v15932_v14 = vpop.f32.mrf.mxu0  ;;  %v9704_v24 = vld [vmem:[#allocation2 + $0x160] sm:$0xf0] }
 0x55a   : > { %7674 = vst [vmem:[#allocation2 + $0x1e0] sm:$0xff] %v7642_v5  ;;  %8318 = vmatpush.bf16.msra.mxu2 %v8168_v41  ;;  %v8171_v12 = vand.u32 %v8065_v15, %v11665_v21  ;;  %v15928_v46 = vpop.f32.mrf.mxu3  ;;  %v7351_v9 = vmul.f32 0.01, %v7247_v19  ;;  %vm7415_vm4 = vcmp.gt.f32.partialorder %v15799_v54, 20.0  ;;  %9803 = vmatmul.msk.bf16.vlgmr.msrb.gmra.mxu3 %vm3106_vm13, %v15869_v2  ;;  %vm7416_vm10 = vcmp.gt.f32.partialorder %v15841_v26, 20.0 }
 0x55b   : > { %v7253_v17 = vmul.f32 %v10768_v42, %v7252_v60  ;;  %vm7255_vm5 = vcmp.lt.f32.partialorder %v7254_v18, 0.0004427343  ;;  %v9702_v23 = vld [vmem:[#allocation2 + $0x120] sm:$0xf]  ;;  %v9707_v63 = vor.u32 %v9998_v49, %v9704_v24  ;;  %v9982_v15 = vld [vmem:[#allocation2 + $0xa4] sm:$0xf]  ;;  %v6345_v18 = vmul.f32 %v15896_v45, %v15748_v51 }
 0x55c   : > { %8331 = vmatpush.bf16.msra.mxu3 %v8171_v12  ;;  %v15934_v8 = vpop.f32.mrf.mxu1  ;;  %v7479_v31 = vsel %vm7415_vm4, %v15792_v30, %v7351_v9  ;;  %v9703_v5 = vor.u32 %v10006_v40, %v9702_v23  ;;  %v9638_v41 = vld [vmem:[#allocation2 + $0xa0] sm:$0xf]  ;;  %v9576_v9 = vld [vmem:[#allocation2 + $0x60] sm:$0xf0]  ;;  %v6347_v23 = vmul.f32 %v15910_v55, %v15772_v47  ;;  %v6348_v49 = vmul.f32 %v15912_v38, %v15774_v10 }
 0x55d   : > { %v7608_v54 = vmul.f32 %v7479_v31, %v7479_v31  ;;  %v6362_v38 = vmul.f32 %v15917_v56, %v15786_v25  ;;  %v6363_v56 = vmul.f32 %v15926_v61, %v15802_v37  ;;  %v9967_v37 = vld [vmem:[#allocation2 + $0x2c] sm:$0xf] }
 0x55f   : > { %v10770_v4 = vpop.eup %10769  ;;  %v15943_v3 = vpop.f32.mrf.mxu2  ;;  %v9990_v36 = vld [vmem:[#allocation2 + $0xdc] sm:$0xf0]  ;;  %v9640_v59 = vld [vmem:[#allocation2 + $0xe0] sm:$0xf0] }
 0x560   : > { %v7250_v22 = vmul.f32 0.6931472, %v10770_v4  ;;  %v9639_v60 = vor.u32 %v9990_v36, %v9638_v41  ;;  %v9643_v12 = vor.u32 %v9982_v15, %v9640_v59  ;;  %v6346_v4 = vmul.f32 %v15898_v52, %v15750_v28  ;;  %v9774_v28 = vld [vmem:[#allocation2 + $0x1a8] sm:$0xf]  ;;  %v10015_v52 = vld [vmem:[#allocation2 + $0x1ac] sm:$0xf] }
 0x561   : > { %v10022_v32 = vld [vmem:[#allocation2 + $0x1dc] sm:$0xf0]  ;;  %v9768_v62 = vld [vmem:[#allocation2 + $0x1e0] sm:$0xf0]  ;;  %v15948_v58 = vpop.f32.mrf.mxu0  ;;  %v9710_v36 = vld [vmem:[#allocation2 + $0x128] sm:$0xf] }
 0x562   : > { %v9767_v35 = vor.u32 %v10022_v32, %v9766_v16  ;;  %v9771_v44 = vor.u32 %v10014_v1, %v9768_v62  ;;  %v7256_v34 = vsel %vm7255_vm5, %v7253_v17, %v7250_v22  ;;  %v15945_v42 = vpop.f32.mrf.mxu3  ;;  %v9574_v16 = vld [vmem:[#allocation2 + $0x20] sm:$0xf]  ;;  %v9966_v1 = vld [vmem:[#allocation2 + $0x24] sm:$0xf]  ;;  %v9999_v41 = vld [vmem:[#allocation2 + $0x12c] sm:$0xf] }
 0x563   : > { %v7352_v48 = vmul.f32 0.01, %v7256_v34  ;;  %v9579_v62 = vor.u32 %v9966_v1, %v9576_v9  ;;  %v9975_v1 = vld [vmem:[#allocation2 + $0x64] sm:$0xf0] }
 0x564   : > { %8293 = vmatpush.bf16.msra.mxu0 %v9767_v35  ;;  %8306 = vmatpush.bf16.msra.mxu1 %v9771_v44  ;;  %v15950_v19 = vpop.f32.mrf.mxu1 }
 0x565   : > { %v7480_v30 = vsel %vm7416_vm10, %v15816_v0, %v7352_v48  ;;  %v9974_v0 = vld [vmem:[#allocation2 + $0x5c] sm:$0xf0] }
 0x566   : > { %v7515_v53 = vpack.c.bf16 %v7480_v30, %v7479_v31  ;;  %v7609_v57 = vmul.f32 %v7480_v30, %v7480_v30  ;;  %v9575_v32 = vor.u32 %v9974_v0, %v9574_v16  ;;  %v10007_v30 = vld [vmem:[#allocation2 + $0x164] sm:$0xf0] }
 0x567   : > { %v6281_v22 = vpop.f32.mrf.mxu2 }
 0x568   : > { %8294 = vmatpush.bf16.msra.mxu0 %v9703_v5  ;;  %8307 = vmatpush.bf16.msra.mxu1 %v9707_v63  ;;  %7547 = vst [vmem:[#allocation2 + $0xe8] sm:$0xff] %v7515_v53  ;;  %v7643_v26 = vpack.c.bf16 %v7609_v57, %v7608_v54  ;;  %v15957_v31 = vmul.f32 %v6281_v22, %v15882_v43  ;;  %v9712_v5 = vld [vmem:[#allocation2 + $0x168] sm:$0xf0] }
 0x569   : > { %v6206_v44 = vpop.f32.mrf.mxu0  ;;  %v6361_v57 = vmul.f32 %v15915_v29, %v15784_v39  ;;  %v9584_v22 = vld [vmem:[#allocation2 + $0x68] sm:$0xf0] }
 0x56a   : > { %7675 = vst [vmem:[#allocation2 + $0x1e8] sm:$0xff] %v7643_v26  ;;  %v6320_v17 = vpop.f32.mrf.mxu3  ;;  %v15962_v51 = vadd.f32 %v6345_v18, %v6206_v44 }
 0x56b   : > { %v15960_v35 = vmul.f32 %v6320_v17, %v15884_v6  ;;  %v9646_v17 = vld [vmem:[#allocation2 + $0xa8] sm:$0xf] }
 0x56c   : > { %8295 = vmatpush.bf16.msra.mxu0 %v9639_v60  ;;  %8308 = vmatpush.bf16.msra.mxu1 %v9643_v12  ;;  %v6245_v34 = vpop.f32.mrf.mxu1  ;;  %v15967_v48 = vmul.f32 100.0, %v15962_v51  ;;  %v9711_v60 = vor.u32 %v10007_v30, %v9710_v36  ;;  %v9715_v12 = vor.u32 %v9999_v41, %v9712_v5  ;;  %v9587_v30 = vor.u32 %v9967_v37, %v9584_v22 }
 0x56d   : > { %v15964_v45 = vadd.f32 %v6346_v4, %v6245_v34 }
 0x56e   : > { %v6537_v63 = vmin.f32 %v15967_v48, 20.0  ;;  %vm7369_vm1 = vcmp.gt.f32.partialorder %v15967_v48, 20.0 }
 0x56f   : > { %v15970_v43 = vmul.f32 100.0, %v15964_v45  ;;  %v6284_v59 = vpop.f32.mrf.mxu2  ;;  %v9991_v39 = vld [vmem:[#allocation2 + $0xe4] sm:$0xf0]  ;;  %v9648_v29 = vld [vmem:[#allocation2 + $0xe8] sm:$0xf0] }
 0x570   : > { %8296 = vmatpush.bf16.msra.mxu0 %v9575_v32  ;;  %8309 = vmatpush.bf16.msra.mxu1 %v9579_v62  ;;  %v6613_v15 = vmul.f32 1.442695, %v6537_v63  ;;  %v15984_v55 = vadd.f32 %v6347_v23, %v6284_v59  ;;  %v9983_v32 = vld [vmem:[#allocation2 + $0xac] sm:$0xf]  ;;  %v9647_v34 = vor.u32 %v9991_v39, %v9646_v17 }
 0x571   : > { %v10023_v40 = vld [vmem:[#allocation2 + $0x1e4] sm:$0xf0]  ;;  %v9776_v24 = vld [vmem:[#allocation2 + $0x1e8] sm:$0xf0]  ;;  %v6538_v53 = vmin.f32 %v15970_v43, 20.0  ;;  %v6208_v0 = vpop.f32.mrf.mxu0  ;;  %vm7370_vm14 = vcmp.gt.f32.partialorder %v15970_v43, 20.0 }
 0x572   : > { %v9775_v6 = vor.u32 %v10023_v40, %v9774_v28  ;;  %v9779_v54 = vor.u32 %v10015_v52, %v9776_v24  ;;  %v6323_v26 = vpop.f32.mrf.mxu3  ;;  %10771 = vpow2.f32 %v6613_v15  ;;  %v15991_v18 = vmul.f32 100.0, %v15984_v55  ;;  %v9582_v52 = vld [vmem:[#allocation2 + $0x28] sm:$0xf] }
 0x573   : > { %9804 = vmatmul.msk.bf16.vlgmr.msra.gmra.mxu0 %vm3106_vm13, %v15869_v2  ;;  %9805 = vmatmul.msk.bf16.vlgmr.msra.gmra.mxu1 %vm3106_vm13, %v15869_v2  ;;  %v6615_v47 = vmul.f32 1.442695, %v6538_v53  ;;  %v15986_v10 = vadd.f32 %v6348_v49, %v6323_v26  ;;  %v15996_v16 = vadd.f32 %v6361_v57, %v6208_v0  ;;  %v9651_v28 = vor.u32 %v9983_v32, %v9648_v29 }
 0x574   : > { %8319 = vmatpush.bf16.msra.mxu2 %v9775_v6  ;;  %8332 = vmatpush.bf16.msra.mxu3 %v9779_v54  ;;  %v6247_v9 = vpop.f32.mrf.mxu1  ;;  %v6539_v62 = vmin.f32 %v15991_v18, 20.0  ;;  %v6364_v6 = vmul.f32 %v15928_v46, %v15804_v7  ;;  %v9583_v54 = vor.u32 %v9975_v1, %v9582_v52  ;;  %v6377_v49 = vmul.f32 %v15932_v14, %v15811_v33 }
 0x575   : > { %v15994_v4 = vmul.f32 100.0, %v15986_v10  ;;  %10773 = vpow2.f32 %v6615_v47  ;;  %v15998_v25 = vadd.f32 %v6362_v38, %v6247_v9  ;;  %v16005_v40 = vmul.f32 100.0, %v15996_v16 }
 0x576   : > { %v6617_v61 = vmul.f32 1.442695, %v6539_v62  ;;  %v16018_v7 = vmul.f32 %v15934_v8, %v15813_v50  ;;  %v16030_v0 = vmul.f32 %v15945_v42, %v15831_v27  ;;  %v16034_v9 = vmul.f32 %v15948_v58, %v15843_v13 }
 0x577   : > { %v6540_v44 = vmin.f32 %v15994_v4, 20.0  ;;  %v16008_v24 = vmul.f32 100.0, %v15998_v25  ;;  %v6553_v5 = vmin.f32 %v16005_v40, 20.0  ;;  %v6286_v53 = vpop.f32.mrf.mxu2  ;;  %vm7371_vm9 = vcmp.gt.f32.partialorder %v15991_v18, 20.0 }
 0x578   : > { %8320 = vmatpush.bf16.msra.mxu2 %v9711_v60  ;;  %8333 = vmatpush.bf16.msra.mxu3 %v9715_v12  ;;  %v10772_v36 = vpop.eup %10771  ;;  %10775 = vpow2.f32 %v6617_v61  ;;  %v16020_v46 = vadd.f32 %v6363_v56, %v6286_v53  ;;  %v16026_v12 = vmul.f32 %v15943_v3, %v15829_v11  ;;  %vm7372_vm4 = vcmp.gt.f32.partialorder %v15994_v4, 20.0 }
 0x579   : > { %v6619_v23 = vmul.f32 1.442695, %v6540_v44  ;;  %v6554_v63 = vmin.f32 %v16008_v24, 20.0  ;;  %v6825_v14 = vadd.f32 1.0, %v10772_v36  ;;  %v6828_v26 = vmul.f32 -0.5, %v10772_v36  ;;  %v6211_v58 = vpop.f32.mrf.mxu0 }
 0x57a   : > { %v6325_v57 = vpop.f32.mrf.mxu3  ;;  %v6831_v41 = vand.u32 2147483647, %v10772_v36  ;;  %v6645_v60 = vmul.f32 1.442695, %v6553_v5  ;;  %v16037_v39 = vmul.f32 100.0, %v16020_v46  ;;  %v16058_v61 = vadd.f32 %v6377_v49, %v6211_v58 }
 0x57b   : > { %v16022_v59 = vadd.f32 %v6364_v6, %v6325_v57  ;;  %v10774_v33 = vpop.eup %10773  ;;  %10777 = vpow2.f32 %v6619_v23  ;;  %v6829_v50 = vadd.f32 1.0, %v6828_v26  ;;  %v6647_v8 = vmul.f32 1.442695, %v6554_v63 }
 0x57c   : > { %8321 = vmatpush.bf16.msra.mxu2 %v9647_v34  ;;  %8334 = vmatpush.bf16.msra.mxu3 %v9651_v28  ;;  %v6834_v15 = vadd.f32 1.0, %v10774_v33  ;;  %v6837_v47 = vmul.f32 -0.5, %v10774_v33  ;;  %v6840_v38 = vand.u32 2147483647, %v10774_v33  ;;  %10779 = vlog2.f32 %v6825_v14 }
 0x57d   : > { %vm16039_vm12 = vcmp.lt.f32.partialorder %v6831_v41, 0.0004427343  ;;  %v16044_v29 = vmul.f32 100.0, %v16022_v59  ;;  %v6830_v27 = vmul.f32 %v10772_v36, %v6829_v50  ;;  %v6555_v42 = vmin.f32 %v16037_v39, 20.0 }
 0x57e   : > { %10781 = vlog2.f32 %v6834_v15  ;;  %v6838_v3 = vadd.f32 1.0, %v6837_v47  ;;  %v10776_v1 = vpop.eup %10775  ;;  %vm16047_vm11 = vcmp.lt.f32.partialorder %v6840_v38, 0.0004427343  ;;  %vm7385_vm10 = vcmp.gt.f32.partialorder %v16005_v40, 20.0 }
 0x57f   : > { %10783 = vpow2.f32 %v6645_v60  ;;  %v6843_v56 = vadd.f32 1.0, %v10776_v1  ;;  %v6846_v17 = vmul.f32 -0.5, %v10776_v1  ;;  %v6849_v32 = vand.u32 2147483647, %v10776_v1 }
 0x580   : > { %8322 = vmatpush.bf16.msra.mxu2 %v9583_v54  ;;  %8335 = vmatpush.bf16.msra.mxu3 %v9587_v30  ;;  %10785 = vpow2.f32 %v6647_v8  ;;  %v6556_v62 = vmin.f32 %v16044_v29, 20.0  ;;  %v6649_v52 = vmul.f32 1.442695, %v6555_v42  ;;  %v6839_v54 = vmul.f32 %v10774_v33, %v6838_v3 }
 0x581   : > { %v10778_v22 = vpop.eup %10777  ;;  %10787 = vlog2.f32 %v6843_v56  ;;  %v6847_v37 = vadd.f32 1.0, %v6846_v17  ;;  %vm16060_vm15 = vcmp.lt.f32.partialorder %v6849_v32, 0.0004427343  ;;  %v16098_v36 = vmul.f32 100.0, %v16058_v61 }
 0x582   : > { %v6852_v44 = vadd.f32 1.0, %v10778_v22  ;;  %v6855_v34 = vmul.f32 -0.5, %v10778_v22  ;;  %v6858_v28 = vand.u32 2147483647, %v10778_v22  ;;  %v10780_v6 = vpop.eup %10779  ;;  %v6651_v5 = vmul.f32 1.442695, %v6556_v62 }
 0x583   : > { %9806 = vmatmul.msk.bf16.vlgmr.msra.gmra.mxu2 %vm3106_vm13, %v15869_v2  ;;  %9807 = vmatmul.msk.bf16.vlgmr.msra.gmra.mxu3 %vm3106_vm13, %v15869_v2  ;;  %v6827_v2 = vmul.f32 0.6931472, %v10780_v6  ;;  %v6848_v14 = vmul.f32 %v10776_v1, %v6847_v37  ;;  %v6394_v37 = vmul.f32 %v15950_v19, %v15845_v20 }
 0x584   : > { %v10782_v23 = vpop.eup %10781  ;;  %10789 = vlog2.f32 %v6852_v44  ;;  %v6856_v57 = vadd.f32 1.0, %v6855_v34  ;;  %vm16064_vm3 = vcmp.lt.f32.partialorder %v6858_v28, 0.0004427343 }
 0x585   : > { %v10784_v63 = vpop.eup %10783  ;;  %v6836_v53 = vmul.f32 0.6931472, %v10782_v23  ;;  %10791 = vpow2.f32 %v6649_v52  ;;  %v6833_v49 = vsel %vm16039_vm12, %v6830_v27, %v6827_v2  ;;  %vm7386_vm12 = vcmp.gt.f32.partialorder %v16008_v24, 20.0 }
 0x586   : > { %v10786_v33 = vpop.eup %10785  ;;  %v6969_v26 = vadd.f32 1.0, %v10784_v63  ;;  %v6972_v41 = vmul.f32 -0.5, %v10784_v63  ;;  %v7305_v15 = vmul.f32 0.01, %v6833_v49  ;;  %v6975_v38 = vand.u32 2147483647, %v10784_v63 }
 0x587   : > { %v6842_v47 = vsel %vm16047_vm11, %v6839_v54, %v6836_v53  ;;  %v6978_v60 = vadd.f32 1.0, %v10786_v33  ;;  %v6981_v3 = vmul.f32 -0.5, %v10786_v33  ;;  %v10788_v42 = vpop.eup %10787  ;;  %v6857_v1 = vmul.f32 %v10778_v22, %v6856_v57 }
 0x588   : > { %v7306_v50 = vmul.f32 0.01, %v6842_v47  ;;  %10793 = vlog2.f32 %v6969_v26  ;;  %v6973_v8 = vadd.f32 1.0, %v6972_v41  ;;  %v7433_v11 = vsel %vm7369_vm1, %v15962_v51, %v7305_v15  ;;  %v6250_v47 = vpop.f32.mrf.mxu1 }
 0x589   : > { %10795 = vlog2.f32 %v6978_v60  ;;  %v6984_v27 = vand.u32 2147483647, %v10786_v33  ;;  %v7562_v56 = vmul.f32 %v7433_v11, %v7433_v11  ;;  %v6845_v17 = vmul.f32 0.6931472, %v10788_v42 }
 0x58a   : > { %v10790_v58 = vpop.eup %10789  ;;  %v7434_v13 = vsel %vm7370_vm14, %v15964_v45, %v7306_v50  ;;  %vm16080_vm5 = vcmp.lt.f32.partialorder %v6975_v38, 0.0004427343  ;;  %v6974_v48 = vmul.f32 %v10784_v63, %v6973_v8  ;;  %v6982_v22 = vadd.f32 1.0, %v6981_v3  ;;  %v6289_v38 = vpop.f32.mrf.mxu2 }
 0x58b   : > { %v10792_v62 = vpop.eup %10791  ;;  %v7492_v44 = vpack.c.bf16 %v7434_v13, %v7433_v11  ;;  %v7563_v34 = vmul.f32 %v7434_v13, %v7434_v13  ;;  %v6854_v28 = vmul.f32 0.6931472, %v10790_v58  ;;  %v6851_v51 = vsel %vm16060_vm15, %v6848_v14, %v6845_v17  ;;  %v6328_v8 = vpop.f32.mrf.mxu3 }
 0x58c   : > { %v6987_v43 = vadd.f32 1.0, %v10792_v62  ;;  %v6990_v45 = vmul.f32 -0.5, %v10792_v62  ;;  %v7307_v6 = vmul.f32 0.01, %v6851_v51  ;;  %vm16090_vm1 = vcmp.lt.f32.partialorder %v6984_v27, 0.0004427343 }
 0x58d   : > { %v7620_v52 = vpack.c.bf16 %v7563_v34, %v7562_v56  ;;  %7524 = vst [vmem:[#allocation2 + $0x30] sm:$0xff] %v7492_v44  ;;  %v6860_v54 = vsel %vm16064_vm3, %v6857_v1, %v6854_v28  ;;  %v6993_v63 = vand.u32 2147483647, %v10792_v62  ;;  %v6983_v15 = vmul.f32 %v10786_v33, %v6982_v22 }
 0x58e   : > { %v10794_v23 = vpop.eup %10793  ;;  %v7308_v2 = vmul.f32 0.01, %v6860_v54  ;;  %10797 = vlog2.f32 %v6987_v43  ;;  %v6991_v30 = vadd.f32 1.0, %v6990_v45  ;;  %v7435_v57 = vsel %vm7371_vm9, %v15984_v55, %v7307_v6 }
 0x58f   : > { %v10796_v53 = vpop.eup %10795  ;;  %7652 = vst [vmem:[#allocation2 + $0x130] sm:$0xff] %v7620_v52  ;;  %v6971_v49 = vmul.f32 0.6931472, %v10794_v23  ;;  %10799 = vpow2.f32 %v6651_v5  ;;  %v7564_v14 = vmul.f32 %v7435_v57, %v7435_v57  ;;  %v6213_v5 = vpop.f32.mrf.mxu0  ;;  %vm16107_vm11 = vcmp.lt.f32.partialorder %v6993_v63, 0.0004427343 }
 0x590   : > { %v7436_v26 = vsel %vm7372_vm4, %v15986_v10, %v7308_v2  ;;  %v6980_v41 = vmul.f32 0.6931472, %v10796_v53  ;;  %v6992_v55 = vmul.f32 %v10792_v62, %v6991_v30  ;;  %v6569_v10 = vmin.f32 %v16098_v36, 20.0  ;;  %v6252_v6 = vpop.f32.mrf.mxu1 }
 0x591   : > { %v7493_v60 = vpack.c.bf16 %v7436_v26, %v7435_v57  ;;  %v7565_v50 = vmul.f32 %v7436_v26, %v7436_v26  ;;  %v6977_v18 = vsel %vm16080_vm5, %v6974_v48, %v6971_v49  ;;  %v16113_v1 = vadd.f32 %v16018_v7, %v6250_v47 }
 0x592   : > { %v7321_v3 = vmul.f32 0.01, %v6977_v18  ;;  %v6986_v42 = vsel %vm16090_vm1, %v6983_v15, %v6980_v41  ;;  %v16116_v27 = vadd.f32 %v16026_v12, %v6289_v38  ;;  %v6677_v13 = vmul.f32 1.442695, %v6569_v10  ;;  %v6291_v54 = vpop.f32.mrf.mxu2 }
 0x593   : > { %v7621_v4 = vpack.c.bf16 %v7565_v50, %v7564_v14  ;;  %7525 = vst [vmem:[#allocation2 + $0x38] sm:$0xff] %v7493_v60  ;;  %v7322_v33 = vmul.f32 0.01, %v6986_v42  ;;  %v16122_v17 = vadd.f32 %v16030_v0, %v6328_v8  ;;  %v16125_v32 = vadd.f32 %v16034_v9, %v6213_v5  ;;  %v6330_v8 = vpop.f32.mrf.mxu3 }
 0x594   : > { %v10798_v58 = vpop.eup %10797  ;;  %v7449_v56 = vsel %vm7385_vm10, %v15996_v16, %v7321_v3  ;;  %v16131_v34 = vmul.f32 100.0, %v16113_v1  ;;  %10801 = vpow2.f32 %v6677_v13  ;;  %vm7387_vm14 = vcmp.gt.f32.partialorder %v16037_v39, 20.0 }
 0x595   : > { %v10800_v62 = vpop.eup %10799  ;;  %7653 = vst [vmem:[#allocation2 + $0x138] sm:$0xff] %v7621_v4  ;;  %v7578_v44 = vmul.f32 %v7449_v56, %v7449_v56  ;;  %v7450_v7 = vsel %vm7386_vm12, %v15998_v25, %v7322_v33  ;;  %v6989_v12 = vmul.f32 0.6931472, %v10798_v58  ;;  %v16137_v25 = vmul.f32 100.0, %v16116_v27 }
 0x596   : > { %v7500_v40 = vpack.c.bf16 %v7450_v7, %v7449_v56  ;;  %v7579_v16 = vmul.f32 %v7450_v7, %v7450_v7  ;;  %v6996_v28 = vadd.f32 1.0, %v10800_v62  ;;  %v6999_v48 = vmul.f32 -0.5, %v10800_v62 }
 0x597   : > { %v6995_v0 = vsel %vm16107_vm11, %v6992_v55, %v6989_v12  ;;  %v6570_v9 = vmin.f32 %v16131_v34, 20.0  ;;  %v16140_v45 = vmul.f32 100.0, %v16122_v17  ;;  %v16143_v52 = vmul.f32 100.0, %v16125_v32 }
 0x598   : > { %7532 = vst [vmem:[#allocation2 + $0x70] sm:$0xff] %v7500_v40  ;;  %v7628_v51 = vpack.c.bf16 %v7579_v16, %v7578_v44  ;;  %10803 = vlog2.f32 %v6996_v28  ;;  %v7323_v22 = vmul.f32 0.01, %v6995_v0  ;;  %v7000_v43 = vadd.f32 1.0, %v6999_v48 }
 0x599   : > { %v6679_v24 = vmul.f32 1.442695, %v6570_v9  ;;  %v6571_v23 = vmin.f32 %v16137_v25, 20.0  ;;  %v7002_v2 = vand.u32 2147483647, %v10800_v62  ;;  %v6572_v30 = vmin.f32 %v16140_v45, 20.0 }
 0x59a   : > { %7660 = vst [vmem:[#allocation2 + $0x170] sm:$0xff] %v7628_v51  ;;  %v6585_v63 = vmin.f32 %v16143_v52, 20.0  ;;  %v10802_v53 = vpop.eup %10801  ;;  %v7451_v57 = vsel %vm7387_vm14, %v16020_v46, %v7323_v22  ;;  %v16152_v14 = vadd.f32 %v6394_v37, %v6252_v6  ;;  %v16155_v26 = vadd.f32 %v15957_v31, %v6291_v54 }
 0x59b   : > { %10805 = vpow2.f32 %v6679_v24  ;;  %v6681_v49 = vmul.f32 1.442695, %v6571_v23  ;;  %v7001_v19 = vmul.f32 %v10800_v62, %v7000_v43  ;;  %v7113_v41 = vadd.f32 1.0, %v10802_v53 }
 0x59c   : > { %v7116_v15 = vmul.f32 -0.5, %v10802_v53  ;;  %v6683_v47 = vmul.f32 1.442695, %v6572_v30  ;;  %v6709_v38 = vmul.f32 1.442695, %v6585_v63  ;;  %v16158_v60 = vmul.f32 100.0, %v16152_v14 }
 0x59d   : > { %10807 = vpow2.f32 %v6681_v49  ;;  %vm7003_vm15 = vcmp.lt.f32.partialorder %v7002_v2, 0.0004427343  ;;  %vm7388_vm3 = vcmp.gt.f32.partialorder %v16044_v29, 20.0  ;;  %v16162_v46 = vmul.f32 100.0, %v16155_v26 }
 0x59e   : > { %v10804_v20 = vpop.eup %10803  ;;  %10809 = vlog2.f32 %v7113_v41  ;;  %v7119_v18 = vand.u32 2147483647, %v10802_v53  ;;  %v6586_v55 = vmin.f32 %v16158_v60, 20.0  ;;  %v7580_v5 = vmul.f32 %v7451_v57, %v7451_v57 }
 0x59f   : > { %v6998_v39 = vmul.f32 0.6931472, %v10804_v20  ;;  %10811 = vpow2.f32 %v6683_v47  ;;  %v7117_v42 = vadd.f32 1.0, %v7116_v15  ;;  %v6587_v33 = vmin.f32 %v16162_v46, 20.0 }
 0x5a0   : > { %10813 = vpow2.f32 %v6709_v38  ;;  %v6711_v4 = vmul.f32 1.442695, %v6586_v55  ;;  %vm7401_vm9 = vcmp.gt.f32.partialorder %v16098_v36, 20.0  ;;  %v16171_v56 = vadd.f32 %v15960_v35, %v6330_v8 }
 0x5a1   : > { %v10806_v31 = vpop.eup %10805  ;;  %v7004_v50 = vsel %vm7003_vm15, %v7001_v19, %v6998_v39  ;;  %vm16173_vm4 = vcmp.lt.f32.partialorder %v7119_v18, 0.0004427343  ;;  %v7118_v40 = vmul.f32 %v10802_v53, %v7117_v42  ;;  %vm7402_vm5 = vcmp.gt.f32.partialorder %v16131_v34, 20.0 }
 0x5a2   : > { %v7324_v3 = vmul.f32 0.01, %v7004_v50  ;;  %v7122_v11 = vadd.f32 1.0, %v10806_v31  ;;  %v7125_v10 = vmul.f32 -0.5, %v10806_v31  ;;  %v7128_v16 = vand.u32 2147483647, %v10806_v31 }
 0x5a3   : > { %v10808_v13 = vpop.eup %10807  ;;  %v6713_v35 = vmul.f32 1.442695, %v6587_v33  ;;  %vm7403_vm12 = vcmp.gt.f32.partialorder %v16137_v25, 20.0  ;;  %v16189_v47 = vmul.f32 100.0, %v16171_v56  ;;  %vm7404_vm14 = vcmp.gt.f32.partialorder %v16140_v45, 20.0 }
 0x5a4   : > { %v7452_v58 = vsel %vm7388_vm3, %v16022_v59, %v7324_v3  ;;  %10815 = vlog2.f32 %v7122_v11  ;;  %v10810_v12 = vpop.eup %10809  ;;  %v7131_v28 = vadd.f32 1.0, %v10808_v13  ;;  %v7134_v29 = vmul.f32 -0.5, %v10808_v13 }
 0x5a5   : > { %v7501_v62 = vpack.c.bf16 %v7452_v58, %v7451_v57  ;;  %v7581_v44 = vmul.f32 %v7452_v58, %v7452_v58  ;;  %10817 = vpow2.f32 %v6711_v4  ;;  %v10812_v59 = vpop.eup %10811  ;;  %v7115_v0 = vmul.f32 0.6931472, %v10810_v12 }
 0x5a6   : > { %v7126_v9 = vadd.f32 1.0, %v7125_v10  ;;  %10819 = vlog2.f32 %v7131_v28  ;;  %v7135_v51 = vadd.f32 1.0, %v7134_v29  ;;  %v7137_v22 = vand.u32 2147483647, %v10808_v13  ;;  %v10814_v43 = vpop.eup %10813 }
 0x5a7   : > { %7533 = vst [vmem:[#allocation2 + $0x78] sm:$0xff] %v7501_v62  ;;  %v7629_v48 = vpack.c.bf16 %v7581_v44, %v7580_v5  ;;  %v7140_v24 = vadd.f32 1.0, %v10812_v59  ;;  %v7121_v6 = vsel %vm16173_vm4, %v7118_v40, %v7115_v0  ;;  %v7143_v54 = vmul.f32 -0.5, %v10812_v59 }
 0x5a8   : > { %v7146_v37 = vand.u32 2147483647, %v10812_v59  ;;  %10821 = vpow2.f32 %v6713_v35  ;;  %v7337_v2 = vmul.f32 0.01, %v7121_v6  ;;  %vm16180_vm10 = vcmp.lt.f32.partialorder %v7128_v16, 0.0004427343 }
 0x5a9   : > { %7661 = vst [vmem:[#allocation2 + $0x178] sm:$0xff] %v7629_v48  ;;  %10823 = vlog2.f32 %v7140_v24  ;;  %v7257_v63 = vadd.f32 1.0, %v10814_v43  ;;  %v7127_v49 = vmul.f32 %v10806_v31, %v7126_v9  ;;  %v7144_v20 = vadd.f32 1.0, %v7143_v54  ;;  %v7772_v54 = vld [vmem:[#allocation2 + $0x230] sm:$0x11] }
 0x5aa   : > { %v10816_v23 = vpop.eup %10815  ;;  %v7260_v19 = vmul.f32 -0.5, %v10814_v43  ;;  %v7465_v41 = vsel %vm7401_vm9, %v16058_v61, %v7337_v2  ;;  %v7136_v38 = vmul.f32 %v10808_v13, %v7135_v51  ;;  %vm16193_vm1 = vcmp.lt.f32.partialorder %v7137_v22, 0.0004427343  ;;  %v7773_v2 = vld [vmem:[#allocation2 + $0x238] sm:$0x11] }
 0x5ab   : > { %v10818_v53 = vpop.eup %10817  ;;  %v7124_v57 = vmul.f32 0.6931472, %v10816_v23  ;;  %10825 = vlog2.f32 %v7257_v63  ;;  %vm16197_vm11 = vcmp.lt.f32.partialorder %v7146_v37, 0.0004427343  ;;  %v7594_v5 = vmul.f32 %v7465_v41, %v7465_v41 }
 0x5ac   : > { %v7266_v15 = vadd.f32 1.0, %v10818_v53  ;;  %v10820_v61 = vpop.eup %10819  ;;  %v7261_v18 = vadd.f32 1.0, %v7260_v19  ;;  %v7269_v55 = vmul.f32 -0.5, %v10818_v53  ;;  %v7145_v42 = vmul.f32 %v10812_v59, %v7144_v20 }
 0x5ad   : > { %v7130_v39 = vsel %vm16180_vm10, %v7127_v49, %v7124_v57  ;;  %v7133_v3 = vmul.f32 0.6931472, %v10820_v61  ;;  %v7263_v11 = vand.u32 2147483647, %v10814_v43  ;;  %vm7417_vm15 = vcmp.gt.f32.partialorder %v16143_v52, 20.0 }
 0x5ae   : > { %v7338_v36 = vmul.f32 0.01, %v7130_v39  ;;  %10827 = vlog2.f32 %v7266_v15  ;;  %v16202_v8 = vpop.eup %10821  ;;  %v7270_v33 = vadd.f32 1.0, %v7269_v55  ;;  %v6588_v13 = vmin.f32 %v16189_v47, 20.0 }
 0x5af   : > { %v10824_v10 = vpop.eup %10823  ;;  %v7275_v58 = vadd.f32 1.0, %v16202_v8  ;;  %v7139_v7 = vsel %vm16193_vm1, %v7136_v38, %v7133_v3  ;;  %vm7418_vm3 = vcmp.gt.f32.partialorder %v16158_v60, 20.0  ;;  %v7262_v28 = vmul.f32 %v10814_v43, %v7261_v18 }
 0x5b0   : > { %v7466_v4 = vsel %vm7402_vm5, %v16113_v1, %v7338_v36  ;;  %v7142_v12 = vmul.f32 0.6931472, %v10824_v10  ;;  %v7339_v16 = vmul.f32 0.01, %v7139_v7  ;;  %v7272_v29 = vand.u32 2147483647, %v10818_v53 }
 0x5b1   : > { %v7508_v62 = vpack.c.bf16 %v7466_v4, %v7465_v41  ;;  %v7595_v44 = vmul.f32 %v7466_v4, %v7466_v4  ;;  %v10826_v40 = vpop.eup %10825  ;;  %10829 = vlog2.f32 %v7275_v58  ;;  %v7278_v48 = vmul.f32 -0.5, %v16202_v8 }
 0x5b2   : > { %v7148_v34 = vsel %vm16197_vm11, %v7145_v42, %v7142_v12  ;;  %v7259_v59 = vmul.f32 0.6931472, %v10826_v40  ;;  %v7467_v9 = vsel %vm7403_vm12, %v16116_v27, %v7339_v16  ;;  %vm7264_vm9 = vcmp.lt.f32.partialorder %v7263_v11, 0.0004427343 }
 0x5b3   : > { %7540 = vst [vmem:[#allocation2 + $0xb0] sm:$0xff] %v7508_v62  ;;  %v7636_v1 = vpack.c.bf16 %v7595_v44, %v7594_v5  ;;  %v7340_v35 = vmul.f32 0.01, %v7148_v34  ;;  %v6715_v51 = vmul.f32 1.442695, %v6588_v13  ;;  %v7596_v22 = vmul.f32 %v7467_v9, %v7467_v9 }
 0x5b4   : > { %v10828_v0 = vpop.eup %10827  ;;  %v7265_v24 = vsel %vm7264_vm9, %v7262_v28, %v7259_v59  ;;  %v7271_v6 = vmul.f32 %v10818_v53, %v7270_v33  ;;  %vm7273_vm4 = vcmp.lt.f32.partialorder %v7272_v29, 0.0004427343  ;;  %v7279_v63 = vadd.f32 1.0, %v7278_v48  ;;  %v10008_v59 = vld [vmem:[#allocation2 + $0x16c] sm:$0xf0] }
 0x5b5   : > { %7668 = vst [vmem:[#allocation2 + $0x1b0] sm:$0xff] %v7636_v1  ;;  %v7268_v43 = vmul.f32 0.6931472, %v10828_v0  ;;  %v7468_v37 = vsel %vm7404_vm14, %v16122_v17, %v7340_v35  ;;  %v7353_v23 = vmul.f32 0.01, %v7265_v24  ;;  %10831 = vpow2.f32 %v6715_v51 }
 0x5b6   : > { %v7509_v30 = vpack.c.bf16 %v7468_v37, %v7467_v9  ;;  %v7597_v25 = vmul.f32 %v7468_v37, %v7468_v37  ;;  %v7986_v53 = vunpack.c.l.b16 %v7772_v54  ;;  %v7987_v19 = vunpack.c.h.b16 %v7772_v54  ;;  %v9720_v48 = vld [vmem:[#allocation2 + $0x170] sm:$0xf0] }
 0x5b7   : > { %v7274_v27 = vsel %vm7273_vm4, %v7271_v6, %v7268_v43  ;;  %v10830_v57 = vpop.eup %10829  ;;  %v7481_v49 = vsel %vm7417_vm15, %v16125_v32, %v7353_v23  ;;  %v7281_v17 = vand.u32 2147483647, %v16202_v8  ;;  %v7988_v15 = vunpack.c.l.b16 %v7773_v2 }
 0x5b8   : > { %v7354_v20 = vmul.f32 0.01, %v7274_v27  ;;  %7541 = vst [vmem:[#allocation2 + $0xb8] sm:$0xff] %v7509_v30  ;;  %v7637_v41 = vpack.c.bf16 %v7597_v25, %v7596_v22  ;;  %v7610_v45 = vmul.f32 %v7481_v49, %v7481_v49  ;;  %v8066_v38 = vpack.c.b16 %v7986_v53, %v7986_v53 }
 0x5b9   : > { %v8067_v50 = vpack.c.b16 %v7987_v19, %v7987_v19  ;;  %v7989_v31 = vunpack.c.h.b16 %v7773_v2  ;;  %v7277_v32 = vmul.f32 0.6931472, %v10830_v57  ;;  %v8068_v36 = vpack.c.b16 %v7988_v15, %v7988_v15 }
 0x5ba   : > { %v7482_v39 = vsel %vm7418_vm3, %v16152_v14, %v7354_v20  ;;  %7669 = vst [vmem:[#allocation2 + $0x1b8] sm:$0xff] %v7637_v41  ;;  %v8174_v55 = vand.u32 %v8066_v38, %v11665_v21  ;;  %v7280_v11 = vmul.f32 %v16202_v8, %v7279_v63  ;;  %vm7282_vm5 = vcmp.lt.f32.partialorder %v7281_v17, 0.0004427343  ;;  %v9654_v17 = vld [vmem:[#allocation2 + $0xb0] sm:$0xf] }
 0x5bb   : > { %v7516_v61 = vpack.c.bf16 %v7482_v39, %v7481_v49  ;;  %v7611_v52 = vmul.f32 %v7482_v39, %v7482_v39  ;;  %v10832_v18 = vpop.eup %10831  ;;  %v8177_v5 = vand.u32 %v8067_v50, %v11665_v21  ;;  %v8069_v3 = vpack.c.b16 %v7989_v31, %v7989_v31  ;;  %v9976_v31 = vld [vmem:[#allocation2 + $0x6c] sm:$0xf0] }
 0x5bc   : > { %v7284_v60 = vadd.f32 1.0, %v10832_v18  ;;  %v7287_v14 = vmul.f32 -0.5, %v10832_v18  ;;  %8344 = vmatpush.bf16.msrb.mxu0 %v8174_v55  ;;  %v8180_v10 = vand.u32 %v8068_v36, %v11665_v21  ;;  %v7283_v33 = vsel %vm7282_vm5, %v7280_v11, %v7277_v32  ;;  %v9782_v8 = vld [vmem:[#allocation2 + $0x1b0] sm:$0xf]  ;;  %v10016_v7 = vld [vmem:[#allocation2 + $0x1b4] sm:$0xf] }
 0x5bd   : > { %7548 = vst [vmem:[#allocation2 + $0xf0] sm:$0xff] %v7516_v61  ;;  %v7644_v42 = vpack.c.bf16 %v7611_v52, %v7610_v45  ;;  %8357 = vmatpush.bf16.msrb.mxu1 %v8177_v5  ;;  %v8183_v4 = vand.u32 %v8069_v3, %v11665_v21  ;;  %v7355_v58 = vmul.f32 0.01, %v7283_v33  ;;  %v7290_v62 = vand.u32 2147483647, %v10832_v18 }
 0x5be   : > { %10833 = vlog2.f32 %v7284_v60  ;;  %8370 = vmatpush.bf16.msrb.mxu2 %v8180_v10  ;;  %v7288_v13 = vadd.f32 1.0, %v7287_v14  ;;  %vm7419_vm10 = vcmp.gt.f32.partialorder %v16162_v46, 20.0  ;;  %vm7420_vm1 = vcmp.gt.f32.partialorder %v16189_v47, 20.0  ;;  %v9718_v46 = vld [vmem:[#allocation2 + $0x130] sm:$0xf] }
 0x5bf   : > { %7676 = vst [vmem:[#allocation2 + $0x1f0] sm:$0xff] %v7644_v42  ;;  %8383 = vmatpush.bf16.msrb.mxu3 %v8183_v4  ;;  %v7483_v12 = vsel %vm7419_vm10, %v16155_v26, %v7355_v58  ;;  %vm7291_vm12 = vcmp.lt.f32.partialorder %v7290_v62, 0.0004427343  ;;  %v10000_v26 = vld [vmem:[#allocation2 + $0x134] sm:$0xf]  ;;  %v9719_v37 = vor.u32 %v10008_v59, %v9718_v46  ;;  %vm8552_vm11 = vcmask 1042434  }
 0x5c0   : > { %v7289_v16 = vmul.f32 %v10832_v18, %v7288_v13  ;;  %v7612_v0 = vmul.f32 %v7483_v12, %v7483_v12  ;;  %v9723_v23 = vor.u32 %v10000_v26, %v9720_v48  ;;  %v9592_v61 = vld [vmem:[#allocation2 + $0x70] sm:$0xf0]  ;;  %v9590_v11 = vld [vmem:[#allocation2 + $0x30] sm:$0xf]  ;;  %v10009_v59 = vld [vmem:[#allocation2 + $0x174] sm:$0xf0] }
 0x5c1   : > { %v9968_v60 = vld [vmem:[#allocation2 + $0x34] sm:$0xf]  ;;  %v9591_v10 = vor.u32 %v9976_v31, %v9590_v11  ;;  %v9728_v48 = vld [vmem:[#allocation2 + $0x178] sm:$0xf0]  ;;  %vm8558_vm14 = vcmask 1046534  }
 0x5c2   : > { %v9595_v4 = vor.u32 %v9968_v60, %v9592_v61  ;;  %v9598_v61 = vld [vmem:[#allocation2 + $0x38] sm:$0xf] }
 0x5c4   : > { %v10834_v44 = vpop.eup %10833  ;;  %v8194_v35 = vpop.f32.mrf.mxu0  ;;  %v9992_v25 = vld [vmem:[#allocation2 + $0xec] sm:$0xf0]  ;;  %v9656_v27 = vld [vmem:[#allocation2 + $0xf0] sm:$0xf0] }
 0x5c5   : > { %v7286_v40 = vmul.f32 0.6931472, %v10834_v44  ;;  %v8207_v51 = vpop.f32.mrf.mxu1  ;;  %v8409_v22 = vrot.slane %v8194_v35, 1  ;;  %v8457_v24 = vrot.slane %v8194_v35, 2  ;;  %v9655_v38 = vor.u32 %v9992_v25, %v9654_v17  ;;  %v9662_v25 = vld [vmem:[#allocation2 + $0xb8] sm:$0xf] }
 0x5c6   : > { %v10024_v28 = vld [vmem:[#allocation2 + $0x1ec] sm:$0xf0]  ;;  %v9784_v29 = vld [vmem:[#allocation2 + $0x1f0] sm:$0xf0]  ;;  %v8410_v43 = vrot.slane %v8207_v51, 1  ;;  %v8458_v6 = vrot.slane %v8207_v51, 2 }
 0x5c7   : > { %v9783_v21 = vor.u32 %v10024_v28, %v9782_v8  ;;  %v9787_v1 = vor.u32 %v10016_v7, %v9784_v29  ;;  %v7292_v34 = vsel %vm7291_vm12, %v7289_v16, %v7286_v40  ;;  %v8441_v63 = vmul.f32 %v8409_v22, %v8194_v35  ;;  %v10017_v16 = vld [vmem:[#allocation2 + $0x1bc] sm:$0xf]  ;;  %v9726_v22 = vld [vmem:[#allocation2 + $0x138] sm:$0xf] }
 0x5c8   : > { %v7356_v9 = vmul.f32 0.01, %v7292_v34  ;;  %v8442_v47 = vmul.f32 %v8410_v43, %v8207_v51  ;;  %v16247_v34 = vld [vmem:[%s16315_s3] sm:$0x3]  ;;  %v9727_v43 = vor.u32 %v10009_v59, %v9726_v22 }
 0x5c9   : > { %8345 = vmatpush.bf16.msrb.mxu0 %v9783_v21  ;;  %8358 = vmatpush.bf16.msrb.mxu1 %v9787_v1  ;;  %v8489_v15 = vadd.f32 %v8457_v24, %v8441_v63  ;;  %v10001_v24 = vld [vmem:[#allocation2 + $0x13c] sm:$0xf] }
 0x5ca   : > { %v7484_v54 = vsel %vm7420_vm1, %v16171_v56, %v7356_v9  ;;  %v9984_v56 = vld [vmem:[#allocation2 + $0xb4] sm:$0xf]  ;;  %v8490_v39 = vadd.f32 %v8458_v6, %v8442_v47  ;;  %v9731_v6 = vor.u32 %v10001_v24, %v9728_v48 }
 0x5cb   : > { %v7517_v2 = vpack.c.bf16 %v7484_v54, %v7483_v12  ;;  %v7613_v30 = vmul.f32 %v7484_v54, %v7484_v54  ;;  %v8220_v57 = vpop.f32.mrf.mxu2  ;;  %v8233_v49 = vpop.f32.mrf.mxu3  ;;  %v9659_v50 = vor.u32 %v9984_v56, %v9656_v27  ;;  %v8505_v36 = vand.u32 2147483647, %v8489_v15  ;;  %v9790_v12 = vld [vmem:[#allocation2 + $0x1b8] sm:$0xf]  ;;  %v9985_v27 = vld [vmem:[#allocation2 + $0xbc] sm:$0xf] }
 0x5cc   : > { %v8411_v20 = vrot.slane %v8220_v57, 1  ;;  %v8459_v53 = vrot.slane %v8220_v57, 2  ;;  %v8412_v19 = vrot.slane %v8233_v49, 1  ;;  %v8460_v41 = vrot.slane %v8233_v49, 2  ;;  %v8196_v3 = vpop.f32.mrf.mxu0 }
 0x5cd   : > { %8346 = vmatpush.bf16.msrb.mxu0 %v9719_v37  ;;  %8359 = vmatpush.bf16.msrb.mxu1 %v9723_v23  ;;  %7549 = vst [vmem:[#allocation2 + $0xf8] sm:$0xff] %v7517_v2  ;;  %v7645_v45 = vpack.c.bf16 %v7613_v30, %v7612_v0  ;;  %v8506_v18 = vand.u32 2147483647, %v8490_v39  ;;  %v8209_v42 = vpop.f32.mrf.mxu1  ;;  %v9600_v39 = vld [vmem:[#allocation2 + $0x78] sm:$0xf0] }
 0x5ce   : > { %v8443_v52 = vmul.f32 %v8411_v20, %v8220_v57  ;;  %v8444_v32 = vmul.f32 %v8412_v19, %v8233_v49  ;;  %v9977_v19 = vld [vmem:[#allocation2 + $0x74] sm:$0xf0] }
 0x5cf   : > { %7677 = vst [vmem:[#allocation2 + $0x1f8] sm:$0xff] %v7645_v45  ;;  %v8537_v14 = vrot.slane %v8506_v18, 7 }
 0x5d0   : > { %v8491_v55 = vadd.f32 %v8459_v53, %v8443_v52  ;;  %v8492_v5 = vadd.f32 %v8460_v41, %v8444_v32 }
 0x5d1   : > { %8347 = vmatpush.bf16.msrb.mxu0 %v9655_v38  ;;  %8360 = vmatpush.bf16.msrb.mxu1 %v9659_v50  ;;  %v16239_v13 = vsel %vm2613_vm7, %v8505_v36, %v8537_v14 }
 0x5d2   : > { %v8507_v33 = vand.u32 2147483647, %v8491_v55  ;;  %v8508_v58 = vand.u32 2147483647, %v8492_v5  ;;  %v9599_v55 = vor.u32 %v9977_v19, %v9598_v61  ;;  %v9969_v5 = vld [vmem:[#allocation2 + $0x3c] sm:$0xf] }
 0x5d3   : > { %v8222_v62 = vpop.f32.mrf.mxu2  ;;  %v8235_v44 = vpop.f32.mrf.mxu3  ;;  %v9603_v3 = vor.u32 %v9969_v5, %v9600_v39 }
 0x5d4   : > { %v8538_v8 = vrot.slane %v8507_v33, 6  ;;  %v8539_v7 = vrot.slane %v8508_v58, 5  ;;  %v8246_v0 = vpop.f32.mrf.mxu0  ;;  %v9993_v54 = vld [vmem:[#allocation2 + $0xf4] sm:$0xf0]  ;;  %v9664_v37 = vld [vmem:[#allocation2 + $0xf8] sm:$0xf0] }
 0x5d5   : > { %8348 = vmatpush.bf16.msrb.mxu0 %v9591_v10  ;;  %8361 = vmatpush.bf16.msrb.mxu1 %v9595_v4  ;;  %v8259_v9 = vpop.f32.mrf.mxu1  ;;  %v8413_v46 = vrot.slane %v8246_v0, 1  ;;  %v8461_v35 = vrot.slane %v8246_v0, 2  ;;  %v9663_v20 = vor.u32 %v9993_v54, %v9662_v25  ;;  %v9667_v53 = vor.u32 %v9985_v27, %v9664_v37 }
 0x5d6   : > { %v10025_v40 = vld [vmem:[#allocation2 + $0x1f4] sm:$0xf0]  ;;  %v9792_v28 = vld [vmem:[#allocation2 + $0x1f8] sm:$0xf0]  ;;  %v16242_v29 = vsel %vm8552_vm11, %v8538_v8, %v8539_v7  ;;  %v8414_v51 = vrot.slane %v8259_v9, 1  ;;  %v8462_v26 = vrot.slane %v8259_v9, 2 }
 0x5d7   : > { %v9791_v21 = vor.u32 %v10025_v40, %v9790_v12  ;;  %v9795_v1 = vor.u32 %v10017_v16, %v9792_v28  ;;  %v8445_v23 = vmul.f32 %v8413_v46, %v8246_v0 }
 0x5d8   : > { %9808 = vmatmul.msk.bf16.vlgmr.msrb.gmra.mxu0 %vm3106_vm13, %v16247_v34  ;;  %9809 = vmatmul.msk.bf16.vlgmr.msrb.gmra.mxu1 %vm3106_vm13, %v16247_v34  ;;  %v8446_v2 = vmul.f32 %v8414_v51, %v8259_v9 }
 0x5d9   : > { %8371 = vmatpush.bf16.msrb.mxu2 %v9791_v21  ;;  %8384 = vmatpush.bf16.msrb.mxu3 %v9795_v1  ;;  %v8493_v63 = vadd.f32 %v8461_v35, %v8445_v23 }
 0x5da   : > { %v8494_v47 = vadd.f32 %v8462_v26, %v8446_v2 }
 0x5db   : > { %v8272_v30 = vpop.f32.mrf.mxu2  ;;  %v8509_v45 = vand.u32 2147483647, %v8493_v63 }
 0x5dc   : > { %v8415_v57 = vrot.slane %v8272_v30, 1  ;;  %v8463_v49 = vrot.slane %v8272_v30, 2  ;;  %v8510_v17 = vand.u32 2147483647, %v8494_v47  ;;  %v8248_v50 = vpop.f32.mrf.mxu0 }
 0x5dd   : > { %8372 = vmatpush.bf16.msrb.mxu2 %v9727_v43  ;;  %8385 = vmatpush.bf16.msrb.mxu3 %v9731_v6  ;;  %v8285_v41 = vpop.f32.mrf.mxu3  ;;  %v8261_v31 = vpop.f32.mrf.mxu1  ;;  %v8540_v52 = vrot.slane %v8509_v45, 4 }
 0x5de   : > { %v8447_v56 = vmul.f32 %v8415_v57, %v8272_v30  ;;  %v8416_v15 = vrot.slane %v8285_v41, 1  ;;  %v8464_v38 = vrot.slane %v8285_v41, 2  ;;  %v8541_v32 = vrot.slane %v8510_v17, 3 }
 0x5e0   : > { %v8495_v36 = vadd.f32 %v8463_v49, %v8447_v56  ;;  %v8448_v18 = vmul.f32 %v8416_v15, %v8285_v41  ;;  %v8557_v42 = vsel %vm2616_vm6, %v8540_v52, %v8541_v32 }
 0x5e1   : > { %8373 = vmatpush.bf16.msrb.mxu2 %v9663_v20  ;;  %8386 = vmatpush.bf16.msrb.mxu3 %v9667_v53  ;;  %v8555_v20 = vsel %vm252_vm0, %v16239_v13, %v16242_v29 }
 0x5e2   : > { %v8511_v11 = vand.u32 2147483647, %v8495_v36  ;;  %v8496_v60 = vadd.f32 %v8464_v38, %v8448_v18 }
 0x5e3   : > { %v8274_v14 = vpop.f32.mrf.mxu2 }
 0x5e4   : > { %v8542_v10 = vrot.slane %v8511_v11, 2  ;;  %v8512_v4 = vand.u32 2147483647, %v8496_v60 }
 0x5e5   : > { %8374 = vmatpush.bf16.msrb.mxu2 %v9599_v55  ;;  %8387 = vmatpush.bf16.msrb.mxu3 %v9603_v3  ;;  %v8287_v33 = vpop.f32.mrf.mxu3 }
 0x5e6   : > { %v8543_v58 = vrot.slane %v8512_v4, 1 }
 0x5e8   : > { %9810 = vmatmul.msk.bf16.vlgmr.msrb.gmra.mxu2 %vm3106_vm13, %v16247_v34  ;;  %9811 = vmatmul.msk.bf16.vlgmr.msrb.gmra.mxu3 %vm3106_vm13, %v16247_v34  ;;  %v8559_v62 = vsel %vm8558_vm14, %v8542_v10, %v8543_v58 }
 0x5e9   : > { %v8561_v53 = vsel %vm255_vm2, %v8557_v42, %v8559_v62 }
 0x5ea   : > { %v8562_v19 = vsel %vm582_vm8, %v8555_v20, %v8561_v53 }
 0x5eb   : > { %8572 = vst [vmem:[%s16269_s5] sm:$0xff] %v8562_v19 }
 0x5f0   : > { %v8298_v44 = vpop.f32.mrf.mxu0  ;;  %v8311_v8 = vpop.f32.mrf.mxu1 }
 0x5f1   : > { %v8417_v7 = vrot.slane %v8298_v44, 1  ;;  %v8465_v12 = vrot.slane %v8298_v44, 2  ;;  %v8418_v40 = vrot.slane %v8311_v8, 1  ;;  %v8466_v16 = vrot.slane %v8311_v8, 2 }
 0x5f3   : > { %v8449_v28 = vmul.f32 %v8417_v7, %v8298_v44  ;;  %v8450_v21 = vmul.f32 %v8418_v40, %v8311_v8 }
 0x5f5   : > { %v8497_v1 = vadd.f32 %v8465_v12, %v8449_v28  ;;  %v8498_v59 = vadd.f32 %v8466_v16, %v8450_v21 }
 0x5f7   : > { %v8513_v48 = vand.u32 2147483647, %v8497_v1  ;;  %v8514_v0 = vand.u32 2147483647, %v8498_v59 }
 0x5f8   : > { %v8300_v9 = vpop.f32.mrf.mxu0  ;;  %v8313_v46 = vpop.f32.mrf.mxu1 }
 0x5f9   : > { %v8544_v35 = vrot.slane %v8514_v0, 7 }
 0x5fb   : > { %v8563_v51 = vsel %vm2613_vm7, %v8513_v48, %v8544_v35 }
 0x606   : > { %v8324_v34 = vpop.f32.mrf.mxu2  ;;  %v8337_v26 = vpop.f32.mrf.mxu3 }
 0x607   : > { %v8419_v22 = vrot.slane %v8324_v34, 1  ;;  %v8467_v24 = vrot.slane %v8324_v34, 2  ;;  %v8420_v43 = vrot.slane %v8337_v26, 1  ;;  %v8468_v6 = vrot.slane %v8337_v26, 2 }
 0x609   : > { %v8451_v54 = vmul.f32 %v8419_v22, %v8324_v34  ;;  %v8452_v37 = vmul.f32 %v8420_v43, %v8337_v26 }
 0x60b   : > { %v8499_v23 = vadd.f32 %v8467_v24, %v8451_v54  ;;  %v8500_v2 = vadd.f32 %v8468_v6, %v8452_v37 }
 0x60d   : > { %v8515_v30 = vand.u32 2147483647, %v8499_v23  ;;  %v8516_v25 = vand.u32 2147483647, %v8500_v2 }
 0x60e   : > { %v8326_v27 = vpop.f32.mrf.mxu2  ;;  %v8339_v63 = vpop.f32.mrf.mxu3 }
 0x60f   : > { %v8545_v47 = vrot.slane %v8515_v30, 6  ;;  %v8546_v57 = vrot.slane %v8516_v25, 5 }
 0x611   : > { %v8564_v49 = vsel %vm8552_vm11, %v8545_v47, %v8546_v57 }
 0x612   : > { %v8565_v41 = vsel %vm252_vm0, %v8563_v51, %v8564_v49 }
 0x655   : > { %v8350_v45 = vpop.f32.mrf.mxu0  ;;  %v8363_v17 = vpop.f32.mrf.mxu1 }
 0x656   : > { %v8421_v39 = vrot.slane %v8350_v45, 1  ;;  %v8422_v38 = vrot.slane %v8363_v17, 1  ;;  %v8469_v31 = vrot.slane %v8350_v45, 2  ;;  %v8470_v13 = vrot.slane %v8363_v17, 2 }
 0x658   : > { %v8453_v50 = vmul.f32 %v8421_v39, %v8350_v45  ;;  %v8454_v61 = vmul.f32 %v8422_v38, %v8363_v17 }
 0x65a   : > { %v8501_v29 = vadd.f32 %v8469_v31, %v8453_v50  ;;  %v8502_v52 = vadd.f32 %v8470_v13, %v8454_v61 }
 0x65c   : > { %v8517_v5 = vand.u32 2147483647, %v8501_v29  ;;  %v8518_v3 = vand.u32 2147483647, %v8502_v52 }
 0x65d   : > { %v8352_v56 = vpop.f32.mrf.mxu0  ;;  %v8365_v15 = vpop.f32.mrf.mxu1 }
 0x65e   : > { %v8547_v33 = vrot.slane %v8517_v5, 4  ;;  %v8548_v58 = vrot.slane %v8518_v3, 3 }
 0x660   : > { %v8566_v16 = vsel %vm2616_vm6, %v8547_v33, %v8548_v58 }
 0x66b   : > { %v8376_v32 = vpop.f32.mrf.mxu2  ;;  %v8389_v36 = vpop.f32.mrf.mxu3 }
 0x66c   : > { %v8423_v18 = vrot.slane %v8376_v32, 1  ;;  %v8424_v55 = vrot.slane %v8389_v36, 1  ;;  %v8471_v11 = vrot.slane %v8376_v32, 2  ;;  %v8472_v14 = vrot.slane %v8389_v36, 2 }
 0x66e   : > { %v8455_v42 = vmul.f32 %v8423_v18, %v8376_v32  ;;  %v8456_v60 = vmul.f32 %v8424_v55, %v8389_v36 }
 0x670   : > { %v8503_v10 = vadd.f32 %v8471_v11, %v8455_v42  ;;  %v8504_v4 = vadd.f32 %v8472_v14, %v8456_v60 }
 0x672   : > { %v8519_v62 = vand.u32 2147483647, %v8503_v10  ;;  %v8520_v44 = vand.u32 2147483647, %v8504_v4 }
 0x673   : > { %v8378_v8 = vpop.f32.mrf.mxu2  ;;  %v8391_v7 = vpop.f32.mrf.mxu3 }
 0x674   : > { %v8549_v12 = vrot.slane %v8519_v62, 2  ;;  %v8550_v40 = vrot.slane %v8520_v44, 1 }
 0x676   : > { %v8567_v28 = vsel %vm8558_vm14, %v8549_v12, %v8550_v40 }
 0x677   : > { %v8568_v21 = vsel %vm255_vm2, %v8566_v16, %v8567_v28 }
 0x678   : > { %v8569_v1 = vsel %vm582_vm8, %v8565_v41, %v8568_v21 }
 0x679   : > { %8573 = vst [vmem:[%s16269_s5 + $0x8] sm:$0xff] %v8569_v1 }
 0x67a   : > { %10892 = shalt.err (!%p10889_p3)
}
 0x67b   : > { %10026 = dma.vmem_to_hbm [thread:$0]  (%p10991_p5), %s8588_s9, 256, %s8590_s10, %s8575_s27  }
 0x67c PF: > { %p10032_p4 = scmp.ge.s32.totalorder %s10927_s18, 2  ;;  %s8601_s23 = sand.u32 1, %s10915_s15  }
 0x67d   : > { %s8602_s28 = scalar_lea.sflag [#allocation4], %s8601_s23 }
 0x67e   : > { %p10029_p7 = pnand %p10032_p4, %p10995_p6 }
 0x680   : > { %p10030_p8 = pneg %p10029_p7 }
 0x682   : > { %10910 = dma.done.wait (%p10030_p8), %s8602_s28, 256  }
 0x683   : > { %10912 = vsyncadd (%p10030_p8), %s8602_s28, 4294967040  ;;  %p14_p9 = scmp.ge.s32.totalorder %s10979_s21, 4   ;;  %s16609_s15 = smov %s10919_s16 }
 0x684   : > { %s16610_s16 = smov %s10923_s17  ;;  %s16611_s17 = smov %s10989_s24 }
 0x685   : > { %s16612_s18 = smov %s10979_s21  ;;  %16 = sbr.rel (!%p14_p9) target bundleno = 3 (0x3), region = 78 }
 0x68a   :  { %8608 = vsyncpa [#allocation4], 1 }
 0x68b   :  { %8610 = vsyncpa [#allocation4 + $0x1], 1 }

</bundles_post_ra>
